<compile_context>
chip_gen: v5e
topology: v5e:2x2
jax: 0.10.0
libtpu: 0.0.40
codegen_flags: <defaults>
</compile_context>

<pallas_src>
import jax
import jax.numpy as jnp
from jax.experimental import pallas as pl
from jax.experimental.pallas import tpu as pltpu

BN_EPS = 1e-5


# ----------------------------------------------------------------------------
# Fused residual-block kernel (one batch element per grid step)
# ----------------------------------------------------------------------------
def _residual_block_kernel(x_ref, w1_ref, s1_ref, b1_ref,
                           w2_ref, s2_ref, b2_ref, o_ref, patch_ref):
    H, W, C = x_ref.shape

    x = x_ref[...]                                     # (H, W, C) f32, read once

    def reflect_pad(a):                                # (H, W, C) -> (H+2, W+2, C)
        # torch ReflectionPad2d(1): row -1 <- row 1, row H <- row H-2 (same for
        # columns; corners fall out of the double reflection automatically).
        rows = jnp.concatenate([a[1:2], a, a[H - 2:H - 1]], axis=0)
        return jnp.concatenate(
            [rows[:, 1:2], rows, rows[:, W - 2:W - 1]], axis=1)

    def conv3x3(a, w_ref):
        # One bf16 cast of the whole padded tile, 9 tap writes into the
        # lane-aligned patch scratch, then a single K=9*C MXU matmul with
        # internal (f32) accumulation.
        ap = reflect_pad(a).astype(jnp.bfloat16)       # (H+2, W+2, C) bf16
        for t in range(9):
            ki, kj = t // 3, t % 3
            patch_ref[:, t * C:(t + 1) * C] = (
                ap[ki:ki + H, kj:kj + W, :].reshape(H * W, C))
        return jnp.dot(patch_ref[...], w_ref[...],
                       preferred_element_type=jnp.float32)      # (H*W, C) f32

    # ---- conv1 + BN1 (folded affine) + ReLU.  Dropout(0.5) is identity (eval).
    h = jnp.maximum(conv3x3(x, w1_ref) * s1_ref[...] + b1_ref[...], 0.0)

    # ---- conv2 + BN2 (patch scratch reused; conv1's read already happened).
    y = conv3x3(h.reshape(H, W, C), w2_ref) * s2_ref[...] + b2_ref[...]

    # ---- residual add in f32 and lane-dense store.
    o_ref[...] = (x + y.reshape(H, W, C)).astype(o_ref.dtype)


# ----------------------------------------------------------------------------
# Wrapper: NCHW in / NCHW out (PyTorch convention)
# ----------------------------------------------------------------------------
@jax.jit
def residual_block_forward(x_nchw, params):
    x = jnp.transpose(x_nchw, (0, 2, 3, 1)).astype(jnp.float32)     # -> NHWC
    N, H, W, C = x.shape

    def w_to_mat(w):
        # torch [Cout, Cin, 3, 3] -> [(kh, kw, cin) = 9*Cin, Cout], bf16.
        # Row index t*Cin + cin with t = kh*3 + kw matches the patch layout.
        return jnp.transpose(w, (2, 3, 1, 0)).reshape(9 * C, C).astype(jnp.bfloat16)

    w1m = w_to_mat(params["w1"])
    w2m = w_to_mat(params["w2"])
    s1 = params["bn1"][0].reshape(1, C).astype(jnp.float32)
    b1 = params["bn1"][1].reshape(1, C).astype(jnp.float32)
    s2 = params["bn2"][0].reshape(1, C).astype(jnp.float32)
    b2 = params["bn2"][1].reshape(1, C).astype(jnp.float32)

    flops = 4 * N * H * W * 9 * C * C                      # 2 convs, 2 flops/MAC
    bytes_accessed = 2 * N * H * W * C * 4 + (w1m.size + w2m.size) * 2

    out = pl.pallas_call(
        _residual_block_kernel,
        out_shape=jax.ShapeDtypeStruct((N, H, W, C), jnp.float32),
        grid_spec=pltpu.PrefetchScalarGridSpec(
            num_scalar_prefetch=0,
            grid=(N,),
            in_specs=[
                pl.BlockSpec((None, H, W, C), lambda n: (n, 0, 0, 0)),  # x (unpadded)
                pl.BlockSpec((9 * C, C), lambda n: (0, 0)),             # w1 (resident)
                pl.BlockSpec((1, C), lambda n: (0, 0)),                 # BN1 scale
                pl.BlockSpec((1, C), lambda n: (0, 0)),                 # BN1 shift
                pl.BlockSpec((9 * C, C), lambda n: (0, 0)),             # w2 (resident)
                pl.BlockSpec((1, C), lambda n: (0, 0)),                 # BN2 scale
                pl.BlockSpec((1, C), lambda n: (0, 0)),                 # BN2 shift
            ],
            out_specs=pl.BlockSpec((None, H, W, C), lambda n: (n, 0, 0, 0)),
            scratch_shapes=[pltpu.VMEM((H * W, 9 * C), jnp.bfloat16)],  # patch matrix
        ),
        compiler_params=pltpu.CompilerParams(
            dimension_semantics=("parallel",)),
        cost_estimate=pl.CostEstimate(
            flops=flops, transcendentals=0, bytes_accessed=bytes_accessed),
    )(x, w1m, s1, b1, w2m, s2, b2)

    return jnp.transpose(out, (0, 3, 1, 2))                             # -> NCHW


# ----------------------------------------------------------------------------
# Pure-JAX reference (same eval-mode semantics) for correctness check
# ----------------------------------------------------------------------------
def residual_block_ref(x_nchw, params):
    x = jnp.transpose(x_nchw, (0, 2, 3, 1)).astype(jnp.float32)

    def conv(h, w):  # w: torch [Cout, Cin, 3, 3]
        hp = jnp.pad(h, ((0, 0), (1, 1), (1, 1), (0, 0)), mode="reflect")
        return jax.lax.conv_general_dilated(
            hp, jnp.transpose(w, (2, 3, 1, 0)), (1, 1), "VALID",
            dimension_numbers=("NHWC", "HWIO", "NHWC"))

    s1, b1 = params["bn1"]
    s2, b2 = params["bn2"]
    h = jnp.maximum(conv(x, params["w1"]) * s1 + b1, 0.0)
    y = conv(h, params["w2"]) * s2 + b2
    return jnp.transpose(x + y, (0, 3, 1, 2))


# ----------------------------------------------------------------------------
# Deterministic synthetic parameters
# ----------------------------------------------------------------------------
def _bn_affine(key, c):
    k1, k2, k3, k4 = jax.random.split(key, 4)
    gamma = 1.0 + 0.1 * jax.random.normal(k1, (c,), jnp.float32)
    beta = 0.1 * jax.random.normal(k2, (c,), jnp.float32)
    mean = 0.1 * jax.random.normal(k3, (c,), jnp.float32)
    var = 1.0 + 0.1 * jnp.abs(jax.random.normal(k4, (c,), jnp.float32))
    scale = gamma * jax.lax.rsqrt(var + BN_EPS)
    shift = beta - mean * scale
    return scale, shift


def init_params(key, c):
    k1, k2, k3, k4 = jax.random.split(key, 4)
    std = 1.0 / (c * 9) ** 0.5
    return {
        "w1": std * jax.random.normal(k1, (c, c, 3, 3), jnp.float32),
        "bn1": _bn_affine(k3, c),
        "w2": std * jax.random.normal(k2, (c, c, 3, 3), jnp.float32),
        "bn2": _bn_affine(k4, c),
    }


# ----------------------------------------------------------------------------
if __name__ == "__main__":
    key = jax.random.PRNGKey(0)
    k_param, k_input = jax.random.split(key)

    # num_filters = 128 keeps the channel axis lane-dense; N=4 gives an even
    # number of grid steps (2 per TensorCore on v7x).
    N, C, H, W = 4, 128, 16, 16
    params = init_params(k_param, C)
    x = jax.random.normal(k_input, (N, C, H, W), jnp.float32)

    out = jax.block_until_ready(residual_block_forward(x, params))
    ref = jax.block_until_ready(residual_block_ref(x, params))

    assert out.shape == (N, C, H, W), out.shape
    assert bool(jnp.all(jnp.isfinite(out)))
    max_err = float(jnp.max(jnp.abs(out - ref)))
    assert max_err < 3e-1, f"max abs error vs reference: {max_err}"
    print("KERNEL_OK")
</pallas_src>

<mosaic_0001>
module attributes {stable_mosaic.version = 11 : i64} {
  func.func @_residual_block_kernel(%arg0: i32, %arg1: memref<1x16x16x128xf32, #tpu.memory_space<vmem>>, %arg2: memref<1152x128xbf16, #tpu.memory_space<vmem>>, %arg3: memref<1x128xf32, #tpu.memory_space<vmem>>, %arg4: memref<1x128xf32, #tpu.memory_space<vmem>>, %arg5: memref<1152x128xbf16, #tpu.memory_space<vmem>>, %arg6: memref<1x128xf32, #tpu.memory_space<vmem>>, %arg7: memref<1x128xf32, #tpu.memory_space<vmem>>, %arg8: memref<1x16x16x128xf32, #tpu.memory_space<vmem>>, %arg9: memref<256x1152xbf16, #tpu.memory_space<vmem>>) attributes {dimension_semantics = [#tpu.dimension_semantics<parallel>], iteration_bounds = array<i64: 4>, scalar_prefetch = 0 : i64, scratch_operands = 1 : i64, tpu.core_type = #tpu.core_type<tc>, window_params = [{transform_indices = @transform_0, window_bounds = array<i64: 1, 16, 16, 128>}, {pipeline_mode = #tpu.pipeline_mode<synchronous>, transform_indices = @transform_1, window_bounds = array<i64: 1152, 128>}, {pipeline_mode = #tpu.pipeline_mode<synchronous>, transform_indices = @transform_2, window_bounds = array<i64: 1, 128>}, {pipeline_mode = #tpu.pipeline_mode<synchronous>, transform_indices = @transform_3, window_bounds = array<i64: 1, 128>}, {pipeline_mode = #tpu.pipeline_mode<synchronous>, transform_indices = @transform_4, window_bounds = array<i64: 1152, 128>}, {pipeline_mode = #tpu.pipeline_mode<synchronous>, transform_indices = @transform_5, window_bounds = array<i64: 1, 128>}, {pipeline_mode = #tpu.pipeline_mode<synchronous>, transform_indices = @transform_6, window_bounds = array<i64: 1, 128>}, {transform_indices = @transform_7, window_bounds = array<i64: 1, 16, 16, 128>}]} {
    %c0 = arith.constant 0 : index
    %c0_0 = arith.constant 0 : index
    %c0_1 = arith.constant 0 : index
    %c0_2 = arith.constant 0 : index
    %0 = vector.load %arg1[%c0, %c0_0, %c0_1, %c0_2] : memref<1x16x16x128xf32, #tpu.memory_space<vmem>>, vector<1x16x16x128xf32>
    %1 = vector.shape_cast %0 : vector<1x16x16x128xf32> to vector<16x16x128xf32>
    %2 = vector.extract_strided_slice %1 {offsets = [1, 0, 0], sizes = [1, 16, 128], strides = [1, 1, 1]} : vector<16x16x128xf32> to vector<1x16x128xf32>
    %3 = vector.extract_strided_slice %1 {offsets = [14, 0, 0], sizes = [1, 16, 128], strides = [1, 1, 1]} : vector<16x16x128xf32> to vector<1x16x128xf32>
    %4 = tpu.concatenate %2, %1, %3 in 0 : vector<1x16x128xf32>, vector<16x16x128xf32>, vector<1x16x128xf32> -> vector<18x16x128xf32>
    %5 = vector.extract_strided_slice %4 {offsets = [0, 1, 0], sizes = [18, 1, 128], strides = [1, 1, 1]} : vector<18x16x128xf32> to vector<18x1x128xf32>
    %6 = vector.extract_strided_slice %4 {offsets = [0, 14, 0], sizes = [18, 1, 128], strides = [1, 1, 1]} : vector<18x16x128xf32> to vector<18x1x128xf32>
    %7 = tpu.concatenate %5, %4, %6 in 1 : vector<18x1x128xf32>, vector<18x16x128xf32>, vector<18x1x128xf32> -> vector<18x18x128xf32>
    %8 = arith.truncf %7 : vector<18x18x128xf32> to vector<18x18x128xbf16>
    %9 = vector.extract_strided_slice %8 {offsets = [0, 0, 0], sizes = [16, 16, 128], strides = [1, 1, 1]} : vector<18x18x128xbf16> to vector<16x16x128xbf16>
    %10 = vector.shape_cast %9 : vector<16x16x128xbf16> to vector<256x128xbf16>
    %c0_3 = arith.constant 0 : index
    %c0_4 = arith.constant 0 : index
    %11 = vector.load %arg9[%c0_3, %c0_4] : memref<256x1152xbf16, #tpu.memory_space<vmem>>, vector<256x128xbf16>
    tpu.vector_store %arg9[%c0_3, %c0_4], %10 {strides = array<i32>} : memref<256x1152xbf16, #tpu.memory_space<vmem>>, vector<256x128xbf16>,
    %12 = vector.extract_strided_slice %8 {offsets = [0, 1, 0], sizes = [16, 16, 128], strides = [1, 1, 1]} : vector<18x18x128xbf16> to vector<16x16x128xbf16>
    %13 = vector.shape_cast %12 : vector<16x16x128xbf16> to vector<256x128xbf16>
    %c0_5 = arith.constant 0 : index
    %c128 = arith.constant 128 : index
    %14 = vector.load %arg9[%c0_5, %c128] : memref<256x1152xbf16, #tpu.memory_space<vmem>>, vector<256x128xbf16>
    tpu.vector_store %arg9[%c0_5, %c128], %13 {strides = array<i32>} : memref<256x1152xbf16, #tpu.memory_space<vmem>>, vector<256x128xbf16>,
    %15 = vector.extract_strided_slice %8 {offsets = [0, 2, 0], sizes = [16, 16, 128], strides = [1, 1, 1]} : vector<18x18x128xbf16> to vector<16x16x128xbf16>
    %16 = vector.shape_cast %15 : vector<16x16x128xbf16> to vector<256x128xbf16>
    %c0_6 = arith.constant 0 : index
    %c256 = arith.constant 256 : index
    %17 = vector.load %arg9[%c0_6, %c256] : memref<256x1152xbf16, #tpu.memory_space<vmem>>, vector<256x128xbf16>
    tpu.vector_store %arg9[%c0_6, %c256], %16 {strides = array<i32>} : memref<256x1152xbf16, #tpu.memory_space<vmem>>, vector<256x128xbf16>,
    %18 = vector.extract_strided_slice %8 {offsets = [1, 0, 0], sizes = [16, 16, 128], strides = [1, 1, 1]} : vector<18x18x128xbf16> to vector<16x16x128xbf16>
    %19 = vector.shape_cast %18 : vector<16x16x128xbf16> to vector<256x128xbf16>
    %c0_7 = arith.constant 0 : index
    %c384 = arith.constant 384 : index
    %20 = vector.load %arg9[%c0_7, %c384] : memref<256x1152xbf16, #tpu.memory_space<vmem>>, vector<256x128xbf16>
    tpu.vector_store %arg9[%c0_7, %c384], %19 {strides = array<i32>} : memref<256x1152xbf16, #tpu.memory_space<vmem>>, vector<256x128xbf16>,
    %21 = vector.extract_strided_slice %8 {offsets = [1, 1, 0], sizes = [16, 16, 128], strides = [1, 1, 1]} : vector<18x18x128xbf16> to vector<16x16x128xbf16>
    %22 = vector.shape_cast %21 : vector<16x16x128xbf16> to vector<256x128xbf16>
    %c0_8 = arith.constant 0 : index
    %c512 = arith.constant 512 : index
    %23 = vector.load %arg9[%c0_8, %c512] : memref<256x1152xbf16, #tpu.memory_space<vmem>>, vector<256x128xbf16>
    tpu.vector_store %arg9[%c0_8, %c512], %22 {strides = array<i32>} : memref<256x1152xbf16, #tpu.memory_space<vmem>>, vector<256x128xbf16>,
    %24 = vector.extract_strided_slice %8 {offsets = [1, 2, 0], sizes = [16, 16, 128], strides = [1, 1, 1]} : vector<18x18x128xbf16> to vector<16x16x128xbf16>
    %25 = vector.shape_cast %24 : vector<16x16x128xbf16> to vector<256x128xbf16>
    %c0_9 = arith.constant 0 : index
    %c640 = arith.constant 640 : index
    %26 = vector.load %arg9[%c0_9, %c640] : memref<256x1152xbf16, #tpu.memory_space<vmem>>, vector<256x128xbf16>
    tpu.vector_store %arg9[%c0_9, %c640], %25 {strides = array<i32>} : memref<256x1152xbf16, #tpu.memory_space<vmem>>, vector<256x128xbf16>,
    %27 = vector.extract_strided_slice %8 {offsets = [2, 0, 0], sizes = [16, 16, 128], strides = [1, 1, 1]} : vector<18x18x128xbf16> to vector<16x16x128xbf16>
    %28 = vector.shape_cast %27 : vector<16x16x128xbf16> to vector<256x128xbf16>
    %c0_10 = arith.constant 0 : index
    %c768 = arith.constant 768 : index
    %29 = vector.load %arg9[%c0_10, %c768] : memref<256x1152xbf16, #tpu.memory_space<vmem>>, vector<256x128xbf16>
    tpu.vector_store %arg9[%c0_10, %c768], %28 {strides = array<i32>} : memref<256x1152xbf16, #tpu.memory_space<vmem>>, vector<256x128xbf16>,
    %30 = vector.extract_strided_slice %8 {offsets = [2, 1, 0], sizes = [16, 16, 128], strides = [1, 1, 1]} : vector<18x18x128xbf16> to vector<16x16x128xbf16>
    %31 = vector.shape_cast %30 : vector<16x16x128xbf16> to vector<256x128xbf16>
    %c0_11 = arith.constant 0 : index
    %c896 = arith.constant 896 : index
    %32 = vector.load %arg9[%c0_11, %c896] : memref<256x1152xbf16, #tpu.memory_space<vmem>>, vector<256x128xbf16>
    tpu.vector_store %arg9[%c0_11, %c896], %31 {strides = array<i32>} : memref<256x1152xbf16, #tpu.memory_space<vmem>>, vector<256x128xbf16>,
    %33 = vector.extract_strided_slice %8 {offsets = [2, 2, 0], sizes = [16, 16, 128], strides = [1, 1, 1]} : vector<18x18x128xbf16> to vector<16x16x128xbf16>
    %34 = vector.shape_cast %33 : vector<16x16x128xbf16> to vector<256x128xbf16>
    %c0_12 = arith.constant 0 : index
    %c1024 = arith.constant 1024 : index
    %35 = vector.load %arg9[%c0_12, %c1024] : memref<256x1152xbf16, #tpu.memory_space<vmem>>, vector<256x128xbf16>
    tpu.vector_store %arg9[%c0_12, %c1024], %34 {strides = array<i32>} : memref<256x1152xbf16, #tpu.memory_space<vmem>>, vector<256x128xbf16>,
    %c0_13 = arith.constant 0 : index
    %c0_14 = arith.constant 0 : index
    %36 = vector.load %arg9[%c0_13, %c0_14] : memref<256x1152xbf16, #tpu.memory_space<vmem>>, vector<256x1152xbf16>
    %c0_15 = arith.constant 0 : index
    %c0_16 = arith.constant 0 : index
    %37 = vector.load %arg2[%c0_15, %c0_16] : memref<1152x128xbf16, #tpu.memory_space<vmem>>, vector<1152x128xbf16>
    %cst = arith.constant dense<0.000000e+00> : vector<256x128xf32>
    %38 = tpu.matmul %36, %37, %cst {dimension_numbers = #tpu.dot_dimension_numbers<[1], [0], [0], [1], [0, 0, 1, 1], [], []>} : vector<256x1152xbf16>, vector<1152x128xbf16>, vector<256x128xf32> -> vector<256x128xf32>
    %c0_17 = arith.constant 0 : index
    %c0_18 = arith.constant 0 : index
    %39 = vector.load %arg3[%c0_17, %c0_18] : memref<1x128xf32, #tpu.memory_space<vmem>>, vector<1x128xf32>
    %40 = vector.broadcast %39 : vector<1x128xf32> to vector<256x128xf32>
    %41 = arith.mulf %38, %40 : vector<256x128xf32>
    %c0_19 = arith.constant 0 : index
    %c0_20 = arith.constant 0 : index
    %42 = vector.load %arg4[%c0_19, %c0_20] : memref<1x128xf32, #tpu.memory_space<vmem>>, vector<1x128xf32>
    %43 = vector.broadcast %42 : vector<1x128xf32> to vector<256x128xf32>
    %44 = arith.addf %41, %43 : vector<256x128xf32>
    %cst_21 = arith.constant 0.000000e+00 : f32
    %45 = vector.broadcast %cst_21 : f32 to vector<256x128xf32>
    %46 = arith.maximumf %44, %45 : vector<256x128xf32>
    %47 = vector.shape_cast %46 : vector<256x128xf32> to vector<16x16x128xf32>
    %48 = vector.extract_strided_slice %47 {offsets = [1, 0, 0], sizes = [1, 16, 128], strides = [1, 1, 1]} : vector<16x16x128xf32> to vector<1x16x128xf32>
    %49 = vector.extract_strided_slice %47 {offsets = [14, 0, 0], sizes = [1, 16, 128], strides = [1, 1, 1]} : vector<16x16x128xf32> to vector<1x16x128xf32>
    %50 = tpu.concatenate %48, %47, %49 in 0 : vector<1x16x128xf32>, vector<16x16x128xf32>, vector<1x16x128xf32> -> vector<18x16x128xf32>
    %51 = vector.extract_strided_slice %50 {offsets = [0, 1, 0], sizes = [18, 1, 128], strides = [1, 1, 1]} : vector<18x16x128xf32> to vector<18x1x128xf32>
    %52 = vector.extract_strided_slice %50 {offsets = [0, 14, 0], sizes = [18, 1, 128], strides = [1, 1, 1]} : vector<18x16x128xf32> to vector<18x1x128xf32>
    %53 = tpu.concatenate %51, %50, %52 in 1 : vector<18x1x128xf32>, vector<18x16x128xf32>, vector<18x1x128xf32> -> vector<18x18x128xf32>
    %54 = arith.truncf %53 : vector<18x18x128xf32> to vector<18x18x128xbf16>
    %55 = vector.extract_strided_slice %54 {offsets = [0, 0, 0], sizes = [16, 16, 128], strides = [1, 1, 1]} : vector<18x18x128xbf16> to vector<16x16x128xbf16>
    %56 = vector.shape_cast %55 : vector<16x16x128xbf16> to vector<256x128xbf16>
    %c0_22 = arith.constant 0 : index
    %c0_23 = arith.constant 0 : index
    %57 = vector.load %arg9[%c0_22, %c0_23] : memref<256x1152xbf16, #tpu.memory_space<vmem>>, vector<256x128xbf16>
    tpu.vector_store %arg9[%c0_22, %c0_23], %56 {strides = array<i32>} : memref<256x1152xbf16, #tpu.memory_space<vmem>>, vector<256x128xbf16>,
    %58 = vector.extract_strided_slice %54 {offsets = [0, 1, 0], sizes = [16, 16, 128], strides = [1, 1, 1]} : vector<18x18x128xbf16> to vector<16x16x128xbf16>
    %59 = vector.shape_cast %58 : vector<16x16x128xbf16> to vector<256x128xbf16>
    %c0_24 = arith.constant 0 : index
    %c128_25 = arith.constant 128 : index
    %60 = vector.load %arg9[%c0_24, %c128_25] : memref<256x1152xbf16, #tpu.memory_space<vmem>>, vector<256x128xbf16>
    tpu.vector_store %arg9[%c0_24, %c128_25], %59 {strides = array<i32>} : memref<256x1152xbf16, #tpu.memory_space<vmem>>, vector<256x128xbf16>,
    %61 = vector.extract_strided_slice %54 {offsets = [0, 2, 0], sizes = [16, 16, 128], strides = [1, 1, 1]} : vector<18x18x128xbf16> to vector<16x16x128xbf16>
    %62 = vector.shape_cast %61 : vector<16x16x128xbf16> to vector<256x128xbf16>
    %c0_26 = arith.constant 0 : index
    %c256_27 = arith.constant 256 : index
    %63 = vector.load %arg9[%c0_26, %c256_27] : memref<256x1152xbf16, #tpu.memory_space<vmem>>, vector<256x128xbf16>
    tpu.vector_store %arg9[%c0_26, %c256_27], %62 {strides = array<i32>} : memref<256x1152xbf16, #tpu.memory_space<vmem>>, vector<256x128xbf16>,
    %64 = vector.extract_strided_slice %54 {offsets = [1, 0, 0], sizes = [16, 16, 128], strides = [1, 1, 1]} : vector<18x18x128xbf16> to vector<16x16x128xbf16>
    %65 = vector.shape_cast %64 : vector<16x16x128xbf16> to vector<256x128xbf16>
    %c0_28 = arith.constant 0 : index
    %c384_29 = arith.constant 384 : index
    %66 = vector.load %arg9[%c0_28, %c384_29] : memref<256x1152xbf16, #tpu.memory_space<vmem>>, vector<256x128xbf16>
    tpu.vector_store %arg9[%c0_28, %c384_29], %65 {strides = array<i32>} : memref<256x1152xbf16, #tpu.memory_space<vmem>>, vector<256x128xbf16>,
    %67 = vector.extract_strided_slice %54 {offsets = [1, 1, 0], sizes = [16, 16, 128], strides = [1, 1, 1]} : vector<18x18x128xbf16> to vector<16x16x128xbf16>
    %68 = vector.shape_cast %67 : vector<16x16x128xbf16> to vector<256x128xbf16>
    %c0_30 = arith.constant 0 : index
    %c512_31 = arith.constant 512 : index
    %69 = vector.load %arg9[%c0_30, %c512_31] : memref<256x1152xbf16, #tpu.memory_space<vmem>>, vector<256x128xbf16>
    tpu.vector_store %arg9[%c0_30, %c512_31], %68 {strides = array<i32>} : memref<256x1152xbf16, #tpu.memory_space<vmem>>, vector<256x128xbf16>,
    %70 = vector.extract_strided_slice %54 {offsets = [1, 2, 0], sizes = [16, 16, 128], strides = [1, 1, 1]} : vector<18x18x128xbf16> to vector<16x16x128xbf16>
    %71 = vector.shape_cast %70 : vector<16x16x128xbf16> to vector<256x128xbf16>
    %c0_32 = arith.constant 0 : index
    %c640_33 = arith.constant 640 : index
    %72 = vector.load %arg9[%c0_32, %c640_33] : memref<256x1152xbf16, #tpu.memory_space<vmem>>, vector<256x128xbf16>
    tpu.vector_store %arg9[%c0_32, %c640_33], %71 {strides = array<i32>} : memref<256x1152xbf16, #tpu.memory_space<vmem>>, vector<256x128xbf16>,
    %73 = vector.extract_strided_slice %54 {offsets = [2, 0, 0], sizes = [16, 16, 128], strides = [1, 1, 1]} : vector<18x18x128xbf16> to vector<16x16x128xbf16>
    %74 = vector.shape_cast %73 : vector<16x16x128xbf16> to vector<256x128xbf16>
    %c0_34 = arith.constant 0 : index
    %c768_35 = arith.constant 768 : index
    %75 = vector.load %arg9[%c0_34, %c768_35] : memref<256x1152xbf16, #tpu.memory_space<vmem>>, vector<256x128xbf16>
    tpu.vector_store %arg9[%c0_34, %c768_35], %74 {strides = array<i32>} : memref<256x1152xbf16, #tpu.memory_space<vmem>>, vector<256x128xbf16>,
    %76 = vector.extract_strided_slice %54 {offsets = [2, 1, 0], sizes = [16, 16, 128], strides = [1, 1, 1]} : vector<18x18x128xbf16> to vector<16x16x128xbf16>
    %77 = vector.shape_cast %76 : vector<16x16x128xbf16> to vector<256x128xbf16>
    %c0_36 = arith.constant 0 : index
    %c896_37 = arith.constant 896 : index
    %78 = vector.load %arg9[%c0_36, %c896_37] : memref<256x1152xbf16, #tpu.memory_space<vmem>>, vector<256x128xbf16>
    tpu.vector_store %arg9[%c0_36, %c896_37], %77 {strides = array<i32>} : memref<256x1152xbf16, #tpu.memory_space<vmem>>, vector<256x128xbf16>,
    %79 = vector.extract_strided_slice %54 {offsets = [2, 2, 0], sizes = [16, 16, 128], strides = [1, 1, 1]} : vector<18x18x128xbf16> to vector<16x16x128xbf16>
    %80 = vector.shape_cast %79 : vector<16x16x128xbf16> to vector<256x128xbf16>
    %c0_38 = arith.constant 0 : index
    %c1024_39 = arith.constant 1024 : index
    %81 = vector.load %arg9[%c0_38, %c1024_39] : memref<256x1152xbf16, #tpu.memory_space<vmem>>, vector<256x128xbf16>
    tpu.vector_store %arg9[%c0_38, %c1024_39], %80 {strides = array<i32>} : memref<256x1152xbf16, #tpu.memory_space<vmem>>, vector<256x128xbf16>,
    %c0_40 = arith.constant 0 : index
    %c0_41 = arith.constant 0 : index
    %82 = vector.load %arg9[%c0_40, %c0_41] : memref<256x1152xbf16, #tpu.memory_space<vmem>>, vector<256x1152xbf16>
    %c0_42 = arith.constant 0 : index
    %c0_43 = arith.constant 0 : index
    %83 = vector.load %arg5[%c0_42, %c0_43] : memref<1152x128xbf16, #tpu.memory_space<vmem>>, vector<1152x128xbf16>
    %cst_44 = arith.constant dense<0.000000e+00> : vector<256x128xf32>
    %84 = tpu.matmul %82, %83, %cst_44 {dimension_numbers = #tpu.dot_dimension_numbers<[1], [0], [0], [1], [0, 0, 1, 1], [], []>} : vector<256x1152xbf16>, vector<1152x128xbf16>, vector<256x128xf32> -> vector<256x128xf32>
    %c0_45 = arith.constant 0 : index
    %c0_46 = arith.constant 0 : index
    %85 = vector.load %arg6[%c0_45, %c0_46] : memref<1x128xf32, #tpu.memory_space<vmem>>, vector<1x128xf32>
    %86 = vector.broadcast %85 : vector<1x128xf32> to vector<256x128xf32>
    %87 = arith.mulf %84, %86 : vector<256x128xf32>
    %c0_47 = arith.constant 0 : index
    %c0_48 = arith.constant 0 : index
    %88 = vector.load %arg7[%c0_47, %c0_48] : memref<1x128xf32, #tpu.memory_space<vmem>>, vector<1x128xf32>
    %89 = vector.broadcast %88 : vector<1x128xf32> to vector<256x128xf32>
    %90 = arith.addf %87, %89 : vector<256x128xf32>
    %91 = vector.shape_cast %90 : vector<256x128xf32> to vector<16x16x128xf32>
    %92 = arith.addf %1, %91 : vector<16x16x128xf32>
    %c0_49 = arith.constant 0 : index
    %c0_50 = arith.constant 0 : index
    %c0_51 = arith.constant 0 : index
    %c0_52 = arith.constant 0 : index
    %93 = vector.load %arg8[%c0_49, %c0_50, %c0_51, %c0_52] : memref<1x16x16x128xf32, #tpu.memory_space<vmem>>, vector<1x16x16x128xf32>
    %94 = vector.shape_cast %93 : vector<1x16x16x128xf32> to vector<16x16x128xf32>
    %95 = vector.shape_cast %92 : vector<16x16x128xf32> to vector<1x16x16x128xf32>
    tpu.vector_store %arg8[%c0_49, %c0_50, %c0_51, %c0_52], %95 {strides = array<i32>} : memref<1x16x16x128xf32, #tpu.memory_space<vmem>>, vector<1x16x16x128xf32>,
    return
  }
  func.func @transform_0(%arg0: i32) -> (i32, i32, i32, i32) {
    %c0_i32 = arith.constant 0 : i32
    %c0_i32_0 = arith.constant 0 : i32
    %c0_i32_1 = arith.constant 0 : i32
    %c0_i32_2 = arith.constant 0 : i32
    return %arg0, %c0_i32, %c0_i32_0, %c0_i32_1 : i32, i32, i32, i32
  }
  func.func @transform_1(%arg0: i32) -> (i32, i32) {
    %c0_i32 = arith.constant 0 : i32
    %c0_i32_0 = arith.constant 0 : i32
    %c0_i32_1 = arith.constant 0 : i32
    return %c0_i32, %c0_i32_0 : i32, i32
  }
  func.func @transform_2(%arg0: i32) -> (i32, i32) {
    %c0_i32 = arith.constant 0 : i32
    %c0_i32_0 = arith.constant 0 : i32
    %c0_i32_1 = arith.constant 0 : i32
    return %c0_i32, %c0_i32_0 : i32, i32
  }
  func.func @transform_3(%arg0: i32) -> (i32, i32) {
    %c0_i32 = arith.constant 0 : i32
    %c0_i32_0 = arith.constant 0 : i32
    %c0_i32_1 = arith.constant 0 : i32
    return %c0_i32, %c0_i32_0 : i32, i32
  }
  func.func @transform_4(%arg0: i32) -> (i32, i32) {
    %c0_i32 = arith.constant 0 : i32
    %c0_i32_0 = arith.constant 0 : i32
    %c0_i32_1 = arith.constant 0 : i32
    return %c0_i32, %c0_i32_0 : i32, i32
  }
  func.func @transform_5(%arg0: i32) -> (i32, i32) {
    %c0_i32 = arith.constant 0 : i32
    %c0_i32_0 = arith.constant 0 : i32
    %c0_i32_1 = arith.constant 0 : i32
    return %c0_i32, %c0_i32_0 : i32, i32
  }
  func.func @transform_6(%arg0: i32) -> (i32, i32) {
    %c0_i32 = arith.constant 0 : i32
    %c0_i32_0 = arith.constant 0 : i32
    %c0_i32_1 = arith.constant 0 : i32
    return %c0_i32, %c0_i32_0 : i32, i32
  }
  func.func @transform_7(%arg0: i32) -> (i32, i32, i32, i32) {
    %c0_i32 = arith.constant 0 : i32
    %c0_i32_0 = arith.constant 0 : i32
    %c0_i32_1 = arith.constant 0 : i32
    %c0_i32_2 = arith.constant 0 : i32
    return %arg0, %c0_i32, %c0_i32_0, %c0_i32_1 : i32, i32, i32, i32
  }
}

</mosaic_0001>

<bundles_post_ra>
// kernel: residual_block_forward.1
= control target key start
LH: loop header
LB: loop body
LE: loop exit
PB: predicated region body
PF: predicated region fallthrough
CT: control target
= control target key end

     0   :  { %12 = vsyncpa [#allocation4], 0  ;;  %s12927_s0 = inlined_call_operand.vmem [shape: f32[4,16,16,128], index: 0, kind: input, shape index: {}]   ;;  %s12928_s1 = inlined_call_operand.vmem [shape: bf16[1152,128], index: 1, kind: input, shape index: {}]   ;;  %s12929_s2 = inlined_call_operand.vmem [shape: f32[1,128], index: 2, kind: input, shape index: {}]   ;;  %s12930_s3 = inlined_call_operand.vmem [shape: f32[1,128], index: 3, kind: input, shape index: {}]   ;;  %s12931_s4 = inlined_call_operand.vmem [shape: bf16[1152,128], index: 4, kind: input, shape index: {}]   ;;  %s12932_s5 = inlined_call_operand.vmem [shape: f32[1,128], index: 5, kind: input, shape index: {}]   ;;  %s12933_s6 = inlined_call_operand.vmem [shape: f32[1,128], index: 6, kind: input, shape index: {}]   ;;  %s12934_s7 = inlined_call_operand.hbm [shape: f32[4,16,16,128], index: 7, kind: output, shape index: {}]  }
   0x1   :  { %14 = vsyncpa [#allocation4 + $0x1], 0  ;;  %s9925_s24 = smov 0   ;;  %s9927_s25 = smov 0  }
   0x2   :  { %s9929_s26 = smov 0   ;;  %s9931_s27 = smov 0  }
   0x3 LB: > { %s9946_s28 = sadd.s32 4294967295, %s9881_s27   ;;  %s7516_s29 = sadd.s32 4294967294, %s9881_s27   ;;  %s9881_s27 = sphi %s9931_s27, %s12999_s27   ;;  %s9877_s26 = sphi %s9929_s26, %s12998_s26   ;;  %s9873_s25 = sphi %s9927_s25, %s12997_s25   ;;  %s9869_s24 = sphi %s9925_s24, %s12996_s24  }
   0x4   : > { %s9950_s30 = sadd.s32 1, %s9881_s27   ;;  %s179_s8 = sadd.s32 1, %s9877_s26 }
   0x5   : > { %s176_s9 = ssub.s32 %s9881_s27, %s9950_s30  ;;  %p189_p0 = scmp.ne.s32.totalorder %s9877_s26, %s9873_s25 }
   0x6   : > { %p177_p1 = scmp.eq.s32.totalorder %s176_s9, 0  ;;  %p190_p2 = scmp.eq.s32.totalorder %s9946_s28, 3 }
   0x7   : > { %p195_p3 = scmp.ne.s32.totalorder %s9873_s25, %s9869_s24  ;;  %p196_p4 = scmp.eq.s32.totalorder %s7516_s29, 3 }
   0x8   : > { %s9961_s10 = scalar_select %p177_p1, %s9877_s26, %s179_s8  }
   0x9   : > { %p9963_p5 = por %p190_p2, %p189_p0  ;;  %p9967_p6 = por %p196_p4, %p195_p3 }
   0xa   : > { %p7519_p7 = scmp.ge.s32.totalorder %s9881_s27, 1  ;;  %p240_p8 = scmp.lt.s32.totalorder %s9881_s27, 5 }
   0xc   : > { %p241_p9 = pnand %p7519_p7, %p240_p8 }
   0xe   : > { %244 = sbr.rel (%p241_p9) target bundleno = 1584 (0x630), region = 48 }
  0x13   : > { %v9440_v0 = vld [vmem:[%s12928_s1 + $0x38] sm:$0xff]  ;;  %p272_p10 = scmp.lt.s32.totalorder %s9946_s28, 3  ;;  %v9439_v2 = vld [vmem:[%s12928_s1 + $0x30] sm:$0xff]  ;;  %v9438_v4 = vld [vmem:[%s12928_s1 + $0x28] sm:$0xff]  ;;  %vm373_vm0 = vcmask 1040384   ;;  %v12942_v59 = vmov 0 }
  0x14   : > { %v9448_v1 = vld [vmem:[%s12928_s1 + $0x78] sm:$0xff]  ;;  %2956 = vmatpush.bf16.msra.mxu0 %v9440_v0  ;;  %9722 = vmatpush.bf16.msra.mxu2 %v9440_v0  ;;  %v9447_v3 = vld [vmem:[%s12928_s1 + $0x70] sm:$0xff]  ;;  %v9446_v8 = vld [vmem:[%s12928_s1 + $0x68] sm:$0xff]  ;;  %vm614_vm1 = vsmask.f32 3328  ;;  %vm1084_vm4 = vcmask 1042432  }
  0x15   : > { %s273_s19 = scalar_select %p272_p10, %s9946_s28, 3  ;;  %9730 = vmatpush.bf16.msra.mxu3 %v9448_v1  ;;  %3045 = vmatpush.bf16.msra.mxu1 %v9448_v1  ;;  %v9437_v19 = vld [vmem:[%s12928_s1 + $0x20] sm:$0xff]  ;;  %vm615_vm2 = vsmask.f32 7440  ;;  %v9436_v35 = vld [vmem:[%s12928_s1 + $0x18] sm:$0xff]  ;;  %v9435_v48 = vld [vmem:[%s12928_s1 + $0x10] sm:$0xff] }
  0x16   : > { %v9445_v24 = vld [vmem:[%s12928_s1 + $0x60] sm:$0xff]  ;;  %v9444_v36 = vld [vmem:[%s12928_s1 + $0x58] sm:$0xff]  ;;  %v9443_v58 = vld [vmem:[%s12928_s1 + $0x50] sm:$0xff]  ;;  %vm1085_vm5 = vcmask 1046532   ;;  %s269_s20 = sand.u32 1, %s9873_s25   ;;  %s9721_s8 = sshll.u32 %s9946_s28, 8 }
  0x17   : > { %s9288_s22 = sshll.u32 %s273_s19, 8  ;;  %vm10066_vm3 = vmor %vm614_vm1, %vm615_vm2  ;;  %s7520_s23 = sshll.u32 %s269_s20, 8 }
  0x18   : > { %s9993_s13 = scalar_lea.vmem %s12927_s0, %s9288_s22  ;;  %2957 = vmatpush.bf16.msra.mxu0 %v9439_v2  ;;  %9723 = vmatpush.bf16.msra.mxu2 %v9439_v2  ;;  %v12943_v59 = vsel %vm10066_vm3, 4294967295, %v12942_v59  ;;  %v9434_v2 = vld [vmem:[%s12928_s1 + $0x8] sm:$0xff]  ;;  %vm10605_vm6 = vmor %vm1084_vm4, %vm1085_vm5  ;;  %s12674_s29 = scalar_lea.vmem [#allocation3], %s7520_s23 }
  0x19   : > { %v279_v5 = vld [vmem:[%s9993_s13 + $0x10] sm:$0xff]  ;;  %v280_v6 = vld [vmem:[%s9993_s13 + $0x18] sm:$0xff]  ;;  %9731 = vmatpush.bf16.msra.mxu3 %v9447_v3  ;;  %3046 = vmatpush.bf16.msra.mxu1 %v9447_v3  ;;  %v10025_v30 = vld [vmem:[%s9993_s13 + $0x80] sm:$0xff]  ;;  %12944 = vst [vmem:[#allocation6_spill] sm:$0xff] %v12943_v59  ;;  %s7450_s15 = scalar_lea.hbm %s12934_s7, %s9721_s8  ;;  %s7451_s16 = sshll.u32 %s12674_s29, 4  ;;  %s7452_s16 = int_to_ptr.vmem [resolvable:$true] %s7451_s16 }
  0x1a   : > { %v291_v7 = vld [vmem:[%s9993_s13 + $0x70] sm:$0xff]  ;;  %v325_v9 = vrot.slane %v279_v5, 1  ;;  %v374_v10 = vrot.slane %v279_v5, 7  ;;  %v375_v11 = vrot.slane %v280_v6, 7  ;;  %v292_v12 = vld [vmem:[%s9993_s13 + $0x78] sm:$0xff]  ;;  %v470_v23 = vrot.slane %v280_v6, 5 }
  0x1b   : > { %v332_v13 = vrot.slane %v291_v7, 1  ;;  %v395_v14 = vrot.slane %v291_v7, 7  ;;  %v396_v15 = vrot.slane %v292_v12, 7  ;;  %v477_v16 = vrot.slane %v292_v12, 5  ;;  %v10056_v56 = vld [vmem:[%s9993_s13 + $0x88] sm:$0xff]  ;;  %v277_v0 = vld [vmem:[%s9993_s13] sm:$0xff] }
  0x1c   : > { %v376_v17 = vsel %vm373_vm0, %v374_v10, %v375_v11  ;;  %v502_v18 = vsel %vm373_vm0, %v325_v9, %v374_v10  ;;  %2958 = vmatpush.bf16.msra.mxu0 %v9438_v4  ;;  %9724 = vmatpush.bf16.msra.mxu2 %v9438_v4  ;;  %v518_v39 = vsel %vm373_vm0, %v375_v11, %v470_v23  ;;  %v333_v43 = vrot.slane %v10025_v30, 1  ;;  %v9442_v6 = vld [vmem:[%s12928_s1 + $0x48] sm:$0xff]  ;;  %v9441_v23 = vld [vmem:[%s12928_s1 + $0x40] sm:$0xff]  ;;  %s7453_s17 = sshll.u32 %s7450_s15, 4  ;;  %s7439_s28 = scalar_lea.sflag [#allocation4], %s269_s20  ;;  %s7454_s17 = int_to_ptr.hbm [resolvable:$true] %s7453_s17 }
  0x1d   : > { %v10007_v20 = vpack.c.bf16 %v502_v18, %v502_v18  ;;  %v10009_v21 = vpack.c.bf16 %v376_v17, %v376_v17  ;;  %v397_v22 = vsel %vm373_vm0, %v395_v14, %v396_v15  ;;  %9732 = vmatpush.bf16.msra.mxu3 %v9446_v8  ;;  %3047 = vmatpush.bf16.msra.mxu1 %v9446_v8  ;;  %v398_v57 = vrot.slane %v10025_v30, 7  ;;  %v10086_v8 = vld [vmem:[%s9993_s13 + $0x8] sm:$0xff]  ;;  %v9433_v17 = vld [vmem:[%s12928_s1] sm:$0xff]  ;;  %v9456_v30 = vld [vmem:[%s12928_s1 + $0xb8] sm:$0xff]  ;;  %s9833_s18 = sshra.s32 %s7454_s17, 4  ;;  %s9839_s23 = scalar_lea.hbm %s12934_s7, 1024  ;;  %s9834_s18 = int_to_ptr.hbm [resolvable:$true] %s9833_s18 }
  0x1e   : > { %v509_v25 = vsel %vm373_vm0, %v332_v13, %v395_v14  ;;  %v10016_v26 = vpack.c.bf16 %v397_v22, %v397_v22  ;;  %v525_v27 = vsel %vm373_vm0, %v396_v15, %v477_v16  ;;  %v10052_v50 = vpack.c.bf16 %v518_v39, %v518_v39  ;;  %v9472_v39 = vld [vmem:[%s12928_s1 + $0x138] sm:$0xff]  ;;  %s9835_s19 = scalar_lea.hbm %s9834_s18, 256  ;;  %p9840_p0 = scmp.lt.s32.totalorder %s9834_s18, %s12934_s7 }
  0x1f   : > { %582 = vst [vmem:[#allocation2] sm:$0xf] %v10007_v20  ;;  %v10020_v28 = vpack.c.bf16 %v509_v25, %v509_v25  ;;  %v10022_v29 = vpack.c.bf16 %v525_v27, %v525_v27  ;;  %v618_v33 = vshrl.u32 %v10007_v20, 16  ;;  %v621_v34 = vshll.u32 %v10007_v20, 16  ;;  %p9836_p11 = scmp.ne.s32.totalorder %s9834_s18, %s9835_s19  ;;  %p9841_p1 = scmp.lt.s32.totalorder %s9839_s23, %s9835_s19 }
  0x20   : > { %583 = vst [vmem:[#allocation2 + $0x24] sm:$0xf] %v10009_v21  ;;  %v795_v31 = vshll.u32 %v10016_v26, 16  ;;  %v799_v32 = vshrl.u32 %v10016_v26, 16  ;;  %2959 = vmatpush.bf16.msra.mxu0 %v9437_v19  ;;  %9725 = vmatpush.bf16.msra.mxu2 %v9437_v19  ;;  %v627_v42 = vshll.u32 %v10009_v21, 16  ;;  %v631_v47 = vshrl.u32 %v10009_v21, 16 }
  0x21   : > { %586 = vst [vmem:[#allocation2 + $0x90] sm:$0xf] %v10007_v20  ;;  %v786_v37 = vshrl.u32 %v10020_v28, 16  ;;  %v789_v38 = vshll.u32 %v10020_v28, 16  ;;  %9733 = vmatpush.bf16.msra.mxu3 %v9445_v24  ;;  %3048 = vmatpush.bf16.msra.mxu1 %v9445_v24  ;;  %v805_v46 = vshll.u32 %v10022_v29, 16  ;;  %v620_v51 = vrot.slane %v618_v33, 4  ;;  %p9837_p12 = pnand %p9836_p11, %p9963_p5  ;;  %p9842_p2 = por %p9841_p1, %p9840_p0 }
  0x22   : > { %587 = vst [vmem:[#allocation2 + $0xb4] sm:$0xf] %v10009_v21  ;;  %v797_v40 = vrot.slane %v795_v31, 5  ;;  %v801_v41 = vrot.slane %v799_v32, 4  ;;  %v623_v52 = vrot.slane %v621_v34, 5  ;;  %v629_v54 = vrot.slane %v627_v42, 5 }
  0x23   : > { %1256 = vst [vmem:[#allocation2 + $0x54] sm:$0xf] %v10007_v20  ;;  %v788_v44 = vrot.slane %v786_v37, 4  ;;  %v791_v45 = vrot.slane %v789_v38, 5  ;;  %v633_v55 = vrot.slane %v631_v47, 4  ;;  %v807_v62 = vrot.slane %v805_v46, 5  ;;  %p9838_p13 = pneg %p9837_p12 }
  0x24   : > { %1257 = vst [vmem:[#allocation2 + $0x78] sm:$0xf] %v10009_v21  ;;  %v802_v49 = vor.u32 %v801_v41, %v797_v40  ;;  %2960 = vmatpush.bf16.msra.mxu0 %v9436_v35  ;;  %9726 = vmatpush.bf16.msra.mxu2 %v9436_v35  ;;  %v624_v63 = vor.u32 %v623_v52, %v620_v51  ;;  %v399_v1 = vrot.slane %v10056_v56, 7  ;;  %v637_v4 = vshll.u32 %v10052_v50, 16  ;;  %v9464_v31 = vld [vmem:[%s12928_s1 + $0xf8] sm:$0xff]  ;;  %v295_v42 = vld [vmem:[%s9993_s13 + $0x90] sm:$0xff] }
  0x25   : > { %1388 = vst [vmem:[#allocation2 + $0x18] sm:$0xf] %v10007_v20  ;;  %v792_v53 = vor.u32 %v791_v45, %v788_v44  ;;  %9734 = vmatpush.bf16.msra.mxu3 %v9444_v36  ;;  %3049 = vmatpush.bf16.msra.mxu1 %v9444_v36  ;;  %v634_v3 = vor.u32 %v633_v55, %v629_v54  ;;  %v326_v11 = vrot.slane %v277_v0, 1  ;;  %v377_v12 = vrot.slane %v277_v0, 7  ;;  %v9455_v46 = vld [vmem:[%s12928_s1 + $0xb0] sm:$0xff]  ;;  %v10135_v47 = vld [vmem:[%s9993_s13 + $0x98] sm:$0xff]  ;;  %p9843_p3 = pnand %p9842_p2, %p9838_p13 }
  0x26   : > { %1389 = vst [vmem:[#allocation2 + $0x3c] sm:$0xf] %v10009_v21  ;;  %v803_v61 = vrot.slane %v802_v49, 4  ;;  %v510_v5 = vsel %vm373_vm0, %v333_v43, %v398_v57  ;;  %v7541_v9 = vld [vmem:[#allocation2] sm:$0xf]  ;;  %v625_v14 = vrot.slane %v624_v63, 4  ;;  %v400_v15 = vsel %vm373_vm0, %v398_v57, %v399_v1 }
  0x27   : > { %598 = vst [vmem:[#allocation2 + $0x240] sm:$0xf] %v10020_v28  ;;  %v793_v60 = vrot.slane %v792_v53, 4  ;;  %v9293_v13 = vld [vmem:[#allocation2 + $0x20] sm:$0xf0]  ;;  %v10095_v16 = vpack.c.bf16 %v510_v5, %v510_v5  ;;  %v635_v18 = vrot.slane %v634_v3, 4  ;;  %v503_v32 = vsel %vm373_vm0, %v326_v11, %v377_v12 }
  0x28   : > { %599 = vst [vmem:[#allocation2 + $0x264] sm:$0xf] %v10016_v26  ;;  %2961 = vmatpush.bf16.msra.mxu0 %v9435_v48  ;;  %9727 = vmatpush.bf16.msra.mxu2 %v9435_v48  ;;  %v808_v10 = vsel %vm10066_vm3, %v803_v61, %v807_v62  ;;  %v639_v19 = vrot.slane %v637_v4, 5  ;;  %v378_v22 = vrot.slane %v10086_v8, 7  ;;  %v7542_v25 = vor.u32 %v9293_v13, %v7541_v9 }
  0x29   : > { %1268 = vst [vmem:[#allocation2 + $0x204] sm:$0xf] %v10020_v28  ;;  %9735 = vmatpush.bf16.msra.mxu3 %v9443_v58  ;;  %3050 = vmatpush.bf16.msra.mxu1 %v9443_v58  ;;  %v798_v7 = vsel %vm10066_vm3, %v793_v60, %v797_v40  ;;  %v10111_v33 = vpack.c.bf16 %v400_v15, %v400_v15  ;;  %v478_v36 = vrot.slane %v10056_v56, 5  ;;  %v810_v37 = vshrl.u32 %v10095_v16, 16  ;;  %v9463_v60 = vld [vmem:[%s12928_s1 + $0xf0] sm:$0xff] }
  0x2a   : > { %1269 = vst [vmem:[#allocation2 + $0x228] sm:$0xf] %v10016_v26  ;;  %v630_v35 = vsel %vm10066_vm3, %v625_v14, %v629_v54  ;;  %v640_v38 = vsel %vm10066_vm3, %v635_v18, %v639_v19  ;;  %v379_v40 = vsel %vm373_vm0, %v377_v12, %v378_v22  ;;  %v813_v41 = vshll.u32 %v10095_v16, 16  ;;  %v9471_v56 = vld [vmem:[%s12928_s1 + $0x130] sm:$0xff] }
  0x2b   : > { %1400 = vst [vmem:[#allocation2 + $0x1c8] sm:$0xf] %v10020_v28  ;;  %v10127_v43 = vpack.c.bf16 %v503_v32, %v503_v32  ;;  %v819_v44 = vshll.u32 %v10111_v33, 16  ;;  %v823_v45 = vshrl.u32 %v10111_v33, 16  ;;  %v10137_v49 = vpack.c.bf16 %v379_v40, %v379_v40 }
  0x2c   : > { %1401 = vst [vmem:[#allocation2 + $0x1ec] sm:$0xf] %v10016_v26  ;;  %2962 = vmatpush.bf16.msra.mxu0 %v9434_v2  ;;  %9728 = vmatpush.bf16.msra.mxu2 %v9434_v2  ;;  %v526_v51 = vsel %vm373_vm0, %v399_v1, %v478_v36  ;;  %v812_v52 = vrot.slane %v810_v37, 4  ;;  %v471_v53 = vrot.slane %v10086_v8, 5  ;;  %v815_v55 = vrot.slane %v813_v41, 5  ;;  %v9454_v36 = vld [vmem:[%s12928_s1 + $0xa8] sm:$0xff] }
  0x2d   : > { %1023 = vst [vmem:[#allocation2 + $0x244] sm:$0xf] %v798_v7  ;;  %9736 = vmatpush.bf16.msra.mxu3 %v9442_v6  ;;  %3051 = vmatpush.bf16.msra.mxu1 %v9442_v6  ;;  %v334_v57 = vrot.slane %v295_v42, 1  ;;  %v401_v61 = vrot.slane %v295_v42, 7  ;;  %v402_v62 = vrot.slane %v10135_v47, 7  ;;  %v10150_v63 = vpack.c.bf16 %v526_v51, %v526_v51 }
  0x2e   : > { %v7829_v24 = vld [vmem:[#allocation2 + $0x240] sm:$0xf]  ;;  %1024 = vst [vmem:[#allocation2 + $0x268] sm:$0xf] %v808_v10  ;;  %v821_v0 = vrot.slane %v819_v44, 5  ;;  %v825_v1 = vrot.slane %v823_v45, 4  ;;  %v519_v3 = vsel %vm373_vm0, %v378_v22, %v471_v53  ;;  %v816_v9 = vor.u32 %v815_v55, %v812_v52 }
  0x2f   : > { %v9365_v27 = vld [vmem:[#allocation2 + $0x260] sm:$0xf0]  ;;  %1326 = vst [vmem:[#allocation2 + $0x208] sm:$0xf] %v798_v7  ;;  %v642_v2 = vshrl.u32 %v10127_v43, 16  ;;  %v645_v4 = vshll.u32 %v10127_v43, 16  ;;  %v511_v8 = vsel %vm373_vm0, %v334_v57, %v401_v61  ;;  %v10165_v14 = vpack.c.bf16 %v519_v3, %v519_v3 }
  0x30   : > { %v7830_v34 = vor.u32 %v9365_v27, %v7829_v24  ;;  %1327 = vst [vmem:[#allocation2 + $0x22c] sm:$0xf] %v808_v10  ;;  %2963 = vmatpush.bf16.msra.mxu0 %v9433_v17  ;;  %9729 = vmatpush.bf16.msra.mxu2 %v9433_v17  ;;  %v651_v5 = vshll.u32 %v10137_v49, 16  ;;  %v655_v6 = vshrl.u32 %v10137_v49, 16  ;;  %v826_v12 = vor.u32 %v825_v1, %v821_v0  ;;  %v10206_v1 = vld [vmem:[%s9993_s13 + $0xa8] sm:$0xff] }
  0x31   : > { %1432 = vst [vmem:[#allocation2 + $0x1cc] sm:$0xf] %v798_v7  ;;  %9737 = vmatpush.bf16.msra.mxu3 %v9441_v23  ;;  %3052 = vmatpush.bf16.msra.mxu1 %v9441_v23  ;;  %v829_v13 = vshll.u32 %v10150_v63, 16  ;;  %v644_v15 = vrot.slane %v642_v2, 4  ;;  %v647_v18 = vrot.slane %v645_v4, 5  ;;  %v10169_v23 = vpack.c.bf16 %v511_v8, %v511_v8 }
  0x32   : > { %1433 = vst [vmem:[#allocation2 + $0x1f0] sm:$0xf] %v808_v10  ;;  %v403_v10 = vsel %vm373_vm0, %v401_v61, %v402_v62  ;;  %v653_v19 = vrot.slane %v651_v5, 5  ;;  %v657_v22 = vrot.slane %v655_v6, 4  ;;  %v827_v27 = vrot.slane %v826_v12, 4  ;;  %v9470_v61 = vld [vmem:[%s12928_s1 + $0x128] sm:$0xff] }
  0x33   : > { %1007 = vst [vmem:[#allocation2 + $0x4] sm:$0xf] %v630_v35  ;;  %2964 = vmatmul.bf16.vlgmr.msra.gmra.mxu0 %v7542_v25  ;;  %3004 = vmatmul.bf16.vlgmr.msra.gmra.mxu2 %v7830_v34  ;;  %v10171_v24 = vpack.c.bf16 %v403_v10, %v403_v10  ;;  %v817_v25 = vrot.slane %v816_v9, 4  ;;  %v648_v32 = vor.u32 %v647_v18, %v644_v15  ;;  %v834_v37 = vshrl.u32 %v10169_v23, 16  ;;  %v281_v12 = vld [vmem:[%s9993_s13 + $0x20] sm:$0xff] }
  0x34   : > { %3134 = vmatpush.bf16.msrb.mxu2 %v9456_v30  ;;  %v9361_v48 = vld [vmem:[#allocation2 + $0x244] sm:$0xf]  ;;  %1008 = vst [vmem:[#allocation2 + $0x28] sm:$0xf] %v640_v38  ;;  %3312 = vmatpush.bf16.msrb.mxu0 %v9472_v39  ;;  %v831_v30 = vrot.slane %v829_v13, 5  ;;  %v658_v34 = vor.u32 %v657_v22, %v653_v19  ;;  %v405_v9 = vrot.slane %v10206_v1, 7 }
  0x35   : > { %3223 = vmatpush.bf16.msrb.mxu3 %v9464_v31  ;;  %v7831_v54 = vld [vmem:[#allocation2 + $0x264] sm:$0xf0]  ;;  %1420 = vst [vmem:[#allocation2 + $0x1c] sm:$0xf] %v630_v35  ;;  %v661_v31 = vshll.u32 %v10165_v14, 16  ;;  %v843_v39 = vshll.u32 %v10171_v24, 16  ;;  %v822_v41 = vsel %vm10066_vm3, %v817_v25, %v821_v0 }
  0x36   : > { %v7834_v58 = vor.u32 %v9361_v48, %v7831_v54  ;;  %1421 = vst [vmem:[#allocation2 + $0x40] sm:$0xf] %v640_v38  ;;  %v832_v44 = vsel %vm10066_vm3, %v827_v27, %v831_v30  ;;  %v649_v51 = vrot.slane %v648_v32, 4  ;;  %v659_v52 = vrot.slane %v658_v34, 4  ;;  %v7613_v15 = vld [vmem:[#allocation2 + $0x90] sm:$0xf] }
  0x37   : > { %1011 = vst [vmem:[#allocation2 + $0x94] sm:$0xf] %v630_v35  ;;  %v663_v45 = vrot.slane %v661_v31, 5  ;;  %v836_v54 = vrot.slane %v834_v37, 4  ;;  %v845_v57 = vrot.slane %v843_v39, 5  ;;  %v327_v32 = vrot.slane %v281_v12, 1 }
  0x38   : > { %3135 = vmatpush.bf16.msrb.mxu2 %v9455_v46  ;;  %3093 = vmatmul.bf16.vlgmr.msra.gmra.mxu3 %v7834_v58  ;;  %1012 = vst [vmem:[#allocation2 + $0xb8] sm:$0xf] %v640_v38  ;;  %v847_v46 = vshrl.u32 %v10171_v24, 16  ;;  %v297_v58 = vld [vmem:[%s9993_s13 + $0xa0] sm:$0xff]  ;;  %v654_v3 = vsel %vm10066_vm3, %v649_v51, %v653_v19  ;;  %v9311_v22 = vld [vmem:[#allocation2 + $0xb0] sm:$0xf0] }
  0x39   : > { %1314 = vst [vmem:[#allocation2 + $0x58] sm:$0xf] %v630_v35  ;;  %3224 = vmatpush.bf16.msrb.mxu3 %v9463_v60  ;;  %3313 = vmatpush.bf16.msrb.mxu0 %v9471_v56  ;;  %v479_v35 = vrot.slane %v10135_v47, 5  ;;  %v9462_v56 = vld [vmem:[%s12928_s1 + $0xe8] sm:$0xff]  ;;  %v664_v4 = vsel %vm10066_vm3, %v659_v52, %v663_v45  ;;  %v335_v5 = vrot.slane %v297_v58, 1  ;;  %v404_v6 = vrot.slane %v297_v58, 7 }
  0x3a   : > { %v9289_v7 = vld [vmem:[#allocation2 + $0x4] sm:$0xf]  ;;  %1315 = vst [vmem:[#allocation2 + $0x7c] sm:$0xf] %v640_v38  ;;  %v837_v38 = vshll.u32 %v10169_v23, 16  ;;  %v380_v34 = vrot.slane %v281_v12, 7  ;;  %v7614_v39 = vor.u32 %v9311_v22, %v7613_v15 }
  0x3b   : > { %v7543_v11 = vld [vmem:[#allocation2 + $0x24] sm:$0xf0]  ;;  %584 = vst [vmem:[#allocation2 + $0x48] sm:$0xf] %v10127_v43  ;;  %v527_v53 = vsel %vm373_vm0, %v402_v62, %v479_v35  ;;  %v849_v62 = vrot.slane %v847_v46, 4  ;;  %v512_v18 = vsel %vm373_vm0, %v335_v5, %v404_v6  ;;  %v406_v27 = vsel %vm373_vm0, %v404_v6, %v405_v9 }
  0x3c   : > { %v7546_v17 = vor.u32 %v9289_v7, %v7543_v11  ;;  %585 = vst [vmem:[#allocation2 + $0x6c] sm:$0xf] %v10137_v49  ;;  %3136 = vmatpush.bf16.msrb.mxu2 %v9454_v36  ;;  %v839_v55 = vrot.slane %v837_v38, 5  ;;  %v10203_v0 = vpack.c.bf16 %v527_v53, %v527_v53  ;;  %v10223_v36 = vpack.c.bf16 %v512_v18, %v512_v18 }
  0x3d   : > { %1254 = vst [vmem:[#allocation2 + $0xc] sm:$0xf] %v10127_v43  ;;  %3225 = vmatpush.bf16.msrb.mxu3 %v9462_v56  ;;  %3314 = vmatpush.bf16.msrb.mxu0 %v9470_v61  ;;  %v850_v10 = vor.u32 %v849_v62, %v845_v57  ;;  %v10226_v37 = vpack.c.bf16 %v406_v27, %v406_v27 }
  0x3e   : > { %3053 = vmatmul.bf16.vlgmr.msra.gmra.mxu1 %v7546_v17  ;;  %1255 = vst [vmem:[#allocation2 + $0x30] sm:$0xf] %v10137_v49  ;;  %v840_v7 = vor.u32 %v839_v55, %v836_v54  ;;  %v853_v8 = vshll.u32 %v10203_v0, 16  ;;  %v10216_v17 = vld [vmem:[%s9993_s13 + $0x28] sm:$0xff]  ;;  %v504_v46 = vsel %vm373_vm0, %v327_v32, %v380_v34  ;;  %v858_v52 = vshrl.u32 %v10223_v36, 16 }
  0x3f   : > { %600 = vst [vmem:[#allocation2 + $0x288] sm:$0xf] %v10095_v16  ;;  %v851_v30 = vrot.slane %v850_v10, 4  ;;  %v381_v35 = vrot.slane %v10216_v17, 7  ;;  %v861_v53 = vshll.u32 %v10223_v36, 16  ;;  %v867_v54 = vshll.u32 %v10226_v37, 16 }
  0x40   : > { %601 = vst [vmem:[#allocation2 + $0x2ac] sm:$0xf] %v10111_v33  ;;  %v841_v25 = vrot.slane %v840_v7, 4  ;;  %v855_v31 = vrot.slane %v853_v8, 5  ;;  %v871_v55 = vshrl.u32 %v10226_v37, 16  ;;  %v10245_v58 = vpack.c.bf16 %v504_v46, %v504_v46 }
  0x41   : > { %1270 = vst [vmem:[#allocation2 + $0x24c] sm:$0xf] %v10095_v16  ;;  %v382_v51 = vsel %vm373_vm0, %v380_v34, %v381_v35  ;;  %v869_v6 = vrot.slane %v867_v54, 5  ;;  %v9307_v18 = vld [vmem:[#allocation2 + $0x94] sm:$0xf] }
  0x42   : > { %v7577_v40 = vld [vmem:[#allocation2 + $0x48] sm:$0xf]  ;;  %1271 = vst [vmem:[#allocation2 + $0x270] sm:$0xf] %v10111_v33  ;;  %v856_v45 = vsel %vm10066_vm3, %v851_v30, %v855_v31  ;;  %v10248_v61 = vpack.c.bf16 %v382_v51, %v382_v51  ;;  %v873_v7 = vrot.slane %v871_v55, 4  ;;  %v669_v10 = vshll.u32 %v10245_v58, 16 }
  0x43   : > { %v9302_v42 = vld [vmem:[#allocation2 + $0x68] sm:$0xf0]  ;;  %1402 = vst [vmem:[#allocation2 + $0x210] sm:$0xf] %v10095_v16  ;;  %v7615_v30 = vld [vmem:[#allocation2 + $0xb4] sm:$0xf0] }
  0x44   : > { %v7578_v48 = vor.u32 %v9302_v42, %v7577_v40  ;;  %1403 = vst [vmem:[#allocation2 + $0x234] sm:$0xf] %v10111_v33  ;;  %v846_v40 = vsel %vm10066_vm3, %v841_v25, %v845_v57  ;;  %v9453_v42 = vld [vmem:[%s12928_s1 + $0xa0] sm:$0xff]  ;;  %v679_v12 = vshrl.u32 %v10248_v61, 16  ;;  %v299_v25 = vld [vmem:[%s9993_s13 + $0xb0] sm:$0xff]  ;;  %v671_v34 = vrot.slane %v669_v10, 5 }
  0x45   : > { %1025 = vst [vmem:[#allocation2 + $0x28c] sm:$0xf] %v822_v41  ;;  %3137 = vmatpush.bf16.msrb.mxu2 %v9453_v42  ;;  %v407_v42 = vrot.slane %v299_v25, 7  ;;  %v7618_v46 = vor.u32 %v9307_v18, %v7615_v30 }
  0x46   : > { %2969 = vmatmul.bf16.gmra.mxu0 %v7578_v48  ;;  %v7865_v60 = vld [vmem:[#allocation2 + $0x288] sm:$0xf]  ;;  %1026 = vst [vmem:[#allocation2 + $0x2b0] sm:$0xf] %v832_v44 }
  0x47   : > { %v9374_v47 = vld [vmem:[#allocation2 + $0x2a8] sm:$0xf0]  ;;  %1328 = vst [vmem:[#allocation2 + $0x250] sm:$0xf] %v822_v41 }
  0x48   : > { %v7866_v2 = vor.u32 %v9374_v47, %v7865_v60  ;;  %1329 = vst [vmem:[#allocation2 + $0x274] sm:$0xf] %v832_v44  ;;  %v472_v47 = vrot.slane %v10216_v17, 5 }
  0x49   : > { %1434 = vst [vmem:[#allocation2 + $0x214] sm:$0xf] %v822_v41  ;;  %v480_v41 = vrot.slane %v10206_v1, 5  ;;  %v860_v1 = vrot.slane %v858_v52, 4 }
  0x4a   : > { %3009 = vmatmul.bf16.gmra.mxu2 %v7866_v2  ;;  %1435 = vst [vmem:[#allocation2 + $0x238] sm:$0xf] %v832_v44  ;;  %v863_v2 = vrot.slane %v861_v53, 5  ;;  %v520_v8 = vsel %vm373_vm0, %v381_v35, %v472_v47 }
  0x4b   : > { %1009 = vst [vmem:[#allocation2 + $0x4c] sm:$0xf] %v654_v3  ;;  %v528_v60 = vsel %vm373_vm0, %v405_v9, %v480_v41  ;;  %v666_v9 = vshrl.u32 %v10245_v58, 16  ;;  %v10270_v31 = vpack.c.bf16 %v520_v8, %v520_v8  ;;  %v336_v41 = vrot.slane %v299_v25, 1 }
  0x4c   : > { %v9370_v11 = vld [vmem:[#allocation2 + $0x28c] sm:$0xf]  ;;  %1010 = vst [vmem:[#allocation2 + $0x70] sm:$0xf] %v664_v4  ;;  %v10257_v5 = vpack.c.bf16 %v528_v60, %v528_v60  ;;  %v864_v15 = vor.u32 %v863_v2, %v860_v1  ;;  %v10291_v1 = vld [vmem:[%s9993_s13 + $0x38] sm:$0xff] }
  0x4d   : > { %v7867_v13 = vld [vmem:[#allocation2 + $0x2ac] sm:$0xf0]  ;;  %1312 = vst [vmem:[#allocation2 + $0x10] sm:$0xf] %v654_v3  ;;  %v9461_v3 = vld [vmem:[%s12928_s1 + $0xe0] sm:$0xff]  ;;  %v668_v32 = vrot.slane %v666_v9, 4  ;;  %v513_v47 = vsel %vm373_vm0, %v336_v41, %v407_v42 }
  0x4e   : > { %v7870_v19 = vor.u32 %v9370_v11, %v7867_v13  ;;  %1313 = vst [vmem:[#allocation2 + $0x34] sm:$0xf] %v664_v4  ;;  %v9469_v4 = vld [vmem:[%s12928_s1 + $0x120] sm:$0xff]  ;;  %3226 = vmatpush.bf16.msrb.mxu3 %v9461_v3  ;;  %v675_v11 = vshll.u32 %v10248_v61, 16  ;;  %v877_v22 = vshll.u32 %v10257_v5, 16  ;;  %v685_v52 = vshll.u32 %v10270_v31, 16 }
  0x4f   : > { %602 = vst [vmem:[#allocation2 + $0x2d0] sm:$0xf] %v10169_v23  ;;  %3315 = vmatpush.bf16.msrb.mxu0 %v9469_v4  ;;  %v672_v51 = vor.u32 %v671_v34, %v668_v32  ;;  %v10295_v10 = vpack.c.bf16 %v513_v47, %v513_v47 }
  0x50   : > { %3098 = vmatmul.bf16.gmra.mxu3 %v7870_v19  ;;  %603 = vst [vmem:[#allocation2 + $0x2f4] sm:$0xf] %v10171_v24  ;;  %v874_v19 = vor.u32 %v873_v7, %v869_v6  ;;  %v677_v35 = vrot.slane %v675_v11, 5  ;;  %v687_v3 = vrot.slane %v685_v52, 5  ;;  %v384_v11 = vrot.slane %v10291_v1, 7  ;;  %v9468_v52 = vld [vmem:[%s12928_s1 + $0x118] sm:$0xff] }
  0x51   : > { %1272 = vst [vmem:[#allocation2 + $0x294] sm:$0xf] %v10169_v23  ;;  %v673_v2 = vrot.slane %v672_v51, 4  ;;  %v885_v32 = vshll.u32 %v10295_v10, 16  ;;  %v9460_v51 = vld [vmem:[%s12928_s1 + $0xd8] sm:$0xff] }
  0x52   : > { %v9298_v38 = vld [vmem:[#allocation2 + $0x4c] sm:$0xf]  ;;  %1273 = vst [vmem:[#allocation2 + $0x2b8] sm:$0xf] %v10171_v24  ;;  %3227 = vmatpush.bf16.msrb.mxu3 %v9460_v51 }
  0x53   : > { %v7579_v44 = vld [vmem:[#allocation2 + $0x6c] sm:$0xf0]  ;;  %1404 = vst [vmem:[#allocation2 + $0x258] sm:$0xf] %v10169_v23  ;;  %3316 = vmatpush.bf16.msrb.mxu0 %v9468_v52  ;;  %v286_v51 = vld [vmem:[%s9993_s13 + $0x48] sm:$0xff] }
  0x54   : > { %v7582_v48 = vor.u32 %v9298_v38, %v7579_v44  ;;  %1405 = vst [vmem:[#allocation2 + $0x27c] sm:$0xf] %v10171_v24  ;;  %v681_v38 = vrot.slane %v679_v12, 4  ;;  %v875_v44 = vrot.slane %v874_v19, 4  ;;  %v9452_v19 = vld [vmem:[%s12928_s1 + $0x98] sm:$0xff] }
  0x55   : > { %1027 = vst [vmem:[#allocation2 + $0x2d4] sm:$0xf] %v846_v40  ;;  %3138 = vmatpush.bf16.msrb.mxu2 %v9452_v19  ;;  %v10343_v19 = vld [vmem:[%s9993_s13 + $0xc8] sm:$0xff] }
  0x56   : > { %3058 = vmatmul.bf16.gmra.mxu1 %v7582_v48  ;;  %2974 = vmatmul.bf16.gmra.mxu0 %v7614_v39  ;;  %v7901_v57 = vld [vmem:[#allocation2 + $0x2d0] sm:$0xf]  ;;  %1028 = vst [vmem:[#allocation2 + $0x2f8] sm:$0xf] %v856_v45  ;;  %v10274_v39 = vld [vmem:[%s9993_s13 + $0xb8] sm:$0xff]  ;;  %v682_v55 = vor.u32 %v681_v38, %v677_v35 }
  0x57   : > { %v9383_v56 = vld [vmem:[#allocation2 + $0x2f0] sm:$0xf0]  ;;  %1330 = vst [vmem:[#allocation2 + $0x298] sm:$0xf] %v846_v40  ;;  %v408_v53 = vrot.slane %v10274_v39, 7  ;;  %v481_v18 = vrot.slane %v10274_v39, 5 }
  0x58   : > { %v7902_v62 = vor.u32 %v9383_v56, %v7901_v57  ;;  %1331 = vst [vmem:[#allocation2 + $0x2bc] sm:$0xf] %v856_v45  ;;  %v283_v56 = vld [vmem:[%s9993_s13 + $0x30] sm:$0xff] }
  0x59   : > { %1436 = vst [vmem:[#allocation2 + $0x25c] sm:$0xf] %v846_v40  ;;  %v865_v40 = vrot.slane %v864_v15, 4  ;;  %v409_v4 = vsel %vm373_vm0, %v407_v42, %v408_v53  ;;  %v328_v7 = vrot.slane %v283_v56, 1  ;;  %v383_v9 = vrot.slane %v283_v56, 7 }
  0x5a   : > { %3014 = vmatmul.bf16.gmra.mxu2 %v7902_v62  ;;  %1437 = vst [vmem:[#allocation2 + $0x280] sm:$0xf] %v856_v45  ;;  %v879_v45 = vrot.slane %v877_v22, 5 }
  0x5b   : > { %588 = vst [vmem:[#allocation2 + $0xd8] sm:$0xf] %v10245_v58  ;;  %v870_v60 = vsel %vm10066_vm3, %v865_v40, %v869_v6  ;;  %v683_v6 = vrot.slane %v682_v55, 4  ;;  %v505_v25 = vsel %vm373_vm0, %v328_v7, %v383_v9  ;;  %v385_v30 = vsel %vm373_vm0, %v383_v9, %v384_v11 }
  0x5c   : > { %v9379_v13 = vld [vmem:[#allocation2 + $0x2d4] sm:$0xf]  ;;  %589 = vst [vmem:[#allocation2 + $0xfc] sm:$0xf] %v10248_v61  ;;  %v880_v62 = vsel %vm10066_vm3, %v875_v44, %v879_v45  ;;  %v10314_v39 = vpack.c.bf16 %v505_v25, %v505_v25  ;;  %v529_v40 = vsel %vm373_vm0, %v408_v53, %v481_v18  ;;  %v10317_v42 = vpack.c.bf16 %v385_v30, %v385_v30 }
  0x5d   : > { %v7903_v17 = vld [vmem:[#allocation2 + $0x2f4] sm:$0xf0]  ;;  %1258 = vst [vmem:[#allocation2 + $0x9c] sm:$0xf] %v10245_v58  ;;  %v688_v22 = vsel %vm10066_vm3, %v683_v6, %v687_v3  ;;  %v10326_v53 = vpack.c.bf16 %v529_v40, %v529_v40 }
  0x5e   : > { %v7906_v27 = vor.u32 %v9379_v13, %v7903_v17  ;;  %1259 = vst [vmem:[#allocation2 + $0xc0] sm:$0xf] %v10248_v61  ;;  %v10298_v13 = vpack.c.bf16 %v409_v4, %v409_v4  ;;  %v678_v17 = vsel %vm10066_vm3, %v673_v2, %v677_v35  ;;  %v699_v56 = vshll.u32 %v10317_v42, 16 }
  0x5f   : > { %1390 = vst [vmem:[#allocation2 + $0x60] sm:$0xf] %v10245_v58  ;;  %v703_v47 = vshrl.u32 %v10317_v42, 16  ;;  %v901_v6 = vshll.u32 %v10326_v53, 16 }
  0x60   : > { %3103 = vmatmul.bf16.gmra.mxu3 %v7906_v27  ;;  %1391 = vst [vmem:[#allocation2 + $0x84] sm:$0xf] %v10248_v61  ;;  %v882_v27 = vshrl.u32 %v10295_v10, 16  ;;  %v891_v34 = vshll.u32 %v10298_v13, 16  ;;  %v895_v35 = vshrl.u32 %v10298_v13, 16 }
  0x61   : > { %604 = vst [vmem:[#allocation2 + $0x318] sm:$0xf] %v10223_v36  ;;  %v705_v18 = vrot.slane %v703_v47, 4  ;;  %v903_v25 = vrot.slane %v901_v6, 5 }
  0x62   : > { %v7649_v48 = vld [vmem:[#allocation2 + $0xd8] sm:$0xf]  ;;  %605 = vst [vmem:[#allocation2 + $0x33c] sm:$0xf] %v10226_v37  ;;  %v884_v44 = vrot.slane %v882_v27, 4  ;;  %v897_v55 = vrot.slane %v895_v35, 4 }
  0x63   : > { %v9320_v54 = vld [vmem:[#allocation2 + $0xf8] sm:$0xf0]  ;;  %1274 = vst [vmem:[#allocation2 + $0x2dc] sm:$0xf] %v10223_v36  ;;  %v411_v35 = vrot.slane %v10343_v19, 7 }
  0x64   : > { %v7650_v57 = vor.u32 %v9320_v54, %v7649_v48  ;;  %1275 = vst [vmem:[#allocation2 + $0x300] sm:$0xf] %v10226_v37  ;;  %v473_v48 = vrot.slane %v10291_v1, 5  ;;  %v893_v54 = vrot.slane %v891_v34, 5 }
  0x65   : > { %1406 = vst [vmem:[#allocation2 + $0x2a0] sm:$0xf] %v10223_v36 }
  0x66   : > { %3063 = vmatmul.bf16.gmra.mxu1 %v7618_v46  ;;  %2979 = vmatmul.bf16.gmra.mxu0 %v7650_v57  ;;  %1407 = vst [vmem:[#allocation2 + $0x2c4] sm:$0xf] %v10226_v37  ;;  %v887_v46 = vrot.slane %v885_v32, 5  ;;  %v690_v57 = vshrl.u32 %v10314_v39, 16  ;;  %v521_v2 = vsel %vm373_vm0, %v384_v11, %v473_v48  ;;  %v898_v4 = vor.u32 %v897_v55, %v893_v54 }
  0x67   : > { %1029 = vst [vmem:[#allocation2 + $0x31c] sm:$0xf] %v870_v60 }
  0x68   : > { %v7937_v8 = vld [vmem:[#allocation2 + $0x318] sm:$0xf]  ;;  %1030 = vst [vmem:[#allocation2 + $0x340] sm:$0xf] %v880_v62  ;;  %v888_v1 = vor.u32 %v887_v46, %v884_v44  ;;  %v692_v9 = vrot.slane %v690_v57, 4  ;;  %v285_v46 = vld [vmem:[%s9993_s13 + $0x40] sm:$0xff] }
  0x69   : > { %v9392_v12 = vld [vmem:[#allocation2 + $0x338] sm:$0xf0]  ;;  %1332 = vst [vmem:[#allocation2 + $0x2e0] sm:$0xf] %v870_v60  ;;  %v329_v47 = vrot.slane %v285_v46, 1 }
  0x6a   : > { %v7938_v15 = vor.u32 %v9392_v12, %v7937_v8  ;;  %1333 = vst [vmem:[#allocation2 + $0x304] sm:$0xf] %v880_v62  ;;  %v301_v12 = vld [vmem:[%s9993_s13 + $0xc0] sm:$0xff]  ;;  %v889_v11 = vrot.slane %v888_v1, 4  ;;  %v387_v1 = vrot.slane %v286_v51, 7 }
  0x6b   : > { %1438 = vst [vmem:[#allocation2 + $0x2a4] sm:$0xf] %v870_v60  ;;  %v693_v60 = vshll.u32 %v10314_v39, 16  ;;  %v337_v27 = vrot.slane %v301_v12, 1  ;;  %v410_v30 = vrot.slane %v301_v12, 7 }
  0x6c   : > { %3019 = vmatmul.bf16.gmra.mxu2 %v7938_v15  ;;  %1439 = vst [vmem:[#allocation2 + $0x2c8] sm:$0xf] %v880_v62  ;;  %v10340_v15 = vpack.c.bf16 %v521_v2, %v521_v2 }
  0x6d   : > { %1013 = vst [vmem:[#allocation2 + $0xdc] sm:$0xf] %v678_v17  ;;  %v695_v8 = vrot.slane %v693_v60, 5  ;;  %v514_v52 = vsel %vm373_vm0, %v337_v27, %v410_v30  ;;  %v412_v57 = vsel %vm373_vm0, %v410_v30, %v411_v35 }
  0x6e   : > { %v9388_v38 = vld [vmem:[#allocation2 + $0x31c] sm:$0xf]  ;;  %1014 = vst [vmem:[#allocation2 + $0x100] sm:$0xf] %v688_v22  ;;  %v10362_v2 = vpack.c.bf16 %v514_v52, %v514_v52 }
  0x6f   : > { %v7939_v41 = vld [vmem:[#allocation2 + $0x33c] sm:$0xf0]  ;;  %1316 = vst [vmem:[#allocation2 + $0xa0] sm:$0xf] %v678_v17  ;;  %v696_v34 = vor.u32 %v695_v8, %v692_v9  ;;  %v482_v9 = vrot.slane %v10343_v19, 5  ;;  %v9451_v8 = vld [vmem:[%s12928_s1 + $0x90] sm:$0xff] }
  0x70   : > { %v7942_v45 = vor.u32 %v9388_v38, %v7939_v41  ;;  %1317 = vst [vmem:[#allocation2 + $0xc4] sm:$0xf] %v688_v22  ;;  %v709_v41 = vshll.u32 %v10340_v15, 16  ;;  %3139 = vmatpush.bf16.msrb.mxu2 %v9451_v8 }
  0x71   : > { %1422 = vst [vmem:[#allocation2 + $0x64] sm:$0xf] %v678_v17  ;;  %v701_v17 = vrot.slane %v699_v56, 5  ;;  %v697_v55 = vrot.slane %v696_v34, 4 }
  0x72   : > { %3108 = vmatmul.bf16.gmra.mxu3 %v7942_v45  ;;  %1423 = vst [vmem:[#allocation2 + $0x88] sm:$0xf] %v688_v22  ;;  %v899_v22 = vrot.slane %v898_v4, 4  ;;  %v894_v45 = vsel %vm10066_vm3, %v889_v11, %v893_v54  ;;  %v711_v56 = vrot.slane %v709_v41, 5  ;;  %v386_v54 = vrot.slane %v285_v46, 7  ;;  %v9459_v46 = vld [vmem:[%s12928_s1 + $0xd0] sm:$0xff] }
  0x73   : > { %590 = vst [vmem:[#allocation2 + $0x120] sm:$0xf] %v10314_v39  ;;  %v706_v40 = vor.u32 %v705_v18, %v701_v17  ;;  %v10364_v4 = vpack.c.bf16 %v412_v57, %v412_v57  ;;  %3228 = vmatpush.bf16.msrb.mxu3 %v9459_v46 }
  0x74   : > { %v9316_v62 = vld [vmem:[#allocation2 + $0xdc] sm:$0xf]  ;;  %591 = vst [vmem:[#allocation2 + $0x144] sm:$0xf] %v10317_v42  ;;  %v904_v48 = vsel %vm10066_vm3, %v899_v22, %v903_v25  ;;  %v506_v18 = vsel %vm373_vm0, %v329_v47, %v386_v54  ;;  %v388_v11 = vsel %vm373_vm0, %v386_v54, %v387_v1  ;;  %v906_v22 = vshrl.u32 %v10362_v2, 16 }
  0x75   : > { %v7651_v3 = vld [vmem:[#allocation2 + $0xfc] sm:$0xf0]  ;;  %1260 = vst [vmem:[#allocation2 + $0xe4] sm:$0xf] %v10314_v39  ;;  %v707_v60 = vrot.slane %v706_v40, 4  ;;  %v915_v19 = vshll.u32 %v10364_v4, 16  ;;  %v10380_v30 = vpack.c.bf16 %v506_v18, %v506_v18 }
  0x76   : > { %v7654_v7 = vor.u32 %v9316_v62, %v7651_v3  ;;  %1261 = vst [vmem:[#allocation2 + $0x108] sm:$0xf] %v10317_v42  ;;  %v919_v25 = vshrl.u32 %v10364_v4, 16  ;;  %v474_v40 = vrot.slane %v286_v51, 5 }
  0x77   : > { %1392 = vst [vmem:[#allocation2 + $0xa8] sm:$0xf] %v10314_v39  ;;  %v712_v12 = vsel %vm10066_vm3, %v707_v60, %v711_v56  ;;  %v714_v51 = vshrl.u32 %v10380_v30, 16  ;;  %v717_v57 = vshll.u32 %v10380_v30, 16 }
  0x78   : > { %3068 = vmatmul.bf16.gmra.mxu1 %v7654_v7  ;;  %1393 = vst [vmem:[#allocation2 + $0xcc] sm:$0xf] %v10317_v42  ;;  %v702_v7 = vsel %vm10066_vm3, %v697_v55, %v701_v17  ;;  %v909_v17 = vshll.u32 %v10362_v2, 16  ;;  %v921_v55 = vrot.slane %v919_v25, 4  ;;  %v522_v60 = vsel %vm373_vm0, %v387_v1, %v474_v40 }
  0x79   : > { %606 = vst [vmem:[#allocation2 + $0x360] sm:$0xf] %v10295_v10  ;;  %v10404_v1 = vpack.c.bf16 %v522_v60, %v522_v60  ;;  %v719_v18 = vrot.slane %v717_v57, 5  ;;  %v287_v57 = vld [vmem:[%s9993_s13 + $0x50] sm:$0xff] }
  0x7a   : > { %v7685_v32 = vld [vmem:[#allocation2 + $0x120] sm:$0xf]  ;;  %607 = vst [vmem:[#allocation2 + $0x384] sm:$0xf] %v10298_v13 }
  0x7b   : > { %v9329_v38 = vld [vmem:[#allocation2 + $0x140] sm:$0xf0]  ;;  %1276 = vst [vmem:[#allocation2 + $0x324] sm:$0xf] %v10295_v10 }
  0x7c   : > { %v7686_v44 = vor.u32 %v9329_v38, %v7685_v32  ;;  %1277 = vst [vmem:[#allocation2 + $0x348] sm:$0xf] %v10298_v13  ;;  %v530_v32 = vsel %vm373_vm0, %v411_v35, %v482_v9  ;;  %v10383_v38 = vpack.c.bf16 %v388_v11, %v388_v11  ;;  %v917_v35 = vrot.slane %v915_v19, 5  ;;  %v303_v9 = vld [vmem:[%s9993_s13 + $0xd0] sm:$0xff] }
  0x7d   : > { %1408 = vst [vmem:[#allocation2 + $0x2e8] sm:$0xf] %v10295_v10  ;;  %v10391_v52 = vpack.c.bf16 %v530_v32, %v530_v32  ;;  %v338_v25 = vrot.slane %v303_v9, 1 }
  0x7e   : > { %2984 = vmatmul.bf16.gmra.mxu0 %v7686_v44  ;;  %1409 = vst [vmem:[#allocation2 + $0x30c] sm:$0xf] %v10298_v13  ;;  %v908_v44 = vrot.slane %v906_v22, 4  ;;  %v723_v56 = vshll.u32 %v10383_v38, 16  ;;  %v727_v47 = vshrl.u32 %v10383_v38, 16 }
  0x7f   : > { %1031 = vst [vmem:[#allocation2 + $0x364] sm:$0xf] %v894_v45 }
  0x80   : > { %v7973_v62 = vld [vmem:[#allocation2 + $0x360] sm:$0xf]  ;;  %1032 = vst [vmem:[#allocation2 + $0x388] sm:$0xf] %v904_v48  ;;  %v725_v11 = vrot.slane %v723_v56, 5  ;;  %v729_v22 = vrot.slane %v727_v47, 4 }
  0x81   : > { %v9401_v3 = vld [vmem:[#allocation2 + $0x380] sm:$0xf0]  ;;  %1334 = vst [vmem:[#allocation2 + $0x328] sm:$0xf] %v894_v45  ;;  %v10425_v47 = vld [vmem:[%s9993_s13 + $0x58] sm:$0xff] }
  0x82   : > { %v7974_v6 = vor.u32 %v9401_v3, %v7973_v62  ;;  %1335 = vst [vmem:[#allocation2 + $0x34c] sm:$0xf] %v904_v48 }
  0x83   : > { %1440 = vst [vmem:[#allocation2 + $0x2ec] sm:$0xf] %v894_v45  ;;  %v911_v45 = vrot.slane %v909_v17, 5  ;;  %v10408_v17 = vld [vmem:[%s9993_s13 + $0xd8] sm:$0xff] }
  0x84   : > { %3024 = vmatmul.bf16.gmra.mxu2 %v7974_v6  ;;  %1441 = vst [vmem:[#allocation2 + $0x310] sm:$0xf] %v904_v48  ;;  %v9467_v48 = vld [vmem:[%s12928_s1 + $0x110] sm:$0xff]  ;;  %v922_v6 = vor.u32 %v921_v55, %v917_v35 }
  0x85   : > { %1015 = vst [vmem:[#allocation2 + $0x124] sm:$0xf] %v702_v7  ;;  %3317 = vmatpush.bf16.msrb.mxu0 %v9467_v48  ;;  %v912_v62 = vor.u32 %v911_v45, %v908_v44  ;;  %v733_v44 = vshll.u32 %v10404_v1, 16  ;;  %v414_v45 = vrot.slane %v10408_v17, 7  ;;  %v730_v48 = vor.u32 %v729_v22, %v725_v11 }
  0x86   : > { %v9397_v27 = vld [vmem:[#allocation2 + $0x364] sm:$0xf]  ;;  %1016 = vst [vmem:[#allocation2 + $0x148] sm:$0xf] %v712_v12  ;;  %v923_v32 = vrot.slane %v922_v6, 4 }
  0x87   : > { %v7975_v34 = vld [vmem:[#allocation2 + $0x384] sm:$0xf0]  ;;  %1318 = vst [vmem:[#allocation2 + $0xe8] sm:$0xf] %v702_v7  ;;  %v913_v19 = vrot.slane %v912_v62, 4  ;;  %v735_v62 = vrot.slane %v733_v44, 5 }
  0x88   : > { %v7978_v41 = vor.u32 %v9397_v27, %v7975_v34  ;;  %1319 = vst [vmem:[#allocation2 + $0x10c] sm:$0xf] %v712_v12  ;;  %v413_v27 = vrot.slane %v303_v9, 7  ;;  %v731_v6 = vrot.slane %v730_v48, 4 }
  0x89   : > { %1424 = vst [vmem:[#allocation2 + $0xac] sm:$0xf] %v702_v7  ;;  %v925_v7 = vshll.u32 %v10391_v52, 16 }
  0x8a   : > { %3113 = vmatmul.bf16.gmra.mxu3 %v7978_v41  ;;  %1425 = vst [vmem:[#allocation2 + $0xd0] sm:$0xf] %v712_v12  ;;  %v716_v12 = vrot.slane %v714_v51, 4  ;;  %v918_v51 = vsel %vm10066_vm3, %v913_v19, %v917_v35  ;;  %v515_v60 = vsel %vm373_vm0, %v338_v25, %v413_v27  ;;  %v330_v35 = vrot.slane %v287_v57, 1 }
  0x8b   : > { %592 = vst [vmem:[#allocation2 + $0x168] sm:$0xf] %v10380_v30  ;;  %v927_v34 = vrot.slane %v925_v7, 5  ;;  %v389_v7 = vrot.slane %v287_v57, 7  ;;  %v10429_v9 = vpack.c.bf16 %v515_v60, %v515_v60 }
  0x8c   : > { %v9325_v54 = vld [vmem:[#allocation2 + $0x124] sm:$0xf]  ;;  %593 = vst [vmem:[#allocation2 + $0x18c] sm:$0xf] %v10383_v38  ;;  %v720_v41 = vor.u32 %v719_v18, %v716_v12  ;;  %v390_v12 = vrot.slane %v10425_v47, 7 }
  0x8d   : > { %v7687_v3 = vld [vmem:[#allocation2 + $0x144] sm:$0xf0]  ;;  %1262 = vst [vmem:[#allocation2 + $0x12c] sm:$0xf] %v10380_v30  ;;  %v928_v56 = vsel %vm10066_vm3, %v923_v32, %v927_v34  ;;  %v736_v34 = vsel %vm10066_vm3, %v731_v6, %v735_v62  ;;  %v933_v44 = vshll.u32 %v10429_v9, 16 }
  0x8e   : > { %v7690_v8 = vor.u32 %v9325_v54, %v7687_v3  ;;  %1263 = vst [vmem:[#allocation2 + $0x150] sm:$0xf] %v10383_v38  ;;  %v721_v54 = vrot.slane %v720_v41, 4  ;;  %v415_v3 = vsel %vm373_vm0, %v413_v27, %v414_v45  ;;  %v483_v27 = vrot.slane %v10408_v17, 5  ;;  %v9450_v32 = vld [vmem:[%s12928_s1 + $0x88] sm:$0xff] }
  0x8f   : > { %1394 = vst [vmem:[#allocation2 + $0xf0] sm:$0xf] %v10380_v30  ;;  %v10432_v22 = vpack.c.bf16 %v415_v3, %v415_v3  ;;  %v930_v41 = vshrl.u32 %v10429_v9, 16  ;;  %3140 = vmatpush.bf16.msrb.mxu2 %v9450_v32  ;;  %v475_v3 = vrot.slane %v10425_v47, 5  ;;  %v9458_v6 = vld [vmem:[%s12928_s1 + $0xc8] sm:$0xff] }
  0x90   : > { %3073 = vmatmul.bf16.gmra.mxu1 %v7690_v8  ;;  %1395 = vst [vmem:[#allocation2 + $0x114] sm:$0xf] %v10383_v38  ;;  %v726_v25 = vsel %vm10066_vm3, %v721_v54, %v725_v11  ;;  %v391_v11 = vsel %vm373_vm0, %v389_v7, %v390_v12  ;;  %3229 = vmatpush.bf16.msrb.mxu3 %v9458_v6 }
  0x91   : > { %608 = vst [vmem:[#allocation2 + $0x3a8] sm:$0xf] %v10362_v2  ;;  %v939_v17 = vshll.u32 %v10432_v22, 16  ;;  %v10451_v60 = vpack.c.bf16 %v391_v11, %v391_v11  ;;  %v932_v54 = vrot.slane %v930_v41, 4 }
  0x92   : > { %v7721_v40 = vld [vmem:[#allocation2 + $0x168] sm:$0xf]  ;;  %609 = vst [vmem:[#allocation2 + $0x3cc] sm:$0xf] %v10364_v4 }
  0x93   : > { %v9338_v46 = vld [vmem:[#allocation2 + $0x188] sm:$0xf0]  ;;  %1278 = vst [vmem:[#allocation2 + $0x36c] sm:$0xf] %v10362_v2  ;;  %v751_v32 = vshrl.u32 %v10451_v60, 16 }
  0x94   : > { %v7722_v55 = vor.u32 %v9338_v46, %v7721_v40  ;;  %1279 = vst [vmem:[#allocation2 + $0x390] sm:$0xf] %v10364_v4  ;;  %v507_v40 = vsel %vm373_vm0, %v330_v35, %v389_v7  ;;  %v943_v46 = vshrl.u32 %v10432_v22, 16  ;;  %v9466_v35 = vld [vmem:[%s12928_s1 + $0x108] sm:$0xff] }
  0x95   : > { %1410 = vst [vmem:[#allocation2 + $0x330] sm:$0xf] %v10362_v2  ;;  %3318 = vmatpush.bf16.msrb.mxu0 %v9466_v35 }
  0x96   : > { %2989 = vmatmul.bf16.gmra.mxu0 %v7722_v55  ;;  %1411 = vst [vmem:[#allocation2 + $0x354] sm:$0xf] %v10364_v4  ;;  %v10448_v55 = vpack.c.bf16 %v507_v40, %v507_v40 }
  0x97   : > { %1033 = vst [vmem:[#allocation2 + $0x3ac] sm:$0xf] %v918_v51 }
  0x98   : > { %12945 = vst [vmem:[#allocation7_spill] sm:$0xff] %v10429_v9  ;;  %v8009_v8 = vld [vmem:[#allocation2 + $0x3a8] sm:$0xf]  ;;  %v738_v47 = vshrl.u32 %v10448_v55, 16 }
  0x99   : > { %1034 = vst [vmem:[#allocation2 + $0x3d0] sm:$0xf] %v928_v56  ;;  %v9410_v18 = vld [vmem:[#allocation2 + $0x3c8] sm:$0xf0] }
  0x9a   : > { %1336 = vst [vmem:[#allocation2 + $0x370] sm:$0xf] %v918_v51  ;;  %v8010_v19 = vor.u32 %v9410_v18, %v8009_v8  ;;  %v941_v8 = vrot.slane %v939_v17, 5  ;;  %v945_v18 = vrot.slane %v943_v46, 4  ;;  %v740_v46 = vrot.slane %v738_v47, 4 }
  0x9b   : > { %1337 = vst [vmem:[#allocation2 + $0x394] sm:$0xf] %v928_v56 }
  0x9c   : > { %1442 = vst [vmem:[#allocation2 + $0x334] sm:$0xf] %v918_v51  ;;  %3029 = vmatmul.bf16.gmra.mxu2 %v8010_v19  ;;  %v531_v51 = vsel %vm373_vm0, %v414_v45, %v483_v27  ;;  %v9480_v45 = vld [vmem:[%s12928_s1 + $0x178] sm:$0xff]  ;;  %v741_v19 = vshll.u32 %v10448_v55, 16  ;;  %v747_v27 = vshll.u32 %v10451_v60, 16 }
  0x9d   : > { %1443 = vst [vmem:[#allocation2 + $0x358] sm:$0xf] %v928_v56  ;;  %v935_v56 = vrot.slane %v933_v44, 5  ;;  %v10463_v7 = vpack.c.bf16 %v531_v51, %v531_v51  ;;  %3401 = vmatpush.bf16.msrb.mxu1 %v9480_v45  ;;  %v946_v44 = vor.u32 %v945_v18, %v941_v8  ;;  %v305_v51 = vld [vmem:[%s9993_s13 + $0xe0] sm:$0xff] }
  0x9e   : > { %1017 = vst [vmem:[#allocation2 + $0x16c] sm:$0xf] %v726_v25  ;;  %v9406_v48 = vld [vmem:[#allocation2 + $0x3ac] sm:$0xf]  ;;  %v339_v35 = vrot.slane %v305_v51, 1  ;;  %v416_v47 = vrot.slane %v305_v51, 7 }
  0x9f   : > { %1018 = vst [vmem:[#allocation2 + $0x190] sm:$0xf] %v736_v34  ;;  %v936_v40 = vor.u32 %v935_v56, %v932_v54  ;;  %v949_v11 = vshll.u32 %v10463_v7, 16  ;;  %v753_v54 = vrot.slane %v751_v32, 4  ;;  %v306_v56 = vld [vmem:[%s9993_s13 + $0xe8] sm:$0xff] }
  0xa0   : > { %v8011_v57 = vld [vmem:[#allocation2 + $0x3cc] sm:$0xf0]  ;;  %1320 = vst [vmem:[#allocation2 + $0x130] sm:$0xf] %v726_v25 }
  0xa1   : > { %v8014_v62 = vor.u32 %v9406_v48, %v8011_v57  ;;  %1321 = vst [vmem:[#allocation2 + $0x154] sm:$0xf] %v736_v34  ;;  %v743_v48 = vrot.slane %v741_v19, 5  ;;  %v951_v6 = vrot.slane %v949_v11, 5  ;;  %v417_v19 = vrot.slane %v306_v56, 7 }
  0xa2   : > { %1426 = vst [vmem:[#allocation2 + $0xf4] sm:$0xf] %v726_v25 }
  0xa3   : > { %12946 = vst [vmem:[#allocation8_spill] sm:$0xff] %v10463_v7  ;;  %3118 = vmatmul.bf16.gmra.mxu3 %v8014_v62  ;;  %v749_v62 = vrot.slane %v747_v27, 5  ;;  %v744_v18 = vor.u32 %v743_v48, %v740_v46  ;;  %v516_v46 = vsel %vm373_vm0, %v339_v35, %v416_v47 }
  0xa4   : > { %1427 = vst [vmem:[#allocation2 + $0x118] sm:$0xf] %v736_v34  ;;  %v523_v34 = vsel %vm373_vm0, %v390_v12, %v475_v3  ;;  %v937_v12 = vrot.slane %v936_v40, 4  ;;  %v947_v3 = vrot.slane %v946_v44, 4 }
  0xa5   : > { %594 = vst [vmem:[#allocation2 + $0x1b0] sm:$0xf] %v10448_v55  ;;  %v9334_v25 = vld [vmem:[#allocation2 + $0x16c] sm:$0xf]  ;;  %v10477_v57 = vpack.c.bf16 %v523_v34, %v523_v34  ;;  %v754_v27 = vor.u32 %v753_v54, %v749_v62  ;;  %v745_v11 = vrot.slane %v744_v18, 4 }
  0xa6   : > { %595 = vst [vmem:[#allocation2 + $0x1d4] sm:$0xf] %v10451_v60  ;;  %v7723_v41 = vld [vmem:[#allocation2 + $0x18c] sm:$0xf0]  ;;  %v942_v34 = vsel %vm10066_vm3, %v937_v12, %v941_v8  ;;  %v952_v44 = vsel %vm10066_vm3, %v947_v3, %v951_v6  ;;  %v10496_v54 = vld [vmem:[%s9993_s13 + $0x68] sm:$0xff]  ;;  %v10498_v3 = vpack.c.bf16 %v516_v46, %v516_v46 }
  0xa7   : > { %1264 = vst [vmem:[#allocation2 + $0x174] sm:$0xf] %v10448_v55  ;;  %v7726_v17 = vor.u32 %v9334_v25, %v7723_v41  ;;  %v757_v32 = vshll.u32 %v10477_v57, 16  ;;  %v289_v41 = vld [vmem:[%s9993_s13 + $0x60] sm:$0xff]  ;;  %v755_v48 = vrot.slane %v754_v27, 4  ;;  %v750_v35 = vsel %vm10066_vm3, %v745_v11, %v749_v62 }
  0xa8   : > { %1265 = vst [vmem:[#allocation2 + $0x198] sm:$0xf] %v10451_v60  ;;  %v331_v8 = vrot.slane %v289_v41, 1  ;;  %v393_v27 = vrot.slane %v10496_v54, 7  ;;  %v9449_v62 = vld [vmem:[%s12928_s1 + $0x80] sm:$0xff] }
  0xa9   : > { %1396 = vst [vmem:[#allocation2 + $0x138] sm:$0xf] %v10448_v55  ;;  %3078 = vmatmul.bf16.gmra.mxu1 %v7726_v17  ;;  %v418_v17 = vsel %vm373_vm0, %v416_v47, %v417_v19  ;;  %v759_v51 = vrot.slane %v757_v32, 5  ;;  %3141 = vmatpush.bf16.msrb.mxu2 %v9449_v62 }
  0xaa   : > { %1397 = vst [vmem:[#allocation2 + $0x15c] sm:$0xf] %v10451_v60  ;;  %v10500_v6 = vpack.c.bf16 %v418_v17, %v418_v17 }
  0xab   : > { %610 = vst [vmem:[#allocation2 + $0x3f0] sm:$0xf] %v10429_v9  ;;  %v760_v47 = vsel %vm10066_vm3, %v755_v48, %v759_v51 }
  0xac   : > { %v7757_v45 = vld [vmem:[#allocation2 + $0x1b0] sm:$0xf]  ;;  %611 = vst [vmem:[#allocation2 + $0x414] sm:$0xf] %v10432_v22  ;;  %v967_v11 = vshrl.u32 %v10500_v6, 16 }
  0xad   : > { %v9347_v25 = vld [vmem:[#allocation2 + $0x1d0] sm:$0xf0]  ;;  %1280 = vst [vmem:[#allocation2 + $0x3b4] sm:$0xf] %v10429_v9 }
  0xae   : > { %v7758_v40 = vor.u32 %v9347_v25, %v7757_v45  ;;  %1281 = vst [vmem:[#allocation2 + $0x3d8] sm:$0xf] %v10432_v22  ;;  %v392_v45 = vrot.slane %v289_v41, 7  ;;  %v484_v25 = vrot.slane %v306_v56, 5  ;;  %v9479_v56 = vld [vmem:[%s12928_s1 + $0x170] sm:$0xff]  ;;  %v963_v41 = vshll.u32 %v10500_v6, 16 }
  0xaf   : > { %1412 = vst [vmem:[#allocation2 + $0x378] sm:$0xf] %v10429_v9  ;;  %3402 = vmatpush.bf16.msrb.mxu1 %v9479_v56 }
  0xb0   : > { %2994 = vmatmul.bf16.gmra.mxu0 %v7758_v40  ;;  %1413 = vst [vmem:[#allocation2 + $0x39c] sm:$0xf] %v10432_v22  ;;  %v508_v32 = vsel %vm373_vm0, %v331_v8, %v392_v45  ;;  %v954_v40 = vshrl.u32 %v10498_v3, 16 }
  0xb1   : > { %1035 = vst [vmem:[#allocation2 + $0x3f4] sm:$0xf] %v942_v34  ;;  %v10522_v51 = vpack.c.bf16 %v508_v32, %v508_v32  ;;  %v9478_v32 = vld [vmem:[%s12928_s1 + $0x168] sm:$0xff] }
  0xb2   : > { %v8045_v12 = vld [vmem:[#allocation2 + $0x3f0] sm:$0xf]  ;;  %1036 = vst [vmem:[#allocation2 + $0x418] sm:$0xf] %v952_v44  ;;  %v956_v8 = vrot.slane %v954_v40, 4 }
  0xb3   : > { %v9419_v7 = vld [vmem:[#allocation2 + $0x410] sm:$0xf0]  ;;  %1338 = vst [vmem:[#allocation2 + $0x3b8] sm:$0xf] %v942_v34  ;;  %3403 = vmatpush.bf16.msrb.mxu1 %v9478_v32 }
  0xb4   : > { %v8046_v18 = vor.u32 %v9419_v7, %v8045_v12  ;;  %1339 = vst [vmem:[#allocation2 + $0x3dc] sm:$0xf] %v952_v44  ;;  %v532_v7 = vsel %vm373_vm0, %v417_v19, %v484_v25  ;;  %v394_v19 = vsel %vm373_vm0, %v392_v45, %v393_v27  ;;  %v965_v25 = vrot.slane %v963_v41, 5 }
  0xb5   : > { %1444 = vst [vmem:[#allocation2 + $0x37c] sm:$0xf] %v942_v34  ;;  %v957_v34 = vshll.u32 %v10498_v3, 16  ;;  %v10520_v46 = vpack.c.bf16 %v532_v7, %v532_v7  ;;  %v10524_v56 = vpack.c.bf16 %v394_v19, %v394_v19  ;;  %v476_v45 = vrot.slane %v10496_v54, 5 }
  0xb6   : > { %3034 = vmatmul.bf16.gmra.mxu2 %v8046_v18  ;;  %1445 = vst [vmem:[#allocation2 + $0x3a0] sm:$0xf] %v952_v44  ;;  %v969_v18 = vrot.slane %v967_v11, 4  ;;  %v762_v54 = vshrl.u32 %v10522_v51, 16 }
  0xb7   : > { %1019 = vst [vmem:[#allocation2 + $0x1b4] sm:$0xf] %v750_v35  ;;  %v959_v12 = vrot.slane %v957_v34, 5  ;;  %v973_v62 = vshll.u32 %v10520_v46, 16 }
  0xb8   : > { %v9415_v17 = vld [vmem:[#allocation2 + $0x3f4] sm:$0xf]  ;;  %1020 = vst [vmem:[#allocation2 + $0x1d8] sm:$0xf] %v760_v47  ;;  %v970_v11 = vor.u32 %v969_v18, %v965_v25  ;;  %v775_v18 = vshrl.u32 %v10524_v56, 16 }
  0xb9   : > { %v8047_v44 = vld [vmem:[#allocation2 + $0x414] sm:$0xf0]  ;;  %1322 = vst [vmem:[#allocation2 + $0x178] sm:$0xf] %v750_v35  ;;  %v960_v41 = vor.u32 %v959_v12, %v956_v8  ;;  %v9477_v8 = vld [vmem:[%s12928_s1 + $0x160] sm:$0xff]  ;;  %v771_v12 = vshll.u32 %v10524_v56, 16 }
  0xba   : > { %12947 = vst [vmem:[#allocation9_spill] sm:$0xff] %v10520_v46  ;;  %v8050_v48 = vor.u32 %v9415_v17, %v8047_v44  ;;  %v9465_v17 = vld [vmem:[%s12928_s1 + $0x100] sm:$0xff]  ;;  %v971_v32 = vrot.slane %v970_v11, 4  ;;  %3404 = vmatpush.bf16.msrb.mxu1 %v9477_v8 }
  0xbb   : > { %1323 = vst [vmem:[#allocation2 + $0x19c] sm:$0xf] %v760_v47  ;;  %v3054_v40 = vpop.f32.mrf.mxu1  ;;  %3319 = vmatpush.bf16.msrb.mxu0 %v9465_v17  ;;  %v9476_v17 = vld [vmem:[%s12928_s1 + $0x158] sm:$0xff]  ;;  %v3094_v11 = vpop.f32.mrf.mxu3 }
  0xbc   : > { %1428 = vst [vmem:[#allocation2 + $0x13c] sm:$0xf] %v750_v35  ;;  %3123 = vmatmul.bf16.gmra.mxu3 %v8050_v48  ;;  %v9457_v35 = vld [vmem:[%s12928_s1 + $0xc0] sm:$0xff]  ;;  %v765_v48 = vshll.u32 %v10522_v51, 16 }
  0xbd   : > { %1429 = vst [vmem:[#allocation2 + $0x160] sm:$0xf] %v760_v47  ;;  %v2965_v47 = vpop.f32.mrf.mxu0  ;;  %3230 = vmatpush.bf16.msrb.mxu3 %v9457_v35  ;;  %v961_v35 = vrot.slane %v960_v41, 4 }
  0xbe   : > { %596 = vst [vmem:[#allocation2 + $0x1f8] sm:$0xf] %v10522_v51  ;;  %v9343_v7 = vld [vmem:[#allocation2 + $0x1b4] sm:$0xf]  ;;  %v10541_v44 = vadd.f32 %v3054_v40, %v2965_v47  ;;  %v975_v47 = vrot.slane %v973_v62, 5  ;;  %v764_v40 = vrot.slane %v762_v54, 4  ;;  %v3005_v62 = vpop.f32.mrf.mxu2  ;;  %3405 = vmatpush.bf16.msrb.mxu1 %v9476_v17 }
  0xbf   : > { %597 = vst [vmem:[#allocation2 + $0x21c] sm:$0xf] %v10524_v56  ;;  %v7759_v34 = vld [vmem:[#allocation2 + $0x1d4] sm:$0xf0]  ;;  %v767_v46 = vrot.slane %v765_v48, 5  ;;  %v10569_v8 = vadd.f32 %v3094_v11, %v3005_v62 }
  0xc0   : > { %1266 = vst [vmem:[#allocation2 + $0x1bc] sm:$0xf] %v10522_v51  ;;  %v7762_v19 = vor.u32 %v9343_v7, %v7759_v34  ;;  %v524_v7 = vsel %vm373_vm0, %v393_v27, %v476_v45  ;;  %v773_v27 = vrot.slane %v771_v12, 5  ;;  %v777_v45 = vrot.slane %v775_v18, 4  ;;  %v9488_v54 = vld [vmem:[%s12928_s1 + $0x1b8] sm:$0xff] }
  0xc1   : > { %1267 = vst [vmem:[#allocation2 + $0x1e0] sm:$0xf] %v10524_v56  ;;  %v10559_v9 = vpack.c.bf16 %v524_v7, %v524_v7  ;;  %v9496_v48 = vld [vmem:[%s12928_s1 + $0x1f8] sm:$0xff]  ;;  %v966_v12 = vsel %vm10066_vm3, %v961_v35, %v965_v25  ;;  %v768_v18 = vor.u32 %v767_v46, %v764_v40  ;;  %3490 = vmatpush.bf16.msra.mxu2 %v9488_v54 }
  0xc2   : > { %1398 = vst [vmem:[#allocation2 + $0x180] sm:$0xf] %v10522_v51  ;;  %3083 = vmatmul.bf16.gmra.mxu1 %v7762_v19  ;;  %v778_v62 = vor.u32 %v777_v45, %v773_v27  ;;  %3579 = vmatpush.bf16.msra.mxu3 %v9496_v48 }
  0xc3   : > { %1399 = vst [vmem:[#allocation2 + $0x1a4] sm:$0xf] %v10524_v56  ;;  %v781_v11 = vshll.u32 %v10559_v9, 16  ;;  %v10587_v35 = vpop.f32.mrf.mxu1  ;;  %v769_v17 = vrot.slane %v768_v18, 4  ;;  %v10594_v48 = vpop.f32.mrf.mxu3 }
  0xc4   : > { %612 = vst [vmem:[#allocation2 + $0x438] sm:$0xf] %v10498_v3 }
  0xc5   : > { %v7793_v34 = vld [vmem:[#allocation2 + $0x1f8] sm:$0xf]  ;;  %613 = vst [vmem:[#allocation2 + $0x45c] sm:$0xf] %v10500_v6  ;;  %v10571_v7 = vpop.f32.mrf.mxu0  ;;  %v783_v45 = vrot.slane %v781_v11, 5  ;;  %v774_v18 = vsel %vm10066_vm3, %v769_v17, %v773_v27 }
  0xc6   : > { %v9356_v19 = vld [vmem:[#allocation2 + $0x218] sm:$0xf0]  ;;  %1282 = vst [vmem:[#allocation2 + $0x3fc] sm:$0xf] %v10498_v3  ;;  %v10592_v54 = vpop.f32.mrf.mxu2  ;;  %v7557_v11 = vld [vmem:[#allocation2 + $0x10] sm:$0xf] }
  0xc7   : > { %v7794_v41 = vor.u32 %v9356_v19, %v7793_v34  ;;  %1283 = vst [vmem:[#allocation2 + $0x420] sm:$0xf] %v10500_v6  ;;  %v9475_v34 = vld [vmem:[%s12928_s1 + $0x150] sm:$0xff]  ;;  %v9504_v19 = vld [vmem:[%s12928_s1 + $0x238] sm:$0xff] }
  0xc8   : > { %1414 = vst [vmem:[#allocation2 + $0x3c0] sm:$0xf] %v10498_v3  ;;  %3668 = vmatpush.bf16.msra.mxu0 %v9504_v19  ;;  %3406 = vmatpush.bf16.msrb.mxu1 %v9475_v34  ;;  %v1089_v19 = vrot.slane %v10009_v21, 5  ;;  %v9473_v34 = vld [vmem:[%s12928_s1 + $0x140] sm:$0xff]  ;;  %v7523_v21 = vrot.slane %v10007_v20, 9 }
  0xc9   : > { %12948 = vst [vmem:[#allocation10_spill] sm:$0xff] %v10569_v8  ;;  %2999 = vmatmul.bf16.gmra.mxu0 %v7794_v41  ;;  %v976_v41 = vsel %vm10066_vm3, %v971_v32, %v975_v47  ;;  %v9474_v32 = vld [vmem:[%s12928_s1 + $0x148] sm:$0xff]  ;;  %v779_v47 = vrot.slane %v778_v62, 4 }
  0xca   : > { %1415 = vst [vmem:[#allocation2 + $0x3e4] sm:$0xf] %v10500_v6  ;;  %v1091_v17 = vrot.slane %v1089_v19, 4  ;;  %v1090_v20 = vsel %vm10605_vm6, %v7523_v21, %v1089_v19  ;;  %v7524_v19 = vrot.slane %v10127_v43, 9  ;;  %v9290_v43 = vld [vmem:[#allocation2 + $0xc] sm:$0xf] }
  0xcb   : > { %1418 = vst [vmem:[#allocation2 + $0x450] sm:$0xf] %v10498_v3  ;;  %v8081_v46 = vld [vmem:[#allocation2 + $0x438] sm:$0xf]  ;;  %v784_v62 = vsel %vm10066_vm3, %v779_v47, %v783_v45  ;;  %v7551_v21 = vld [vmem:[#allocation2 + $0x2c] sm:$0xf0] }
  0xcc   : > { %1419 = vst [vmem:[#allocation2 + $0x474] sm:$0xf] %v10500_v6  ;;  %v9428_v25 = vld [vmem:[#allocation2 + $0x458] sm:$0xf0]  ;;  %3407 = vmatpush.bf16.msrb.mxu1 %v9474_v32  ;;  %v1092_v32 = vrot.slane %v10052_v50, 5  ;;  %v1096_v50 = vrot.slane %v10137_v49, 5 }
  0xcd   : > { %1037 = vst [vmem:[#allocation2 + $0x43c] sm:$0xf] %v966_v12  ;;  %v8082_v40 = vor.u32 %v9428_v25, %v8081_v46  ;;  %v2970_v46 = vpop.f32.mrf.mxu0  ;;  %v9295_v25 = vld [vmem:[#allocation2 + $0x30] sm:$0xf0] }
  0xce   : > { %1038 = vst [vmem:[#allocation2 + $0x460] sm:$0xf] %v976_v41  ;;  %v3010_v45 = vpop.f32.mrf.mxu2  ;;  %v1093_v59 = vsel %vm10605_vm6, %v1091_v17, %v1092_v32  ;;  %v7593_v32 = vld [vmem:[#allocation2 + $0x58] sm:$0xf] }
  0xcf   : > { %1340 = vst [vmem:[#allocation2 + $0x400] sm:$0xf] %v966_v12  ;;  %3039 = vmatmul.bf16.gmra.mxu2 %v8082_v40 }
  0xd0   : > { %1341 = vst [vmem:[#allocation2 + $0x424] sm:$0xf] %v976_v41  ;;  %3408 = vmatpush.bf16.msrb.mxu1 %v9473_v34 }
  0xd1   : > { %12949 = vst [vmem:[#allocation11_spill] sm:$0xff] %v10592_v54 }
  0xd2   : > { %12950 = vst [vmem:[#allocation12_spill] sm:$0xff] %v10594_v48 }
  0xd3   : > { %1446 = vst [vmem:[#allocation2 + $0x3c4] sm:$0xf] %v966_v12  ;;  %v3059_v47 = vpop.f32.mrf.mxu1  ;;  %v3099_v8 = vpop.f32.mrf.mxu3 }
  0xd4   : > { %1447 = vst [vmem:[#allocation2 + $0x3e8] sm:$0xf] %v976_v41  ;;  %v9424_v40 = vld [vmem:[#allocation2 + $0x43c] sm:$0xf] }
  0xd5   : > { %1450 = vst [vmem:[#allocation2 + $0x454] sm:$0xf] %v966_v12  ;;  %v8083_v48 = vld [vmem:[#allocation2 + $0x45c] sm:$0xf0]  ;;  %v7558_v12 = vor.u32 %v9295_v25, %v7557_v11  ;;  %v10619_v34 = vpop.f32.mrf.mxu0  ;;  %v1098_v11 = vrot.slane %v1096_v50, 4 }
  0xd6   : > { %1451 = vst [vmem:[#allocation2 + $0x478] sm:$0xf] %v976_v41  ;;  %v8086_v54 = vor.u32 %v9424_v40, %v8083_v48  ;;  %v10612_v41 = vadd.f32 %v3059_v47, %v2970_v46  ;;  %v10617_v48 = vadd.f32 %v3099_v8, %v3010_v45  ;;  %v1097_v8 = vsel %vm10605_vm6, %v7524_v19, %v1096_v50  ;;  %v9304_v45 = vld [vmem:[#allocation2 + $0x78] sm:$0xf0] }
  0xd7   : > { %1021 = vst [vmem:[#allocation2 + $0x1fc] sm:$0xf] %v774_v18  ;;  %v7594_v50 = vor.u32 %v9304_v45, %v7593_v32 }
  0xd8   : > { %1022 = vst [vmem:[#allocation2 + $0x220] sm:$0xf] %v784_v62  ;;  %3128 = vmatmul.bf16.gmra.mxu3 %v8086_v54 }
  0xd9   : > { %1324 = vst [vmem:[#allocation2 + $0x1c0] sm:$0xf] %v774_v18  ;;  %3320 = vmatmul.bf16.vlgmr.msrb.gmra.mxu0 %v7558_v12 }
  0xda   : > { %1325 = vst [vmem:[#allocation2 + $0x1e4] sm:$0xf] %v784_v62 }
  0xdb   : > { %1430 = vst [vmem:[#allocation2 + $0x184] sm:$0xf] %v774_v18  ;;  %v1099_v18 = vrot.slane %v10165_v14, 5  ;;  %v10623_v49 = vpop.f32.mrf.mxu1  ;;  %v10629_v40 = vpop.f32.mrf.mxu3 }
  0xdc   : > { %1431 = vst [vmem:[#allocation2 + $0x1a8] sm:$0xf] %v784_v62  ;;  %v10627_v62 = vpop.f32.mrf.mxu2 }
  0xdd   : > { %1222 = vst [vmem:[#allocation2 + $0x8] sm:$0xf] %v1090_v20  ;;  %v1100_v14 = vsel %vm10605_vm6, %v1098_v11, %v1099_v18  ;;  %v2975_v12 = vpop.f32.mrf.mxu0 }
  0xde   : > { %v9352_v54 = vld [vmem:[#allocation2 + $0x1fc] sm:$0xf]  ;;  %1223 = vst [vmem:[#allocation2 + $0x2c] sm:$0xf] %v1093_v59 }
  0xdf   : > { %v7795_v46 = vld [vmem:[#allocation2 + $0x21c] sm:$0xf0]  ;;  %1226 = vst [vmem:[#allocation2 + $0x98] sm:$0xf] %v1090_v20 }
  0xe0   : > { %v7798_v25 = vor.u32 %v9352_v54, %v7795_v46  ;;  %1227 = vst [vmem:[#allocation2 + $0xbc] sm:$0xf] %v1093_v59  ;;  %v7554_v46 = vor.u32 %v9290_v43, %v7551_v21  ;;  %v9495_v43 = vld [vmem:[%s12928_s1 + $0x1f0] sm:$0xff] }
  0xe1   : > { %1358 = vst [vmem:[#allocation2 + $0x5c] sm:$0xf] %v1090_v20  ;;  %v9503_v21 = vld [vmem:[%s12928_s1 + $0x230] sm:$0xff]  ;;  %3580 = vmatpush.bf16.msra.mxu3 %v9495_v43  ;;  %v7629_v43 = vld [vmem:[#allocation2 + $0xa0] sm:$0xf] }
  0xe2   : > { %3088 = vmatmul.bf16.gmra.mxu1 %v7798_v25  ;;  %1359 = vst [vmem:[#allocation2 + $0x80] sm:$0xf] %v1093_v59  ;;  %v7525_v25 = vrot.slane %v10245_v58, 9  ;;  %3669 = vmatpush.bf16.msra.mxu0 %v9503_v21  ;;  %v9313_v21 = vld [vmem:[#allocation2 + $0xc0] sm:$0xf0] }
  0xe3   : > { %12953 = vst [vmem:[#allocation13_spill] sm:$0xff] %v10629_v40  ;;  %v3104_v18 = vpop.f32.mrf.mxu3  ;;  %v1113_v40 = vrot.slane %v10340_v15, 5 }
  0xe4   : > { %1452 = vst [vmem:[#allocation2 + $0x20] sm:$0xf] %v1090_v20  ;;  %v7549_v17 = vld [vmem:[#allocation2 + $0x8] sm:$0xf]  ;;  %v3064_v20 = vpop.f32.mrf.mxu1  ;;  %v3015_v11 = vpop.f32.mrf.mxu2 }
  0xe5   : > { %1453 = vst [vmem:[#allocation2 + $0x44] sm:$0xf] %v1093_v59  ;;  %v9294_v47 = vld [vmem:[#allocation2 + $0x28] sm:$0xf0]  ;;  %v10633_v19 = vadd.f32 %v3064_v20, %v2975_v12  ;;  %v9487_v59 = vld [vmem:[%s12928_s1 + $0x1b0] sm:$0xff] }
  0xe6   : > { %1356 = vst [vmem:[#allocation2 + $0x14] sm:$0xf] %v1097_v8  ;;  %v7550_v54 = vor.u32 %v9294_v47, %v7549_v17  ;;  %v1106_v17 = vrot.slane %v10270_v31, 5  ;;  %3491 = vmatpush.bf16.msra.mxu2 %v9487_v59 }
  0xe7   : > { %1357 = vst [vmem:[#allocation2 + $0x38] sm:$0xf] %v1100_v14 }
  0xe8   : > { %1224 = vst [vmem:[#allocation2 + $0x50] sm:$0xf] %v1097_v8  ;;  %3142 = vmatmul.bf16.vlgmr.msrb.gmra.mxu2 %v7550_v54  ;;  %3231 = vmatmul.bf16.vlgmr.msrb.gmra.mxu3 %v7554_v46  ;;  %v10642_v8 = vadd.f32 %v3104_v18, %v3015_v11  ;;  %v10651_v54 = vpop.f32.mrf.mxu0  ;;  %v9299_v11 = vld [vmem:[#allocation2 + $0x54] sm:$0xf]  ;;  %v7587_v18 = vld [vmem:[#allocation2 + $0x74] sm:$0xf0] }
  0xe9   : > { %1225 = vst [vmem:[#allocation2 + $0x74] sm:$0xf] %v1100_v14  ;;  %v1103_v14 = vrot.slane %v10248_v61, 5  ;;  %3325 = vmatmul.bf16.gmra.mxu0 %v7594_v50 }
  0xea   : > { %12954 = vst [vmem:[#allocation14_spill] sm:$0xff] %v10642_v8  ;;  %v7595_v8 = vld [vmem:[#allocation2 + $0x7c] sm:$0xf0] }
  0xeb   : > { %v1104_v58 = vsel %vm10605_vm6, %v7525_v25, %v1103_v14  ;;  %v1105_v47 = vrot.slane %v1103_v14, 4  ;;  %v10659_v59 = vpop.f32.mrf.mxu3  ;;  %v7590_v14 = vor.u32 %v9299_v11, %v7587_v18 }
  0xec   : > { %1360 = vst [vmem:[#allocation2 + $0xa4] sm:$0xf] %v1104_v58  ;;  %v10655_v50 = vpop.f32.mrf.mxu1  ;;  %v10657_v20 = vpop.f32.mrf.mxu2 }
  0xed   : > { %v9291_v32 = vld [vmem:[#allocation2 + $0x14] sm:$0xf]  ;;  %v1107_v46 = vsel %vm10605_vm6, %v1105_v47, %v1106_v17  ;;  %1228 = vst [vmem:[#allocation2 + $0xe0] sm:$0xf] %v1104_v58  ;;  %v7630_v17 = vor.u32 %v9313_v21, %v7629_v43  ;;  %v7526_v47 = vrot.slane %v10314_v39, 9 }
  0xee   : > { %v7559_v12 = vld [vmem:[#allocation2 + $0x34] sm:$0xf0]  ;;  %1361 = vst [vmem:[#allocation2 + $0xc8] sm:$0xf] %v1107_v46  ;;  %v7623_v43 = vld [vmem:[#allocation2 + $0xbc] sm:$0xf0] }
  0xef   : > { %v7562_v45 = vor.u32 %v9291_v32, %v7559_v12  ;;  %v7585_v61 = vld [vmem:[#allocation2 + $0x50] sm:$0xf]  ;;  %1229 = vst [vmem:[#allocation2 + $0x104] sm:$0xf] %v1107_v46 }
  0xf0   : > { %v9303_v31 = vld [vmem:[#allocation2 + $0x70] sm:$0xf0]  ;;  %12955 = vst [vmem:[#allocation15_spill] sm:$0xff] %v10657_v20  ;;  %v2980_v32 = vpop.f32.mrf.mxu0  ;;  %v9300_v20 = vld [vmem:[#allocation2 + $0x5c] sm:$0xf] }
  0xf1   : > { %12956 = vst [vmem:[#allocation16_spill] sm:$0xff] %v10659_v59  ;;  %v7586_v25 = vor.u32 %v9303_v31, %v7585_v61  ;;  %v7598_v18 = vor.u32 %v9300_v20, %v7595_v8 }
  0xf2   : > { %3409 = vmatmul.bf16.vlgmr.msrb.gmra.mxu1 %v7562_v45  ;;  %1454 = vst [vmem:[#allocation2 + $0x68] sm:$0xf] %v1104_v58  ;;  %v1110_v45 = vrot.slane %v10317_v42, 5  ;;  %v7621_v42 = vld [vmem:[#allocation2 + $0x98] sm:$0xf] }
  0xf3   : > { %1455 = vst [vmem:[#allocation2 + $0x8c] sm:$0xf] %v1107_v46 }
  0xf4   : > { %v3020_v12 = vpop.f32.mrf.mxu2  ;;  %v1111_v31 = vsel %vm10605_vm6, %v7526_v47, %v1110_v45  ;;  %v1112_v11 = vrot.slane %v1110_v45, 4  ;;  %v9309_v47 = vld [vmem:[#allocation2 + $0xa4] sm:$0xf]  ;;  %v9486_v45 = vld [vmem:[%s12928_s1 + $0x1a8] sm:$0xff] }
  0xf5   : > { %v3069_v59 = vpop.f32.mrf.mxu1  ;;  %v3109_v58 = vpop.f32.mrf.mxu3  ;;  %1362 = vst [vmem:[#allocation2 + $0xec] sm:$0xf] %v1111_v31  ;;  %3492 = vmatpush.bf16.msra.mxu2 %v9486_v45 }
  0xf6   : > { %v10664_v46 = vadd.f32 %v3069_v59, %v2980_v32  ;;  %v10666_v61 = vadd.f32 %v3109_v58, %v3020_v12  ;;  %v1114_v39 = vsel %vm10605_vm6, %v1112_v11, %v1113_v40  ;;  %1230 = vst [vmem:[#allocation2 + $0x128] sm:$0xf] %v1111_v31  ;;  %v9308_v59 = vld [vmem:[#allocation2 + $0x9c] sm:$0xf]  ;;  %v7527_v58 = vrot.slane %v10380_v30, 9  ;;  %v9494_v11 = vld [vmem:[%s12928_s1 + $0x1e8] sm:$0xff] }
  0xf7   : > { %1363 = vst [vmem:[#allocation2 + $0x110] sm:$0xf] %v1114_v39  ;;  %v7626_v32 = vor.u32 %v9308_v59, %v7623_v43  ;;  %3581 = vmatpush.bf16.msra.mxu3 %v9494_v11 }
  0xf8   : > { %3147 = vmatmul.bf16.gmra.mxu2 %v7586_v25  ;;  %3236 = vmatmul.bf16.gmra.mxu3 %v7590_v14  ;;  %1231 = vst [vmem:[#allocation2 + $0x14c] sm:$0xf] %v1114_v39  ;;  %v9312_v25 = vld [vmem:[#allocation2 + $0xb8] sm:$0xf0]  ;;  %v10672_v15 = vpop.f32.mrf.mxu0  ;;  %v7665_v14 = vld [vmem:[#allocation2 + $0xe8] sm:$0xf] }
  0xf9   : > { %3330 = vmatmul.bf16.gmra.mxu0 %v7630_v17  ;;  %1456 = vst [vmem:[#allocation2 + $0xb0] sm:$0xf] %v1111_v31  ;;  %v7622_v21 = vor.u32 %v9312_v25, %v7621_v42  ;;  %v9322_v17 = vld [vmem:[#allocation2 + $0x108] sm:$0xf0]  ;;  %v7631_v31 = vld [vmem:[#allocation2 + $0xc4] sm:$0xf0] }
  0xfa   : > { %1457 = vst [vmem:[#allocation2 + $0xd4] sm:$0xf] %v1114_v39  ;;  %v7666_v40 = vor.u32 %v9322_v17, %v7665_v14  ;;  %v1117_v39 = vrot.slane %v10383_v38, 5  ;;  %v1120_v42 = vrot.slane %v10404_v1, 5  ;;  %v7634_v43 = vor.u32 %v9309_v47, %v7631_v31  ;;  %v7657_v14 = vld [vmem:[#allocation2 + $0xe0] sm:$0xf] }
  0xfb   : > { %v9321_v38 = vld [vmem:[#allocation2 + $0x100] sm:$0xf0]  ;;  %v7701_v31 = vld [vmem:[#allocation2 + $0x130] sm:$0xf] }
  0xfc   : > { %v10674_v8 = vpop.f32.mrf.mxu2  ;;  %v1118_v30 = vsel %vm10605_vm6, %v7527_v58, %v1117_v39  ;;  %v1119_v59 = vrot.slane %v1117_v39, 4  ;;  %v9317_v1 = vld [vmem:[#allocation2 + $0xe4] sm:$0xf]  ;;  %v7658_v58 = vor.u32 %v9321_v38, %v7657_v14 }
  0xfd   : > { %12957 = vst [vmem:[#allocation17_spill] sm:$0xff] %v10674_v8  ;;  %v10676_v20 = vpop.f32.mrf.mxu1  ;;  %v10678_v12 = vpop.f32.mrf.mxu3 }
  0xfe   : > { %12958 = vst [vmem:[#allocation18_spill] sm:$0xff] %v10678_v12  ;;  %v9318_v12 = vld [vmem:[#allocation2 + $0xec] sm:$0xf]  ;;  %v7667_v8 = vld [vmem:[#allocation2 + $0x10c] sm:$0xf0] }
  0xff   : > { %1364 = vst [vmem:[#allocation2 + $0x134] sm:$0xf] %v1118_v30  ;;  %v7670_v38 = vor.u32 %v9318_v12, %v7667_v8  ;;  %v7695_v8 = vld [vmem:[#allocation2 + $0x14c] sm:$0xf0] }
 0x100   : > { %v2985_v25 = vpop.f32.mrf.mxu0  ;;  %1232 = vst [vmem:[#allocation2 + $0x170] sm:$0xf] %v1118_v30 }
 0x101   : > { %1458 = vst [vmem:[#allocation2 + $0xf8] sm:$0xf] %v1118_v30  ;;  %v7528_v30 = vrot.slane %v10448_v55, 9 }
 0x102   : > { %3414 = vmatmul.bf16.gmra.mxu1 %v7598_v18  ;;  %v9502_v18 = vld [vmem:[%s12928_s1 + $0x228] sm:$0xff] }
 0x103   : > { %3670 = vmatpush.bf16.msra.mxu0 %v9502_v18  ;;  %v9331_v18 = vld [vmem:[#allocation2 + $0x150] sm:$0xf0] }
 0x107   : > { %v3025_v17 = vpop.f32.mrf.mxu2 }
 0x108   : > { %3152 = vmatmul.bf16.gmra.mxu2 %v7622_v21  ;;  %3241 = vmatmul.bf16.gmra.mxu3 %v7626_v32  ;;  %v1121_v21 = vsel %vm10605_vm6, %v1119_v59, %v1120_v42  ;;  %v7659_v32 = vld [vmem:[#allocation2 + $0x104] sm:$0xf0]  ;;  %v10700_v42 = vpop.f32.mrf.mxu0  ;;  %v7702_v59 = vor.u32 %v9331_v18, %v7701_v31  ;;  %v9340_v31 = vld [vmem:[#allocation2 + $0x198] sm:$0xf0] }
 0x109   : > { %3335 = vmatmul.bf16.gmra.mxu0 %v7666_v40  ;;  %1365 = vst [vmem:[#allocation2 + $0x158] sm:$0xf] %v1121_v21  ;;  %v7662_v39 = vor.u32 %v9317_v1, %v7659_v32  ;;  %v9330_v32 = vld [vmem:[#allocation2 + $0x148] sm:$0xf0] }
 0x10a   : > { %1233 = vst [vmem:[#allocation2 + $0x194] sm:$0xf] %v1121_v21 }
 0x10b   : > { %1459 = vst [vmem:[#allocation2 + $0x11c] sm:$0xf] %v1121_v21  ;;  %v1127_v21 = vrot.slane %v10477_v57, 5 }
 0x10d   : > { %v3074_v40 = vpop.f32.mrf.mxu1  ;;  %v3114_v45 = vpop.f32.mrf.mxu3 }
 0x10e   : > { %v10696_v11 = vadd.f32 %v3074_v40, %v2985_v25  ;;  %v10698_v47 = vadd.f32 %v3114_v45, %v3025_v17  ;;  %v9326_v45 = vld [vmem:[#allocation2 + $0x12c] sm:$0xf] }
 0x10f   : > { %v10709_v1 = vpop.f32.mrf.mxu2  ;;  %v7698_v18 = vor.u32 %v9326_v45, %v7695_v8  ;;  %v9501_v45 = vld [vmem:[%s12928_s1 + $0x220] sm:$0xff]  ;;  %v7529_v8 = vrot.slane %v10522_v51, 9  ;;  %v9335_v51 = vld [vmem:[#allocation2 + $0x174] sm:$0xf] }
 0x110   : > { %12959 = vst [vmem:[#allocation19_spill] sm:$0xff] %v10709_v1  ;;  %3671 = vmatpush.bf16.msra.mxu0 %v9501_v45 }
 0x112   : > { %3419 = vmatmul.bf16.gmra.mxu1 %v7634_v43  ;;  %v1124_v43 = vrot.slane %v10451_v60, 5  ;;  %v7693_v60 = vld [vmem:[#allocation2 + $0x128] sm:$0xf] }
 0x113   : > { %v2990_v55 = vpop.f32.mrf.mxu0  ;;  %v7694_v12 = vor.u32 %v9330_v32, %v7693_v60 }
 0x114   : > { %v1125_v25 = vsel %vm10605_vm6, %v7528_v30, %v1124_v43  ;;  %v1126_v14 = vrot.slane %v1124_v43, 4  ;;  %v9485_v43 = vld [vmem:[%s12928_s1 + $0x1a0] sm:$0xff] }
 0x115   : > { %1366 = vst [vmem:[#allocation2 + $0x17c] sm:$0xf] %v1125_v25  ;;  %v10711_v40 = vpop.f32.mrf.mxu1  ;;  %v10713_v57 = vpop.f32.mrf.mxu3  ;;  %3493 = vmatpush.bf16.msra.mxu2 %v9485_v43  ;;  %v9339_v43 = vld [vmem:[#allocation2 + $0x190] sm:$0xf0] }
 0x116   : > { %v1128_v17 = vsel %vm10605_vm6, %v1126_v14, %v1127_v21  ;;  %1234 = vst [vmem:[#allocation2 + $0x1b8] sm:$0xf] %v1125_v25  ;;  %v9327_v21 = vld [vmem:[#allocation2 + $0x134] sm:$0xf] }
 0x117   : > { %1367 = vst [vmem:[#allocation2 + $0x1a0] sm:$0xf] %v1128_v17 }
 0x118   : > { %3157 = vmatmul.bf16.gmra.mxu2 %v7658_v58  ;;  %3246 = vmatmul.bf16.gmra.mxu3 %v7662_v39  ;;  %1235 = vst [vmem:[#allocation2 + $0x1dc] sm:$0xf] %v1128_v17  ;;  %v7737_v58 = vld [vmem:[#allocation2 + $0x178] sm:$0xf] }
 0x119   : > { %3340 = vmatmul.bf16.gmra.mxu0 %v7702_v59  ;;  %12960 = vst [vmem:[#allocation20_spill] sm:$0xff] %v10713_v57  ;;  %v7738_v39 = vor.u32 %v9340_v31, %v7737_v58  ;;  %v1134_v58 = vrot.slane %v10559_v9, 5 }
 0x11a   : > { %1460 = vst [vmem:[#allocation2 + $0x140] sm:$0xf] %v1125_v25  ;;  %v7703_v25 = vld [vmem:[#allocation2 + $0x154] sm:$0xf0] }
 0x11b   : > { %1461 = vst [vmem:[#allocation2 + $0x164] sm:$0xf] %v1128_v17  ;;  %v10715_v30 = vpop.f32.mrf.mxu0  ;;  %v9493_v17 = vld [vmem:[%s12928_s1 + $0x1e0] sm:$0xff]  ;;  %v7706_v31 = vor.u32 %v9327_v21, %v7703_v25 }
 0x11c   : > { %3582 = vmatpush.bf16.msra.mxu3 %v9493_v17 }
 0x11f   : > { %v3030_v59 = vpop.f32.mrf.mxu2 }
 0x122   : > { %3424 = vmatmul.bf16.gmra.mxu1 %v7670_v38 }
 0x126   : > { %v3079_v14 = vpop.f32.mrf.mxu1  ;;  %v3119_v38 = vpop.f32.mrf.mxu3 }
 0x127   : > { %v10723_v60 = vadd.f32 %v3079_v14, %v2990_v55  ;;  %v10725_v32 = vadd.f32 %v3119_v38, %v3030_v59  ;;  %v7729_v59 = vld [vmem:[#allocation2 + $0x170] sm:$0xf]  ;;  %v10737_v21 = vpop.f32.mrf.mxu2  ;;  %v7773_v14 = vld [vmem:[#allocation2 + $0x1c0] sm:$0xf]  ;;  %v9349_v38 = vld [vmem:[#allocation2 + $0x1e0] sm:$0xf0] }
 0x128   : > { %3162 = vmatmul.bf16.gmra.mxu2 %v7694_v12  ;;  %3251 = vmatmul.bf16.gmra.mxu3 %v7698_v18  ;;  %v1131_v12 = vrot.slane %v10524_v56, 5  ;;  %v7731_v56 = vld [vmem:[#allocation2 + $0x194] sm:$0xf0]  ;;  %v7730_v9 = vor.u32 %v9339_v43, %v7729_v59  ;;  %12962 = vst [vmem:[#allocation22_spill] sm:$0xff] %v10737_v21  ;;  %v7774_v45 = vor.u32 %v9349_v38, %v7773_v14  ;;  %v1138_v43 = vrot.slane %v10016_v26, 5 }
 0x129   : > { %3345 = vmatmul.bf16.gmra.mxu0 %v7738_v39  ;;  %12961 = vst [vmem:[#allocation21_spill] sm:$0xff] %v10725_v32  ;;  %v7734_v17 = vor.u32 %v9335_v51, %v7731_v56  ;;  %v1141_v51 = vrot.slane %v10022_v29, 5  ;;  %v7765_v56 = vld [vmem:[#allocation2 + $0x1b8] sm:$0xf]  ;;  %v7809_v21 = vld [vmem:[#allocation2 + $0x208] sm:$0xf] }
 0x12a   : > { %v1132_v55 = vsel %vm10605_vm6, %v7529_v8, %v1131_v12  ;;  %v1133_v18 = vrot.slane %v1131_v12, 4  ;;  %v1140_v38 = vrot.slane %v1138_v43, 4  ;;  %v9358_v32 = vld [vmem:[#allocation2 + $0x228] sm:$0xf0] }
 0x12b   : > { %1368 = vst [vmem:[#allocation2 + $0x1c4] sm:$0xf] %v1132_v55 }
 0x12c   : > { %v1135_v39 = vsel %vm10605_vm6, %v1133_v18, %v1134_v58  ;;  %1236 = vst [vmem:[#allocation2 + $0x200] sm:$0xf] %v1132_v55  ;;  %v9336_v58 = vld [vmem:[#allocation2 + $0x17c] sm:$0xf] }
 0x12d   : > { %1369 = vst [vmem:[#allocation2 + $0x1e8] sm:$0xf] %v1135_v39  ;;  %v2995_v25 = vpop.f32.mrf.mxu0 }
 0x12e   : > { %1237 = vst [vmem:[#allocation2 + $0x224] sm:$0xf] %v1135_v39  ;;  %v10739_v8 = vpop.f32.mrf.mxu1  ;;  %v10741_v12 = vpop.f32.mrf.mxu3 }
 0x12f   : > { %1462 = vst [vmem:[#allocation2 + $0x188] sm:$0xf] %v1132_v55 }
 0x130   : > { %1463 = vst [vmem:[#allocation2 + $0x1ac] sm:$0xf] %v1135_v39  ;;  %v7530_v39 = vrot.slane %v10020_v28, 9 }
 0x131   : > { %12963 = vst [vmem:[#allocation23_spill] sm:$0xff] %v10741_v12  ;;  %v1142_v12 = vsel %vm10605_vm6, %v1140_v38, %v1141_v51 }
 0x132   : > { %3429 = vmatmul.bf16.gmra.mxu1 %v7706_v31  ;;  %v7739_v31 = vld [vmem:[#allocation2 + $0x19c] sm:$0xf0]  ;;  %v1139_v14 = vsel %vm10605_vm6, %v7530_v39, %v1138_v43  ;;  %1371 = vst [vmem:[#allocation2 + $0x230] sm:$0xf] %v1142_v12  ;;  %v9345_v1 = vld [vmem:[#allocation2 + $0x1c4] sm:$0xf] }
 0x133   : > { %v7742_v18 = vor.u32 %v9336_v58, %v7739_v31  ;;  %1370 = vst [vmem:[#allocation2 + $0x20c] sm:$0xf] %v1139_v14  ;;  %v7767_v58 = vld [vmem:[#allocation2 + $0x1dc] sm:$0xf0] }
 0x134   : > { %1238 = vst [vmem:[#allocation2 + $0x248] sm:$0xf] %v1139_v14  ;;  %v7775_v38 = vld [vmem:[#allocation2 + $0x1e4] sm:$0xf0] }
 0x135   : > { %v10743_v59 = vpop.f32.mrf.mxu0  ;;  %1239 = vst [vmem:[#allocation2 + $0x26c] sm:$0xf] %v1142_v12 }
 0x136   : > { %1464 = vst [vmem:[#allocation2 + $0x1d0] sm:$0xf] %v1139_v14  ;;  %v1148_v14 = vrot.slane %v10150_v63, 5 }
 0x137   : > { %1465 = vst [vmem:[#allocation2 + $0x1f4] sm:$0xf] %v1142_v12  ;;  %v7531_v12 = vrot.slane %v10095_v16, 9  ;;  %v7803_v16 = vld [vmem:[#allocation2 + $0x224] sm:$0xf0] }
 0x138   : > { %3167 = vmatmul.bf16.gmra.mxu2 %v7730_v9  ;;  %3256 = vmatmul.bf16.gmra.mxu3 %v7734_v17  ;;  %v9348_v9 = vld [vmem:[#allocation2 + $0x1d8] sm:$0xf0] }
 0x139   : > { %3350 = vmatmul.bf16.gmra.mxu0 %v7774_v45  ;;  %v3035_v55 = vpop.f32.mrf.mxu2  ;;  %v9344_v45 = vld [vmem:[#allocation2 + $0x1bc] sm:$0xf]  ;;  %v7766_v26 = vor.u32 %v9348_v9, %v7765_v56 }
 0x13a   : > { %v7770_v39 = vor.u32 %v9344_v45, %v7767_v58  ;;  %v9357_v45 = vld [vmem:[#allocation2 + $0x220] sm:$0xf0] }
 0x13f   : > { %v3084_v17 = vpop.f32.mrf.mxu1  ;;  %v3124_v31 = vpop.f32.mrf.mxu3 }
 0x140   : > { %v10752_v28 = vadd.f32 %v3084_v17, %v2995_v25  ;;  %v10754_v29 = vadd.f32 %v3124_v31, %v3035_v55  ;;  %v9484_v25 = vld [vmem:[%s12928_s1 + $0x198] sm:$0xff]  ;;  %v7801_v17 = vld [vmem:[#allocation2 + $0x200] sm:$0xf] }
 0x141   : > { %v3037_v43 = vpop.f32.mrf.mxu2  ;;  %v9492_v55 = vld [vmem:[%s12928_s1 + $0x1d8] sm:$0xff]  ;;  %3494 = vmatpush.bf16.msra.mxu2 %v9484_v25 }
 0x142   : > { %3434 = vmatmul.bf16.gmra.mxu1 %v7742_v18  ;;  %v7810_v18 = vor.u32 %v9358_v32, %v7809_v21  ;;  %3583 = vmatpush.bf16.msra.mxu3 %v9492_v55  ;;  %v1145_v32 = vrot.slane %v10111_v33, 5  ;;  %v7778_v21 = vor.u32 %v9345_v1, %v7775_v38  ;;  %v9500_v33 = vld [vmem:[%s12928_s1 + $0x218] sm:$0xff]  ;;  %v9353_v1 = vld [vmem:[#allocation2 + $0x204] sm:$0xf] }
 0x143   : > { %3672 = vmatpush.bf16.msra.mxu0 %v9500_v33  ;;  %v7532_v33 = vrot.slane %v10169_v23, 9  ;;  %v7839_v23 = vld [vmem:[#allocation2 + $0x26c] sm:$0xf0] }
 0x144   : > { %v1147_v9 = vrot.slane %v1145_v32, 4  ;;  %v1146_v31 = vsel %vm10605_vm6, %v7531_v12, %v1145_v32  ;;  %v9354_v32 = vld [vmem:[#allocation2 + $0x20c] sm:$0xf] }
 0x145   : > { %1372 = vst [vmem:[#allocation2 + $0x254] sm:$0xf] %v1146_v31 }
 0x146   : > { %v3000_v57 = vpop.f32.mrf.mxu0  ;;  %1240 = vst [vmem:[#allocation2 + $0x290] sm:$0xf] %v1146_v31 }
 0x147   : > { %v3126_v51 = vpop.f32.mrf.mxu3  ;;  %v10774_v63 = vpop.f32.mrf.mxu1  ;;  %1466 = vst [vmem:[#allocation2 + $0x218] sm:$0xf] %v1146_v31  ;;  %v1155_v31 = vrot.slane %v10203_v0, 5 }
 0x148   : > { %3172 = vmatmul.bf16.gmra.mxu2 %v7766_v26  ;;  %3261 = vmatmul.bf16.gmra.mxu3 %v7770_v39  ;;  %v10762_v56 = vadd.f32 %v3126_v51, %v3037_v43  ;;  %v1149_v26 = vsel %vm10605_vm6, %v1147_v9, %v1148_v14  ;;  %v7802_v39 = vor.u32 %v9357_v45, %v7801_v17  ;;  %v9367_v43 = vld [vmem:[#allocation2 + $0x270] sm:$0xf0]  ;;  %v1152_v9 = vrot.slane %v10171_v24, 5 }
 0x149   : > { %3355 = vmatmul.bf16.gmra.mxu0 %v7810_v18  ;;  %1373 = vst [vmem:[#allocation2 + $0x278] sm:$0xf] %v1149_v26  ;;  %v7845_v18 = vld [vmem:[#allocation2 + $0x250] sm:$0xf]  ;;  %v7806_v51 = vor.u32 %v9353_v1, %v7803_v16 }
 0x14a   : > { %1241 = vst [vmem:[#allocation2 + $0x2b4] sm:$0xf] %v1149_v26  ;;  %v7846_v25 = vor.u32 %v9367_v43, %v7845_v18  ;;  %v1154_v1 = vrot.slane %v1152_v9, 4  ;;  %v9366_v18 = vld [vmem:[#allocation2 + $0x268] sm:$0xf0] }
 0x14b   : > { %1467 = vst [vmem:[#allocation2 + $0x23c] sm:$0xf] %v1149_v26 }
 0x14c   : > { %v1156_v24 = vsel %vm10605_vm6, %v1154_v1, %v1155_v31  ;;  %v9363_v1 = vld [vmem:[#allocation2 + $0x254] sm:$0xf] }
 0x14d   : > { %1375 = vst [vmem:[#allocation2 + $0x2c0] sm:$0xf] %v1156_v24 }
 0x14e   : > { %v3002_v58 = vpop.f32.mrf.mxu0  ;;  %1243 = vst [vmem:[#allocation2 + $0x2fc] sm:$0xf] %v1156_v24 }
 0x14f   : > { %1469 = vst [vmem:[#allocation2 + $0x284] sm:$0xf] %v1156_v24  ;;  %v1159_v24 = vrot.slane %v10226_v37, 5  ;;  %v3057_v37 = vadd.f32 %v10587_v35, %v10571_v7 }
 0x152   : > { %3439 = vmatmul.bf16.gmra.mxu1 %v7778_v21  ;;  %v3040_v38 = vpop.f32.mrf.mxu2  ;;  %v7811_v21 = vld [vmem:[#allocation2 + $0x22c] sm:$0xf0] }
 0x153   : > { %v7814_v17 = vor.u32 %v9354_v32, %v7811_v21  ;;  %v9376_v32 = vld [vmem:[#allocation2 + $0x2b8] sm:$0xf0] }
 0x156   : > { %v3321_v55 = vpop.f32.mrf.mxu0 }
 0x158   : > { %3177 = vmatmul.bf16.gmra.mxu2 %v7802_v39  ;;  %3266 = vmatmul.bf16.gmra.mxu3 %v7806_v51  ;;  %v7837_v39 = vld [vmem:[#allocation2 + $0x248] sm:$0xf]  ;;  %v1153_v51 = vsel %vm10605_vm6, %v7532_v33, %v1152_v9 }
 0x159   : > { %3360 = vmatmul.bf16.gmra.mxu0 %v7846_v25  ;;  %1374 = vst [vmem:[#allocation2 + $0x29c] sm:$0xf] %v1153_v51  ;;  %v7838_v25 = vor.u32 %v9366_v18, %v7837_v39  ;;  %v7847_v39 = vld [vmem:[#allocation2 + $0x274] sm:$0xf0]  ;;  %v9483_v18 = vld [vmem:[%s12928_s1 + $0x190] sm:$0xff] }
 0x15a   : > { %v3042_v16 = vpop.f32.mrf.mxu2  ;;  %1242 = vst [vmem:[#allocation2 + $0x2d8] sm:$0xf] %v1153_v51  ;;  %3495 = vmatpush.bf16.msra.mxu2 %v9483_v18 }
 0x15b   : > { %v3129_v12 = vpop.f32.mrf.mxu3  ;;  %1468 = vst [vmem:[#allocation2 + $0x260] sm:$0xf] %v1153_v51 }
 0x15c   : > { %v10777_v14 = vadd.f32 %v3129_v12, %v3040_v38  ;;  %v9362_v38 = vld [vmem:[#allocation2 + $0x24c] sm:$0xf] }
 0x15d   : > { %v7842_v12 = vor.u32 %v9362_v38, %v7839_v23  ;;  %v7850_v23 = vor.u32 %v9363_v1, %v7847_v39 }
 0x15e   : > { %12964 = vst [vmem:[#allocation24_spill] sm:$0xff] %v10777_v14  ;;  %v10783_v43 = vpop.f32.mrf.mxu0 }
 0x15f   : > { %v3089_v45 = vpop.f32.mrf.mxu1 }
 0x160   : > { %v10781_v26 = vadd.f32 %v3089_v45, %v3000_v57  ;;  %v7881_v57 = vld [vmem:[#allocation2 + $0x298] sm:$0xf] }
 0x162   : > { %3444 = vmatmul.bf16.gmra.mxu1 %v7814_v17  ;;  %v7882_v17 = vor.u32 %v9376_v32, %v7881_v57  ;;  %v1161_v57 = vrot.slane %v1159_v24, 4  ;;  %v1162_v32 = vrot.slane %v10257_v5, 5 }
 0x163   : > { %v3131_v0 = vpop.f32.mrf.mxu3 }
 0x164   : > { %v10789_v21 = vadd.f32 %v3131_v0, %v3042_v16  ;;  %v9491_v16 = vld [vmem:[%s12928_s1 + $0x1d0] sm:$0xff]  ;;  %v7533_v0 = vrot.slane %v10223_v36, 9 }
 0x165   : > { %3584 = vmatpush.bf16.msra.mxu3 %v9491_v16  ;;  %v9499_v36 = vld [vmem:[%s12928_s1 + $0x210] sm:$0xff] }
 0x166   : > { %12965 = vst [vmem:[#allocation25_spill] sm:$0xff] %v10789_v21  ;;  %v10793_v33 = vpop.f32.mrf.mxu0  ;;  %v9375_v21 = vld [vmem:[#allocation2 + $0x2b0] sm:$0xf0]  ;;  %3673 = vmatpush.bf16.msra.mxu0 %v9499_v36 }
 0x167   : > { %v3091_v45 = vpop.f32.mrf.mxu1 }
 0x168   : > { %v10791_v9 = vadd.f32 %v3091_v45, %v3002_v58  ;;  %3182 = vmatmul.bf16.gmra.mxu2 %v7838_v25  ;;  %3271 = vmatmul.bf16.gmra.mxu3 %v7842_v12  ;;  %v7873_v45 = vld [vmem:[#allocation2 + $0x290] sm:$0xf] }
 0x169   : > { %3365 = vmatmul.bf16.gmra.mxu0 %v7882_v17  ;;  %v1163_v17 = vsel %vm10605_vm6, %v1161_v57, %v1162_v32  ;;  %v7874_v18 = vor.u32 %v9375_v21, %v7873_v45  ;;  %v9372_v57 = vld [vmem:[#allocation2 + $0x29c] sm:$0xf]  ;;  %v7883_v32 = vld [vmem:[#allocation2 + $0x2bc] sm:$0xf0] }
 0x16a   : > { %1377 = vst [vmem:[#allocation2 + $0x308] sm:$0xf] %v1163_v17 }
 0x16b   : > { %v3143_v31 = vpop.f32.mrf.mxu2  ;;  %v3232_v58 = vpop.f32.mrf.mxu3  ;;  %1245 = vst [vmem:[#allocation2 + $0x344] sm:$0xf] %v1163_v17 }
 0x16c   : > { %v3144_v51 = vadd.f32 %v3143_v31, %v10541_v44  ;;  %v1160_v44 = vsel %vm10605_vm6, %v7533_v0, %v1159_v24  ;;  %v7875_v31 = vld [vmem:[#allocation2 + $0x2b4] sm:$0xf0]  ;;  %1471 = vst [vmem:[#allocation2 + $0x2cc] sm:$0xf] %v1163_v17  ;;  %v7886_v17 = vor.u32 %v9372_v57, %v7883_v32 }
 0x16d   : > { %1376 = vst [vmem:[#allocation2 + $0x2e4] sm:$0xf] %v1160_v44 }
 0x16e   : > { %v3233_v38 = vadd.f32 %v3232_v58, %v3144_v51  ;;  %v10805_v14 = vpop.f32.mrf.mxu0  ;;  %1244 = vst [vmem:[#allocation2 + $0x320] sm:$0xf] %v1160_v44  ;;  %v7917_v51 = vld [vmem:[#allocation2 + $0x2e0] sm:$0xf]  ;;  %v9385_v58 = vld [vmem:[#allocation2 + $0x300] sm:$0xf0] }
 0x16f   : > { %v3410_v25 = vpop.f32.mrf.mxu1  ;;  %1470 = vst [vmem:[#allocation2 + $0x2a8] sm:$0xf] %v1160_v44  ;;  %v1166_v44 = vrot.slane %v10298_v13, 5 }
 0x170   : > { %v3322_v12 = vadd.f32 %v3321_v55, %v3233_v38  ;;  %v9371_v55 = vld [vmem:[#allocation2 + $0x294] sm:$0xf] }
 0x171   : > { %v7878_v35 = vor.u32 %v9371_v55, %v7875_v31  ;;  %v1168_v55 = vrot.slane %v1166_v44, 4  ;;  %v1169_v31 = vrot.slane %v10326_v53, 5 }
 0x172   : > { %v10813_v1 = vadd.f32 %v3410_v25, %v3322_v12  ;;  %3449 = vmatmul.bf16.gmra.mxu1 %v7850_v23  ;;  %v7918_v23 = vor.u32 %v9385_v58, %v7917_v51  ;;  %v3062_v58 = vadd.f32 %v10623_v49, %v10619_v34 }
 0x173   : > { %v3145_v5 = vpop.f32.mrf.mxu2  ;;  %v3234_v16 = vpop.f32.mrf.mxu3  ;;  %v1170_v51 = vsel %vm10605_vm6, %v1168_v55, %v1169_v31  ;;  %v1173_v31 = vrot.slane %v10364_v4, 5 }
 0x174   : > { %v3146_v39 = vadd.f32 %v3145_v5, %v3057_v37  ;;  %v7534_v5 = vrot.slane %v10295_v10, 9  ;;  %1379 = vst [vmem:[#allocation2 + $0x350] sm:$0xf] %v1170_v51 }
 0x175   : > { %1247 = vst [vmem:[#allocation2 + $0x38c] sm:$0xf] %v1170_v51 }
 0x176   : > { %v3235_v7 = vadd.f32 %v3234_v16, %v3146_v39  ;;  %v10819_v25 = vpop.f32.mrf.mxu0  ;;  %v1167_v13 = vsel %vm10605_vm6, %v7534_v5, %v1166_v44  ;;  %1473 = vst [vmem:[#allocation2 + $0x314] sm:$0xf] %v1170_v51  ;;  %v9490_v5 = vld [vmem:[%s12928_s1 + $0x1c8] sm:$0xff]  ;;  %v1175_v51 = vrot.slane %v1173_v31, 4 }
 0x177   : > { %v3412_v24 = vpop.f32.mrf.mxu1  ;;  %1378 = vst [vmem:[#allocation2 + $0x32c] sm:$0xf] %v1167_v13  ;;  %3585 = vmatpush.bf16.msra.mxu3 %v9490_v5 }
 0x178   : > { %3187 = vmatmul.bf16.gmra.mxu2 %v7874_v18  ;;  %v3324_v38 = vadd.f32 %v10783_v43, %v3235_v7  ;;  %3276 = vmatmul.bf16.gmra.mxu3 %v7878_v35  ;;  %v9656_v43 = vld [vmem:[%s12931_s4 + $0x38] sm:$0xff]  ;;  %v7911_v7 = vld [vmem:[#allocation2 + $0x2fc] sm:$0xf0]  ;;  %1246 = vst [vmem:[#allocation2 + $0x368] sm:$0xf] %v1167_v13 }
 0x179   : > { %3370 = vmatmul.bf16.gmra.mxu0 %v7918_v23  ;;  %6501 = vmatpush.bf16.msra.mxu1 %v9656_v43  ;;  %v9384_v18 = vld [vmem:[#allocation2 + $0x2f8] sm:$0xf0]  ;;  %v7953_v23 = vld [vmem:[#allocation2 + $0x328] sm:$0xf]  ;;  %1472 = vst [vmem:[#allocation2 + $0x2f0] sm:$0xf] %v1167_v13 }
 0x17a   : > { %v10821_v0 = vadd.f32 %v3412_v24, %v3324_v38  ;;  %v7919_v43 = vld [vmem:[#allocation2 + $0x304] sm:$0xf0]  ;;  %v7535_v13 = vrot.slane %v10362_v2, 9 }
 0x17b   : > { %v3148_v21 = vpop.f32.mrf.mxu2  ;;  %v3237_v45 = vpop.f32.mrf.mxu3  ;;  %v9498_v2 = vld [vmem:[%s12928_s1 + $0x208] sm:$0xff] }
 0x17c   : > { %v3149_v12 = vadd.f32 %v3148_v21, %v10612_v41  ;;  %v7909_v41 = vld [vmem:[#allocation2 + $0x2d8] sm:$0xf]  ;;  %v9394_v21 = vld [vmem:[#allocation2 + $0x348] sm:$0xf0]  ;;  %3674 = vmatpush.bf16.msra.mxu0 %v9498_v2 }
 0x17d   : > { %v7910_v24 = vor.u32 %v9384_v18, %v7909_v41  ;;  %v7954_v49 = vor.u32 %v9394_v21, %v7953_v23  ;;  %v7947_v23 = vld [vmem:[#allocation2 + $0x344] sm:$0xf0] }
 0x17e   : > { %v3238_v37 = vadd.f32 %v3237_v45, %v3149_v12  ;;  %v10831_v16 = vpop.f32.mrf.mxu0 }
 0x17f   : > { %v3415_v36 = vpop.f32.mrf.mxu1 }
 0x180   : > { %v3327_v39 = vadd.f32 %v10793_v33, %v3238_v37  ;;  %v9380_v33 = vld [vmem:[#allocation2 + $0x2dc] sm:$0xf]  ;;  %v9381_v37 = vld [vmem:[#allocation2 + $0x2e4] sm:$0xf] }
 0x181   : > { %v7914_v32 = vor.u32 %v9380_v33, %v7911_v7  ;;  %v7922_v41 = vor.u32 %v9381_v37, %v7919_v43  ;;  %v7945_v33 = vld [vmem:[#allocation2 + $0x320] sm:$0xf]  ;;  %v9393_v7 = vld [vmem:[#allocation2 + $0x340] sm:$0xf0] }
 0x182   : > { %v10839_v10 = vadd.f32 %v3415_v36, %v3327_v39  ;;  %3454 = vmatmul.bf16.gmra.mxu1 %v7886_v17  ;;  %v9482_v36 = vld [vmem:[%s12928_s1 + $0x188] sm:$0xff] }
 0x183   : > { %v3150_v53 = vpop.f32.mrf.mxu2  ;;  %v3239_v38 = vpop.f32.mrf.mxu3  ;;  %3496 = vmatpush.bf16.msra.mxu2 %v9482_v36 }
 0x184   : > { %v3151_v35 = vadd.f32 %v3150_v53, %v3062_v58  ;;  %v1176_v58 = vrot.slane %v10391_v52, 5 }
 0x186   : > { %v3240_v57 = vadd.f32 %v3239_v38, %v3151_v35  ;;  %v10842_v45 = vpop.f32.mrf.mxu0  ;;  %v1177_v4 = vsel %vm10605_vm6, %v1175_v51, %v1176_v58  ;;  %v12966_v58 = vld [vmem:[#allocation7_spill] sm:$0xff] }
 0x187   : > { %v3417_v12 = vpop.f32.mrf.mxu1  ;;  %1381 = vst [vmem:[#allocation2 + $0x398] sm:$0xf] %v1177_v4 }
 0x188   : > { %3192 = vmatmul.bf16.gmra.mxu2 %v7910_v24  ;;  %v3329_v34 = vadd.f32 %v10805_v14, %v3240_v57  ;;  %3281 = vmatmul.bf16.gmra.mxu3 %v7914_v32  ;;  %v3067_v24 = vadd.f32 %v10655_v50, %v10651_v54  ;;  %v7946_v57 = vor.u32 %v9393_v7, %v7945_v33  ;;  %v12967_v7 = vld [vmem:[#allocation8_spill] sm:$0xff] }
 0x189   : > { %3375 = vmatmul.bf16.gmra.mxu0 %v7954_v49  ;;  %1249 = vst [vmem:[#allocation2 + $0x3d4] sm:$0xf] %v1177_v4 }
 0x18a   : > { %v10844_v44 = vadd.f32 %v3417_v12, %v3329_v34  ;;  %v7989_v12 = vld [vmem:[#allocation2 + $0x370] sm:$0xf]  ;;  %v9403_v34 = vld [vmem:[#allocation2 + $0x390] sm:$0xf0]  ;;  %1475 = vst [vmem:[#allocation2 + $0x35c] sm:$0xf] %v1177_v4 }
 0x18b   : > { %v3153_v17 = vpop.f32.mrf.mxu2  ;;  %v3242_v14 = vpop.f32.mrf.mxu3 }
 0x18c   : > { %v3154_v55 = vadd.f32 %v3153_v17, %v10633_v19  ;;  %v1174_v19 = vsel %vm10605_vm6, %v7535_v13, %v1173_v31  ;;  %v7990_v17 = vor.u32 %v9403_v34, %v7989_v12 }
 0x18d   : > { %1380 = vst [vmem:[#allocation2 + $0x374] sm:$0xf] %v1174_v19 }
 0x18e   : > { %v3243_v39 = vadd.f32 %v3242_v14, %v3154_v55  ;;  %v10857_v35 = vpop.f32.mrf.mxu0  ;;  %1248 = vst [vmem:[#allocation2 + $0x3b0] sm:$0xf] %v1174_v19  ;;  %v9390_v55 = vld [vmem:[#allocation2 + $0x32c] sm:$0xf]  ;;  %v7955_v14 = vld [vmem:[#allocation2 + $0x34c] sm:$0xf0] }
 0x18f   : > { %v3420_v18 = vpop.f32.mrf.mxu1  ;;  %1474 = vst [vmem:[#allocation2 + $0x338] sm:$0xf] %v1174_v19  ;;  %v7958_v13 = vor.u32 %v9390_v55, %v7955_v14  ;;  %v1183_v19 = vrot.slane %v12967_v7, 5 }
 0x190   : > { %v3332_v53 = vadd.f32 %v10819_v25, %v3243_v39  ;;  %v9389_v25 = vld [vmem:[#allocation2 + $0x324] sm:$0xf] }
 0x191   : > { %v7950_v50 = vor.u32 %v9389_v25, %v7947_v23  ;;  %v3072_v25 = vadd.f32 %v10676_v20, %v10672_v15  ;;  %v307_v20 = vld [vmem:[%s9993_s13 + $0xf0] sm:$0xff] }
 0x192   : > { %v10865_v38 = vadd.f32 %v3420_v18, %v3332_v53  ;;  %3459 = vmatmul.bf16.gmra.mxu1 %v7922_v41  ;;  %v1180_v41 = vrot.slane %v10432_v22, 5  ;;  %v7536_v53 = vrot.slane %v12966_v58, 9  ;;  %v340_v14 = vrot.slane %v307_v20, 1 }
 0x193   : > { %v3155_v52 = vpop.f32.mrf.mxu2  ;;  %v3244_v32 = vpop.f32.mrf.mxu3 }
 0x194   : > { %v3156_v21 = vadd.f32 %v3155_v52, %v3067_v24  ;;  %v1182_v33 = vrot.slane %v1180_v41, 4  ;;  %v9402_v24 = vld [vmem:[#allocation2 + $0x388] sm:$0xf0]  ;;  %v1181_v22 = vsel %vm10605_vm6, %v7536_v53, %v1180_v41  ;;  %v9481_v53 = vld [vmem:[%s12928_s1 + $0x180] sm:$0xff] }
 0x195   : > { %1382 = vst [vmem:[#allocation2 + $0x3bc] sm:$0xf] %v1181_v22  ;;  %3497 = vmatpush.bf16.msra.mxu2 %v9481_v53 }
 0x196   : > { %v3245_v54 = vadd.f32 %v3244_v32, %v3156_v21  ;;  %v10871_v43 = vpop.f32.mrf.mxu0  ;;  %v1184_v52 = vsel %vm10605_vm6, %v1182_v33, %v1183_v19  ;;  %1250 = vst [vmem:[#allocation2 + $0x3f8] sm:$0xf] %v1181_v22 }
 0x197   : > { %v3422_v49 = vpop.f32.mrf.mxu1  ;;  %1383 = vst [vmem:[#allocation2 + $0x3e0] sm:$0xf] %v1184_v52 }
 0x198   : > { %3197 = vmatmul.bf16.gmra.mxu2 %v7946_v57  ;;  %v3334_v37 = vadd.f32 %v10831_v16, %v3245_v54  ;;  %3286 = vmatmul.bf16.gmra.mxu3 %v7950_v50  ;;  %v9655_v16 = vld [vmem:[%s12931_s4 + $0x30] sm:$0xff]  ;;  %v8025_v54 = vld [vmem:[#allocation2 + $0x3b8] sm:$0xf]  ;;  %v9412_v50 = vld [vmem:[#allocation2 + $0x3d8] sm:$0xf0] }
 0x199   : > { %3380 = vmatmul.bf16.gmra.mxu0 %v7990_v17  ;;  %6502 = vmatpush.bf16.msra.mxu1 %v9655_v16  ;;  %v7983_v57 = vld [vmem:[#allocation2 + $0x38c] sm:$0xf0]  ;;  %1251 = vst [vmem:[#allocation2 + $0x41c] sm:$0xf] %v1184_v52  ;;  %v308_v17 = vld [vmem:[%s9993_s13 + $0xf8] sm:$0xff]  ;;  %v8026_v55 = vor.u32 %v9412_v50, %v8025_v54 }
 0x19a   : > { %v10873_v36 = vadd.f32 %v3422_v49, %v3334_v37  ;;  %1476 = vst [vmem:[#allocation2 + $0x380] sm:$0xf] %v1181_v22  ;;  %v420_v41 = vrot.slane %v308_v17, 7  ;;  %v7991_v16 = vld [vmem:[#allocation2 + $0x394] sm:$0xf0] }
 0x19b   : > { %v3158_v5 = vpop.f32.mrf.mxu2  ;;  %v3247_v39 = vpop.f32.mrf.mxu3  ;;  %1477 = vst [vmem:[#allocation2 + $0x3a4] sm:$0xf] %v1184_v52  ;;  %v1187_v52 = vrot.slane %v10500_v6, 5  ;;  %v12968_v6 = vld [vmem:[#allocation9_spill] sm:$0xff] }
 0x19c   : > { %v3159_v31 = vadd.f32 %v3158_v5, %v10664_v46  ;;  %v7981_v46 = vld [vmem:[#allocation2 + $0x368] sm:$0xf]  ;;  %v1190_v50 = vrot.slane %v12968_v6, 5 }
 0x19d   : > { %v7982_v12 = vor.u32 %v9402_v24, %v7981_v46  ;;  %v485_v46 = vrot.slane %v308_v17, 5  ;;  %v1189_v54 = vrot.slane %v1187_v52, 4 }
 0x19e   : > { %v3248_v18 = vadd.f32 %v3247_v39, %v3159_v31  ;;  %v10883_v2 = vpop.f32.mrf.mxu0  ;;  %v419_v31 = vrot.slane %v307_v20, 7 }
 0x19f   : > { %v3425_v51 = vpop.f32.mrf.mxu1 }
 0x1a0   : > { %v3337_v4 = vadd.f32 %v10842_v45, %v3248_v18  ;;  %v9398_v45 = vld [vmem:[#allocation2 + $0x36c] sm:$0xf]  ;;  %v421_v33 = vsel %vm373_vm0, %v419_v31, %v420_v41 }
 0x1a1   : > { %v7986_v37 = vor.u32 %v9398_v45, %v7983_v57 }
 0x1a2   : > { %v10891_v23 = vadd.f32 %v3425_v51, %v3337_v4  ;;  %3464 = vmatmul.bf16.gmra.mxu1 %v7958_v13  ;;  %v9399_v13 = vld [vmem:[#allocation2 + $0x374] sm:$0xf]  ;;  %v517_v51 = vsel %vm373_vm0, %v340_v14, %v419_v31  ;;  %v10911_v4 = vpack.c.bf16 %v421_v33, %v421_v33  ;;  %v1191_v31 = vsel %vm10605_vm6, %v1189_v54, %v1190_v50  ;;  %v8019_v33 = vld [vmem:[#allocation2 + $0x3d4] sm:$0xf0] }
 0x1a3   : > { %v3160_v21 = vpop.f32.mrf.mxu2  ;;  %v3249_v34 = vpop.f32.mrf.mxu3  ;;  %v10908_v7 = vpack.c.bf16 %v517_v51, %v517_v51  ;;  %v7994_v22 = vor.u32 %v9399_v13, %v7991_v16  ;;  %v9497_v51 = vld [vmem:[%s12928_s1 + $0x200] sm:$0xff]  ;;  %1385 = vst [vmem:[#allocation2 + $0x428] sm:$0xf] %v1191_v31 }
 0x1a4   : > { %v3161_v32 = vadd.f32 %v3160_v21, %v3072_v25  ;;  %1285 = vst [vmem:[#allocation2 + $0x468] sm:$0xf] %v10911_v4  ;;  %v1296_v57 = vshll.u32 %v10911_v4, 16  ;;  %3675 = vmatpush.bf16.msra.mxu0 %v9497_v51 }
 0x1a5   : > { %1284 = vst [vmem:[#allocation2 + $0x444] sm:$0xf] %v10908_v7  ;;  %v1287_v25 = vshrl.u32 %v10908_v7, 16  ;;  %v1290_v21 = vshll.u32 %v10908_v7, 16 }
 0x1a6   : > { %v3250_v49 = vadd.f32 %v3249_v34, %v3161_v32  ;;  %v10896_v39 = vpop.f32.mrf.mxu0  ;;  %v1300_v32 = vshrl.u32 %v10911_v4, 16  ;;  %v7537_v34 = vrot.slane %v10498_v3, 9  ;;  %1416 = vst [vmem:[#allocation2 + $0x408] sm:$0xf] %v10908_v7  ;;  %v1298_v17 = vrot.slane %v1296_v57, 5 }
 0x1a7   : > { %v3427_v15 = vpop.f32.mrf.mxu1  ;;  %1417 = vst [vmem:[#allocation2 + $0x42c] sm:$0xf] %v10911_v4  ;;  %v1292_v20 = vrot.slane %v1290_v21, 5 }
 0x1a8   : > { %3202 = vmatmul.bf16.gmra.mxu2 %v7982_v12  ;;  %v3339_v5 = vadd.f32 %v10857_v35, %v3250_v49  ;;  %3291 = vmatmul.bf16.gmra.mxu3 %v7986_v37  ;;  %v9489_v35 = vld [vmem:[%s12928_s1 + $0x1c0] sm:$0xff]  ;;  %v1188_v3 = vsel %vm10605_vm6, %v7537_v34, %v1187_v52  ;;  %1253 = vst [vmem:[#allocation2 + $0x464] sm:$0xf] %v1191_v31 }
 0x1a9   : > { %3385 = vmatmul.bf16.gmra.mxu0 %v8026_v55  ;;  %3586 = vmatpush.bf16.msra.mxu3 %v9489_v35  ;;  %v9411_v55 = vld [vmem:[#allocation2 + $0x3d0] sm:$0xf0]  ;;  %1384 = vst [vmem:[#allocation2 + $0x404] sm:$0xf] %v1188_v3  ;;  %v8061_v52 = vld [vmem:[#allocation2 + $0x400] sm:$0xf] }
 0x1aa   : > { %v10898_v18 = vadd.f32 %v3427_v15, %v3339_v5  ;;  %v1289_v15 = vrot.slane %v1287_v25, 4  ;;  %v8017_v5 = vld [vmem:[#allocation2 + $0x3b0] sm:$0xf]  ;;  %v9407_v35 = vld [vmem:[#allocation2 + $0x3b4] sm:$0xf] }
 0x1ab   : > { %v3163_v58 = vpop.f32.mrf.mxu2  ;;  %v3252_v24 = vpop.f32.mrf.mxu3  ;;  %1252 = vst [vmem:[#allocation2 + $0x440] sm:$0xf] %v1188_v3 }
 0x1ac   : > { %v3164_v19 = vadd.f32 %v3163_v58, %v10696_v11  ;;  %v533_v11 = vsel %vm373_vm0, %v420_v41, %v485_v46  ;;  %v1302_v41 = vrot.slane %v1300_v32, 4  ;;  %v1293_v58 = vor.u32 %v1292_v20, %v1289_v15  ;;  %1478 = vst [vmem:[#allocation2 + $0x3c8] sm:$0xf] %v1188_v3  ;;  %v9408_v20 = vld [vmem:[#allocation2 + $0x3bc] sm:$0xf] }
 0x1ad   : > { %v10924_v49 = vpack.c.bf16 %v533_v11, %v533_v11  ;;  %v8022_v11 = vor.u32 %v9407_v35, %v8019_v33  ;;  %1479 = vst [vmem:[#allocation2 + $0x3ec] sm:$0xf] %v1191_v31  ;;  %v9420_v35 = vld [vmem:[#allocation2 + $0x418] sm:$0xf0] }
 0x1ae   : > { %v3253_v45 = vadd.f32 %v3252_v24, %v3164_v19  ;;  %v10928_v14 = vpop.f32.mrf.mxu0  ;;  %v1303_v19 = vor.u32 %v1302_v41, %v1298_v17  ;;  %v8018_v24 = vor.u32 %v9411_v55, %v8017_v5  ;;  %1482 = vst [vmem:[#allocation2 + $0x458] sm:$0xf] %v1188_v3  ;;  %v8027_v5 = vld [vmem:[#allocation2 + $0x3dc] sm:$0xf0]  ;;  %v1349_v55 = vrot.slane %v10911_v4, 5 }
 0x1af   : > { %v3430_v12 = vpop.f32.mrf.mxu1  ;;  %v1306_v13 = vshll.u32 %v10924_v49, 16  ;;  %1483 = vst [vmem:[#allocation2 + $0x47c] sm:$0xf] %v1191_v31  ;;  %v8030_v41 = vor.u32 %v9408_v20, %v8027_v5  ;;  %v9654_v31 = vld [vmem:[%s12931_s4 + $0x28] sm:$0xff] }
 0x1b0   : > { %v3342_v37 = vadd.f32 %v10871_v43, %v3253_v45  ;;  %v3077_v43 = vadd.f32 %v10711_v40, %v10700_v42  ;;  %v1294_v42 = vrot.slane %v1293_v58, 4  ;;  %v1304_v21 = vrot.slane %v1303_v19, 4  ;;  %6503 = vmatpush.bf16.msra.mxu1 %v9654_v31 }
 0x1b1   : > { %v1308_v40 = vrot.slane %v1306_v13, 5  ;;  %v1351_v51 = vrot.slane %v1349_v55, 4  ;;  %v1352_v58 = vrot.slane %v10924_v49, 5  ;;  %v9416_v49 = vld [vmem:[#allocation2 + $0x3fc] sm:$0xf] }
 0x1b2   : > { %v10937_v16 = vadd.f32 %v3430_v12, %v3342_v37  ;;  %3469 = vmatmul.bf16.gmra.mxu1 %v7994_v22  ;;  %v9421_v22 = vld [vmem:[#allocation2 + $0x420] sm:$0xf0]  ;;  %v1299_v12 = vsel %vm10066_vm3, %v1294_v42, %v1298_v17 }
 0x1b3   : > { %v3165_v53 = vpop.f32.mrf.mxu2  ;;  %v3254_v25 = vpop.f32.mrf.mxu3  ;;  %v8062_v54 = vor.u32 %v9421_v22, %v8061_v52  ;;  %v1309_v6 = vsel %vm10066_vm3, %v1304_v21, %v1308_v40  ;;  %1342 = vst [vmem:[#allocation2 + $0x448] sm:$0xf] %v1299_v12  ;;  %v1353_v19 = vsel %vm10605_vm6, %v1351_v51, %v1352_v58  ;;  %v9425_v51 = vld [vmem:[#allocation2 + $0x444] sm:$0xf]  ;;  %v8091_v58 = vld [vmem:[#allocation2 + $0x464] sm:$0xf0] }
 0x1b4   : > { %v3166_v46 = vadd.f32 %v3165_v53, %v3077_v43  ;;  %1343 = vst [vmem:[#allocation2 + $0x46c] sm:$0xf] %v1309_v6  ;;  %v7538_v43 = vrot.slane %v10908_v7, 9  ;;  %v8053_v53 = vld [vmem:[#allocation2 + $0x3f8] sm:$0xf] }
 0x1b5   : > { %1448 = vst [vmem:[#allocation2 + $0x40c] sm:$0xf] %v1299_v12  ;;  %v8054_v42 = vor.u32 %v9420_v35, %v8053_v53  ;;  %v7573_v35 = vld [vmem:[#allocation2 + $0x20] sm:$0xf] }
 0x1b6   : > { %v3255_v45 = vadd.f32 %v3254_v25, %v3166_v46  ;;  %v3351_v50 = vpop.f32.mrf.mxu0  ;;  %1449 = vst [vmem:[#allocation2 + $0x430] sm:$0xf] %v1309_v6  ;;  %v1350_v4 = vsel %vm10605_vm6, %v7538_v43, %v1349_v55  ;;  %v3082_v46 = vadd.f32 %v10739_v8, %v10715_v30  ;;  %v8063_v6 = vld [vmem:[#allocation2 + $0x424] sm:$0xf0] }
 0x1b7   : > { %v3432_v57 = vpop.f32.mrf.mxu1  ;;  %1386 = vst [vmem:[#allocation2 + $0x44c] sm:$0xf] %v1350_v4 }
 0x1b8   : > { %3207 = vmatmul.bf16.gmra.mxu2 %v8018_v24  ;;  %v3344_v34 = vadd.f32 %v10883_v2, %v3255_v45  ;;  %3296 = vmatmul.bf16.gmra.mxu3 %v8022_v11  ;;  %1387 = vst [vmem:[#allocation2 + $0x470] sm:$0xf] %v1353_v19 }
 0x1b9   : > { %3390 = vmatmul.bf16.gmra.mxu0 %v8062_v54  ;;  %1480 = vst [vmem:[#allocation2 + $0x410] sm:$0xf] %v1350_v4  ;;  %v9417_v54 = vld [vmem:[#allocation2 + $0x404] sm:$0xf] }
 0x1ba   : > { %v10947_v37 = vadd.f32 %v3432_v57, %v3344_v34  ;;  %v8097_v25 = vld [vmem:[#allocation2 + $0x448] sm:$0xf]  ;;  %1481 = vst [vmem:[#allocation2 + $0x434] sm:$0xf] %v1353_v19  ;;  %v9297_v4 = vld [vmem:[#allocation2 + $0x40] sm:$0xf0] }
 0x1bb   : > { %v3168_v15 = vpop.f32.mrf.mxu2  ;;  %v3257_v2 = vpop.f32.mrf.mxu3  ;;  %v9430_v22 = vld [vmem:[#allocation2 + $0x468] sm:$0xf0] }
 0x1bc   : > { %v3169_v17 = vadd.f32 %v3168_v15, %v10723_v60  ;;  %v8098_v8 = vor.u32 %v9430_v22, %v8097_v25 }
 0x1be   : > { %v3258_v3 = vadd.f32 %v3257_v2, %v3169_v17  ;;  %v3353_v33 = vpop.f32.mrf.mxu0  ;;  %v8066_v17 = vor.u32 %v9417_v54, %v8063_v6 }
 0x1bf   : > { %v3435_v13 = vpop.f32.mrf.mxu1 }
 0x1c0   : > { %v3347_v60 = vadd.f32 %v10896_v39, %v3258_v3  ;;  %v8055_v39 = vld [vmem:[#allocation2 + $0x41c] sm:$0xf0] }
 0x1c1   : > { %v8058_v45 = vor.u32 %v9416_v49, %v8055_v39  ;;  %v8089_v3 = vld [vmem:[#allocation2 + $0x440] sm:$0xf]  ;;  %v7574_v49 = vor.u32 %v9297_v4, %v7573_v35 }
 0x1c2   : > { %v10963_v24 = vadd.f32 %v3435_v13, %v3347_v60  ;;  %3474 = vmatmul.bf16.gmra.mxu1 %v8030_v41  ;;  %v9429_v41 = vld [vmem:[#allocation2 + $0x460] sm:$0xf0] }
 0x1c3   : > { %v3170_v7 = vpop.f32.mrf.mxu2  ;;  %v3259_v40 = vpop.f32.mrf.mxu3 }
 0x1c4   : > { %v3171_v52 = vadd.f32 %v3170_v7, %v3082_v46  ;;  %v8094_v46 = vor.u32 %v9425_v51, %v8091_v58 }
 0x1c6   : > { %v3260_v21 = vadd.f32 %v3259_v40, %v3171_v52  ;;  %v3356_v57 = vpop.f32.mrf.mxu0  ;;  %v9426_v52 = vld [vmem:[#allocation2 + $0x44c] sm:$0xf] }
 0x1c7   : > { %v3437_v11 = vpop.f32.mrf.mxu1 }
 0x1c8   : > { %3212 = vmatmul.bf16.gmra.mxu2 %v8054_v42  ;;  %v3349_v30 = vadd.f32 %v10928_v14, %v3260_v21  ;;  %3301 = vmatmul.bf16.gmra.mxu3 %v8058_v45  ;;  %v3087_v14 = vadd.f32 %v10774_v63, %v10743_v59  ;;  %v8099_v42 = vld [vmem:[#allocation2 + $0x46c] sm:$0xf0]  ;;  %v9653_v45 = vld [vmem:[%s12931_s4 + $0x20] sm:$0xff] }
 0x1c9   : > { %3395 = vmatmul.bf16.gmra.mxu0 %v8098_v8  ;;  %v8102_v21 = vor.u32 %v9426_v52, %v8099_v42  ;;  %6504 = vmatpush.bf16.msra.mxu1 %v9653_v45  ;;  %v9296_v8 = vld [vmem:[#allocation2 + $0x38] sm:$0xf0] }
 0x1ca   : > { %v10966_v12 = vadd.f32 %v3437_v11, %v3349_v30  ;;  %v7565_v30 = vld [vmem:[#allocation2 + $0x18] sm:$0xf] }
 0x1cb   : > { %v3173_v34 = vpop.f32.mrf.mxu2  ;;  %v3262_v20 = vpop.f32.mrf.mxu3 }
 0x1cc   : > { %v3174_v15 = vadd.f32 %v3173_v34, %v10752_v28  ;;  %v8090_v28 = vor.u32 %v9429_v41, %v8089_v3 }
 0x1ce   : > { %v3263_v5 = vadd.f32 %v3262_v20, %v3174_v15  ;;  %v3358_v31 = vpop.f32.mrf.mxu0  ;;  %v9292_v15 = vld [vmem:[#allocation2 + $0x1c] sm:$0xf] }
 0x1cf   : > { %v3440_v2 = vpop.f32.mrf.mxu1 }
 0x1d0   : > { %v3352_v55 = vadd.f32 %v3351_v50, %v3263_v5  ;;  %v7566_v5 = vor.u32 %v9296_v8, %v7565_v30 }
 0x1d2   : > { %v10971_v13 = vadd.f32 %v3440_v2, %v3352_v55  ;;  %3479 = vmatmul.bf16.gmra.mxu1 %v8066_v17  ;;  %v7609_v2 = vld [vmem:[#allocation2 + $0x68] sm:$0xf]  ;;  %v9306_v55 = vld [vmem:[#allocation2 + $0x88] sm:$0xf0] }
 0x1d3   : > { %v3175_v43 = vpop.f32.mrf.mxu2  ;;  %v3264_v53 = vpop.f32.mrf.mxu3 }
 0x1d4   : > { %v3176_v60 = vadd.f32 %v3175_v43, %v3087_v14  ;;  %v7610_v43 = vor.u32 %v9306_v55, %v7609_v2  ;;  %v9652_v55 = vld [vmem:[%s12931_s4 + $0x18] sm:$0xff] }
 0x1d5   : > { %6505 = vmatpush.bf16.msra.mxu1 %v9652_v55  ;;  %v9319_v55 = vld [vmem:[#allocation2 + $0xf4] sm:$0xf] }
 0x1d6   : > { %v3265_v19 = vadd.f32 %v3264_v53, %v3176_v60  ;;  %v3361_v39 = vpop.f32.mrf.mxu0 }
 0x1d7   : > { %v3442_v50 = vpop.f32.mrf.mxu1 }
 0x1d8   : > { %3217 = vmatmul.bf16.gmra.mxu2 %v8090_v28  ;;  %v3354_v7 = vadd.f32 %v3353_v33, %v3265_v19  ;;  %3306 = vmatmul.bf16.gmra.mxu3 %v8094_v46  ;;  %v12970_v28 = vld [vmem:[#allocation10_spill] sm:$0xff] }
 0x1d9   : > { %3676 = vmatmul.bf16.vlgmr.msra.gmra.mxu0 %v7574_v49  ;;  %v7601_v46 = vld [vmem:[#allocation2 + $0x60] sm:$0xf]  ;;  %v12971_v49 = vld [vmem:[#allocation11_spill] sm:$0xff] }
 0x1da   : > { %v10973_v59 = vadd.f32 %v3442_v50, %v3354_v7  ;;  %v9305_v50 = vld [vmem:[#allocation2 + $0x80] sm:$0xf0] }
 0x1db   : > { %v3178_v63 = vpop.f32.mrf.mxu2  ;;  %v3267_v25 = vpop.f32.mrf.mxu3 }
 0x1dc   : > { %v3179_v40 = vadd.f32 %v3178_v63, %v10781_v26  ;;  %v7567_v26 = vld [vmem:[#allocation2 + $0x3c] sm:$0xf0]  ;;  %v12972_v63 = vld [vmem:[#allocation12_spill] sm:$0xff] }
 0x1dd   : > { %v7570_v41 = vor.u32 %v9292_v15, %v7567_v26  ;;  %v3097_v52 = vadd.f32 %v12972_v63, %v12971_v49 }
 0x1de   : > { %v3268_v22 = vadd.f32 %v3267_v25, %v3179_v40  ;;  %v3363_v34 = vpop.f32.mrf.mxu0  ;;  %v9301_v40 = vld [vmem:[#allocation2 + $0x64] sm:$0xf]  ;;  %v7603_v25 = vld [vmem:[#allocation2 + $0x84] sm:$0xf0] }
 0x1df   : > { %v3445_v11 = vpop.f32.mrf.mxu1  ;;  %v7606_v8 = vor.u32 %v9301_v40, %v7603_v25  ;;  %v12974_v25 = vld [vmem:[#allocation14_spill] sm:$0xff] }
 0x1e0   : > { %v3357_v33 = vadd.f32 %v3356_v57, %v3268_v22 }
 0x1e2   : > { %v10979_v54 = vadd.f32 %v3445_v11, %v3357_v33  ;;  %3484 = vmatmul.bf16.gmra.mxu1 %v8102_v21  ;;  %v7602_v21 = vor.u32 %v9305_v50, %v7601_v46  ;;  %v7645_v11 = vld [vmem:[#allocation2 + $0xb0] sm:$0xf]  ;;  %v9315_v33 = vld [vmem:[#allocation2 + $0xd0] sm:$0xf0]  ;;  %v7681_v46 = vld [vmem:[#allocation2 + $0xf8] sm:$0xf] }
 0x1e3   : > { %v3180_v6 = vpop.f32.mrf.mxu2  ;;  %v3269_v17 = vpop.f32.mrf.mxu3  ;;  %v7646_v15 = vor.u32 %v9315_v33, %v7645_v11  ;;  %v9324_v50 = vld [vmem:[#allocation2 + $0x118] sm:$0xf0] }
 0x1e4   : > { %v3181_v20 = vadd.f32 %v3180_v6, %v10791_v9 }
 0x1e6   : > { %v3270_v3 = vadd.f32 %v3269_v17, %v3181_v20  ;;  %v3366_v51 = vpop.f32.mrf.mxu0 }
 0x1e7   : > { %v3447_v14 = vpop.f32.mrf.mxu1 }
 0x1e8   : > { %3498 = vmatmul.bf16.vlgmr.msra.gmra.mxu2 %v7566_v5  ;;  %v3359_v57 = vadd.f32 %v3358_v31, %v3270_v3  ;;  %3587 = vmatmul.bf16.vlgmr.msra.gmra.mxu3 %v7570_v41 }
 0x1e9   : > { %3681 = vmatmul.bf16.gmra.mxu0 %v7610_v43  ;;  %v12973_v43 = vld [vmem:[#allocation13_spill] sm:$0xff] }
 0x1ea   : > { %v10982_v58 = vadd.f32 %v3447_v14, %v3359_v57  ;;  %v7637_v14 = vld [vmem:[#allocation2 + $0xa8] sm:$0xf]  ;;  %v9314_v57 = vld [vmem:[#allocation2 + $0xc8] sm:$0xf0] }
 0x1eb   : > { %v3183_v60 = vpop.f32.mrf.mxu2  ;;  %v3272_v35 = vpop.f32.mrf.mxu3 }
 0x1ec   : > { %v3184_v53 = vadd.f32 %v3183_v60, %v12970_v28  ;;  %v3102_v60 = vadd.f32 %v12973_v43, %v10627_v62  ;;  %v7717_v43 = vld [vmem:[#allocation2 + $0x140] sm:$0xf] }
 0x1ee   : > { %v3273_v9 = vadd.f32 %v3272_v35, %v3184_v53  ;;  %v3368_v7 = vpop.f32.mrf.mxu0  ;;  %v7639_v35 = vld [vmem:[#allocation2 + $0xcc] sm:$0xf0] }
 0x1ef   : > { %v3450_v4 = vpop.f32.mrf.mxu1 }
 0x1f0   : > { %v3362_v19 = vadd.f32 %v3361_v39, %v3273_v9 }
 0x1f2   : > { %v10987_v31 = vadd.f32 %v3450_v4, %v3362_v19  ;;  %v7638_v4 = vor.u32 %v9314_v57, %v7637_v14 }
 0x1f3   : > { %v3185_v42 = vpop.f32.mrf.mxu2  ;;  %v3274_v45 = vpop.f32.mrf.mxu3 }
 0x1f4   : > { %v3186_v22 = vadd.f32 %v3185_v42, %v3097_v52  ;;  %v7682_v42 = vor.u32 %v9324_v50, %v7681_v46 }
 0x1f6   : > { %v3275_v30 = vadd.f32 %v3274_v45, %v3186_v22  ;;  %v3371_v26 = vpop.f32.mrf.mxu0 }
 0x1f7   : > { %v10989_v6 = vpop.f32.mrf.mxu1 }
 0x1f8   : > { %3503 = vmatmul.bf16.gmra.mxu2 %v7602_v21  ;;  %v10991_v39 = vadd.f32 %v3363_v34, %v3275_v30  ;;  %3592 = vmatmul.bf16.gmra.mxu3 %v7606_v8  ;;  %v7673_v30 = vld [vmem:[#allocation2 + $0xf0] sm:$0xf]  ;;  %v9323_v8 = vld [vmem:[#allocation2 + $0x110] sm:$0xf0] }
 0x1f9   : > { %3686 = vmatmul.bf16.gmra.mxu0 %v7646_v15  ;;  %v7674_v14 = vor.u32 %v9323_v8, %v7673_v30  ;;  %v7711_v8 = vld [vmem:[#allocation2 + $0x15c] sm:$0xf0] }
 0x1fb   : > { %v3188_v20 = vpop.f32.mrf.mxu2  ;;  %v3277_v17 = vpop.f32.mrf.mxu3 }
 0x1fc   : > { %v3189_v5 = vadd.f32 %v3188_v20, %v10617_v48  ;;  %v9310_v48 = vld [vmem:[#allocation2 + $0xac] sm:$0xf] }
 0x1fd   : > { %v7642_v63 = vor.u32 %v9310_v48, %v7639_v35  ;;  %v12975_v20 = vld [vmem:[#allocation15_spill] sm:$0xff] }
 0x1fe   : > { %v3278_v2 = vadd.f32 %v3277_v17, %v3189_v5  ;;  %v3373_v34 = vpop.f32.mrf.mxu0  ;;  %v12976_v5 = vld [vmem:[#allocation16_spill] sm:$0xff] }
 0x1ff   : > { %v3455_v3 = vpop.f32.mrf.mxu1  ;;  %v3107_v17 = vadd.f32 %v12976_v5, %v12975_v20 }
 0x200   : > { %v3367_v41 = vadd.f32 %v3366_v51, %v3278_v2 }
 0x202   : > { %v10999_v28 = vadd.f32 %v3455_v3, %v3367_v41  ;;  %v7675_v3 = vld [vmem:[#allocation2 + $0x114] sm:$0xf0] }
 0x203   : > { %v3190_v53 = vpop.f32.mrf.mxu2  ;;  %v3279_v19 = vpop.f32.mrf.mxu3  ;;  %v7678_v48 = vor.u32 %v9319_v55, %v7675_v3  ;;  %v9342_v55 = vld [vmem:[#allocation2 + $0x1a8] sm:$0xf0] }
 0x204   : > { %v3191_v9 = vadd.f32 %v3190_v53, %v3102_v60  ;;  %v9333_v60 = vld [vmem:[#allocation2 + $0x160] sm:$0xf0] }
 0x206   : > { %v3280_v49 = vadd.f32 %v3279_v19, %v3191_v9  ;;  %v3376_v40 = vpop.f32.mrf.mxu0  ;;  %v7718_v9 = vor.u32 %v9333_v60, %v7717_v43 }
 0x207   : > { %v11001_v51 = vpop.f32.mrf.mxu1 }
 0x208   : > { %3508 = vmatmul.bf16.gmra.mxu2 %v7638_v4  ;;  %v11003_v52 = vadd.f32 %v3368_v7, %v3280_v49  ;;  %3597 = vmatmul.bf16.gmra.mxu3 %v7642_v63  ;;  %v9651_v63 = vld [vmem:[%s12931_s4 + $0x10] sm:$0xff] }
 0x209   : > { %3691 = vmatmul.bf16.gmra.mxu0 %v7682_v42  ;;  %6506 = vmatpush.bf16.msra.mxu1 %v9651_v63 }
 0x20b   : > { %v3193_v62 = vpop.f32.mrf.mxu2  ;;  %v3282_v21 = vpop.f32.mrf.mxu3 }
 0x20c   : > { %v3194_v22 = vadd.f32 %v3193_v62, %v12974_v25  ;;  %v7709_v25 = vld [vmem:[#allocation2 + $0x138] sm:$0xf] }
 0x20e   : > { %v3283_v45 = vadd.f32 %v3282_v21, %v3194_v22  ;;  %v3378_v15 = vpop.f32.mrf.mxu0  ;;  %v9332_v22 = vld [vmem:[#allocation2 + $0x158] sm:$0xf0] }
 0x20f   : > { %v3460_v11 = vpop.f32.mrf.mxu1  ;;  %v12977_v21 = vld [vmem:[#allocation17_spill] sm:$0xff]  ;;  %v7710_v5 = vor.u32 %v9332_v22, %v7709_v25 }
 0x210   : > { %v3372_v33 = vadd.f32 %v3371_v26, %v3283_v45  ;;  %v12978_v45 = vld [vmem:[#allocation18_spill] sm:$0xff] }
 0x212   : > { %v11008_v2 = vadd.f32 %v3460_v11, %v3372_v33  ;;  %v3112_v11 = vadd.f32 %v12978_v45, %v12977_v21  ;;  %v9337_v21 = vld [vmem:[#allocation2 + $0x184] sm:$0xf]  ;;  %v7747_v45 = vld [vmem:[#allocation2 + $0x1a4] sm:$0xf0] }
 0x213   : > { %v3195_v7 = vpop.f32.mrf.mxu2  ;;  %v3284_v57 = vpop.f32.mrf.mxu3 }
 0x214   : > { %v3196_v41 = vadd.f32 %v3195_v7, %v3107_v17  ;;  %v7753_v7 = vld [vmem:[#allocation2 + $0x188] sm:$0xf] }
 0x216   : > { %v3285_v53 = vadd.f32 %v3284_v57, %v3196_v41  ;;  %v3381_v4 = vpop.f32.mrf.mxu0  ;;  %v7754_v57 = vor.u32 %v9342_v55, %v7753_v7 }
 0x217   : > { %v11010_v35 = vpop.f32.mrf.mxu1 }
 0x218   : > { %3513 = vmatmul.bf16.gmra.mxu2 %v7674_v14  ;;  %v11012_v26 = vadd.f32 %v3373_v34, %v3285_v53  ;;  %3602 = vmatmul.bf16.gmra.mxu3 %v7678_v48 }
 0x219   : > { %3696 = vmatmul.bf16.gmra.mxu0 %v7718_v9 }
 0x21b   : > { %v3198_v19 = vpop.f32.mrf.mxu2  ;;  %v3287_v50 = vpop.f32.mrf.mxu3 }
 0x21c   : > { %v3199_v46 = vadd.f32 %v3198_v19, %v10666_v61  ;;  %v9328_v61 = vld [vmem:[#allocation2 + $0x13c] sm:$0xf] }
 0x21d   : > { %v7714_v41 = vor.u32 %v9328_v61, %v7711_v8  ;;  %v9351_v8 = vld [vmem:[#allocation2 + $0x1f0] sm:$0xf0] }
 0x21e   : > { %v3288_v49 = vadd.f32 %v3287_v50, %v3199_v46  ;;  %v3383_v34 = vpop.f32.mrf.mxu0  ;;  %v7745_v50 = vld [vmem:[#allocation2 + $0x180] sm:$0xf] }
 0x21f   : > { %v3465_v42 = vpop.f32.mrf.mxu1 }
 0x220   : > { %v3377_v62 = vadd.f32 %v3376_v40, %v3288_v49  ;;  %v9341_v49 = vld [vmem:[#allocation2 + $0x1a0] sm:$0xf0] }
 0x222   : > { %v11020_v33 = vadd.f32 %v3465_v42, %v3377_v62  ;;  %v12979_v42 = vld [vmem:[#allocation19_spill] sm:$0xff]  ;;  %v12980_v62 = vld [vmem:[#allocation20_spill] sm:$0xff] }
 0x223   : > { %v3200_v30 = vpop.f32.mrf.mxu2  ;;  %v3289_v17 = vpop.f32.mrf.mxu3  ;;  %v3117_v25 = vadd.f32 %v12980_v62, %v12979_v42  ;;  %v12983_v42 = vld [vmem:[#allocation23_spill] sm:$0xff] }
 0x224   : > { %v3201_v20 = vadd.f32 %v3200_v30, %v3112_v11  ;;  %v7746_v30 = vor.u32 %v9341_v49, %v7745_v50  ;;  %v9350_v50 = vld [vmem:[#allocation2 + $0x1e8] sm:$0xf0]  ;;  %v12982_v49 = vld [vmem:[#allocation22_spill] sm:$0xff] }
 0x225   : > { %v3122_v62 = vadd.f32 %v12983_v42, %v12982_v49 }
 0x226   : > { %v3290_v3 = vadd.f32 %v3289_v17, %v3201_v20  ;;  %v3386_v43 = vpop.f32.mrf.mxu0 }
 0x227   : > { %v11022_v40 = vpop.f32.mrf.mxu1 }
 0x228   : > { %3518 = vmatmul.bf16.gmra.mxu2 %v7710_v5  ;;  %v11024_v14 = vadd.f32 %v3378_v15, %v3290_v3  ;;  %3607 = vmatmul.bf16.gmra.mxu3 %v7714_v41  ;;  %v7750_v5 = vor.u32 %v9337_v21, %v7747_v45  ;;  %v12981_v41 = vld [vmem:[#allocation21_spill] sm:$0xff]  ;;  %v9346_v21 = vld [vmem:[#allocation2 + $0x1cc] sm:$0xf]  ;;  %v7783_v45 = vld [vmem:[#allocation2 + $0x1ec] sm:$0xf0] }
 0x229   : > { %3701 = vmatmul.bf16.gmra.mxu0 %v7754_v57 }
 0x22b   : > { %v3203_v60 = vpop.f32.mrf.mxu2  ;;  %v3292_v48 = vpop.f32.mrf.mxu3 }
 0x22c   : > { %v3204_v53 = vadd.f32 %v3203_v60, %v10698_v47  ;;  %v7789_v47 = vld [vmem:[#allocation2 + $0x1d0] sm:$0xf] }
 0x22d   : > { %v7790_v7 = vor.u32 %v9351_v8, %v7789_v47  ;;  %v7825_v47 = vld [vmem:[#allocation2 + $0x218] sm:$0xf]  ;;  %v9360_v8 = vld [vmem:[#allocation2 + $0x238] sm:$0xf0] }
 0x22e   : > { %v3293_v9 = vadd.f32 %v3292_v48, %v3204_v53  ;;  %v3388_v63 = vpop.f32.mrf.mxu0  ;;  %v9650_v48 = vld [vmem:[%s12931_s4 + $0x8] sm:$0xff] }
 0x22f   : > { %v3470_v19 = vpop.f32.mrf.mxu1  ;;  %6507 = vmatpush.bf16.msra.mxu1 %v9650_v48 }
 0x230   : > { %v3382_v46 = vadd.f32 %v3381_v4, %v3293_v9 }
 0x232   : > { %v11029_v22 = vadd.f32 %v3470_v19, %v3382_v46  ;;  %v7781_v46 = vld [vmem:[#allocation2 + $0x1c8] sm:$0xf] }
 0x233   : > { %v3205_v15 = vpop.f32.mrf.mxu2  ;;  %v3294_v61 = vpop.f32.mrf.mxu3 }
 0x234   : > { %v3206_v11 = vadd.f32 %v3205_v15, %v3117_v25 }
 0x236   : > { %v3295_v20 = vadd.f32 %v3294_v61, %v3206_v11  ;;  %v3391_v55 = vpop.f32.mrf.mxu0 }
 0x237   : > { %v11031_v17 = vpop.f32.mrf.mxu1 }
 0x238   : > { %3523 = vmatmul.bf16.gmra.mxu2 %v7746_v30  ;;  %v11033_v4 = vadd.f32 %v3383_v34, %v3295_v20  ;;  %3612 = vmatmul.bf16.gmra.mxu3 %v7750_v5  ;;  %v7782_v30 = vor.u32 %v9350_v50, %v7781_v46  ;;  %v7786_v5 = vor.u32 %v9346_v21, %v7783_v45  ;;  %v7817_v46 = vld [vmem:[#allocation2 + $0x210] sm:$0xf]  ;;  %v9359_v50 = vld [vmem:[#allocation2 + $0x230] sm:$0xf0] }
 0x239   : > { %3706 = vmatmul.bf16.gmra.mxu0 %v7790_v7  ;;  %v7818_v45 = vor.u32 %v9359_v50, %v7817_v46  ;;  %v9368_v46 = vld [vmem:[#allocation2 + $0x278] sm:$0xf0] }
 0x23b   : > { %v3208_v3 = vpop.f32.mrf.mxu2  ;;  %v3297_v60 = vpop.f32.mrf.mxu3 }
 0x23c   : > { %v3209_v57 = vadd.f32 %v3208_v3, %v12981_v41  ;;  %v7826_v3 = vor.u32 %v9360_v8, %v7825_v47 }
 0x23e   : > { %v3298_v53 = vadd.f32 %v3297_v60, %v3209_v57  ;;  %v3393_v34 = vpop.f32.mrf.mxu0 }
 0x23f   : > { %v3475_v9 = vpop.f32.mrf.mxu1 }
 0x240   : > { %v3387_v19 = vadd.f32 %v3386_v43, %v3298_v53 }
 0x242   : > { %v11041_v25 = vadd.f32 %v3475_v9, %v3387_v19 }
 0x243   : > { %v3210_v15 = vpop.f32.mrf.mxu2  ;;  %v3299_v61 = vpop.f32.mrf.mxu3 }
 0x244   : > { %v3211_v11 = vadd.f32 %v3210_v15, %v3122_v62  ;;  %v9355_v15 = vld [vmem:[#allocation2 + $0x214] sm:$0xf] }
 0x246   : > { %v3300_v20 = vadd.f32 %v3299_v61, %v3211_v11  ;;  %v3396_v41 = vpop.f32.mrf.mxu0  ;;  %v9369_v61 = vld [vmem:[#allocation2 + $0x280] sm:$0xf0] }
 0x247   : > { %v11043_v43 = vpop.f32.mrf.mxu1 }
 0x248   : > { %3528 = vmatmul.bf16.gmra.mxu2 %v7782_v30  ;;  %v11045_v7 = vadd.f32 %v3388_v63, %v3300_v20  ;;  %3617 = vmatmul.bf16.gmra.mxu3 %v7786_v5  ;;  %v7819_v63 = vld [vmem:[#allocation2 + $0x234] sm:$0xf0]  ;;  %v7861_v30 = vld [vmem:[#allocation2 + $0x260] sm:$0xf] }
 0x249   : > { %3711 = vmatmul.bf16.gmra.mxu0 %v7826_v3  ;;  %v7822_v47 = vor.u32 %v9355_v15, %v7819_v63  ;;  %v7862_v20 = vor.u32 %v9369_v61, %v7861_v30  ;;  %v9364_v63 = vld [vmem:[#allocation2 + $0x25c] sm:$0xf]  ;;  %v7897_v61 = vld [vmem:[#allocation2 + $0x2a8] sm:$0xf] }
 0x24b   : > { %v3213_v57 = vpop.f32.mrf.mxu2  ;;  %v3302_v53 = vpop.f32.mrf.mxu3 }
 0x24c   : > { %v3214_v60 = vadd.f32 %v3213_v57, %v10754_v29  ;;  %v12987_v57 = vld [vmem:[#allocation24_spill] sm:$0xff] }
 0x24e   : > { %v3303_v48 = vadd.f32 %v3302_v53, %v3214_v60  ;;  %v3398_v49 = vpop.f32.mrf.mxu0 }
 0x24f   : > { %v3480_v9 = vpop.f32.mrf.mxu1 }
 0x250   : > { %v3392_v19 = vadd.f32 %v3391_v55, %v3303_v48 }
 0x252   : > { %v11048_v42 = vadd.f32 %v3480_v9, %v3392_v19  ;;  %v7853_v19 = vld [vmem:[#allocation2 + $0x258] sm:$0xf] }
 0x253   : > { %v3215_v62 = vpop.f32.mrf.mxu2  ;;  %v3304_v11 = vpop.f32.mrf.mxu3 }
 0x254   : > { %12984 = vst [vmem:[#allocation7_spill] sm:$0xff] %v11048_v42  ;;  %v3216_v21 = vadd.f32 %v3215_v62, %v10762_v56 }
 0x256   : > { %v3305_v29 = vadd.f32 %v3304_v11, %v3216_v21  ;;  %v3677_v5 = vpop.f32.mrf.mxu0  ;;  %v12989_v21 = vld [vmem:[#allocation25_spill] sm:$0xff]  ;;  %v7854_v11 = vor.u32 %v9368_v46, %v7853_v19  ;;  %v7889_v46 = vld [vmem:[#allocation2 + $0x2a0] sm:$0xf] }
 0x257   : > { %v11051_v8 = vpop.f32.mrf.mxu1 }
 0x258   : > { %12985 = vst [vmem:[#allocation8_spill] sm:$0xff] %v11051_v8  ;;  %3533 = vmatmul.bf16.gmra.mxu2 %v7818_v45  ;;  %v11053_v55 = vadd.f32 %v3393_v34, %v3305_v29  ;;  %3622 = vmatmul.bf16.gmra.mxu3 %v7822_v47  ;;  %v7855_v34 = vld [vmem:[#allocation2 + $0x27c] sm:$0xf0]  ;;  %v9378_v29 = vld [vmem:[#allocation2 + $0x2c8] sm:$0xf0] }
 0x259   : > { %3716 = vmatmul.bf16.gmra.mxu0 %v7862_v20  ;;  %v7858_v20 = vor.u32 %v9364_v63, %v7855_v34 }
 0x25a   : > { %12986 = vst [vmem:[#allocation9_spill] sm:$0xff] %v11053_v55 }
 0x25b   : > { %v3218_v3 = vpop.f32.mrf.mxu2  ;;  %v3307_v53 = vpop.f32.mrf.mxu3 }
 0x25c   : > { %v3219_v60 = vadd.f32 %v3218_v3, %v12987_v57 }
 0x25e   : > { %v3308_v56 = vadd.f32 %v3307_v53, %v3219_v60  ;;  %v3679_v50 = vpop.f32.mrf.mxu0 }
 0x25f   : > { %v3485_v48 = vpop.f32.mrf.mxu1 }
 0x260   : > { %v3397_v9 = vadd.f32 %v3396_v41, %v3308_v56  ;;  %v7898_v41 = vor.u32 %v9378_v29, %v7897_v61 }
 0x262   : > { %v11056_v62 = vadd.f32 %v3485_v48, %v3397_v9  ;;  %v11065_v9 = vld [vmem:[%s12929_s2] ss:$0 sm:$0xff] }
 0x263   : > { %v3220_v15 = vpop.f32.mrf.mxu2  ;;  %v3309_v30 = vpop.f32.mrf.mxu3 }
 0x264   : > { %12988 = vst [vmem:[#allocation6_spill] sm:$0xff] %v11056_v62  ;;  %v3221_v45 = vadd.f32 %v3220_v15, %v12989_v21  ;;  %v9377_v15 = vld [vmem:[#allocation2 + $0x2c0] sm:$0xf0] }
 0x265   : > { %v9373_v21 = vld [vmem:[#allocation2 + $0x2a4] sm:$0xf]  ;;  %v7890_v61 = vor.u32 %v9377_v15, %v7889_v46 }
 0x266   : > { %v3310_v47 = vadd.f32 %v3309_v30, %v3221_v45  ;;  %v3682_v57 = vpop.f32.mrf.mxu0  ;;  %v7891_v45 = vld [vmem:[#allocation2 + $0x2c4] sm:$0xf0] }
 0x268   : > { %3538 = vmatmul.bf16.gmra.mxu2 %v7854_v11  ;;  %v11059_v3 = vadd.f32 %v3398_v49, %v3310_v47  ;;  %3627 = vmatmul.bf16.gmra.mxu3 %v7858_v20  ;;  %v11070_v49 = vld [vmem:[%s12930_s3] ss:$0 sm:$0xff] }
 0x269   : > { %3721 = vmatmul.bf16.gmra.mxu0 %v7898_v41  ;;  %v9649_v11 = vld [vmem:[%s12931_s4] sm:$0xff]  ;;  %v7894_v41 = vor.u32 %v9373_v21, %v7891_v45 }
 0x26a   : > { %12990 = vst [vmem:[#allocation10_spill] sm:$0xff] %v11059_v3  ;;  %6508 = vmatpush.bf16.msra.mxu1 %v9649_v11  ;;  %v9387_v3 = vld [vmem:[#allocation2 + $0x310] sm:$0xf0] }
 0x26b   : > { %v3499_v60 = vpop.f32.mrf.mxu2  ;;  %v3588_v56 = vpop.f32.mrf.mxu3 }
 0x26c   : > { %v3500_v53 = vadd.f32 %v3499_v60, %v10813_v1 }
 0x26e   : > { %v3589_v48 = vadd.f32 %v3588_v56, %v3500_v53  ;;  %v11072_v63 = vpop.f32.mrf.mxu0 }
 0x270   : > { %v3678_v19 = vadd.f32 %v3677_v5, %v3589_v48  ;;  %v7933_v48 = vld [vmem:[#allocation2 + $0x2f0] sm:$0xf] }
 0x272   : > { %v3761_v1 = vmul.f32 %v11065_v9, %v3678_v19 }
 0x273   : > { %v3501_v34 = vpop.f32.mrf.mxu2  ;;  %v3590_v29 = vpop.f32.mrf.mxu3 }
 0x274   : > { %v3797_v5 = vadd.f32 %v11070_v49, %v3761_v1  ;;  %v3502_v30 = vadd.f32 %v3501_v34, %v10821_v0  ;;  %v7934_v0 = vor.u32 %v9387_v3, %v7933_v48  ;;  %v7925_v3 = vld [vmem:[#allocation2 + $0x2e8] sm:$0xf] }
 0x276   : > { %v3829_v47 = vmax.f32 %v3797_v5, 0.0  ;;  %v3591_v20 = vadd.f32 %v3590_v29, %v3502_v30  ;;  %v11080_v19 = vpop.f32.mrf.mxu0 }
 0x278   : > { %v3878_v60 = vrot.slane %v3829_v47, 1  ;;  %v3928_v53 = vrot.slane %v3829_v47, 7  ;;  %v3680_v56 = vadd.f32 %v3679_v50, %v3591_v20  ;;  %3543 = vmatmul.bf16.gmra.mxu2 %v7890_v61  ;;  %3632 = vmatmul.bf16.gmra.mxu3 %v7894_v41 }
 0x279   : > { %3726 = vmatmul.bf16.gmra.mxu0 %v7934_v0 }
 0x27a   : > { %v4054_v62 = vsel %vm373_vm0, %v3878_v60, %v3928_v53  ;;  %v3762_v1 = vmul.f32 %v11065_v9, %v3680_v56  ;;  %v9382_v60 = vld [vmem:[#allocation2 + $0x2ec] sm:$0xf]  ;;  %v7927_v56 = vld [vmem:[#allocation2 + $0x30c] sm:$0xf0] }
 0x27b   : > { %v4088_v46 = vpack.c.bf16 %v4054_v62, %v4054_v62  ;;  %v3504_v15 = vpop.f32.mrf.mxu2  ;;  %v3593_v11 = vpop.f32.mrf.mxu3  ;;  %v9386_v62 = vld [vmem:[#allocation2 + $0x308] sm:$0xf0] }
 0x27c   : > { %v3798_v34 = vadd.f32 %v11070_v49, %v3762_v1  ;;  %v3505_v21 = vadd.f32 %v3504_v15, %v10839_v10 }
 0x27d   : > { %4135 = vst [vmem:[#allocation2 + $0x48] sm:$0xf] %v4088_v46  ;;  %v4190_v50 = vshrl.u32 %v4088_v46, 16  ;;  %v4193_v45 = vshll.u32 %v4088_v46, 16 }
 0x27e   : > { %4799 = vst [vmem:[#allocation2 + $0xc] sm:$0xf] %v4088_v46  ;;  %v3830_v5 = vmax.f32 %v3798_v34, 0.0  ;;  %v3594_v30 = vadd.f32 %v3593_v11, %v3505_v21  ;;  %v11086_v48 = vpop.f32.mrf.mxu0  ;;  %v7926_v11 = vor.u32 %v9386_v62, %v7925_v3 }
 0x27f   : > { %v4192_v61 = vrot.slane %v4190_v50, 4  ;;  %v4195_v29 = vrot.slane %v4193_v45, 5 }
 0x280   : > { %v3929_v47 = vrot.slane %v3830_v5, 7  ;;  %v4022_v20 = vrot.slane %v3830_v5, 5  ;;  %v3683_v41 = vadd.f32 %v3682_v57, %v3594_v30  ;;  %v7930_v5 = vor.u32 %v9382_v60, %v7927_v56 }
 0x281   : > { %v4196_v10 = vor.u32 %v4195_v29, %v4192_v61  ;;  %v8404_v30 = vrot.slane %v4088_v46, 9 }
 0x282   : > { %v3930_v1 = vsel %vm373_vm0, %v3928_v53, %v3929_v47  ;;  %v4070_v0 = vsel %vm373_vm0, %v3929_v47, %v4022_v20  ;;  %v3763_v15 = vmul.f32 %v11065_v9, %v3683_v41 }
 0x283   : > { %v4089_v34 = vpack.c.bf16 %v3930_v1, %v3930_v1  ;;  %v4090_v21 = vpack.c.bf16 %v4070_v0, %v4070_v0  ;;  %v3506_v50 = vpop.f32.mrf.mxu2  ;;  %v3595_v29 = vpop.f32.mrf.mxu3  ;;  %v4197_v53 = vrot.slane %v4196_v10, 4 }
 0x284   : > { %v3799_v45 = vadd.f32 %v11070_v49, %v3763_v15  ;;  %v3507_v57 = vadd.f32 %v3506_v50, %v10844_v44 }
 0x285   : > { %4136 = vst [vmem:[#allocation2 + $0x6c] sm:$0xf] %v4089_v34  ;;  %v4199_v8 = vshll.u32 %v4089_v34, 16  ;;  %v4203_v55 = vshrl.u32 %v4089_v34, 16  ;;  %v4641_v61 = vrot.slane %v4089_v34, 5  ;;  %v4209_v42 = vshll.u32 %v4090_v21, 16 }
 0x286   : > { %4800 = vst [vmem:[#allocation2 + $0x30] sm:$0xf] %v4089_v34  ;;  %v3831_v47 = vmax.f32 %v3799_v45, 0.0  ;;  %v3596_v20 = vadd.f32 %v3595_v29, %v3507_v57  ;;  %v4644_v15 = vrot.slane %v4090_v21, 5  ;;  %v11098_v10 = vpop.f32.mrf.mxu0  ;;  %v7969_v21 = vld [vmem:[#allocation2 + $0x338] sm:$0xf] }
 0x287   : > { %v4201_v41 = vrot.slane %v4199_v8, 5  ;;  %v4205_v1 = vrot.slane %v4203_v55, 4  ;;  %v4642_v0 = vsel %vm10605_vm6, %v8404_v30, %v4641_v61  ;;  %v4643_v44 = vrot.slane %v4641_v61, 4 }
 0x288   : > { %4769 = vst [vmem:[#allocation2 + $0x50] sm:$0xf] %v4642_v0  ;;  %v3877_v3 = vrot.slane %v3831_v47, 1  ;;  %v3925_v46 = vrot.slane %v3831_v47, 7  ;;  %v3685_v62 = vadd.f32 %v11072_v63, %v3596_v20  ;;  %3548 = vmatmul.bf16.gmra.mxu2 %v7926_v11  ;;  %3637 = vmatmul.bf16.gmra.mxu3 %v7930_v5  ;;  %v4211_v63 = vrot.slane %v4209_v42, 5 }
 0x289   : > { %v4202_v60 = vsel %vm10066_vm3, %v4197_v53, %v4201_v41  ;;  %v4206_v56 = vor.u32 %v4205_v1, %v4201_v41  ;;  %4901 = vst [vmem:[#allocation2 + $0x14] sm:$0xf] %v4642_v0  ;;  %v4645_v8 = vsel %vm10605_vm6, %v4643_v44, %v4644_v15  ;;  %v9396_v11 = vld [vmem:[#allocation2 + $0x358] sm:$0xf0]  ;;  %v7961_v15 = vld [vmem:[#allocation2 + $0x330] sm:$0xf] }
 0x28a   : > { %4557 = vst [vmem:[#allocation2 + $0x4c] sm:$0xf] %v4202_v60  ;;  %v4053_v55 = vsel %vm373_vm0, %v3877_v3, %v3925_v46  ;;  %v3764_v34 = vmul.f32 %v11065_v9, %v3685_v62  ;;  %v7970_v29 = vor.u32 %v9396_v11, %v7969_v21  ;;  %v9395_v62 = vld [vmem:[#allocation2 + $0x350] sm:$0xf0] }
 0x28b   : > { %v4207_v50 = vrot.slane %v4206_v56, 4  ;;  %4770 = vst [vmem:[#allocation2 + $0x74] sm:$0xf] %v4645_v8  ;;  %v4085_v45 = vpack.c.bf16 %v4053_v55, %v4053_v55  ;;  %v3509_v57 = vpop.f32.mrf.mxu2  ;;  %v3598_v5 = vpop.f32.mrf.mxu3  ;;  %v7963_v56 = vld [vmem:[#allocation2 + $0x354] sm:$0xf0] }
 0x28c   : > { %4857 = vst [vmem:[#allocation2 + $0x10] sm:$0xf] %v4202_v60  ;;  %v3800_v30 = vadd.f32 %v11070_v49, %v3764_v34  ;;  %v3510_v61 = vadd.f32 %v3509_v57, %v10865_v38  ;;  %3731 = vmatmul.bf16.gmra.mxu0 %v7970_v29  ;;  %v9391_v60 = vld [vmem:[#allocation2 + $0x334] sm:$0xf] }
 0x28d   : > { %v4212_v53 = vsel %vm10066_vm3, %v4207_v50, %v4211_v63  ;;  %4902 = vst [vmem:[#allocation2 + $0x38] sm:$0xf] %v4645_v8  ;;  %v4166_v47 = vshrl.u32 %v4085_v45, 16  ;;  %v4169_v20 = vshll.u32 %v4085_v45, 16  ;;  %v7966_v29 = vor.u32 %v9391_v60, %v7963_v56 }
 0x28e   : > { %4558 = vst [vmem:[#allocation2 + $0x70] sm:$0xf] %v4212_v53  ;;  %v3832_v41 = vmax.f32 %v3800_v30, 0.0  ;;  %v3599_v42 = vadd.f32 %v3598_v5, %v3510_v61  ;;  %v11109_v8 = vpop.f32.mrf.mxu0  ;;  %v7962_v61 = vor.u32 %v9395_v62, %v7961_v15 }
 0x28f   : > { %4858 = vst [vmem:[#allocation2 + $0x34] sm:$0xf] %v4212_v53  ;;  %v4168_v1 = vrot.slane %v4166_v47, 4  ;;  %v4171_v0 = vrot.slane %v4169_v20, 5  ;;  %v8403_v47 = vrot.slane %v4085_v45, 9 }
 0x290   : > { %4133 = vst [vmem:[#allocation2] sm:$0xf] %v4085_v45  ;;  %v3926_v44 = vrot.slane %v3832_v41, 7  ;;  %v4021_v3 = vrot.slane %v3832_v41, 5  ;;  %v3688_v38 = vadd.f32 %v11080_v19, %v3599_v42 }
 0x291   : > { %4933 = vst [vmem:[#allocation2 + $0x18] sm:$0xf] %v4085_v45  ;;  %v4172_v21 = vor.u32 %v4171_v0, %v4168_v1 }
 0x292   : > { %4137 = vst [vmem:[#allocation2 + $0x90] sm:$0xf] %v4085_v45  ;;  %v3927_v55 = vsel %vm373_vm0, %v3925_v46, %v3926_v44  ;;  %v4069_v34 = vsel %vm373_vm0, %v3926_v44, %v4021_v3  ;;  %v3765_v50 = vmul.f32 %v11065_v9, %v3688_v38 }
 0x293   : > { %4801 = vst [vmem:[#allocation2 + $0x54] sm:$0xf] %v4085_v45  ;;  %v11114_v63 = vpack.c.bf16 %v3927_v55, %v3927_v55  ;;  %v4087_v57 = vpack.c.bf16 %v4069_v34, %v4069_v34  ;;  %v3511_v11 = vpop.f32.mrf.mxu2  ;;  %v3600_v5 = vpop.f32.mrf.mxu3  ;;  %v4173_v41 = vrot.slane %v4172_v21, 4 }
 0x294   : > { %v3801_v19 = vadd.f32 %v11070_v49, %v3765_v50  ;;  %v3512_v30 = vadd.f32 %v3511_v11, %v10873_v36  ;;  %v9672_v11 = vld [vmem:[%s12931_s4 + $0xb8] sm:$0xff] }
 0x295   : > { %4134 = vst [vmem:[#allocation2 + $0x24] sm:$0xf] %v11114_v63  ;;  %v4175_v46 = vshll.u32 %v11114_v63, 16  ;;  %v4179_v53 = vshrl.u32 %v11114_v63, 16  ;;  %v4634_v20 = vrot.slane %v11114_v63, 5  ;;  %v4185_v42 = vshll.u32 %v4087_v57, 16  ;;  %6679 = vmatpush.bf16.msrb.mxu3 %v9672_v11 }
 0x296   : > { %4934 = vst [vmem:[#allocation2 + $0x3c] sm:$0xf] %v11114_v63  ;;  %v3833_v1 = vmax.f32 %v3801_v19, 0.0  ;;  %v3601_v0 = vadd.f32 %v3600_v5, %v3512_v30  ;;  %v4637_v3 = vrot.slane %v4087_v57, 5  ;;  %v11135_v34 = vpop.f32.mrf.mxu0  ;;  %v9664_v57 = vld [vmem:[%s12931_s4 + $0x78] sm:$0xff] }
 0x297   : > { %v4177_v44 = vrot.slane %v4175_v46, 5  ;;  %v4181_v36 = vrot.slane %v4179_v53, 4  ;;  %v11125_v15 = vsel %vm10605_vm6, %v8403_v47, %v4634_v20  ;;  %4138 = vst [vmem:[#allocation2 + $0xb4] sm:$0xf] %v11114_v63  ;;  %v4636_v38 = vrot.slane %v4634_v20, 4  ;;  %6590 = vmatpush.bf16.msrb.mxu2 %v9664_v57 }
 0x298   : > { %4767 = vst [vmem:[#allocation2 + $0x8] sm:$0xf] %v11125_v15  ;;  %v3879_v45 = vrot.slane %v3833_v1, 1  ;;  %v3931_v62 = vrot.slane %v3833_v1, 7  ;;  %v3690_v60 = vadd.f32 %v11086_v48, %v3601_v0  ;;  %3553 = vmatmul.bf16.gmra.mxu2 %v7962_v61  ;;  %3642 = vmatmul.bf16.gmra.mxu3 %v7966_v29  ;;  %v4187_v30 = vrot.slane %v4185_v42, 5  ;;  %v9680_v0 = vld [vmem:[%s12931_s4 + $0xf8] sm:$0xff] }
 0x299   : > { %v11132_v56 = vsel %vm10066_vm3, %v4173_v41, %v4177_v44  ;;  %v4182_v55 = vor.u32 %v4181_v36, %v4177_v44  ;;  %4771 = vst [vmem:[#allocation2 + $0x98] sm:$0xf] %v11125_v15  ;;  %v11140_v21 = vsel %vm10605_vm6, %v4636_v38, %v4637_v3  ;;  %v8421_v20 = vld [vmem:[#allocation2] sm:$0xf]  ;;  %v9688_v3 = vld [vmem:[%s12931_s4 + $0x138] sm:$0xff]  ;;  %6768 = vmatpush.bf16.msrb.mxu0 %v9680_v0 }
 0x29a   : > { %4555 = vst [vmem:[#allocation2 + $0x4] sm:$0xf] %v11132_v56  ;;  %v4055_v50 = vsel %vm373_vm0, %v3879_v45, %v3931_v62  ;;  %v3766_v48 = vmul.f32 %v11065_v9, %v3690_v60  ;;  %v8005_v38 = vld [vmem:[#allocation2 + $0x380] sm:$0xf]  ;;  %6857 = vmatpush.bf16.msrb.mxu1 %v9688_v3 }
 0x29b   : > { %v4183_v19 = vrot.slane %v4182_v55, 4  ;;  %4768 = vst [vmem:[#allocation2 + $0x2c] sm:$0xf] %v11140_v21  ;;  %v11151_v61 = vpack.c.bf16 %v4055_v50, %v4055_v50  ;;  %v3514_v46 = vpop.f32.mrf.mxu2  ;;  %v3603_v1 = vpop.f32.mrf.mxu3  ;;  %v9405_v55 = vld [vmem:[#allocation2 + $0x3a0] sm:$0xf0] }
 0x29c   : > { %4772 = vst [vmem:[#allocation2 + $0xbc] sm:$0xf] %v11140_v21  ;;  %v3802_v53 = vadd.f32 %v11070_v49, %v3766_v48  ;;  %v3515_v47 = vadd.f32 %v3514_v46, %v10891_v23  ;;  %v9509_v5 = vld [vmem:[#allocation2 + $0x20] sm:$0xf0]  ;;  %v8006_v11 = vor.u32 %v9405_v55, %v8005_v38  ;;  %v9404_v46 = vld [vmem:[#allocation2 + $0x398] sm:$0xf0] }
 0x29d   : > { %v4188_v29 = vsel %vm10066_vm3, %v4183_v19, %v4187_v30  ;;  %4903 = vst [vmem:[#allocation2 + $0x5c] sm:$0xf] %v11125_v15  ;;  %v4214_v41 = vshrl.u32 %v11151_v61, 16  ;;  %v4217_v42 = vshll.u32 %v11151_v61, 16  ;;  %v8422_v23 = vor.u32 %v9509_v5, %v8421_v20  ;;  %v7997_v30 = vld [vmem:[#allocation2 + $0x378] sm:$0xf] }
 0x29e   : > { %4556 = vst [vmem:[#allocation2 + $0x28] sm:$0xf] %v4188_v29  ;;  %v3834_v44 = vmax.f32 %v3802_v53, 0.0  ;;  %v3604_v36 = vadd.f32 %v3603_v1, %v3515_v47  ;;  %v11169_v53 = vpop.f32.mrf.mxu0  ;;  %3736 = vmatmul.bf16.gmra.mxu0 %v8006_v11 }
 0x29f   : > { %4560 = vst [vmem:[#allocation2 + $0xb8] sm:$0xf] %v4188_v29  ;;  %v4216_v45 = vrot.slane %v4214_v41, 4  ;;  %v4219_v60 = vrot.slane %v4217_v42, 5  ;;  %6509 = vmatmul.bf16.vlgmr.msra.gmra.mxu1 %v8422_v23  ;;  %v9400_v41 = vld [vmem:[#allocation2 + $0x37c] sm:$0xf]  ;;  %v7998_v23 = vor.u32 %v9404_v46, %v7997_v30 }
 0x2a0   : > { %4860 = vst [vmem:[#allocation2 + $0x7c] sm:$0xf] %v4188_v29  ;;  %v3932_v50 = vrot.slane %v3834_v44, 7  ;;  %v4023_v48 = vrot.slane %v3834_v44, 5  ;;  %v3693_v57 = vadd.f32 %v11098_v10, %v3604_v36  ;;  %v7999_v10 = vld [vmem:[#allocation2 + $0x39c] sm:$0xf0] }
 0x2a1   : > { %4904 = vst [vmem:[#allocation2 + $0x80] sm:$0xf] %v11140_v21  ;;  %v4220_v19 = vor.u32 %v4219_v60, %v4216_v45  ;;  %v8405_v44 = vrot.slane %v11151_v61, 9  ;;  %v8002_v60 = vor.u32 %v9400_v41, %v7999_v10 }
 0x2a2   : > { %4965 = vst [vmem:[#allocation2 + $0x1c] sm:$0xf] %v11132_v56  ;;  %v3933_v47 = vsel %vm373_vm0, %v3931_v62, %v3932_v50  ;;  %v4071_v20 = vsel %vm373_vm0, %v3932_v50, %v4023_v48  ;;  %v3767_v5 = vmul.f32 %v11065_v9, %v3693_v57 }
 0x2a3   : > { %4966 = vst [vmem:[#allocation2 + $0x40] sm:$0xf] %v4188_v29  ;;  %v11175_v42 = vpack.c.bf16 %v3933_v47, %v3933_v47  ;;  %v4093_v1 = vpack.c.bf16 %v4071_v20, %v4071_v20  ;;  %v3516_v0 = vpop.f32.mrf.mxu2  ;;  %v3605_v45 = vpop.f32.mrf.mxu3 }
 0x2a4   : > { %4997 = vst [vmem:[#allocation2 + $0x20] sm:$0xf] %v11125_v15  ;;  %v3803_v36 = vadd.f32 %v11070_v49, %v3767_v5  ;;  %v3517_v62 = vadd.f32 %v3516_v0, %v10898_v18  ;;  %v4221_v15 = vrot.slane %v4220_v19, 4 }
 0x2a5   : > { %4998 = vst [vmem:[#allocation2 + $0x44] sm:$0xf] %v11140_v21  ;;  %v4223_v3 = vshll.u32 %v11175_v42, 16  ;;  %v4227_v38 = vshrl.u32 %v11175_v42, 16  ;;  %v4648_v29 = vrot.slane %v11175_v42, 5  ;;  %v4233_v55 = vshll.u32 %v4093_v1, 16 }
 0x2a6   : > { %4559 = vst [vmem:[#allocation2 + $0x94] sm:$0xf] %v11132_v56  ;;  %v3835_v50 = vmax.f32 %v3803_v36, 0.0  ;;  %v3606_v48 = vadd.f32 %v3605_v45, %v3517_v62  ;;  %v4651_v11 = vrot.slane %v4093_v1, 5  ;;  %v9518_v36 = vld [vmem:[#allocation2 + $0x68] sm:$0xf0] }
 0x2a7   : > { %4802 = vst [vmem:[#allocation2 + $0x78] sm:$0xf] %v11114_v63  ;;  %v4225_v18 = vrot.slane %v4223_v3, 5  ;;  %v4229_v57 = vrot.slane %v4227_v38, 4  ;;  %v11189_v21 = vsel %vm10605_vm6, %v8405_v44, %v4648_v29  ;;  %v4650_v30 = vrot.slane %v4648_v29, 4 }
 0x2a8   : > { %4859 = vst [vmem:[#allocation2 + $0x58] sm:$0xf] %v11132_v56  ;;  %v3880_v46 = vrot.slane %v3835_v50, 1  ;;  %v3934_v47 = vrot.slane %v3835_v50, 7  ;;  %v3695_v20 = vadd.f32 %v11109_v8, %v3606_v48  ;;  %3558 = vmatmul.bf16.gmra.mxu2 %v7998_v23  ;;  %3647 = vmatmul.bf16.gmra.mxu3 %v8002_v60  ;;  %v11205_v8 = vpop.f32.mrf.mxu0  ;;  %v4235_v1 = vrot.slane %v4233_v55, 5 }
 0x2a9   : > { %4139 = vst [vmem:[#allocation2 + $0xd8] sm:$0xf] %v11151_v61  ;;  %v11196_v63 = vsel %vm10066_vm3, %v4221_v15, %v4225_v18  ;;  %v4230_v19 = vor.u32 %v4229_v57, %v4225_v18  ;;  %v11201_v5 = vsel %vm10605_vm6, %v4650_v30, %v4651_v11  ;;  %v8041_v3 = vld [vmem:[#allocation2 + $0x3c8] sm:$0xf]  ;;  %v9414_v48 = vld [vmem:[#allocation2 + $0x3e8] sm:$0xf0] }
 0x2aa   : > { %4803 = vst [vmem:[#allocation2 + $0x9c] sm:$0xf] %v11151_v61  ;;  %v4056_v56 = vsel %vm373_vm0, %v3880_v46, %v3934_v47  ;;  %v3768_v41 = vmul.f32 %v11065_v9, %v3695_v20  ;;  %v8457_v60 = vld [vmem:[#allocation2 + $0x48] sm:$0xf]  ;;  %v8042_v57 = vor.u32 %v9414_v48, %v8041_v3 }
 0x2ab   : > { %4935 = vst [vmem:[#allocation2 + $0x60] sm:$0xf] %v11151_v61  ;;  %v4231_v10 = vrot.slane %v4230_v19, 4  ;;  %v11208_v0 = vpack.c.bf16 %v4056_v56, %v4056_v56  ;;  %v3519_v44 = vpop.f32.mrf.mxu2  ;;  %v3608_v45 = vpop.f32.mrf.mxu3  ;;  %v8458_v50 = vor.u32 %v9518_v36, %v8457_v60  ;;  %v8033_v19 = vld [vmem:[#allocation2 + $0x3c0] sm:$0xf] }
 0x2ac   : > { %4140 = vst [vmem:[#allocation2 + $0xfc] sm:$0xf] %v11175_v42  ;;  %v3804_v62 = vadd.f32 %v11070_v49, %v3768_v41  ;;  %v3520_v23 = vadd.f32 %v3519_v44, %v10937_v16  ;;  %v9413_v56 = vld [vmem:[#allocation2 + $0x3e0] sm:$0xf0]  ;;  %v8035_v36 = vld [vmem:[#allocation2 + $0x3e4] sm:$0xf0] }
 0x2ad   : > { %v4236_v38 = vsel %vm10066_vm3, %v4231_v10, %v4235_v1  ;;  %4561 = vst [vmem:[#allocation2 + $0xdc] sm:$0xf] %v11196_v63  ;;  %v4238_v61 = vshrl.u32 %v11208_v0, 16  ;;  %v4241_v29 = vshll.u32 %v11208_v0, 16  ;;  %v9409_v44 = vld [vmem:[#allocation2 + $0x3c4] sm:$0xf] }
 0x2ae   : > { %4562 = vst [vmem:[#allocation2 + $0x100] sm:$0xf] %v4236_v38  ;;  %v3836_v15 = vmax.f32 %v3804_v62, 0.0  ;;  %v3609_v55 = vadd.f32 %v3608_v45, %v3520_v23  ;;  %3741 = vmatmul.bf16.gmra.mxu0 %v8042_v57  ;;  %v8034_v45 = vor.u32 %v9413_v56, %v8033_v19  ;;  %v8038_v48 = vor.u32 %v9409_v44, %v8035_v36 }
 0x2af   : > { %4773 = vst [vmem:[#allocation2 + $0xe0] sm:$0xf] %v11189_v21  ;;  %v4240_v16 = vrot.slane %v4238_v61, 4  ;;  %v4243_v18 = vrot.slane %v4241_v29, 5  ;;  %6514 = vmatmul.bf16.gmra.mxu1 %v8458_v50  ;;  %v8406_v61 = vrot.slane %v11208_v0, 9 }
 0x2b0   : > { %4774 = vst [vmem:[#allocation2 + $0x104] sm:$0xf] %v11201_v5  ;;  %v3935_v11 = vrot.slane %v3836_v15, 7  ;;  %v4024_v30 = vrot.slane %v3836_v15, 5  ;;  %v3698_v46 = vadd.f32 %v11135_v34, %v3609_v55  ;;  %v11226_v62 = vpop.f32.mrf.mxu0 }
 0x2b1   : > { %4804 = vst [vmem:[#allocation2 + $0xc0] sm:$0xf] %v11175_v42  ;;  %v4244_v20 = vor.u32 %v4243_v18, %v4240_v16 }
 0x2b2   : > { %4861 = vst [vmem:[#allocation2 + $0xa0] sm:$0xf] %v11196_v63  ;;  %v3936_v41 = vsel %vm373_vm0, %v3934_v47, %v3935_v11  ;;  %v4072_v10 = vsel %vm373_vm0, %v3935_v11, %v4024_v30  ;;  %v3769_v1 = vmul.f32 %v11065_v9, %v3698_v46 }
 0x2b3   : > { %4862 = vst [vmem:[#allocation2 + $0xc4] sm:$0xf] %v4236_v38  ;;  %v11228_v34 = vpack.c.bf16 %v3936_v41, %v3936_v41  ;;  %v4096_v23 = vpack.c.bf16 %v4072_v10, %v4072_v10  ;;  %v3521_v3 = vpop.f32.mrf.mxu2  ;;  %v3610_v50 = vpop.f32.mrf.mxu3  ;;  %v4245_v16 = vrot.slane %v4244_v20, 4 }
 0x2b4   : > { %4905 = vst [vmem:[#allocation2 + $0xa4] sm:$0xf] %v11189_v21  ;;  %v3805_v47 = vadd.f32 %v11070_v49, %v3769_v1  ;;  %v3522_v29 = vadd.f32 %v3521_v3, %v10947_v37 }
 0x2b5   : > { %4906 = vst [vmem:[#allocation2 + $0xc8] sm:$0xf] %v11201_v5  ;;  %v4247_v60 = vshll.u32 %v11228_v34, 16  ;;  %v4251_v15 = vshrl.u32 %v11228_v34, 16  ;;  %v4655_v55 = vrot.slane %v11228_v34, 5  ;;  %v4257_v18 = vshll.u32 %v4096_v23, 16 }
 0x2b6   : > { %4936 = vst [vmem:[#allocation2 + $0x84] sm:$0xf] %v11175_v42  ;;  %v3837_v57 = vmax.f32 %v3805_v47, 0.0  ;;  %v3611_v11 = vadd.f32 %v3610_v50, %v3522_v29  ;;  %v4658_v19 = vrot.slane %v4096_v23, 5 }
 0x2b7   : > { %4967 = vst [vmem:[#allocation2 + $0x64] sm:$0xf] %v11196_v63  ;;  %v4249_v37 = vrot.slane %v4247_v60, 5  ;;  %v4253_v30 = vrot.slane %v4251_v15, 4  ;;  %v11242_v46 = vsel %vm10605_vm6, %v8406_v61, %v4655_v55  ;;  %v4657_v56 = vrot.slane %v4655_v55, 4 }
 0x2b8   : > { %4968 = vst [vmem:[#allocation2 + $0x88] sm:$0xf] %v4236_v38  ;;  %v3881_v41 = vrot.slane %v3837_v57, 1  ;;  %v3937_v10 = vrot.slane %v3837_v57, 7  ;;  %v3700_v1 = vadd.f32 %v11169_v53, %v3611_v11  ;;  %3563 = vmatmul.bf16.gmra.mxu2 %v8034_v45  ;;  %3652 = vmatmul.bf16.gmra.mxu3 %v8038_v48  ;;  %v9527_v61 = vld [vmem:[#allocation2 + $0xb0] sm:$0xf0]  ;;  %v11263_v47 = vpop.f32.mrf.mxu0 }
 0x2b9   : > { %4999 = vst [vmem:[#allocation2 + $0x68] sm:$0xf] %v11189_v21  ;;  %v11248_v42 = vsel %vm10066_vm3, %v4245_v16, %v4249_v37  ;;  %v4254_v63 = vor.u32 %v4253_v30, %v4249_v37  ;;  %v11253_v20 = vsel %vm10605_vm6, %v4657_v56, %v4658_v19  ;;  %v4259_v21 = vrot.slane %v4257_v18, 5  ;;  %v8493_v55 = vld [vmem:[#allocation2 + $0x90] sm:$0xf] }
 0x2ba   : > { %5000 = vst [vmem:[#allocation2 + $0x8c] sm:$0xf] %v11201_v5  ;;  %v4057_v38 = vsel %vm373_vm0, %v3881_v41, %v3937_v10  ;;  %v3770_v44 = vmul.f32 %v11065_v9, %v3700_v1  ;;  %v8494_v57 = vor.u32 %v9527_v61, %v8493_v55  ;;  %v8069_v11 = vld [vmem:[#allocation2 + $0x408] sm:$0xf]  ;;  %v9679_v56 = vld [vmem:[%s12931_s4 + $0xf0] sm:$0xff] }
 0x2bb   : > { %4141 = vst [vmem:[#allocation2 + $0x120] sm:$0xf] %v11208_v0  ;;  %v4255_v53 = vrot.slane %v4254_v63, 4  ;;  %v11258_v36 = vpack.c.bf16 %v4057_v38, %v4057_v38  ;;  %v3524_v23 = vpop.f32.mrf.mxu2  ;;  %v3613_v15 = vpop.f32.mrf.mxu3  ;;  %v9687_v63 = vld [vmem:[%s12931_s4 + $0x130] sm:$0xff]  ;;  %v9422_v38 = vld [vmem:[#allocation2 + $0x428] sm:$0xf0]  ;;  %6769 = vmatpush.bf16.msrb.mxu0 %v9679_v56 }
 0x2bc   : > { %4805 = vst [vmem:[#allocation2 + $0xe4] sm:$0xf] %v11208_v0  ;;  %v3806_v5 = vadd.f32 %v11070_v49, %v3770_v44  ;;  %v3525_v3 = vadd.f32 %v3524_v23, %v10963_v24  ;;  %v9663_v24 = vld [vmem:[%s12931_s4 + $0x70] sm:$0xff]  ;;  %6858 = vmatpush.bf16.msrb.mxu1 %v9687_v63  ;;  %v8070_v55 = vor.u32 %v9422_v38, %v8069_v11  ;;  %v9662_v11 = vld [vmem:[%s12931_s4 + $0x68] sm:$0xff] }
 0x2bd   : > { %4937 = vst [vmem:[#allocation2 + $0xa8] sm:$0xf] %v11208_v0  ;;  %v11268_v29 = vsel %vm10066_vm3, %v4255_v53, %v4259_v21  ;;  %v4262_v45 = vshrl.u32 %v11258_v36, 16  ;;  %v4265_v60 = vshll.u32 %v11258_v36, 16  ;;  %v9671_v0 = vld [vmem:[%s12931_s4 + $0xb0] sm:$0xff]  ;;  %6591 = vmatpush.bf16.msrb.mxu2 %v9663_v24  ;;  %v8407_v1 = vrot.slane %v11258_v36, 9 }
 0x2be   : > { %4142 = vst [vmem:[#allocation2 + $0x144] sm:$0xf] %v11228_v34  ;;  %v3838_v50 = vmax.f32 %v3806_v5, 0.0  ;;  %v3614_v48 = vadd.f32 %v3613_v15, %v3525_v3  ;;  %6680 = vmatpush.bf16.msrb.mxu3 %v9671_v0  ;;  %v8077_v21 = vld [vmem:[#allocation2 + $0x410] sm:$0xf]  ;;  %v9670_v56 = vld [vmem:[%s12931_s4 + $0xa8] sm:$0xff] }
 0x2bf   : > { %4563 = vst [vmem:[#allocation2 + $0x124] sm:$0xf] %v11248_v42  ;;  %v4264_v16 = vrot.slane %v4262_v45, 4  ;;  %v4267_v18 = vrot.slane %v4265_v60, 5  ;;  %6519 = vmatmul.bf16.gmra.mxu1 %v8494_v57  ;;  %v9423_v23 = vld [vmem:[#allocation2 + $0x430] sm:$0xf0] }
 0x2c0   : > { %4564 = vst [vmem:[#allocation2 + $0x148] sm:$0xf] %v11268_v29  ;;  %v3938_v37 = vrot.slane %v3838_v50, 7  ;;  %v4025_v30 = vrot.slane %v3838_v50, 5  ;;  %v3703_v19 = vadd.f32 %v11205_v8, %v3614_v48  ;;  %v9418_v45 = vld [vmem:[#allocation2 + $0x40c] sm:$0xf]  ;;  %v8078_v50 = vor.u32 %v9423_v23, %v8077_v21  ;;  %v11300_v24 = vpop.f32.mrf.mxu0 }
 0x2c1   : > { %4775 = vst [vmem:[#allocation2 + $0x128] sm:$0xf] %v11242_v46  ;;  %v4268_v41 = vor.u32 %v4267_v18, %v4264_v16  ;;  %v8071_v60 = vld [vmem:[#allocation2 + $0x42c] sm:$0xf0]  ;;  %6592 = vmatpush.bf16.msrb.mxu2 %v9662_v11 }
 0x2c2   : > { %4776 = vst [vmem:[#allocation2 + $0x14c] sm:$0xf] %v11253_v20  ;;  %v3939_v44 = vsel %vm373_vm0, %v3937_v10, %v3938_v37  ;;  %v4073_v8 = vsel %vm373_vm0, %v3938_v37, %v4025_v30  ;;  %v3771_v53 = vmul.f32 %v11065_v9, %v3703_v19  ;;  %3746 = vmatmul.bf16.gmra.mxu0 %v8078_v50 }
 0x2c3   : > { %4806 = vst [vmem:[#allocation2 + $0x108] sm:$0xf] %v11228_v34  ;;  %v11295_v5 = vpack.c.bf16 %v3939_v44, %v3939_v44  ;;  %v4099_v3 = vpack.c.bf16 %v4073_v8, %v4073_v8  ;;  %v3526_v61 = vpop.f32.mrf.mxu2  ;;  %v4269_v0 = vrot.slane %v4268_v41, 4  ;;  %v3615_v57 = vpop.f32.mrf.mxu3  ;;  %v9678_v8 = vld [vmem:[%s12931_s4 + $0xe8] sm:$0xff]  ;;  %6681 = vmatpush.bf16.msrb.mxu3 %v9670_v56 }
 0x2c4   : > { %4863 = vst [vmem:[#allocation2 + $0xe8] sm:$0xf] %v11248_v42  ;;  %v3807_v10 = vadd.f32 %v11070_v49, %v3771_v53  ;;  %v3527_v15 = vadd.f32 %v3526_v61, %v10966_v12  ;;  %v8074_v12 = vor.u32 %v9418_v45, %v8071_v60  ;;  %6770 = vmatpush.bf16.msrb.mxu0 %v9678_v8 }
 0x2c5   : > { %4864 = vst [vmem:[#allocation2 + $0x10c] sm:$0xf] %v11268_v29  ;;  %v4271_v48 = vshll.u32 %v11295_v5, 16  ;;  %v4275_v16 = vshrl.u32 %v11295_v5, 16  ;;  %v4662_v18 = vrot.slane %v11295_v5, 5  ;;  %v4281_v37 = vshll.u32 %v4099_v3, 16 }
 0x2c6   : > { %4907 = vst [vmem:[#allocation2 + $0xec] sm:$0xf] %v11242_v46  ;;  %v3839_v30 = vmax.f32 %v3807_v10, 0.0  ;;  %v3616_v19 = vadd.f32 %v3615_v57, %v3527_v15  ;;  %v4665_v44 = vrot.slane %v4099_v3, 5 }
 0x2c7   : > { %4908 = vst [vmem:[#allocation2 + $0x110] sm:$0xf] %v11253_v20  ;;  %v4273_v41 = vrot.slane %v4271_v48, 5  ;;  %v4277_v63 = vrot.slane %v4275_v16, 4  ;;  %v11316_v38 = vsel %vm10605_vm6, %v8407_v1, %v4662_v18  ;;  %v4664_v53 = vrot.slane %v4662_v18, 4  ;;  %v9677_v48 = vld [vmem:[%s12931_s4 + $0xe0] sm:$0xff] }
 0x2c8   : > { %4938 = vst [vmem:[#allocation2 + $0xcc] sm:$0xf] %v11228_v34  ;;  %v3882_v21 = vrot.slane %v3839_v30, 1  ;;  %v3940_v23 = vrot.slane %v3839_v30, 7  ;;  %v3705_v61 = vadd.f32 %v11226_v62, %v3616_v19  ;;  %3568 = vmatmul.bf16.gmra.mxu2 %v8070_v55  ;;  %3657 = vmatmul.bf16.gmra.mxu3 %v8074_v12  ;;  %v4283_v60 = vrot.slane %v4281_v37, 5  ;;  %v11358_v19 = vpop.f32.mrf.mxu0 }
 0x2c9   : > { %4969 = vst [vmem:[#allocation2 + $0xac] sm:$0xf] %v11248_v42  ;;  %v11326_v1 = vsel %vm10066_vm3, %v4269_v0, %v4273_v41  ;;  %v4278_v3 = vor.u32 %v4277_v63, %v4273_v41  ;;  %v11331_v34 = vsel %vm10605_vm6, %v4664_v53, %v4665_v44  ;;  %v9536_v55 = vld [vmem:[#allocation2 + $0xf8] sm:$0xf0]  ;;  %v9661_v0 = vld [vmem:[%s12931_s4 + $0x60] sm:$0xff]  ;;  %6771 = vmatpush.bf16.msrb.mxu0 %v9677_v48 }
 0x2ca   : > { %4970 = vst [vmem:[#allocation2 + $0xd0] sm:$0xf] %v11268_v29  ;;  %v4058_v45 = vsel %vm373_vm0, %v3882_v21, %v3940_v23  ;;  %v3772_v62 = vmul.f32 %v11065_v9, %v3705_v61  ;;  %v8529_v30 = vld [vmem:[#allocation2 + $0xd8] sm:$0xf]  ;;  %6593 = vmatpush.bf16.msrb.mxu2 %v9661_v0  ;;  %v8105_v41 = vld [vmem:[#allocation2 + $0x450] sm:$0xf] }
 0x2cb   : > { %5001 = vst [vmem:[#allocation2 + $0xb0] sm:$0xf] %v11242_v46  ;;  %v4279_v42 = vrot.slane %v4278_v3, 4  ;;  %v11336_v10 = vpack.c.bf16 %v4058_v45, %v4058_v45  ;;  %v3529_v15 = vpop.f32.mrf.mxu2  ;;  %v9669_v46 = vld [vmem:[%s12931_s4 + $0xa0] sm:$0xff]  ;;  %v3618_v18 = vpop.f32.mrf.mxu3  ;;  %v8530_v56 = vor.u32 %v9536_v55, %v8529_v30  ;;  %v9431_v63 = vld [vmem:[#allocation2 + $0x470] sm:$0xf0] }
 0x2cc   : > { %5002 = vst [vmem:[#allocation2 + $0xd4] sm:$0xf] %v11253_v20  ;;  %v3808_v29 = vadd.f32 %v11070_v49, %v3772_v62  ;;  %v3530_v50 = vadd.f32 %v3529_v15, %v10971_v13  ;;  %6682 = vmatpush.bf16.msrb.mxu3 %v9669_v46  ;;  %v11363_v21 = vld [vmem:[#allocation2 + $0x454] sm:$0xf]  ;;  %v11366_v61 = vld [vmem:[#allocation2 + $0x474] sm:$0xf0] }
 0x2cd   : > { %4143 = vst [vmem:[#allocation2 + $0x168] sm:$0xf] %v11258_v36  ;;  %v11353_v20 = vsel %vm10066_vm3, %v4279_v42, %v4283_v60  ;;  %v4286_v13 = vshrl.u32 %v11336_v10, 16  ;;  %v4289_v16 = vshll.u32 %v11336_v10, 16  ;;  %v9432_v60 = vld [vmem:[#allocation2 + $0x478] sm:$0xf0]  ;;  %v8110_v30 = vor.u32 %v11363_v21, %v11366_v61 }
 0x2ce   : > { %4807 = vst [vmem:[#allocation2 + $0x12c] sm:$0xf] %v11258_v36  ;;  %v3840_v57 = vmax.f32 %v3808_v29, 0.0  ;;  %v3619_v37 = vadd.f32 %v3618_v18, %v3530_v50  ;;  %v9668_v15 = vld [vmem:[%s12931_s4 + $0x98] sm:$0xff]  ;;  %v8408_v55 = vrot.slane %v11336_v10, 9  ;;  %v9667_v18 = vld [vmem:[%s12931_s4 + $0x90] sm:$0xff] }
 0x2cf   : > { %4939 = vst [vmem:[#allocation2 + $0xf0] sm:$0xf] %v11258_v36  ;;  %v4288_v12 = vrot.slane %v4286_v13, 4  ;;  %v4291_v11 = vrot.slane %v4289_v16, 5  ;;  %6524 = vmatmul.bf16.gmra.mxu1 %v8530_v56  ;;  %v8113_v36 = vld [vmem:[#allocation2 + $0x458] sm:$0xf]  ;;  %v8106_v13 = vor.u32 %v9431_v63, %v8105_v41 }
 0x2d0   : > { %4144 = vst [vmem:[#allocation2 + $0x18c] sm:$0xf] %v11295_v5  ;;  %v3941_v44 = vrot.slane %v3840_v57, 7  ;;  %v4026_v8 = vrot.slane %v3840_v57, 5  ;;  %v3708_v53 = vadd.f32 %v11263_v47, %v3619_v37  ;;  %v9660_v47 = vld [vmem:[%s12931_s4 + $0x58] sm:$0xff]  ;;  %v8114_v0 = vor.u32 %v9432_v60, %v8113_v36  ;;  %6683 = vmatpush.bf16.msrb.mxu3 %v9668_v15  ;;  %v9659_v16 = vld [vmem:[%s12931_s4 + $0x50] sm:$0xff] }
 0x2d1   : > { %4565 = vst [vmem:[#allocation2 + $0x16c] sm:$0xf] %v11326_v1  ;;  %v4292_v3 = vor.u32 %v4291_v11, %v4288_v12  ;;  %6594 = vmatpush.bf16.msrb.mxu2 %v9660_v47  ;;  %v9675_v12 = vld [vmem:[%s12931_s4 + $0xd0] sm:$0xff]  ;;  %v9658_v47 = vld [vmem:[%s12931_s4 + $0x48] sm:$0xff] }
 0x2d2   : > { %4566 = vst [vmem:[#allocation2 + $0x190] sm:$0xf] %v11353_v20  ;;  %v3942_v45 = vsel %vm373_vm0, %v3940_v23, %v3941_v44  ;;  %v4074_v62 = vsel %vm373_vm0, %v3941_v44, %v4026_v8  ;;  %v3773_v42 = vmul.f32 %v11065_v9, %v3708_v53  ;;  %v9676_v9 = vld [vmem:[%s12931_s4 + $0xd8] sm:$0xff]  ;;  %3751 = vmatmul.bf16.gmra.mxu0 %v8114_v0  ;;  %v11404_v44 = vpop.f32.mrf.mxu0  ;;  %v9666_v15 = vld [vmem:[%s12931_s4 + $0x88] sm:$0xff] }
 0x2d3   : > { %4777 = vst [vmem:[#allocation2 + $0x170] sm:$0xf] %v11316_v38  ;;  %v11380_v29 = vpack.c.bf16 %v3942_v45, %v3942_v45  ;;  %v4102_v23 = vpack.c.bf16 %v4074_v62, %v4074_v62  ;;  %v3531_v50 = vpop.f32.mrf.mxu2  ;;  %6772 = vmatpush.bf16.msrb.mxu0 %v9676_v9  ;;  %v4293_v11 = vrot.slane %v4292_v3, 4 }
 0x2d4   : > { %4778 = vst [vmem:[#allocation2 + $0x194] sm:$0xf] %v11331_v34  ;;  %v3809_v46 = vadd.f32 %v11070_v49, %v3773_v42  ;;  %v3532_v48 = vadd.f32 %v3531_v50, %v10973_v59  ;;  %v3620_v59 = vpop.f32.mrf.mxu3  ;;  %6684 = vmatpush.bf16.msrb.mxu3 %v9667_v18  ;;  %v11436_v50 = vld [vmem:[%s12929_s2] ss:$0 sm:$0xff] }
 0x2d5   : > { %4808 = vst [vmem:[#allocation2 + $0x150] sm:$0xf] %v11295_v5  ;;  %v4295_v57 = vshll.u32 %v11380_v29, 16  ;;  %v4299_v37 = vshrl.u32 %v11380_v29, 16  ;;  %v4669_v49 = vrot.slane %v11380_v29, 5  ;;  %v4305_v56 = vshll.u32 %v4102_v23, 16  ;;  %6595 = vmatpush.bf16.msrb.mxu2 %v9659_v16 }
 0x2d6   : > { %4865 = vst [vmem:[#allocation2 + $0x130] sm:$0xf] %v11326_v1  ;;  %v3841_v41 = vmax.f32 %v3809_v46, 0.0  ;;  %v3621_v63 = vadd.f32 %v3620_v59, %v3532_v48  ;;  %v4672_v61 = vrot.slane %v4102_v23, 5  ;;  %v8565_v59 = vld [vmem:[#allocation2 + $0x120] sm:$0xf] }
 0x2d7   : > { %4866 = vst [vmem:[#allocation2 + $0x154] sm:$0xf] %v11353_v20  ;;  %v4297_v8 = vrot.slane %v4295_v57, 5  ;;  %v4301_v53 = vrot.slane %v4299_v37, 4  ;;  %v11409_v21 = vsel %vm10605_vm6, %v8408_v55, %v4669_v49  ;;  %v4671_v36 = vrot.slane %v4669_v49, 4  ;;  %6773 = vmatpush.bf16.msrb.mxu0 %v9675_v12  ;;  %v9665_v12 = vld [vmem:[%s12931_s4 + $0x80] sm:$0xff] }
 0x2d8   : > { %4909 = vst [vmem:[#allocation2 + $0x134] sm:$0xf] %v11316_v38  ;;  %v3883_v45 = vrot.slane %v3841_v41, 1  ;;  %v3943_v3 = vrot.slane %v3841_v41, 7  ;;  %v3710_v62 = vadd.f32 %v11300_v24, %v3621_v63  ;;  %3573 = vmatmul.bf16.gmra.mxu2 %v8106_v13  ;;  %v9674_v24 = vld [vmem:[%s12931_s4 + $0xc8] sm:$0xff]  ;;  %3662 = vmatmul.bf16.gmra.mxu3 %v8110_v30  ;;  %v4307_v46 = vrot.slane %v4305_v56, 5 }
 0x2d9   : > { %4910 = vst [vmem:[#allocation2 + $0x158] sm:$0xf] %v11331_v34  ;;  %v11416_v42 = vsel %vm10066_vm3, %v4293_v11, %v4297_v8  ;;  %v4302_v60 = vor.u32 %v4301_v53, %v4297_v8  ;;  %v11430_v55 = vsel %vm10605_vm6, %v4671_v36, %v4672_v61  ;;  %v11446_v13 = vld [vmem:[%s12930_s3] ss:$0 sm:$0xff]  ;;  %v9545_v57 = vld [vmem:[#allocation2 + $0x140] sm:$0xf0]  ;;  %6685 = vmatpush.bf16.msrb.mxu3 %v9666_v15 }
 0x2da   : > { %4940 = vst [vmem:[#allocation2 + $0x114] sm:$0xf] %v11295_v5  ;;  %v4059_v23 = vsel %vm373_vm0, %v3883_v45, %v3943_v3  ;;  %v3774_v0 = vmul.f32 %v11436_v50, %v3710_v62  ;;  %6596 = vmatpush.bf16.msrb.mxu2 %v9658_v47  ;;  %v9673_v11 = vld [vmem:[%s12931_s4 + $0xc0] sm:$0xff]  ;;  %v8566_v63 = vor.u32 %v9545_v57, %v8565_v59  ;;  %v11470_v61 = vpop.f32.mrf.mxu0  ;;  %v8431_v36 = vld [vmem:[#allocation2 + $0x2c] sm:$0xf0] }
 0x2db   : > { %4971 = vst [vmem:[#allocation2 + $0xf4] sm:$0xf] %v11326_v1  ;;  %v4303_v9 = vrot.slane %v4302_v60, 4  ;;  %v11440_v48 = vpack.c.bf16 %v4059_v23, %v4059_v23  ;;  %v3534_v5 = vpop.f32.mrf.mxu2  ;;  %6774 = vmatpush.bf16.msrb.mxu0 %v9674_v24  ;;  %v8423_v62 = vld [vmem:[#allocation2 + $0x24] sm:$0xf0] }
 0x2dc   : > { %4972 = vst [vmem:[#allocation2 + $0x118] sm:$0xf] %v11353_v20  ;;  %v3810_v16 = vadd.f32 %v11446_v13, %v3774_v0  ;;  %v3535_v18 = vadd.f32 %v3534_v5, %v10979_v54  ;;  %v3623_v49 = vpop.f32.mrf.mxu3  ;;  %v9510_v60 = vld [vmem:[#allocation2 + $0x28] sm:$0xf0] }
 0x2dd   : > { %5003 = vst [vmem:[#allocation2 + $0xf8] sm:$0xf] %v11316_v38  ;;  %v11453_v1 = vsel %vm10066_vm3, %v4303_v9, %v4307_v46  ;;  %v4310_v37 = vshrl.u32 %v11440_v48, 16  ;;  %v4313_v20 = vshll.u32 %v11440_v48, 16  ;;  %v9657_v38 = vld [vmem:[%s12931_s4 + $0x40] sm:$0xff]  ;;  %6686 = vmatpush.bf16.msrb.mxu3 %v9665_v12 }
 0x2de   : > { %5004 = vst [vmem:[#allocation2 + $0x11c] sm:$0xf] %v11331_v34  ;;  %v3842_v30 = vmax.f32 %v3810_v16, 0.0  ;;  %v3624_v54 = vadd.f32 %v3623_v49, %v3535_v18  ;;  %6597 = vmatpush.bf16.msrb.mxu2 %v9657_v38  ;;  %v9505_v9 = vld [vmem:[#allocation2 + $0x4] sm:$0xf] }
 0x2df   : > { %4145 = vst [vmem:[#allocation2 + $0x1b0] sm:$0xf] %v11336_v10  ;;  %v4312_v56 = vrot.slane %v4310_v37, 4  ;;  %v4315_v41 = vrot.slane %v4313_v20, 5  ;;  %6529 = vmatmul.bf16.gmra.mxu1 %v8566_v63  ;;  %6775 = vmatpush.bf16.msrb.mxu0 %v9673_v11  ;;  %v8429_v46 = vld [vmem:[#allocation2 + $0x8] sm:$0xf]  ;;  %v8426_v18 = vor.u32 %v9505_v9, %v8423_v62 }
 0x2e0   : > { %4809 = vst [vmem:[#allocation2 + $0x174] sm:$0xf] %v11336_v10  ;;  %v3944_v34 = vrot.slane %v3842_v30, 7  ;;  %v4027_v8 = vrot.slane %v3842_v30, 5  ;;  %v3713_v53 = vadd.f32 %v11358_v19, %v3624_v54  ;;  %v9506_v19 = vld [vmem:[#allocation2 + $0xc] sm:$0xf]  ;;  %v8430_v57 = vor.u32 %v9510_v60, %v8429_v46 }
 0x2e1   : > { %4941 = vst [vmem:[#allocation2 + $0x138] sm:$0xf] %v11336_v10  ;;  %v4316_v45 = vor.u32 %v4315_v41, %v4312_v56  ;;  %v8434_v5 = vor.u32 %v9506_v19, %v8431_v36  ;;  %v8409_v37 = vrot.slane %v11440_v48, 9 }
 0x2e2   : > { %4146 = vst [vmem:[#allocation2 + $0x1d4] sm:$0xf] %v11380_v29  ;;  %v3945_v47 = vsel %vm373_vm0, %v3943_v3, %v3944_v34  ;;  %v4075_v15 = vsel %vm373_vm0, %v3944_v34, %v4027_v8  ;;  %v3775_v24 = vmul.f32 %v11436_v50, %v3713_v53  ;;  %v11499_v62 = vpop.f32.mrf.mxu0 }
 0x2e3   : > { %4567 = vst [vmem:[#allocation2 + $0x1b4] sm:$0xf] %v11416_v42  ;;  %v11478_v23 = vpack.c.bf16 %v3945_v47, %v3945_v47  ;;  %v4105_v10 = vpack.c.bf16 %v4075_v15, %v4075_v15  ;;  %v3536_v0 = vpop.f32.mrf.mxu2  ;;  %v4317_v54 = vrot.slane %v4316_v45, 4  ;;  %6776 = vmatmul.bf16.vlgmr.msrb.gmra.mxu0 %v8434_v5 }
 0x2e4   : > { %4568 = vst [vmem:[#allocation2 + $0x1d8] sm:$0xf] %v11453_v1  ;;  %v3811_v16 = vadd.f32 %v11446_v13, %v3775_v24  ;;  %v3537_v3 = vadd.f32 %v3536_v0, %v10982_v58  ;;  %v3625_v30 = vpop.f32.mrf.mxu3  ;;  %v9686_v58 = vld [vmem:[%s12931_s4 + $0x128] sm:$0xff] }
 0x2e5   : > { %4779 = vst [vmem:[#allocation2 + $0x1b8] sm:$0xf] %v11409_v21  ;;  %v4319_v20 = vshll.u32 %v11478_v23, 16  ;;  %v4323_v49 = vshrl.u32 %v11478_v23, 16  ;;  %v4676_v59 = vrot.slane %v11478_v23, 5  ;;  %v4329_v38 = vshll.u32 %v4105_v10, 16  ;;  %6859 = vmatpush.bf16.msrb.mxu1 %v9686_v58 }
 0x2e6   : > { %4780 = vst [vmem:[#allocation2 + $0x1dc] sm:$0xf] %v11430_v55  ;;  %v3843_v12 = vmax.f32 %v3811_v16, 0.0  ;;  %v3626_v11 = vadd.f32 %v3625_v30, %v3537_v3  ;;  %v4679_v34 = vrot.slane %v4105_v10, 5  ;;  %v9554_v16 = vld [vmem:[#allocation2 + $0x188] sm:$0xf0]  ;;  %v3453_v58 = vadd.f32 %v10989_v6, %v10991_v39 }
 0x2e7   : > { %4810 = vst [vmem:[#allocation2 + $0x198] sm:$0xf] %v11380_v29  ;;  %v4321_v56 = vrot.slane %v4319_v20, 5  ;;  %v4325_v41 = vrot.slane %v4323_v49, 4  ;;  %v11495_v63 = vsel %vm10605_vm6, %v8409_v37, %v4676_v59  ;;  %v4678_v8 = vrot.slane %v4676_v59, 4 }
 0x2e8   : > { %4867 = vst [vmem:[#allocation2 + $0x178] sm:$0xf] %v11416_v42  ;;  %v3884_v53 = vrot.slane %v3843_v12, 1  ;;  %v3946_v36 = vrot.slane %v3843_v12, 7  ;;  %v3715_v45 = vadd.f32 %v11404_v44, %v3626_v11  ;;  %6598 = vmatmul.bf16.vlgmr.msrb.gmra.mxu2 %v8426_v18  ;;  %6687 = vmatmul.bf16.vlgmr.msrb.gmra.mxu3 %v8430_v57  ;;  %v4331_v10 = vrot.slane %v4329_v38, 5 }
 0x2e9   : > { %4868 = vst [vmem:[#allocation2 + $0x19c] sm:$0xf] %v11453_v1  ;;  %v11504_v60 = vsel %vm10066_vm3, %v4317_v54, %v4321_v56  ;;  %v4326_v47 = vor.u32 %v4325_v41, %v4321_v56  ;;  %v11509_v15 = vsel %vm10605_vm6, %v4678_v8, %v4679_v34  ;;  %v8601_v49 = vld [vmem:[#allocation2 + $0x168] sm:$0xf]  ;;  %v9519_v12 = vld [vmem:[#allocation2 + $0x70] sm:$0xf0] }
 0x2ea   : > { %4911 = vst [vmem:[#allocation2 + $0x17c] sm:$0xf] %v11409_v21  ;;  %v4060_v24 = vsel %vm373_vm0, %v3884_v53, %v3946_v36  ;;  %v3776_v44 = vmul.f32 %v11436_v50, %v3715_v45  ;;  %v8602_v30 = vor.u32 %v9554_v16, %v8601_v49  ;;  %v8467_v11 = vld [vmem:[#allocation2 + $0x74] sm:$0xf0]  ;;  %v11537_v34 = vpop.f32.mrf.mxu0  ;;  %v9514_v53 = vld [vmem:[#allocation2 + $0x4c] sm:$0xf] }
 0x2eb   : > { %4912 = vst [vmem:[#allocation2 + $0x1a0] sm:$0xf] %v11430_v55  ;;  %v4327_v19 = vrot.slane %v4326_v47, 4  ;;  %v11514_v0 = vpack.c.bf16 %v4060_v24, %v4060_v24  ;;  %v3539_v9 = vpop.f32.mrf.mxu2  ;;  %v9515_v47 = vld [vmem:[#allocation2 + $0x54] sm:$0xf] }
 0x2ec   : > { %4942 = vst [vmem:[#allocation2 + $0x15c] sm:$0xf] %v11380_v29  ;;  %v3812_v46 = vadd.f32 %v11446_v13, %v3776_v44  ;;  %v3540_v5 = vadd.f32 %v3539_v9, %v10987_v31  ;;  %v3628_v37 = vpop.f32.mrf.mxu3 }
 0x2ed   : > { %4973 = vst [vmem:[#allocation2 + $0x13c] sm:$0xf] %v11416_v42  ;;  %v11522_v3 = vsel %vm10066_vm3, %v4327_v19, %v4331_v10  ;;  %v4334_v18 = vshrl.u32 %v11514_v0, 16  ;;  %v4337_v57 = vshll.u32 %v11514_v0, 16  ;;  %v8470_v19 = vor.u32 %v9515_v47, %v8467_v11 }
 0x2ee   : > { %4974 = vst [vmem:[#allocation2 + $0x160] sm:$0xf] %v11453_v1  ;;  %v3844_v20 = vmax.f32 %v3812_v46, 0.0  ;;  %v3629_v29 = vadd.f32 %v3628_v37, %v3540_v5  ;;  %v8459_v1 = vld [vmem:[#allocation2 + $0x6c] sm:$0xf0]  ;;  %v8410_v10 = vrot.slane %v11514_v0, 9 }
 0x2ef   : > { %5005 = vst [vmem:[#allocation2 + $0x140] sm:$0xf] %v11409_v21  ;;  %v4336_v31 = vrot.slane %v4334_v18, 4  ;;  %v4339_v59 = vrot.slane %v4337_v57, 5  ;;  %6534 = vmatmul.bf16.gmra.mxu1 %v8602_v30  ;;  %v8462_v44 = vor.u32 %v9514_v53, %v8459_v1 }
 0x2f0   : > { %5006 = vst [vmem:[#allocation2 + $0x164] sm:$0xf] %v11430_v55  ;;  %v3947_v42 = vrot.slane %v3844_v20, 7  ;;  %v4028_v54 = vrot.slane %v3844_v20, 5  ;;  %v3718_v38 = vadd.f32 %v11470_v61, %v3629_v29  ;;  %v8465_v61 = vld [vmem:[#allocation2 + $0x50] sm:$0xf] }
 0x2f1   : > { %4147 = vst [vmem:[#allocation2 + $0x1f8] sm:$0xf] %v11440_v48  ;;  %v4340_v21 = vor.u32 %v4339_v59, %v4336_v31  ;;  %v8466_v45 = vor.u32 %v9519_v12, %v8465_v61 }
 0x2f2   : > { %4811 = vst [vmem:[#allocation2 + $0x1bc] sm:$0xf] %v11440_v48  ;;  %v3948_v56 = vsel %vm373_vm0, %v3946_v36, %v3947_v42  ;;  %v4076_v55 = vsel %vm373_vm0, %v3947_v42, %v4028_v54  ;;  %v3777_v41 = vmul.f32 %v11436_v50, %v3718_v38 }
 0x2f3   : > { %4943 = vst [vmem:[#allocation2 + $0x180] sm:$0xf] %v11440_v48  ;;  %v11540_v6 = vpack.c.bf16 %v3948_v56, %v3948_v56  ;;  %v4108_v39 = vpack.c.bf16 %v4076_v55, %v4076_v55  ;;  %v3541_v8 = vpop.f32.mrf.mxu2  ;;  %v4341_v16 = vrot.slane %v4340_v21, 4  ;;  %6781 = vmatmul.bf16.gmra.mxu0 %v8470_v19  ;;  %v8637_v19 = vld [vmem:[#allocation2 + $0x1b0] sm:$0xf] }
 0x2f4   : > { %4148 = vst [vmem:[#allocation2 + $0x21c] sm:$0xf] %v11478_v23  ;;  %v3813_v36 = vadd.f32 %v11446_v13, %v3777_v41  ;;  %v3542_v24 = vadd.f32 %v3541_v8, %v3453_v58  ;;  %v3630_v5 = vpop.f32.mrf.mxu3  ;;  %v9563_v8 = vld [vmem:[#allocation2 + $0x1d0] sm:$0xf0] }
 0x2f5   : > { %4569 = vst [vmem:[#allocation2 + $0x1fc] sm:$0xf] %v11504_v60  ;;  %v4343_v48 = vshll.u32 %v11540_v6, 16  ;;  %v4347_v9 = vshrl.u32 %v11540_v6, 16  ;;  %v4683_v46 = vrot.slane %v11540_v6, 5  ;;  %v4353_v18 = vshll.u32 %v4108_v39, 16 }
 0x2f6   : > { %4570 = vst [vmem:[#allocation2 + $0x220] sm:$0xf] %v11522_v3  ;;  %v3845_v57 = vmax.f32 %v3813_v36, 0.0  ;;  %v3631_v37 = vadd.f32 %v3630_v5, %v3542_v24  ;;  %v4686_v31 = vrot.slane %v4108_v39, 5 }
 0x2f7   : > { %4781 = vst [vmem:[#allocation2 + $0x200] sm:$0xf] %v11495_v63  ;;  %v4345_v20 = vrot.slane %v4343_v48, 5  ;;  %v4349_v29 = vrot.slane %v4347_v9, 4  ;;  %v11553_v49 = vsel %vm10605_vm6, %v8410_v10, %v4683_v46  ;;  %v4685_v59 = vrot.slane %v4683_v46, 4 }
 0x2f8   : > { %4782 = vst [vmem:[#allocation2 + $0x224] sm:$0xf] %v11509_v15  ;;  %v3885_v30 = vrot.slane %v3845_v57, 1  ;;  %v3949_v42 = vrot.slane %v3845_v57, 7  ;;  %v3720_v54 = vadd.f32 %v11499_v62, %v3631_v37  ;;  %6603 = vmatmul.bf16.gmra.mxu2 %v8462_v44  ;;  %6692 = vmatmul.bf16.gmra.mxu3 %v8466_v45  ;;  %v11569_v62 = vpop.f32.mrf.mxu0  ;;  %v4355_v56 = vrot.slane %v4353_v18, 5 }
 0x2f9   : > { %4812 = vst [vmem:[#allocation2 + $0x1e0] sm:$0xf] %v11478_v23  ;;  %v11560_v38 = vsel %vm10066_vm3, %v4341_v16, %v4345_v20  ;;  %v4350_v12 = vor.u32 %v4349_v29, %v4345_v20  ;;  %v11565_v58 = vsel %vm10605_vm6, %v4685_v59, %v4686_v31  ;;  %v8638_v48 = vor.u32 %v9563_v8, %v8637_v19  ;;  %v9528_v16 = vld [vmem:[#allocation2 + $0xb8] sm:$0xf0]  ;;  %v8503_v57 = vld [vmem:[#allocation2 + $0xbc] sm:$0xf0] }
 0x2fa   : > { %4869 = vst [vmem:[#allocation2 + $0x1c0] sm:$0xf] %v11504_v60  ;;  %v4061_v1 = vsel %vm373_vm0, %v3885_v30, %v3949_v42  ;;  %v3778_v11 = vmul.f32 %v11436_v50, %v3720_v54  ;;  %v3458_v18 = vadd.f32 %v11001_v51, %v11003_v52  ;;  %v8501_v29 = vld [vmem:[#allocation2 + $0x98] sm:$0xf]  ;;  %v9524_v59 = vld [vmem:[#allocation2 + $0x9c] sm:$0xf] }
 0x2fb   : > { %4870 = vst [vmem:[#allocation2 + $0x1e4] sm:$0xf] %v11522_v3  ;;  %v4351_v21 = vrot.slane %v4350_v12, 4  ;;  %v11572_v55 = vpack.c.bf16 %v4061_v1, %v4061_v1  ;;  %v3544_v41 = vpop.f32.mrf.mxu2  ;;  %v8502_v31 = vor.u32 %v9528_v16, %v8501_v29  ;;  %v8506_v12 = vor.u32 %v9524_v59, %v8503_v57  ;;  %v9572_v29 = vld [vmem:[#allocation2 + $0x218] sm:$0xf0] }
 0x2fc   : > { %4913 = vst [vmem:[#allocation2 + $0x1c4] sm:$0xf] %v11495_v63  ;;  %v3814_v61 = vadd.f32 %v11446_v13, %v3778_v11  ;;  %v3545_v39 = vadd.f32 %v3544_v41, %v10999_v28  ;;  %v3633_v36 = vpop.f32.mrf.mxu3 }
 0x2fd   : > { %4914 = vst [vmem:[#allocation2 + $0x1e8] sm:$0xf] %v11509_v15  ;;  %v11580_v53 = vsel %vm10066_vm3, %v4351_v21, %v4355_v56  ;;  %v4358_v45 = vshrl.u32 %v11572_v55, 16  ;;  %v4361_v47 = vshll.u32 %v11572_v55, 16  ;;  %v8411_v1 = vrot.slane %v11572_v55, 9 }
 0x2fe   : > { %4944 = vst [vmem:[#allocation2 + $0x1a4] sm:$0xf] %v11478_v23  ;;  %v3846_v24 = vmax.f32 %v3814_v61, 0.0  ;;  %v3634_v44 = vadd.f32 %v3633_v36, %v3545_v39  ;;  %v8495_v23 = vld [vmem:[#allocation2 + $0xb4] sm:$0xf0] }
 0x2ff   : > { %4975 = vst [vmem:[#allocation2 + $0x184] sm:$0xf] %v11504_v60  ;;  %v4360_v28 = vrot.slane %v4358_v45, 4  ;;  %v4363_v10 = vrot.slane %v4361_v47, 5  ;;  %6539 = vmatmul.bf16.gmra.mxu1 %v8638_v48 }
 0x300   : > { %4976 = vst [vmem:[#allocation2 + $0x1a8] sm:$0xf] %v11522_v3  ;;  %v3950_v9 = vrot.slane %v3846_v24, 7  ;;  %v4029_v46 = vrot.slane %v3846_v24, 5  ;;  %v3723_v5 = vadd.f32 %v11537_v34, %v3634_v44 }
 0x301   : > { %5007 = vst [vmem:[#allocation2 + $0x188] sm:$0xf] %v11495_v63  ;;  %v4364_v60 = vor.u32 %v4363_v10, %v4360_v28  ;;  %v9523_v63 = vld [vmem:[#allocation2 + $0x94] sm:$0xf] }
 0x302   : > { %5008 = vst [vmem:[#allocation2 + $0x1ac] sm:$0xf] %v11509_v15  ;;  %v3951_v37 = vsel %vm373_vm0, %v3949_v42, %v3950_v9  ;;  %v4077_v3 = vsel %vm373_vm0, %v3950_v9, %v4029_v46  ;;  %v3779_v20 = vmul.f32 %v11436_v50, %v3723_v5  ;;  %v3727_v42 = vpop.f32.mrf.mxu0  ;;  %v8498_v54 = vor.u32 %v9523_v63, %v8495_v23  ;;  %v9685_v46 = vld [vmem:[%s12931_s4 + $0x120] sm:$0xff] }
 0x303   : > { %4149 = vst [vmem:[#allocation2 + $0x240] sm:$0xf] %v11514_v0  ;;  %v11596_v34 = vpack.c.bf16 %v3951_v37, %v3951_v37  ;;  %v4111_v51 = vpack.c.bf16 %v4077_v3, %v4077_v3  ;;  %v3546_v52 = vpop.f32.mrf.mxu2  ;;  %v4365_v61 = vrot.slane %v4364_v60, 4  ;;  %6786 = vmatmul.bf16.gmra.mxu0 %v8506_v12  ;;  %6860 = vmatpush.bf16.msrb.mxu1 %v9685_v46 }
 0x304   : > { %4813 = vst [vmem:[#allocation2 + $0x204] sm:$0xf] %v11514_v0  ;;  %v3815_v15 = vadd.f32 %v11446_v13, %v3779_v20  ;;  %v3547_v30 = vadd.f32 %v3546_v52, %v3458_v18  ;;  %v3635_v41 = vpop.f32.mrf.mxu3 }
 0x305   : > { %4945 = vst [vmem:[#allocation2 + $0x1c8] sm:$0xf] %v11514_v0  ;;  %v4367_v11 = vshll.u32 %v11596_v34, 16  ;;  %v4371_v21 = vshrl.u32 %v11596_v34, 16  ;;  %v4690_v56 = vrot.slane %v11596_v34, 5  ;;  %v4377_v39 = vshll.u32 %v4111_v51, 16 }
 0x306   : > { %4150 = vst [vmem:[#allocation2 + $0x264] sm:$0xf] %v11540_v6  ;;  %v3847_v8 = vmax.f32 %v3815_v15, 0.0  ;;  %v3636_v45 = vadd.f32 %v3635_v41, %v3547_v30  ;;  %v4693_v24 = vrot.slane %v4111_v51, 5  ;;  %v8673_v30 = vld [vmem:[#allocation2 + $0x1f8] sm:$0xf]  ;;  %v3463_v41 = vadd.f32 %v11010_v35, %v11012_v26 }
 0x307   : > { %4571 = vst [vmem:[#allocation2 + $0x244] sm:$0xf] %v11560_v38  ;;  %v4369_v47 = vrot.slane %v4367_v11, 5  ;;  %v4373_v0 = vrot.slane %v4371_v21, 4  ;;  %v11609_v36 = vsel %vm10605_vm6, %v8411_v1, %v4690_v56  ;;  %v4692_v44 = vrot.slane %v4690_v56, 4 }
 0x308   : > { %4572 = vst [vmem:[#allocation2 + $0x268] sm:$0xf] %v11580_v53  ;;  %v3886_v19 = vrot.slane %v3847_v8, 1  ;;  %v3952_v28 = vrot.slane %v3847_v8, 7  ;;  %v3725_v10 = vadd.f32 %v11569_v62, %v3636_v45  ;;  %6608 = vmatmul.bf16.gmra.mxu2 %v8498_v54  ;;  %6697 = vmatmul.bf16.gmra.mxu3 %v8502_v31  ;;  %v4379_v23 = vrot.slane %v4377_v39, 5 }
 0x309   : > { %4783 = vst [vmem:[#allocation2 + $0x248] sm:$0xf] %v11553_v49  ;;  %v11616_v48 = vsel %vm10066_vm3, %v4365_v61, %v4369_v47  ;;  %v4374_v9 = vor.u32 %v4373_v0, %v4369_v47  ;;  %v11624_v5 = vsel %vm10605_vm6, %v4692_v44, %v4693_v24  ;;  %v8674_v12 = vor.u32 %v9572_v29, %v8673_v30  ;;  %v8531_v56 = vld [vmem:[#allocation2 + $0xfc] sm:$0xf0]  ;;  %v9537_v61 = vld [vmem:[#allocation2 + $0x100] sm:$0xf0] }
 0x30a   : > { %4784 = vst [vmem:[#allocation2 + $0x26c] sm:$0xf] %v11565_v58  ;;  %v4062_v62 = vsel %vm373_vm0, %v3886_v19, %v3952_v28  ;;  %v3780_v16 = vmul.f32 %v11436_v50, %v3725_v10  ;;  %v11634_v20 = vpop.f32.mrf.mxu0  ;;  %v8539_v39 = vld [vmem:[#allocation2 + $0x104] sm:$0xf0]  ;;  %v9532_v0 = vld [vmem:[#allocation2 + $0xdc] sm:$0xf] }
 0x30b   : > { %4814 = vst [vmem:[#allocation2 + $0x228] sm:$0xf] %v11540_v6  ;;  %v4375_v18 = vrot.slane %v4374_v9, 4  ;;  %v11629_v57 = vpack.c.bf16 %v4062_v62, %v4062_v62  ;;  %v3549_v60 = vpop.f32.mrf.mxu2  ;;  %v8537_v24 = vld [vmem:[#allocation2 + $0xe0] sm:$0xf] }
 0x30c   : > { %4871 = vst [vmem:[#allocation2 + $0x208] sm:$0xf] %v11560_v38  ;;  %v3816_v37 = vadd.f32 %v11446_v13, %v3780_v16  ;;  %v3550_v3 = vadd.f32 %v3549_v60, %v11008_v2  ;;  %v3638_v31 = vpop.f32.mrf.mxu3  ;;  %v9533_v44 = vld [vmem:[#allocation2 + $0xe4] sm:$0xf] }
 0x30d   : > { %4872 = vst [vmem:[#allocation2 + $0x22c] sm:$0xf] %v11580_v53  ;;  %v11639_v51 = vsel %vm10066_vm3, %v4375_v18, %v4379_v23  ;;  %v4382_v52 = vshrl.u32 %v11629_v57, 16  ;;  %v4385_v63 = vshll.u32 %v11629_v57, 16  ;;  %v8542_v10 = vor.u32 %v9533_v44, %v8539_v39  ;;  %v9581_v39 = vld [vmem:[#allocation2 + $0x260] sm:$0xf0] }
 0x30e   : > { %4915 = vst [vmem:[#allocation2 + $0x20c] sm:$0xf] %v11553_v49  ;;  %v3848_v59 = vmax.f32 %v3816_v37, 0.0  ;;  %v3639_v15 = vadd.f32 %v3638_v31, %v3550_v3  ;;  %v8412_v9 = vrot.slane %v11629_v57, 9  ;;  %v11664_v3 = vpop.f32.mrf.mxu1 }
 0x30f   : > { %4916 = vst [vmem:[#allocation2 + $0x230] sm:$0xf] %v11565_v58  ;;  %v4384_v2 = vrot.slane %v4382_v52, 4  ;;  %v4387_v54 = vrot.slane %v4385_v63, 5  ;;  %6544 = vmatmul.bf16.gmra.mxu1 %v8674_v12 }
 0x310   : > { %4946 = vst [vmem:[#allocation2 + $0x1ec] sm:$0xf] %v11540_v6  ;;  %v3953_v1 = vrot.slane %v3848_v59, 7  ;;  %v4030_v11 = vrot.slane %v3848_v59, 5  ;;  %v3728_v21 = vadd.f32 %v3727_v42, %v3639_v15 }
 0x311   : > { %4977 = vst [vmem:[#allocation2 + $0x1cc] sm:$0xf] %v11560_v38  ;;  %v4388_v8 = vor.u32 %v4387_v54, %v4384_v2  ;;  %v8534_v38 = vor.u32 %v9532_v0, %v8531_v56 }
 0x312   : > { %4978 = vst [vmem:[#allocation2 + $0x1f0] sm:$0xf] %v11580_v53  ;;  %v3954_v45 = vsel %vm373_vm0, %v3952_v28, %v3953_v1  ;;  %v4078_v47 = vsel %vm373_vm0, %v3953_v1, %v4030_v11  ;;  %v3781_v6 = vmul.f32 %v11436_v50, %v3728_v21  ;;  %v8538_v28 = vor.u32 %v9537_v61, %v8537_v24  ;;  %v3732_v37 = vpop.f32.mrf.mxu0 }
 0x313   : > { %5009 = vst [vmem:[#allocation2 + $0x1d0] sm:$0xf] %v11553_v49  ;;  %v11654_v42 = vpack.c.bf16 %v3954_v45, %v3954_v45  ;;  %v4114_v35 = vpack.c.bf16 %v4078_v47, %v4078_v47  ;;  %v3551_v26 = vpop.f32.mrf.mxu2  ;;  %v4389_v18 = vrot.slane %v4388_v8, 4  ;;  %6791 = vmatmul.bf16.gmra.mxu0 %v8542_v10 }
 0x314   : > { %5010 = vst [vmem:[#allocation2 + $0x1f4] sm:$0xf] %v11565_v58  ;;  %v3817_v53 = vadd.f32 %v11446_v13, %v3781_v6  ;;  %v3552_v19 = vadd.f32 %v3551_v26, %v3463_v41  ;;  %v3640_v16 = vpop.f32.mrf.mxu3  ;;  %v8709_v26 = vld [vmem:[#allocation2 + $0x240] sm:$0xf] }
 0x315   : > { %4151 = vst [vmem:[#allocation2 + $0x288] sm:$0xf] %v11572_v55  ;;  %v4391_v49 = vshll.u32 %v11654_v42, 16  ;;  %v4395_v46 = vshrl.u32 %v11654_v42, 16  ;;  %v4697_v62 = vrot.slane %v11654_v42, 5  ;;  %v4401_v58 = vshll.u32 %v4114_v35, 16 }
 0x316   : > { %4815 = vst [vmem:[#allocation2 + $0x24c] sm:$0xf] %v11572_v55  ;;  %v3849_v23 = vmax.f32 %v3817_v53, 0.0  ;;  %v3641_v60 = vadd.f32 %v3640_v16, %v3552_v19  ;;  %v4700_v31 = vrot.slane %v4114_v35, 5  ;;  %v8710_v53 = vor.u32 %v9581_v39, %v8709_v26 }
 0x317   : > { %4947 = vst [vmem:[#allocation2 + $0x210] sm:$0xf] %v11572_v55  ;;  %v4393_v29 = vrot.slane %v4391_v49, 5  ;;  %v4397_v52 = vrot.slane %v4395_v46, 4  ;;  %v11669_v63 = vsel %vm10605_vm6, %v8412_v9, %v4697_v62  ;;  %v4699_v59 = vrot.slane %v4697_v62, 4 }
 0x318   : > { %4152 = vst [vmem:[#allocation2 + $0x2ac] sm:$0xf] %v11596_v34  ;;  %v3887_v15 = vrot.slane %v3849_v23, 1  ;;  %v3955_v30 = vrot.slane %v3849_v23, 7  ;;  %v3730_v2 = vadd.f32 %v11634_v20, %v3641_v60  ;;  %6613 = vmatmul.bf16.gmra.mxu2 %v8534_v38  ;;  %6702 = vmatmul.bf16.gmra.mxu3 %v8538_v28  ;;  %v4403_v21 = vrot.slane %v4401_v58, 5 }
 0x319   : > { %4573 = vst [vmem:[#allocation2 + $0x28c] sm:$0xf] %v11616_v48  ;;  %v11676_v55 = vsel %vm10066_vm3, %v4389_v18, %v4393_v29  ;;  %v4398_v54 = vor.u32 %v4397_v52, %v4393_v29  ;;  %v11681_v12 = vsel %vm10605_vm6, %v4699_v59, %v4700_v31  ;;  %v8567_v49 = vld [vmem:[#allocation2 + $0x144] sm:$0xf0]  ;;  %v8575_v46 = vld [vmem:[#allocation2 + $0x14c] sm:$0xf0]  ;;  %v3468_v31 = vadd.f32 %v11022_v40, %v11024_v14 }
 0x31a   : > { %4574 = vst [vmem:[#allocation2 + $0x2b0] sm:$0xf] %v11639_v51  ;;  %v4063_v1 = vsel %vm373_vm0, %v3887_v15, %v3955_v30  ;;  %v3782_v11 = vmul.f32 %v11436_v50, %v3730_v2  ;;  %v3734_v9 = vpop.f32.mrf.mxu0  ;;  %v9541_v58 = vld [vmem:[#allocation2 + $0x124] sm:$0xf]  ;;  %v9546_v29 = vld [vmem:[#allocation2 + $0x148] sm:$0xf0] }
 0x31b   : > { %4785 = vst [vmem:[#allocation2 + $0x290] sm:$0xf] %v11609_v36  ;;  %v4399_v20 = vrot.slane %v4398_v54, 4  ;;  %v11686_v56 = vpack.c.bf16 %v4063_v1, %v4063_v1  ;;  %v3554_v61 = vpop.f32.mrf.mxu2  ;;  %v9542_v52 = vld [vmem:[#allocation2 + $0x12c] sm:$0xf]  ;;  %v8570_v15 = vor.u32 %v9541_v58, %v8567_v49 }
 0x31c   : > { %4786 = vst [vmem:[#allocation2 + $0x2b4] sm:$0xf] %v11624_v5  ;;  %v3818_v41 = vadd.f32 %v11446_v13, %v3782_v11  ;;  %v3643_v6 = vpop.f32.mrf.mxu3  ;;  %v3555_v35 = vadd.f32 %v3554_v61, %v11020_v33  ;;  %v11700_v44 = vpop.f32.mrf.mxu1  ;;  %v8578_v2 = vor.u32 %v9542_v52, %v8575_v46 }
 0x31d   : > { %4816 = vst [vmem:[#allocation2 + $0x270] sm:$0xf] %v11596_v34  ;;  %v11693_v8 = vsel %vm10066_vm3, %v4399_v20, %v4403_v21  ;;  %v4406_v45 = vshrl.u32 %v11686_v56, 16  ;;  %v4409_v47 = vshll.u32 %v11686_v56, 16 }
 0x31e   : > { %4873 = vst [vmem:[#allocation2 + $0x250] sm:$0xf] %v11616_v48  ;;  %v3850_v0 = vmax.f32 %v3818_v41, 0.0  ;;  %v3644_v10 = vadd.f32 %v3643_v6, %v3555_v35 }
 0x31f   : > { %4874 = vst [vmem:[#allocation2 + $0x274] sm:$0xf] %v11639_v51  ;;  %v4408_v38 = vrot.slane %v4406_v45, 4  ;;  %v4411_v24 = vrot.slane %v4409_v47, 5  ;;  %6549 = vmatmul.bf16.gmra.mxu1 %v8710_v53  ;;  %v9590_v46 = vld [vmem:[#allocation2 + $0x2a8] sm:$0xf0] }
 0x320   : > { %4917 = vst [vmem:[#allocation2 + $0x254] sm:$0xf] %v11609_v36  ;;  %v3956_v19 = vrot.slane %v3850_v0, 7  ;;  %v4031_v28 = vrot.slane %v3850_v0, 5  ;;  %v3733_v18 = vadd.f32 %v3732_v37, %v3644_v10 }
 0x321   : > { %4918 = vst [vmem:[#allocation2 + $0x278] sm:$0xf] %v11624_v5  ;;  %v4412_v33 = vor.u32 %v4411_v24, %v4408_v38 }
 0x322   : > { %4948 = vst [vmem:[#allocation2 + $0x234] sm:$0xf] %v11596_v34  ;;  %v3957_v62 = vsel %vm373_vm0, %v3955_v30, %v3956_v19  ;;  %v4079_v16 = vsel %vm373_vm0, %v3956_v19, %v4031_v28  ;;  %v3783_v34 = vmul.f32 %v11436_v50, %v3733_v18  ;;  %v8573_v30 = vld [vmem:[#allocation2 + $0x128] sm:$0xf]  ;;  %v3737_v19 = vpop.f32.mrf.mxu0 }
 0x323   : > { %4979 = vst [vmem:[#allocation2 + $0x214] sm:$0xf] %v11616_v48  ;;  %v11708_v23 = vpack.c.bf16 %v3957_v62, %v3957_v62  ;;  %v4117_v60 = vpack.c.bf16 %v4079_v16, %v4079_v16  ;;  %v3556_v59 = vpop.f32.mrf.mxu2  ;;  %v8413_v48 = vrot.slane %v11686_v56, 9  ;;  %v4413_v40 = vrot.slane %v4412_v33, 4  ;;  %6796 = vmatmul.bf16.gmra.mxu0 %v8578_v2  ;;  %v9684_v62 = vld [vmem:[%s12931_s4 + $0x118] sm:$0xff] }
 0x324   : > { %4980 = vst [vmem:[#allocation2 + $0x238] sm:$0xf] %v11639_v51  ;;  %v3645_v11 = vpop.f32.mrf.mxu3  ;;  %v3819_v14 = vadd.f32 %v11446_v13, %v3783_v34  ;;  %v3557_v51 = vadd.f32 %v3556_v59, %v3468_v31  ;;  %v8574_v20 = vor.u32 %v9546_v29, %v8573_v30  ;;  %v11732_v35 = vpop.f32.mrf.mxu1  ;;  %6861 = vmatpush.bf16.msrb.mxu1 %v9684_v62 }
 0x325   : > { %5011 = vst [vmem:[#allocation2 + $0x218] sm:$0xf] %v11609_v36  ;;  %v4415_v37 = vshll.u32 %v11708_v23, 16  ;;  %v4419_v54 = vshrl.u32 %v11708_v23, 16  ;;  %v4704_v1 = vrot.slane %v11708_v23, 5  ;;  %v4425_v41 = vshll.u32 %v4117_v60, 16 }
 0x326   : > { %5012 = vst [vmem:[#allocation2 + $0x23c] sm:$0xf] %v11624_v5  ;;  %v4707_v45 = vrot.slane %v4117_v60, 5  ;;  %v3851_v5 = vmax.f32 %v3819_v14, 0.0  ;;  %v3646_v47 = vadd.f32 %v3645_v11, %v3557_v51  ;;  %v8745_v60 = vld [vmem:[#allocation2 + $0x288] sm:$0xf] }
 0x327   : > { %4153 = vst [vmem:[#allocation2 + $0x2d0] sm:$0xf] %v11629_v57  ;;  %v4417_v36 = vrot.slane %v4415_v37, 5  ;;  %v4421_v21 = vrot.slane %v4419_v54, 4  ;;  %v11724_v61 = vsel %vm10605_vm6, %v8413_v48, %v4704_v1  ;;  %v4706_v39 = vrot.slane %v4704_v1, 4 }
 0x328   : > { %4817 = vst [vmem:[#allocation2 + $0x294] sm:$0xf] %v11629_v57  ;;  %6618 = vmatmul.bf16.gmra.mxu2 %v8570_v15  ;;  %v3888_v38 = vrot.slane %v3851_v5, 1  ;;  %v3958_v24 = vrot.slane %v3851_v5, 7  ;;  %v3735_v53 = vadd.f32 %v3734_v9, %v3646_v47  ;;  %6707 = vmatmul.bf16.gmra.mxu3 %v8574_v20  ;;  %v4427_v28 = vrot.slane %v4425_v41, 5 }
 0x329   : > { %4949 = vst [vmem:[#allocation2 + $0x258] sm:$0xf] %v11629_v57  ;;  %v11730_v6 = vsel %vm10066_vm3, %v4413_v40, %v4417_v36  ;;  %v4422_v0 = vor.u32 %v4421_v21, %v4417_v36  ;;  %v11737_v26 = vsel %vm10605_vm6, %v4706_v39, %v4707_v45  ;;  %v8746_v34 = vor.u32 %v9590_v46, %v8745_v60  ;;  %v8611_v48 = vld [vmem:[#allocation2 + $0x194] sm:$0xf0]  ;;  %v9551_v40 = vld [vmem:[#allocation2 + $0x174] sm:$0xf] }
 0x32a   : > { %4154 = vst [vmem:[#allocation2 + $0x2f4] sm:$0xf] %v11654_v42  ;;  %v4064_v10 = vsel %vm373_vm0, %v3888_v38, %v3958_v24  ;;  %v3784_v49 = vmul.f32 %v11436_v50, %v3735_v53  ;;  %v3739_v36 = vpop.f32.mrf.mxu0  ;;  %v8614_v21 = vor.u32 %v9551_v40, %v8611_v48  ;;  %v9550_v5 = vld [vmem:[#allocation2 + $0x16c] sm:$0xf]  ;;  %v9555_v47 = vld [vmem:[#allocation2 + $0x190] sm:$0xf0] }
 0x32b   : > { %4575 = vst [vmem:[#allocation2 + $0x2d4] sm:$0xf] %v11676_v55  ;;  %v4423_v57 = vrot.slane %v4422_v0, 4  ;;  %v11748_v9 = vpack.c.bf16 %v4064_v10, %v4064_v10  ;;  %v3559_v18 = vpop.f32.mrf.mxu2  ;;  %v3473_v0 = vadd.f32 %v11031_v17, %v11033_v4  ;;  %v8609_v53 = vld [vmem:[#allocation2 + $0x170] sm:$0xf] }
 0x32c   : > { %4576 = vst [vmem:[#allocation2 + $0x2f8] sm:$0xf] %v11693_v8  ;;  %v3820_v16 = vadd.f32 %v11446_v13, %v3784_v49  ;;  %v3648_v58 = vpop.f32.mrf.mxu3  ;;  %v3560_v31 = vadd.f32 %v3559_v18, %v11029_v22  ;;  %v11763_v11 = vpop.f32.mrf.mxu1  ;;  %v8603_v22 = vld [vmem:[#allocation2 + $0x18c] sm:$0xf0] }
 0x32d   : > { %4787 = vst [vmem:[#allocation2 + $0x2d8] sm:$0xf] %v11669_v63  ;;  %v11746_v33 = vsel %vm10066_vm3, %v4423_v57, %v4427_v28  ;;  %v4430_v29 = vshrl.u32 %v11748_v9, 16  ;;  %v4433_v52 = vshll.u32 %v11748_v9, 16  ;;  %v8610_v28 = vor.u32 %v9555_v47, %v8609_v53  ;;  %v9560_v53 = vld [vmem:[#allocation2 + $0x1bc] sm:$0xf] }
 0x32e   : > { %4788 = vst [vmem:[#allocation2 + $0x2fc] sm:$0xf] %v11681_v12  ;;  %v3852_v59 = vmax.f32 %v3820_v16, 0.0  ;;  %v3649_v2 = vadd.f32 %v3648_v58, %v3560_v31 }
 0x32f   : > { %4818 = vst [vmem:[#allocation2 + $0x2b8] sm:$0xf] %v11654_v42  ;;  %v4432_v15 = vrot.slane %v4430_v29, 4  ;;  %v4435_v30 = vrot.slane %v4433_v52, 5  ;;  %6554 = vmatmul.bf16.gmra.mxu1 %v8746_v34 }
 0x330   : > { %4875 = vst [vmem:[#allocation2 + $0x298] sm:$0xf] %v11676_v55  ;;  %v3959_v37 = vrot.slane %v3852_v59, 7  ;;  %v4032_v54 = vrot.slane %v3852_v59, 5  ;;  %v3738_v1 = vadd.f32 %v3737_v19, %v3649_v2  ;;  %v11806_v2 = vld [vmem:[%s12929_s2] ss:$0 sm:$0xff] }
 0x331   : > { %4876 = vst [vmem:[#allocation2 + $0x2bc] sm:$0xf] %v11693_v8  ;;  %v4436_v14 = vor.u32 %v4435_v30, %v4432_v15  ;;  %v9599_v34 = vld [vmem:[#allocation2 + $0x2f0] sm:$0xf0] }
 0x332   : > { %4919 = vst [vmem:[#allocation2 + $0x29c] sm:$0xf] %v11669_v63  ;;  %v3960_v51 = vsel %vm373_vm0, %v3958_v24, %v3959_v37  ;;  %v4080_v20 = vsel %vm373_vm0, %v3959_v37, %v4032_v54  ;;  %v3785_v45 = vmul.f32 %v11436_v50, %v3738_v1  ;;  %v8606_v24 = vor.u32 %v9550_v5, %v8603_v22  ;;  %v3742_v37 = vpop.f32.mrf.mxu0  ;;  %v8781_v54 = vld [vmem:[#allocation2 + $0x2d0] sm:$0xf]  ;;  %v8647_v5 = vld [vmem:[#allocation2 + $0x1dc] sm:$0xf0] }
 0x333   : > { %4920 = vst [vmem:[#allocation2 + $0x2c0] sm:$0xf] %v11681_v12  ;;  %v11769_v41 = vpack.c.bf16 %v3960_v51, %v3960_v51  ;;  %v4120_v39 = vpack.c.bf16 %v4080_v20, %v4080_v20  ;;  %6801 = vmatmul.bf16.gmra.mxu0 %v8614_v21  ;;  %v4437_v17 = vrot.slane %v4436_v14, 4  ;;  %v8782_v40 = vor.u32 %v9599_v34, %v8781_v54  ;;  %v11820_v14 = vld [vmem:[%s12930_s3] ss:$0 sm:$0xff] }
 0x334   : > { %4950 = vst [vmem:[#allocation2 + $0x27c] sm:$0xf] %v11654_v42  ;;  %v3561_v42 = vpop.f32.mrf.mxu2  ;;  %v3650_v38 = vpop.f32.mrf.mxu3  ;;  %v3821_v4 = vadd.f32 %v11446_v13, %v3785_v45 }
 0x335   : > { %4981 = vst [vmem:[#allocation2 + $0x25c] sm:$0xf] %v11676_v55  ;;  %v8414_v55 = vrot.slane %v11748_v9, 9  ;;  %v4439_v19 = vshll.u32 %v11769_v41, 16  ;;  %v4443_v50 = vshrl.u32 %v11769_v41, 16  ;;  %v4711_v57 = vrot.slane %v11769_v41, 5 }
 0x336   : > { %4982 = vst [vmem:[#allocation2 + $0x280] sm:$0xf] %v11693_v8  ;;  %v3562_v8 = vadd.f32 %v3561_v42, %v3473_v0  ;;  %v4449_v49 = vshll.u32 %v4120_v39, 16  ;;  %v4714_v16 = vrot.slane %v4120_v39, 5  ;;  %v8639_v0 = vld [vmem:[#allocation2 + $0x1d4] sm:$0xf0] }
 0x337   : > { %5013 = vst [vmem:[#allocation2 + $0x260] sm:$0xf] %v11669_v63  ;;  %v4441_v10 = vrot.slane %v4439_v19, 5  ;;  %v4445_v63 = vrot.slane %v4443_v50, 4  ;;  %v11785_v46 = vsel %vm10605_vm6, %v8414_v55, %v4711_v57  ;;  %v4713_v62 = vrot.slane %v4711_v57, 4 }
 0x338   : > { %5014 = vst [vmem:[#allocation2 + $0x284] sm:$0xf] %v11681_v12  ;;  %6623 = vmatmul.bf16.gmra.mxu2 %v8606_v24  ;;  %v3853_v12 = vmax.f32 %v3821_v4, 0.0  ;;  %v3651_v18 = vadd.f32 %v3650_v38, %v3562_v8  ;;  %6712 = vmatmul.bf16.gmra.mxu3 %v8610_v28  ;;  %v4451_v15 = vrot.slane %v4449_v49, 5  ;;  %v9559_v50 = vld [vmem:[#allocation2 + $0x1b4] sm:$0xf]  ;;  %v8650_v57 = vor.u32 %v9560_v53, %v8647_v5 }
 0x339   : > { %4155 = vst [vmem:[#allocation2 + $0x318] sm:$0xf] %v11686_v56  ;;  %v11791_v13 = vsel %vm10066_vm3, %v4437_v17, %v4441_v10  ;;  %v4446_v58 = vor.u32 %v4445_v63, %v4441_v10  ;;  %v11796_v60 = vsel %vm10605_vm6, %v4713_v62, %v4714_v16  ;;  %v8642_v17 = vor.u32 %v9559_v50, %v8639_v0  ;;  %v9564_v4 = vld [vmem:[#allocation2 + $0x1d8] sm:$0xf0] }
 0x33a   : > { %4819 = vst [vmem:[#allocation2 + $0x2dc] sm:$0xf] %v11686_v56  ;;  %v3889_v29 = vrot.slane %v3853_v12, 1  ;;  %v3961_v52 = vrot.slane %v3853_v12, 7  ;;  %v3740_v31 = vadd.f32 %v3739_v36, %v3651_v18  ;;  %v8645_v12 = vld [vmem:[#allocation2 + $0x1b8] sm:$0xf]  ;;  %v3478_v18 = vadd.f32 %v11043_v43, %v11045_v7 }
 0x33b   : > { %4951 = vst [vmem:[#allocation2 + $0x2a0] sm:$0xf] %v11686_v56  ;;  %v4447_v59 = vrot.slane %v4446_v58, 4  ;;  %v11799_v56 = vpop.f32.mrf.mxu1 }
 0x33c   : > { %4156 = vst [vmem:[#allocation2 + $0x33c] sm:$0xf] %v11708_v23  ;;  %v4065_v30 = vsel %vm373_vm0, %v3889_v29, %v3961_v52  ;;  %v3786_v48 = vmul.f32 %v11806_v2, %v3740_v31  ;;  %v3564_v20 = vpop.f32.mrf.mxu2  ;;  %v3653_v36 = vpop.f32.mrf.mxu3  ;;  %v8646_v29 = vor.u32 %v9564_v4, %v8645_v12 }
 0x33d   : > { %4577 = vst [vmem:[#allocation2 + $0x31c] sm:$0xf] %v11730_v6  ;;  %v11812_v1 = vsel %vm10066_vm3, %v4447_v59, %v4451_v15  ;;  %v11814_v22 = vpack.c.bf16 %v4065_v30, %v4065_v30  ;;  %v3565_v45 = vadd.f32 %v3564_v20, %v11041_v25 }
 0x33e   : > { %4578 = vst [vmem:[#allocation2 + $0x340] sm:$0xf] %v11746_v33  ;;  %v3822_v51 = vadd.f32 %v11820_v14, %v3786_v48 }
 0x33f   : > { %4789 = vst [vmem:[#allocation2 + $0x320] sm:$0xf] %v11724_v61  ;;  %v4454_v21 = vshrl.u32 %v11814_v22, 16  ;;  %v4457_v39 = vshll.u32 %v11814_v22, 16  ;;  %6559 = vmatmul.bf16.gmra.mxu1 %v8782_v40  ;;  %v3654_v24 = vadd.f32 %v3653_v36, %v3565_v45 }
 0x340   : > { %4790 = vst [vmem:[#allocation2 + $0x344] sm:$0xf] %v11737_v26  ;;  %v3854_v47 = vmax.f32 %v3822_v51, 0.0 }
 0x341   : > { %4820 = vst [vmem:[#allocation2 + $0x300] sm:$0xf] %v11708_v23  ;;  %v4456_v42 = vrot.slane %v4454_v21, 4  ;;  %v4459_v38 = vrot.slane %v4457_v39, 5  ;;  %v3743_v25 = vadd.f32 %v3742_v37, %v3654_v24 }
 0x342   : > { %4877 = vst [vmem:[#allocation2 + $0x2e0] sm:$0xf] %v11730_v6  ;;  %v3962_v55 = vrot.slane %v3854_v47, 7  ;;  %v4033_v19 = vrot.slane %v3854_v47, 5  ;;  %v8817_v47 = vld [vmem:[#allocation2 + $0x318] sm:$0xf] }
 0x343   : > { %4878 = vst [vmem:[#allocation2 + $0x304] sm:$0xf] %v11746_v33  ;;  %v4460_v8 = vor.u32 %v4459_v38, %v4456_v42  ;;  %6806 = vmatmul.bf16.gmra.mxu0 %v8650_v57  ;;  %v3787_v62 = vmul.f32 %v11806_v2, %v3743_v25  ;;  %v11838_v16 = vpop.f32.mrf.mxu1  ;;  %v9608_v15 = vld [vmem:[#allocation2 + $0x338] sm:$0xf0]  ;;  %v8683_v57 = vld [vmem:[#allocation2 + $0x224] sm:$0xf0] }
 0x344   : > { %4921 = vst [vmem:[#allocation2 + $0x2e4] sm:$0xf] %v11724_v61  ;;  %v3963_v28 = vsel %vm373_vm0, %v3961_v52, %v3962_v55  ;;  %v4081_v10 = vsel %vm373_vm0, %v3962_v55, %v4033_v19  ;;  %v3566_v58 = vpop.f32.mrf.mxu2  ;;  %v3655_v59 = vpop.f32.mrf.mxu3  ;;  %v9683_v19 = vld [vmem:[%s12931_s4 + $0x110] sm:$0xff] }
 0x345   : > { %4922 = vst [vmem:[#allocation2 + $0x308] sm:$0xf] %v11737_v26  ;;  %v11835_v63 = vpack.c.bf16 %v3963_v28, %v3963_v28  ;;  %v4123_v49 = vpack.c.bf16 %v4081_v10, %v4081_v10  ;;  %v4461_v43 = vrot.slane %v4460_v8, 4  ;;  %v3823_v7 = vadd.f32 %v11820_v14, %v3787_v62  ;;  %v8675_v8 = vld [vmem:[#allocation2 + $0x21c] sm:$0xf0]  ;;  %6862 = vmatpush.bf16.msrb.mxu1 %v9683_v19 }
 0x346   : > { %4952 = vst [vmem:[#allocation2 + $0x2c4] sm:$0xf] %v11708_v23  ;;  %v3744_v23 = vpop.f32.mrf.mxu0 }
 0x347   : > { %4983 = vst [vmem:[#allocation2 + $0x2a4] sm:$0xf] %v11730_v6  ;;  %v8415_v6 = vrot.slane %v11814_v22, 9  ;;  %v4463_v52 = vshll.u32 %v11835_v63, 16  ;;  %v4467_v31 = vshrl.u32 %v11835_v63, 16  ;;  %v4718_v34 = vrot.slane %v11835_v63, 5 }
 0x348   : > { %4984 = vst [vmem:[#allocation2 + $0x2c8] sm:$0xf] %v11746_v33  ;;  %6628 = vmatmul.bf16.gmra.mxu2 %v8642_v17  ;;  %v3567_v33 = vadd.f32 %v3566_v58, %v3478_v18  ;;  %6717 = vmatmul.bf16.gmra.mxu3 %v8646_v29  ;;  %v4473_v48 = vshll.u32 %v4123_v49, 16  ;;  %v4721_v40 = vrot.slane %v4123_v49, 5  ;;  %v12991_v49 = vld [vmem:[#allocation7_spill] sm:$0xff] }
 0x349   : > { %5015 = vst [vmem:[#allocation2 + $0x2a8] sm:$0xf] %v11724_v61  ;;  %v4465_v61 = vrot.slane %v4463_v52, 5  ;;  %v4469_v30 = vrot.slane %v4467_v31, 4  ;;  %v11853_v37 = vsel %vm10605_vm6, %v8415_v6, %v4718_v34  ;;  %v4720_v54 = vrot.slane %v4718_v34, 4 }
 0x34a   : > { %5016 = vst [vmem:[#allocation2 + $0x2cc] sm:$0xf] %v11737_v26  ;;  %v3855_v26 = vmax.f32 %v3823_v7, 0.0  ;;  %v3656_v51 = vadd.f32 %v3655_v59, %v3567_v33  ;;  %v4475_v42 = vrot.slane %v4473_v48, 5  ;;  %v9569_v18 = vld [vmem:[#allocation2 + $0x204] sm:$0xf] }
 0x34b   : > { %4157 = vst [vmem:[#allocation2 + $0x360] sm:$0xf] %v11748_v9  ;;  %v11859_v20 = vsel %vm10066_vm3, %v4461_v43, %v4465_v61  ;;  %v4470_v36 = vor.u32 %v4469_v30, %v4465_v61  ;;  %v11864_v21 = vsel %vm10605_vm6, %v4720_v54, %v4721_v40  ;;  %v11880_v50 = vpop.f32.mrf.mxu1  ;;  %v9573_v58 = vld [vmem:[#allocation2 + $0x220] sm:$0xf0]  ;;  %v8686_v29 = vor.u32 %v9569_v18, %v8683_v57  ;;  %v9568_v34 = vld [vmem:[#allocation2 + $0x1fc] sm:$0xf] }
 0x34c   : > { %4821 = vst [vmem:[#allocation2 + $0x324] sm:$0xf] %v11748_v9  ;;  %v3890_v39 = vrot.slane %v3855_v26, 1  ;;  %v3964_v45 = vrot.slane %v3855_v26, 7  ;;  %v3745_v5 = vadd.f32 %v3744_v23, %v3656_v51  ;;  %v3569_v4 = vpop.f32.mrf.mxu2  ;;  %v3658_v12 = vpop.f32.mrf.mxu3  ;;  %v8678_v7 = vor.u32 %v9568_v34, %v8675_v8  ;;  %v8681_v33 = vld [vmem:[#allocation2 + $0x200] sm:$0xf] }
 0x34d   : > { %4953 = vst [vmem:[#allocation2 + $0x2e8] sm:$0xf] %v11748_v9  ;;  %v4471_v0 = vrot.slane %v4470_v36, 4  ;;  %v8818_v9 = vor.u32 %v9608_v15, %v8817_v47  ;;  %v3570_v62 = vadd.f32 %v3569_v4, %v12991_v49  ;;  %v8682_v61 = vor.u32 %v9573_v58, %v8681_v33  ;;  %v12992_v36 = vld [vmem:[#allocation9_spill] sm:$0xff]  ;;  %v8711_v33 = vld [vmem:[#allocation2 + $0x264] sm:$0xf0] }
 0x34e   : > { %4158 = vst [vmem:[#allocation2 + $0x384] sm:$0xf] %v11769_v41  ;;  %v4066_v38 = vsel %vm373_vm0, %v3890_v39, %v3964_v45  ;;  %v3788_v24 = vmul.f32 %v11806_v2, %v3745_v5  ;;  %v3747_v17 = vpop.f32.mrf.mxu0  ;;  %v12993_v39 = vld [vmem:[#allocation8_spill] sm:$0xff] }
 0x34f   : > { %4579 = vst [vmem:[#allocation2 + $0x364] sm:$0xf] %v11791_v13  ;;  %v11873_v53 = vsel %vm10066_vm3, %v4471_v0, %v4475_v42  ;;  %v11875_v55 = vpack.c.bf16 %v4066_v38, %v4066_v38  ;;  %6564 = vmatmul.bf16.gmra.mxu1 %v8818_v9  ;;  %v3659_v31 = vadd.f32 %v3658_v12, %v3570_v62 }
 0x350   : > { %4580 = vst [vmem:[#allocation2 + $0x388] sm:$0xf] %v11812_v1  ;;  %v3824_v25 = vadd.f32 %v11820_v14, %v3788_v24  ;;  %v3483_v5 = vadd.f32 %v12993_v39, %v12992_v36  ;;  %v9582_v36 = vld [vmem:[#allocation2 + $0x268] sm:$0xf0] }
 0x351   : > { %4791 = vst [vmem:[#allocation2 + $0x368] sm:$0xf] %v11785_v46  ;;  %v4478_v28 = vshrl.u32 %v11875_v55, 16  ;;  %v4481_v10 = vshll.u32 %v11875_v55, 16  ;;  %v3748_v15 = vadd.f32 %v3747_v17, %v3659_v31 }
 0x352   : > { %4792 = vst [vmem:[#allocation2 + $0x38c] sm:$0xf] %v11796_v60  ;;  %v3856_v23 = vmax.f32 %v3824_v25, 0.0  ;;  %v8853_v19 = vld [vmem:[#allocation2 + $0x360] sm:$0xf] }
 0x353   : > { %4822 = vst [vmem:[#allocation2 + $0x348] sm:$0xf] %v11769_v41  ;;  %v4480_v6 = vrot.slane %v4478_v28, 4  ;;  %v4483_v52 = vrot.slane %v4481_v10, 5  ;;  %6811 = vmatmul.bf16.gmra.mxu0 %v8686_v29  ;;  %v3789_v51 = vmul.f32 %v11806_v2, %v3748_v15  ;;  %v11907_v42 = vpop.f32.mrf.mxu1  ;;  %v9578_v15 = vld [vmem:[#allocation2 + $0x24c] sm:$0xf] }
 0x354   : > { %4879 = vst [vmem:[#allocation2 + $0x328] sm:$0xf] %v11791_v13  ;;  %v3965_v59 = vrot.slane %v3856_v23, 7  ;;  %v4034_v43 = vrot.slane %v3856_v23, 5  ;;  %v3571_v47 = vpop.f32.mrf.mxu2  ;;  %v3660_v8 = vpop.f32.mrf.mxu3 }
 0x355   : > { %4880 = vst [vmem:[#allocation2 + $0x34c] sm:$0xf] %v11812_v1  ;;  %v4484_v30 = vor.u32 %v4483_v52, %v4480_v6  ;;  %v3825_v38 = vadd.f32 %v11820_v14, %v3789_v51  ;;  %v3572_v24 = vadd.f32 %v3571_v47, %v3483_v5  ;;  %v9617_v57 = vld [vmem:[#allocation2 + $0x380] sm:$0xf0] }
 0x356   : > { %4923 = vst [vmem:[#allocation2 + $0x32c] sm:$0xf] %v11785_v46  ;;  %v3966_v48 = vsel %vm373_vm0, %v3964_v45, %v3965_v59  ;;  %v4082_v54 = vsel %vm373_vm0, %v3965_v59, %v4034_v43  ;;  %v8854_v18 = vor.u32 %v9617_v57, %v8853_v19 }
 0x357   : > { %4924 = vst [vmem:[#allocation2 + $0x350] sm:$0xf] %v11796_v60  ;;  %v11896_v40 = vpack.c.bf16 %v3966_v48, %v3966_v48  ;;  %v4126_v26 = vpack.c.bf16 %v4082_v54, %v4082_v54  ;;  %v4485_v9 = vrot.slane %v4484_v30, 4  ;;  %v3857_v10 = vmax.f32 %v3825_v38, 0.0  ;;  %v9577_v30 = vld [vmem:[#allocation2 + $0x244] sm:$0xf] }
 0x358   : > { %4954 = vst [vmem:[#allocation2 + $0x30c] sm:$0xf] %v11769_v41  ;;  %6633 = vmatmul.bf16.gmra.mxu2 %v8678_v7  ;;  %6722 = vmatmul.bf16.gmra.mxu3 %v8682_v61  ;;  %v8416_v41 = vrot.slane %v11875_v55, 9  ;;  %v3661_v49 = vadd.f32 %v3660_v8, %v3572_v24  ;;  %v8714_v47 = vor.u32 %v9577_v30, %v8711_v33 }
 0x359   : > { %4985 = vst [vmem:[#allocation2 + $0x2ec] sm:$0xf] %v11791_v13  ;;  %v4487_v45 = vshll.u32 %v11896_v40, 16  ;;  %v4491_v13 = vshrl.u32 %v11896_v40, 16  ;;  %v4725_v0 = vrot.slane %v11896_v40, 5  ;;  %v4497_v17 = vshll.u32 %v4126_v26, 16 }
 0x35a   : > { %4986 = vst [vmem:[#allocation2 + $0x310] sm:$0xf] %v11812_v1  ;;  %v3749_v1 = vpop.f32.mrf.mxu0  ;;  %v4728_v28 = vrot.slane %v4126_v26, 5  ;;  %v3891_v58 = vrot.slane %v3857_v10, 1  ;;  %v3967_v29 = vrot.slane %v3857_v10, 7 }
 0x35b   : > { %5017 = vst [vmem:[#allocation2 + $0x2f0] sm:$0xf] %v11785_v46  ;;  %v4489_v46 = vrot.slane %v4487_v45, 5  ;;  %v4493_v25 = vrot.slane %v4491_v13, 4  ;;  %v11914_v4 = vsel %vm10605_vm6, %v8416_v41, %v4725_v0  ;;  %v3750_v6 = vadd.f32 %v3749_v1, %v3661_v49  ;;  %v11943_v51 = vpop.f32.mrf.mxu1  ;;  %v8717_v13 = vld [vmem:[#allocation2 + $0x248] sm:$0xf] }
 0x35c   : > { %5018 = vst [vmem:[#allocation2 + $0x314] sm:$0xf] %v11796_v60  ;;  %v4727_v60 = vrot.slane %v4725_v0, 4  ;;  %v4499_v31 = vrot.slane %v4497_v17, 5  ;;  %v4067_v34 = vsel %vm373_vm0, %v3891_v58, %v3967_v29  ;;  %v8718_v38 = vor.u32 %v9582_v36, %v8717_v13  ;;  %v3574_v17 = vpop.f32.mrf.mxu2  ;;  %v3663_v8 = vpop.f32.mrf.mxu3  ;;  %v8827_v32 = vld [vmem:[#allocation2 + $0x344] sm:$0xf0] }
 0x35d   : > { %4159 = vst [vmem:[#allocation2 + $0x3a8] sm:$0xf] %v11814_v22  ;;  %v11920_v62 = vsel %vm10066_vm3, %v4485_v9, %v4489_v46  ;;  %v4494_v12 = vor.u32 %v4493_v25, %v4489_v46  ;;  %v3790_v59 = vmul.f32 %v11806_v2, %v3750_v6  ;;  %v11936_v7 = vpack.c.bf16 %v4067_v34, %v4067_v34 }
 0x35e   : > { %4823 = vst [vmem:[#allocation2 + $0x36c] sm:$0xf] %v11814_v22  ;;  %v11925_v23 = vsel %vm10605_vm6, %v4727_v60, %v4728_v28 }
 0x35f   : > { %4955 = vst [vmem:[#allocation2 + $0x330] sm:$0xf] %v11814_v22  ;;  %v4495_v52 = vrot.slane %v4494_v12, 4  ;;  %6569 = vmatmul.bf16.gmra.mxu1 %v8854_v18  ;;  %v8719_v22 = vld [vmem:[#allocation2 + $0x26c] sm:$0xf0]  ;;  %v3826_v61 = vadd.f32 %v11820_v14, %v3790_v59  ;;  %v4502_v54 = vshrl.u32 %v11936_v7, 16 }
 0x360   : > { %4160 = vst [vmem:[#allocation2 + $0x3cc] sm:$0xf] %v11835_v63  ;;  %v8722_v48 = vor.u32 %v9578_v15, %v8719_v22  ;;  %v4505_v26 = vshll.u32 %v11936_v7, 16  ;;  %v8417_v10 = vrot.slane %v11936_v7, 9  ;;  %v12994_v18 = vld [vmem:[#allocation6_spill] sm:$0xff] }
 0x361   : > { %4581 = vst [vmem:[#allocation2 + $0x3ac] sm:$0xf] %v11859_v20  ;;  %v11934_v43 = vsel %vm10066_vm3, %v4495_v52, %v4499_v31  ;;  %v3858_v39 = vmax.f32 %v3826_v61, 0.0  ;;  %v4504_v41 = vrot.slane %v4502_v54, 4  ;;  %v8755_v15 = vld [vmem:[#allocation2 + $0x2b4] sm:$0xf0] }
 0x362   : > { %4582 = vst [vmem:[#allocation2 + $0x3d0] sm:$0xf] %v11873_v53  ;;  %v3752_v5 = vpop.f32.mrf.mxu0  ;;  %v4507_v45 = vrot.slane %v4505_v26, 5  ;;  %v12995_v54 = vld [vmem:[#allocation10_spill] sm:$0xff] }
 0x363   : > { %4793 = vst [vmem:[#allocation2 + $0x3b0] sm:$0xf] %v11853_v37  ;;  %6816 = vmatmul.bf16.gmra.mxu0 %v8722_v48  ;;  %v3968_v0 = vrot.slane %v3858_v39, 7  ;;  %v4035_v9 = vrot.slane %v3858_v39, 5  ;;  %v8747_v48 = vld [vmem:[#allocation2 + $0x2ac] sm:$0xf0]  ;;  %v3488_v26 = vadd.f32 %v11664_v3, %v12995_v54 }
 0x364   : > { %4794 = vst [vmem:[#allocation2 + $0x3d4] sm:$0xf] %v11864_v21  ;;  %v4508_v19 = vor.u32 %v4507_v45, %v4504_v41  ;;  %v8889_v60 = vld [vmem:[#allocation2 + $0x3a8] sm:$0xf]  ;;  %v9587_v39 = vld [vmem:[#allocation2 + $0x294] sm:$0xf]  ;;  %v3576_v41 = vpop.f32.mrf.mxu2  ;;  %v3665_v45 = vpop.f32.mrf.mxu3 }
 0x365   : > { %4824 = vst [vmem:[#allocation2 + $0x390] sm:$0xf] %v11835_v63  ;;  %v3969_v1 = vsel %vm373_vm0, %v3967_v29, %v3968_v0  ;;  %v4083_v24 = vsel %vm373_vm0, %v3968_v0, %v4035_v9  ;;  %v8758_v13 = vor.u32 %v9587_v39, %v8755_v15  ;;  %v3577_v0 = vadd.f32 %v3576_v41, %v3488_v26  ;;  %v9586_v9 = vld [vmem:[#allocation2 + $0x28c] sm:$0xf]  ;;  %v9595_v26 = vld [vmem:[#allocation2 + $0x2d4] sm:$0xf] }
 0x366   : > { %4881 = vst [vmem:[#allocation2 + $0x370] sm:$0xf] %v11859_v20  ;;  %v11953_v57 = vpack.c.bf16 %v3969_v1, %v3969_v1  ;;  %v4129_v46 = vpack.c.bf16 %v4083_v24, %v4083_v24  ;;  %v4509_v12 = vrot.slane %v4508_v19, 4  ;;  %v8750_v19 = vor.u32 %v9586_v9, %v8747_v48 }
 0x367   : > { %4882 = vst [vmem:[#allocation2 + $0x394] sm:$0xf] %v11873_v53  ;;  %v9626_v25 = vld [vmem:[#allocation2 + $0x3c8] sm:$0xf0] }
 0x368   : > { %4925 = vst [vmem:[#allocation2 + $0x374] sm:$0xf] %v11853_v37  ;;  %6638 = vmatmul.bf16.gmra.mxu2 %v8714_v47  ;;  %6727 = vmatmul.bf16.gmra.mxu3 %v8718_v38  ;;  %v4515_v28 = vshrl.u32 %v11953_v57, 16  ;;  %v4732_v49 = vrot.slane %v11953_v57, 5  ;;  %v8890_v29 = vor.u32 %v9626_v25, %v8889_v60  ;;  %v4521_v52 = vshll.u32 %v4129_v46, 16 }
 0x369   : > { %4926 = vst [vmem:[#allocation2 + $0x398] sm:$0xf] %v11864_v21  ;;  %v4735_v34 = vrot.slane %v4129_v46, 5  ;;  %v9591_v38 = vld [vmem:[#allocation2 + $0x2b0] sm:$0xf0]  ;;  %v3666_v46 = vadd.f32 %v3665_v45, %v3577_v0  ;;  %v9681_v45 = vld [vmem:[%s12931_s4 + $0x100] sm:$0xff] }
 0x36a   : > { %4956 = vst [vmem:[#allocation2 + $0x354] sm:$0xf] %v11835_v63  ;;  %v4511_v63 = vshll.u32 %v11953_v57, 16  ;;  %v3754_v58 = vpop.f32.mrf.mxu0  ;;  %v4517_v6 = vrot.slane %v4515_v28, 4  ;;  %v11968_v31 = vsel %vm10605_vm6, %v8417_v10, %v4732_v49  ;;  %v4734_v22 = vrot.slane %v4732_v49, 4  ;;  %v9682_v10 = vld [vmem:[%s12931_s4 + $0x108] sm:$0xff] }
 0x36b   : > { %4987 = vst [vmem:[#allocation2 + $0x334] sm:$0xf] %v11859_v20  ;;  %v11961_v20 = vpop.f32.mrf.mxu1  ;;  %v4523_v36 = vrot.slane %v4521_v52, 5  ;;  %v8753_v25 = vld [vmem:[#allocation2 + $0x290] sm:$0xf]  ;;  %v3755_v60 = vadd.f32 %v3754_v58, %v3666_v46  ;;  %6863 = vmatpush.bf16.msrb.mxu1 %v9682_v10  ;;  %v9704_v10 = vld [vmem:[%s12931_s4 + $0x1b8] sm:$0xff] }
 0x36c   : > { %4988 = vst [vmem:[#allocation2 + $0x358] sm:$0xf] %v11873_v53  ;;  %v3575_v53 = vadd.f32 %v3574_v17, %v12994_v18  ;;  %v11979_v61 = vsel %vm10605_vm6, %v4734_v22, %v4735_v34  ;;  %v6599_v18 = vpop.f32.mrf.mxu2  ;;  %7035 = vmatpush.bf16.msra.mxu3 %v9704_v10 }
 0x36d   : > { %5019 = vst [vmem:[#allocation2 + $0x338] sm:$0xf] %v11853_v37  ;;  %v4513_v37 = vrot.slane %v4511_v63, 5  ;;  %v3792_v49 = vmul.f32 %v11806_v2, %v3755_v60 }
 0x36e   : > { %5020 = vst [vmem:[#allocation2 + $0x35c] sm:$0xf] %v11864_v21  ;;  %v3664_v59 = vadd.f32 %v3663_v8, %v3575_v53  ;;  %v8754_v8 = vor.u32 %v9591_v38, %v8753_v25  ;;  %v6688_v53 = vpop.f32.mrf.mxu3 }
 0x36f   : > { %4161 = vst [vmem:[#allocation2 + $0x3f0] sm:$0xf] %v11875_v55  ;;  %v11974_v21 = vsel %vm10066_vm3, %v4509_v12, %v4513_v37  ;;  %v4518_v33 = vor.u32 %v4517_v6, %v4513_v37  ;;  %6574 = vmatmul.bf16.gmra.mxu1 %v8890_v29  ;;  %v3828_v37 = vadd.f32 %v11820_v14, %v3792_v49 }
 0x370   : > { %4825 = vst [vmem:[#allocation2 + $0x3b4] sm:$0xf] %v11875_v55  ;;  %v3753_v30 = vadd.f32 %v3752_v5, %v3664_v59  ;;  %v6600_v6 = vadd.f32 %v6599_v18, %v11700_v44  ;;  %v8791_v44 = vld [vmem:[#allocation2 + $0x2fc] sm:$0xf0]  ;;  %6864 = vmatpush.bf16.msrb.mxu1 %v9681_v45 }
 0x371   : > { %4957 = vst [vmem:[#allocation2 + $0x378] sm:$0xf] %v11875_v55  ;;  %v4519_v55 = vrot.slane %v4518_v33, 4 }
 0x372   : > { %4162 = vst [vmem:[#allocation2 + $0x414] sm:$0xf] %v11896_v40  ;;  %v3791_v47 = vmul.f32 %v11806_v2, %v3753_v30  ;;  %v11995_v24 = vpop.f32.mrf.mxu0 }
 0x373   : > { %4583 = vst [vmem:[#allocation2 + $0x3f4] sm:$0xf] %v11920_v62  ;;  %v11989_v5 = vsel %vm10066_vm3, %v4519_v55, %v4523_v36  ;;  %v11991_v3 = vpop.f32.mrf.mxu1  ;;  %6821 = vmatmul.bf16.gmra.mxu0 %v8758_v13  ;;  %v9596_v55 = vld [vmem:[#allocation2 + $0x2dc] sm:$0xf] }
 0x374   : > { %4584 = vst [vmem:[#allocation2 + $0x418] sm:$0xf] %v11934_v43  ;;  %v3827_v1 = vadd.f32 %v11820_v14, %v3791_v47  ;;  %v12022_v14 = vadd.f32 %v6688_v53, %v6600_v6  ;;  %v6601_v47 = vpop.f32.mrf.mxu2  ;;  %v9600_v13 = vld [vmem:[#allocation2 + $0x2f8] sm:$0xf0]  ;;  %v8794_v0 = vor.u32 %v9596_v55, %v8791_v44 }
 0x375   : > { %4795 = vst [vmem:[#allocation2 + $0x3f8] sm:$0xf] %v11914_v4  ;;  %v6602_v9 = vadd.f32 %v6601_v47, %v11732_v35  ;;  %v9604_v55 = vld [vmem:[#allocation2 + $0x31c] sm:$0xf] }
 0x376   : > { %4796 = vst [vmem:[#allocation2 + $0x41c] sm:$0xf] %v11925_v23  ;;  %v3859_v17 = vmax.f32 %v3827_v1, 0.0  ;;  %v6690_v41 = vpop.f32.mrf.mxu3 }
 0x377   : > { %4826 = vst [vmem:[#allocation2 + $0x3d8] sm:$0xf] %v11896_v40  ;;  %v12047_v60 = vadd.f32 %v6690_v41, %v6602_v9 }
 0x378   : > { %4883 = vst [vmem:[#allocation2 + $0x3b8] sm:$0xf] %v11920_v62  ;;  %6643 = vmatmul.bf16.gmra.mxu2 %v8750_v19  ;;  %v3892_v63 = vrot.slane %v3859_v17, 1  ;;  %v3970_v28 = vrot.slane %v3859_v17, 7  ;;  %6732 = vmatmul.bf16.gmra.mxu3 %v8754_v8  ;;  %v8789_v19 = vld [vmem:[#allocation2 + $0x2d8] sm:$0xf] }
 0x379   : > { %4884 = vst [vmem:[#allocation2 + $0x3dc] sm:$0xf] %v11934_v43  ;;  %v9635_v58 = vld [vmem:[#allocation2 + $0x410] sm:$0xf0] }
 0x37a   : > { %4927 = vst [vmem:[#allocation2 + $0x3bc] sm:$0xf] %v11914_v4  ;;  %v4068_v12 = vsel %vm373_vm0, %v3892_v63, %v3970_v28  ;;  %v12016_v2 = vpop.f32.mrf.mxu0  ;;  %v8790_v63 = vor.u32 %v9600_v13, %v8789_v19  ;;  %v8825_v13 = vld [vmem:[#allocation2 + $0x320] sm:$0xf] }
 0x37b   : > { %4928 = vst [vmem:[#allocation2 + $0x3e0] sm:$0xf] %v11925_v23  ;;  %v12009_v29 = vpack.c.bf16 %v4068_v12, %v4068_v12  ;;  %v12013_v52 = vpop.f32.mrf.mxu1 }
 0x37c   : > { %4958 = vst [vmem:[#allocation2 + $0x39c] sm:$0xf] %v11896_v40  ;;  %v8925_v40 = vld [vmem:[#allocation2 + $0x3f0] sm:$0xf] }
 0x37d   : > { %4989 = vst [vmem:[#allocation2 + $0x37c] sm:$0xf] %v11920_v62  ;;  %v4832_v22 = vshrl.u32 %v12009_v29, 16  ;;  %v4835_v34 = vshll.u32 %v12009_v29, 16  ;;  %v3860_v62 = vmax.f32 %v3828_v37, 0.0  ;;  %v8926_v59 = vor.u32 %v9635_v58, %v8925_v40 }
 0x37e   : > { %4990 = vst [vmem:[#allocation2 + $0x3a0] sm:$0xf] %v11934_v43  ;;  %v6693_v44 = vpop.f32.mrf.mxu3 }
 0x37f   : > { %5021 = vst [vmem:[#allocation2 + $0x380] sm:$0xf] %v11914_v4  ;;  %v4834_v33 = vrot.slane %v4832_v22, 4  ;;  %v4837_v43 = vrot.slane %v4835_v34, 5  ;;  %v3971_v15 = vrot.slane %v3860_v62, 7  ;;  %v4036_v30 = vrot.slane %v3860_v62, 5  ;;  %6579 = vmatmul.bf16.gmra.mxu1 %v8926_v59  ;;  %v6604_v59 = vpop.f32.mrf.mxu2 }
 0x380   : > { %5022 = vst [vmem:[#allocation2 + $0x3a4] sm:$0xf] %v11925_v23  ;;  %v8783_v4 = vld [vmem:[#allocation2 + $0x2f4] sm:$0xf0] }
 0x381   : > { %4163 = vst [vmem:[#allocation2 + $0x438] sm:$0xf] %v11936_v7  ;;  %v4838_v48 = vor.u32 %v4837_v43, %v4834_v33  ;;  %v3972_v54 = vsel %vm373_vm0, %v3970_v28, %v3971_v15  ;;  %v4084_v23 = vsel %vm373_vm0, %v3971_v15, %v4036_v30  ;;  %v8786_v1 = vor.u32 %v9595_v26, %v8783_v4  ;;  %v9696_v28 = vld [vmem:[%s12931_s4 + $0x178] sm:$0xff]  ;;  %v9605_v4 = vld [vmem:[#allocation2 + $0x324] sm:$0xf] }
 0x382   : > { %4827 = vst [vmem:[#allocation2 + $0x3fc] sm:$0xf] %v11936_v7  ;;  %v12030_v36 = vpack.c.bf16 %v3972_v54, %v3972_v54  ;;  %v4132_v39 = vpack.c.bf16 %v4084_v23, %v4084_v23  ;;  %v12044_v8 = vpop.f32.mrf.mxu0  ;;  %6946 = vmatpush.bf16.msra.mxu2 %v9696_v28  ;;  %v6605_v33 = vadd.f32 %v6604_v59, %v11763_v11  ;;  %v9712_v30 = vld [vmem:[%s12931_s4 + $0x1f8] sm:$0xff] }
 0x383   : > { %4959 = vst [vmem:[#allocation2 + $0x3c0] sm:$0xf] %v11936_v7  ;;  %v12037_v38 = vpop.f32.mrf.mxu1  ;;  %6826 = vmatmul.bf16.gmra.mxu0 %v8794_v0  ;;  %v4839_v35 = vrot.slane %v4838_v48, 4  ;;  %v9720_v11 = vld [vmem:[%s12931_s4 + $0x238] sm:$0xff]  ;;  %v8830_v23 = vor.u32 %v9605_v4, %v8827_v32  ;;  %v9711_v32 = vld [vmem:[%s12931_s4 + $0x1f0] sm:$0xff] }
 0x384   : > { %4963 = vst [vmem:[#allocation2 + $0x450] sm:$0xf] %v11936_v7  ;;  %v8418_v7 = vrot.slane %v12009_v29, 9  ;;  %v4841_v46 = vshll.u32 %v12030_v36, 16  ;;  %v4845_v25 = vshrl.u32 %v12030_v36, 16  ;;  %v4894_v17 = vrot.slane %v12030_v36, 5  ;;  %7124 = vmatpush.bf16.msra.mxu0 %v9712_v30  ;;  %7213 = vmatpush.bf16.msra.mxu1 %v9720_v11 }
 0x385   : > { %4586 = vst [vmem:[#allocation2 + $0x460] sm:$0xf] %v11989_v5  ;;  %v4851_v18 = vshll.u32 %v4132_v39, 16  ;;  %v4897_v37 = vrot.slane %v4132_v39, 5  ;;  %v9609_v39 = vld [vmem:[#allocation2 + $0x340] sm:$0xf0] }
 0x386   : > { %4797 = vst [vmem:[#allocation2 + $0x440] sm:$0xf] %v11968_v31  ;;  %v4843_v49 = vrot.slane %v4841_v46, 5  ;;  %v4847_v12 = vrot.slane %v4845_v25, 4  ;;  %v12058_v53 = vsel %vm10605_vm6, %v8418_v7, %v4894_v17  ;;  %v4896_v58 = vrot.slane %v4894_v17, 4  ;;  %v6695_v54 = vpop.f32.mrf.mxu3 }
 0x387   : > { %4798 = vst [vmem:[#allocation2 + $0x464] sm:$0xf] %v11979_v61  ;;  %v4853_v62 = vrot.slane %v4851_v18, 5  ;;  %v6606_v48 = vpop.f32.mrf.mxu2  ;;  %v8863_v25 = vld [vmem:[#allocation2 + $0x38c] sm:$0xf0]  ;;  %v12123_v17 = vadd.f32 %v11995_v24, %v12022_v14 }
 0x388   : > { %4886 = vst [vmem:[#allocation2 + $0x424] sm:$0xf] %v11989_v5  ;;  %6648 = vmatmul.bf16.gmra.mxu2 %v8786_v1  ;;  %v12064_v6 = vsel %vm10066_vm3, %v4839_v35, %v4843_v49  ;;  %v4848_v40 = vor.u32 %v4847_v12, %v4843_v49  ;;  %6737 = vmatmul.bf16.gmra.mxu3 %v8790_v63  ;;  %v8961_v0 = vld [vmem:[#allocation2 + $0x438] sm:$0xf]  ;;  %v9614_v35 = vld [vmem:[#allocation2 + $0x36c] sm:$0xf] }
 0x389   : > { %4929 = vst [vmem:[#allocation2 + $0x404] sm:$0xf] %v11968_v31  ;;  %v12069_v22 = vsel %vm10605_vm6, %v4896_v58, %v4897_v37  ;;  %v8866_v10 = vor.u32 %v9614_v35, %v8863_v25  ;;  %v9613_v12 = vld [vmem:[#allocation2 + $0x364] sm:$0xf]  ;;  %v9618_v18 = vld [vmem:[#allocation2 + $0x388] sm:$0xf0]  ;;  %7125 = vmatpush.bf16.msra.mxu0 %v9711_v32 }
 0x38a   : > { %4930 = vst [vmem:[#allocation2 + $0x428] sm:$0xf] %v11979_v61  ;;  %v4849_v34 = vrot.slane %v4848_v40, 4  ;;  %v12079_v27 = vpop.f32.mrf.mxu0  ;;  %v9511_v24 = vld [vmem:[#allocation2 + $0x30] sm:$0xf0] }
 0x38b   : > { %4992 = vst [vmem:[#allocation2 + $0x3e8] sm:$0xf] %v11989_v5  ;;  %v12074_v43 = vpop.f32.mrf.mxu1  ;;  %v8437_v40 = vld [vmem:[#allocation2 + $0x10] sm:$0xf]  ;;  %v9623_v4 = vld [vmem:[#allocation2 + $0x3b4] sm:$0xf] }
 0x38c   : > { %4996 = vst [vmem:[#allocation2 + $0x478] sm:$0xf] %v11989_v5  ;;  %v4854_v15 = vsel %vm10066_vm3, %v4849_v34, %v4853_v62  ;;  %v12082_v5 = vadd.f32 %v6693_v44, %v6605_v33  ;;  %v8438_v34 = vor.u32 %v9511_v24, %v8437_v40  ;;  %v12142_v62 = vadd.f32 %v12016_v2, %v12047_v60  ;;  %v9719_v2 = vld [vmem:[%s12931_s4 + $0x230] sm:$0xff]  ;;  %v8899_v60 = vld [vmem:[#allocation2 + $0x3d4] sm:$0xf0] }
 0x38d   : > { %5023 = vst [vmem:[#allocation2 + $0x3c8] sm:$0xf] %v11968_v31  ;;  %7214 = vmatpush.bf16.msra.mxu1 %v9719_v2  ;;  %v9636_v40 = vld [vmem:[#allocation2 + $0x418] sm:$0xf0]  ;;  %v8509_v32 = vld [vmem:[#allocation2 + $0xa0] sm:$0xf] }
 0x38e   : > { %5024 = vst [vmem:[#allocation2 + $0x3ec] sm:$0xf] %v11979_v61  ;;  %v6698_v19 = vpop.f32.mrf.mxu3 }
 0x38f   : > { %5027 = vst [vmem:[#allocation2 + $0x458] sm:$0xf] %v11968_v31  ;;  %v8819_v31 = vld [vmem:[#allocation2 + $0x33c] sm:$0xf0] }
 0x390   : > { %5028 = vst [vmem:[#allocation2 + $0x47c] sm:$0xf] %v11979_v61  ;;  %v6607_v61 = vadd.f32 %v6606_v48, %v11799_v56  ;;  %v8822_v41 = vor.u32 %v9604_v55, %v8819_v31  ;;  %v8826_v56 = vor.u32 %v9609_v39, %v8825_v13  ;;  %v8891_v31 = vld [vmem:[#allocation2 + $0x3cc] sm:$0xf0]  ;;  %v9622_v39 = vld [vmem:[#allocation2 + $0x3ac] sm:$0xf] }
 0x391   : > { %4164 = vst [vmem:[#allocation2 + $0x45c] sm:$0xf] %v11953_v57 }
 0x392   : > { %4585 = vst [vmem:[#allocation2 + $0x43c] sm:$0xf] %v11974_v21  ;;  %v12100_v47 = vpop.f32.mrf.mxu0  ;;  %v12103_v45 = vadd.f32 %v6695_v54, %v6607_v61 }
 0x393   : > { %4828 = vst [vmem:[#allocation2 + $0x420] sm:$0xf] %v11953_v57  ;;  %v12097_v26 = vpop.f32.mrf.mxu1  ;;  %6831 = vmatmul.bf16.gmra.mxu0 %v8830_v23  ;;  %v8902_v23 = vor.u32 %v9623_v4, %v8899_v60  ;;  %v9700_v4 = vld [vmem:[%s12931_s4 + $0x198] sm:$0xff] }
 0x394   : > { %4885 = vst [vmem:[#allocation2 + $0x400] sm:$0xf] %v11974_v21 }
 0x395   : > { %4960 = vst [vmem:[#allocation2 + $0x3e4] sm:$0xf] %v11953_v57 }
 0x396   : > { %4964 = vst [vmem:[#allocation2 + $0x474] sm:$0xf] %v11953_v57  ;;  %v6609_v57 = vpop.f32.mrf.mxu2  ;;  %v6700_v28 = vpop.f32.mrf.mxu3 }
 0x397   : > { %4991 = vst [vmem:[#allocation2 + $0x3c4] sm:$0xf] %v11974_v21 }
 0x398   : > { %4995 = vst [vmem:[#allocation2 + $0x454] sm:$0xf] %v11974_v21  ;;  %v9644_v9 = vld [vmem:[#allocation2 + $0x458] sm:$0xf0]  ;;  %6653 = vmatmul.bf16.gmra.mxu2 %v8822_v41  ;;  %6742 = vmatmul.bf16.gmra.mxu3 %v8826_v56  ;;  %v6610_v21 = vadd.f32 %v6609_v57, %v11838_v16  ;;  %v8855_v16 = vld [vmem:[#allocation2 + $0x384] sm:$0xf0] }
 0x399   : > { %4829 = vst [vmem:[#allocation2 + $0x444] sm:$0xf] %v12009_v29  ;;  %v8962_v1 = vor.u32 %v9644_v9, %v8961_v0  ;;  %v8858_v14 = vor.u32 %v9613_v12, %v8855_v16  ;;  %v9627_v41 = vld [vmem:[#allocation2 + $0x3d0] sm:$0xf0]  ;;  %v9520_v0 = vld [vmem:[#allocation2 + $0x78] sm:$0xf0]  ;;  %v8894_v9 = vor.u32 %v9622_v39, %v8891_v31 }
 0x39a   : > { %4961 = vst [vmem:[#allocation2 + $0x408] sm:$0xf] %v12009_v29  ;;  %v12114_v46 = vpop.f32.mrf.mxu0  ;;  %v12117_v29 = vadd.f32 %v6698_v19, %v6610_v21  ;;  %v12170_v19 = vadd.f32 %v12079_v27, %v12103_v45  ;;  %v9702_v27 = vld [vmem:[%s12931_s4 + $0x1a8] sm:$0xff]  ;;  %v9632_v12 = vld [vmem:[#allocation2 + $0x3fc] sm:$0xf] }
 0x39b   : > { %4830 = vst [vmem:[#allocation2 + $0x468] sm:$0xf] %v12030_v36  ;;  %6584 = vmatmul.bf16.gmra.mxu1 %v8962_v1  ;;  %v12111_v7 = vpop.f32.mrf.mxu1  ;;  %v9710_v45 = vld [vmem:[%s12931_s4 + $0x1e8] sm:$0xff]  ;;  %v9692_v31 = vld [vmem:[%s12931_s4 + $0x158] sm:$0xff] }
 0x39c   : > { %4887 = vst [vmem:[#allocation2 + $0x448] sm:$0xf] %v12064_v6  ;;  %7126 = vmatpush.bf16.msra.mxu0 %v9710_v45 }
 0x39d   : > { %4888 = vst [vmem:[#allocation2 + $0x46c] sm:$0xf] %v4854_v15 }
 0x39e   : > { %4931 = vst [vmem:[#allocation2 + $0x44c] sm:$0xf] %v12058_v53  ;;  %v6611_v63 = vpop.f32.mrf.mxu2  ;;  %v6703_v44 = vpop.f32.mrf.mxu3 }
 0x39f   : > { %4932 = vst [vmem:[#allocation2 + $0x470] sm:$0xf] %v12069_v22  ;;  %v6612_v49 = vadd.f32 %v6611_v63, %v11880_v50  ;;  %v9703_v50 = vld [vmem:[%s12931_s4 + $0x1b0] sm:$0xff] }
 0x3a0   : > { %4962 = vst [vmem:[#allocation2 + $0x42c] sm:$0xf] %v12030_v36  ;;  %7036 = vmatpush.bf16.msra.mxu3 %v9703_v50  ;;  %v9631_v50 = vld [vmem:[#allocation2 + $0x3f4] sm:$0xf] }
 0x3a1   : > { %4993 = vst [vmem:[#allocation2 + $0x40c] sm:$0xf] %v12064_v6  ;;  %v12132_v37 = vadd.f32 %v6700_v28, %v6612_v49  ;;  %v9695_v6 = vld [vmem:[%s12931_s4 + $0x170] sm:$0xff]  ;;  %v9694_v28 = vld [vmem:[%s12931_s4 + $0x168] sm:$0xff]  ;;  %v8927_v49 = vld [vmem:[#allocation2 + $0x414] sm:$0xf0] }
 0x3a2   : > { %4994 = vst [vmem:[#allocation2 + $0x430] sm:$0xf] %v4854_v15  ;;  %v12130_v58 = vpop.f32.mrf.mxu0  ;;  %6947 = vmatpush.bf16.msra.mxu2 %v9695_v6 }
 0x3a3   : > { %5025 = vst [vmem:[#allocation2 + $0x410] sm:$0xf] %v12058_v53  ;;  %v12128_v36 = vpop.f32.mrf.mxu1  ;;  %6836 = vmatmul.bf16.gmra.mxu0 %v8866_v10  ;;  %v8861_v53 = vld [vmem:[#allocation2 + $0x368] sm:$0xf]  ;;  %v8935_v10 = vld [vmem:[#allocation2 + $0x41c] sm:$0xf0] }
 0x3a4   : > { %5026 = vst [vmem:[#allocation2 + $0x434] sm:$0xf] %v12069_v22  ;;  %v8862_v22 = vor.u32 %v9618_v18, %v8861_v53  ;;  %7037 = vmatpush.bf16.msra.mxu3 %v9702_v27 }
 0x3a6   : > { %v6614_v59 = vpop.f32.mrf.mxu2  ;;  %v6705_v54 = vpop.f32.mrf.mxu3  ;;  %6948 = vmatpush.bf16.msra.mxu2 %v9694_v28  ;;  %v9706_v28 = vld [vmem:[%s12931_s4 + $0x1c8] sm:$0xff] }
 0x3a7   : > { %v6615_v33 = vadd.f32 %v6614_v59, %v11907_v42  ;;  %v12159_v42 = vadd.f32 %v12044_v8, %v12082_v5  ;;  %v8897_v8 = vld [vmem:[#allocation2 + $0x3b0] sm:$0xf]  ;;  %v8473_v5 = vld [vmem:[#allocation2 + $0x58] sm:$0xf]  ;;  %v8930_v59 = vor.u32 %v9631_v50, %v8927_v49 }
 0x3a8   : > { %6658 = vmatmul.bf16.gmra.mxu2 %v8858_v14  ;;  %6747 = vmatmul.bf16.gmra.mxu3 %v8862_v22  ;;  %v8898_v1 = vor.u32 %v9627_v41, %v8897_v8  ;;  %v8474_v57 = vor.u32 %v9520_v0, %v8473_v5  ;;  %v8938_v14 = vor.u32 %v9632_v12, %v8935_v10  ;;  %v9718_v8 = vld [vmem:[%s12931_s4 + $0x228] sm:$0xff] }
 0x3a9   : > { %v12149_v11 = vadd.f32 %v6703_v44, %v6615_v33  ;;  %v8933_v44 = vld [vmem:[#allocation2 + $0x3f8] sm:$0xf]  ;;  %v9709_v33 = vld [vmem:[%s12931_s4 + $0x1e0] sm:$0xff]  ;;  %v8971_v5 = vld [vmem:[#allocation2 + $0x464] sm:$0xf0]  ;;  %7215 = vmatpush.bf16.msra.mxu1 %v9718_v8 }
 0x3aa   : > { %v12147_v30 = vpop.f32.mrf.mxu0  ;;  %v8934_v2 = vor.u32 %v9636_v40, %v8933_v44  ;;  %7127 = vmatpush.bf16.msra.mxu0 %v9709_v33  ;;  %v9689_v40 = vld [vmem:[%s12931_s4 + $0x140] sm:$0xff]  ;;  %v9512_v8 = vld [vmem:[#allocation2 + $0x38] sm:$0xf0] }
 0x3ab   : > { %6865 = vmatmul.bf16.vlgmr.msrb.gmra.mxu1 %v8438_v34  ;;  %v12145_v15 = vpop.f32.mrf.mxu1  ;;  %v9529_v34 = vld [vmem:[#allocation2 + $0xc0] sm:$0xf0] }
 0x3ac   : > { %v8510_v60 = vor.u32 %v9529_v34, %v8509_v32  ;;  %v9705_v34 = vld [vmem:[%s12931_s4 + $0x1c0] sm:$0xff] }
 0x3ae   : > { %v6616_v48 = vpop.f32.mrf.mxu2  ;;  %v6708_v21 = vpop.f32.mrf.mxu3 }
 0x3af   : > { %v6617_v61 = vadd.f32 %v6616_v48, %v11943_v51  ;;  %v12216_v48 = vadd.f32 %v12114_v46, %v12132_v37  ;;  %v9691_v37 = vld [vmem:[%s12931_s4 + $0x150] sm:$0xff] }
 0x3b1   : > { %v12166_v56 = vadd.f32 %v6705_v54, %v6617_v61  ;;  %v9708_v54 = vld [vmem:[%s12931_s4 + $0x1d8] sm:$0xff] }
 0x3b2   : > { %v12164_v13 = vpop.f32.mrf.mxu0  ;;  %7128 = vmatpush.bf16.msra.mxu0 %v9708_v54  ;;  %v8447_v54 = vld [vmem:[#allocation2 + $0x3c] sm:$0xf0] }
 0x3b3   : > { %v12162_v55 = vpop.f32.mrf.mxu1  ;;  %6841 = vmatmul.bf16.gmra.mxu0 %v8902_v23 }
 0x3b6   : > { %v6619_v51 = vpop.f32.mrf.mxu2  ;;  %v6710_v24 = vpop.f32.mrf.mxu3 }
 0x3b7   : > { %v6620_v25 = vadd.f32 %v6619_v51, %v11961_v20  ;;  %v12190_v20 = vadd.f32 %v12100_v47, %v12117_v29  ;;  %v9693_v29 = vld [vmem:[%s12931_s4 + $0x160] sm:$0xff]  ;;  %v12248_v51 = vadd.f32 %v12130_v58, %v12149_v11  ;;  %v9538_v11 = vld [vmem:[#allocation2 + $0x108] sm:$0xf0] }
 0x3b8   : > { %6663 = vmatmul.bf16.gmra.mxu2 %v8894_v9  ;;  %6752 = vmatmul.bf16.gmra.mxu3 %v8898_v1  ;;  %v9699_v9 = vld [vmem:[%s12931_s4 + $0x190] sm:$0xff]  ;;  %v9690_v1 = vld [vmem:[%s12931_s4 + $0x148] sm:$0xff] }
 0x3b9   : > { %v12177_v63 = vadd.f32 %v6708_v21, %v6620_v25  ;;  %6949 = vmatpush.bf16.msra.mxu2 %v9693_v29  ;;  %v8963_v21 = vld [vmem:[#allocation2 + $0x45c] sm:$0xf0]  ;;  %v9641_v25 = vld [vmem:[#allocation2 + $0x444] sm:$0xf] }
 0x3ba   : > { %v12175_v35 = vpop.f32.mrf.mxu0  ;;  %v8974_v10 = vor.u32 %v9641_v25, %v8971_v5 }
 0x3bb   : > { %6870 = vmatmul.bf16.gmra.mxu1 %v8474_v57  ;;  %v12173_v16 = vpop.f32.mrf.mxu1  ;;  %v9698_v57 = vld [vmem:[%s12931_s4 + $0x188] sm:$0xff] }
 0x3bd   : > { %6950 = vmatpush.bf16.msra.mxu2 %v9692_v31 }
 0x3be   : > { %v6621_v18 = vpop.f32.mrf.mxu2  ;;  %v6713_v61 = vpop.f32.mrf.mxu3 }
 0x3bf   : > { %v6622_v53 = vadd.f32 %v6621_v18, %v11991_v3  ;;  %v9701_v3 = vld [vmem:[%s12931_s4 + $0x1a0] sm:$0xff]  ;;  %v9640_v18 = vld [vmem:[#allocation2 + $0x43c] sm:$0xf] }
 0x3c0   : > { %7038 = vmatpush.bf16.msra.mxu3 %v9701_v3  ;;  %v12271_v3 = vadd.f32 %v12147_v30, %v12166_v56  ;;  %v8439_v30 = vld [vmem:[#allocation2 + $0x34] sm:$0xf0]  ;;  %v9508_v56 = vld [vmem:[#allocation2 + $0x1c] sm:$0xf] }
 0x3c1   : > { %v12197_v47 = vadd.f32 %v6710_v24, %v6622_v53  ;;  %6951 = vmatpush.bf16.msra.mxu2 %v9691_v37  ;;  %v9645_v24 = vld [vmem:[#allocation2 + $0x460] sm:$0xf0]  ;;  %v8969_v53 = vld [vmem:[#allocation2 + $0x440] sm:$0xf]  ;;  %v8450_v37 = vor.u32 %v9508_v56, %v8447_v54 }
 0x3c2   : > { %v12195_v22 = vpop.f32.mrf.mxu0  ;;  %v8970_v44 = vor.u32 %v9645_v24, %v8969_v53  ;;  %v9517_v53 = vld [vmem:[#allocation2 + $0x64] sm:$0xf] }
 0x3c3   : > { %v12193_v6 = vpop.f32.mrf.mxu1  ;;  %6846 = vmatmul.bf16.gmra.mxu0 %v8938_v14  ;;  %v8966_v14 = vor.u32 %v9640_v18, %v8963_v21 }
 0x3c4   : > { %7039 = vmatpush.bf16.msra.mxu3 %v9700_v4 }
 0x3c5   : > { %6952 = vmatpush.bf16.msra.mxu2 %v9690_v1  ;;  %v9547_v1 = vld [vmem:[#allocation2 + $0x150] sm:$0xf0] }
 0x3c6   : > { %v6624_v23 = vpop.f32.mrf.mxu2  ;;  %v6715_v45 = vpop.f32.mrf.mxu3 }
 0x3c7   : > { %v6625_v39 = vadd.f32 %v6624_v23, %v12013_v52  ;;  %v9707_v52 = vld [vmem:[%s12931_s4 + $0x1d0] sm:$0xff]  ;;  %v12282_v23 = vadd.f32 %v12164_v13, %v12177_v63  ;;  %v8445_v13 = vld [vmem:[#allocation2 + $0x18] sm:$0xf] }
 0x3c8   : > { %6668 = vmatmul.bf16.gmra.mxu2 %v8930_v59  ;;  %6757 = vmatmul.bf16.gmra.mxu3 %v8934_v2  ;;  %v8545_v59 = vld [vmem:[#allocation2 + $0xe8] sm:$0xf]  ;;  %v8581_v63 = vld [vmem:[#allocation2 + $0x130] sm:$0xf]  ;;  %v8446_v25 = vor.u32 %v9512_v8, %v8445_v13 }
 0x3c9   : > { %v12226_v46 = vadd.f32 %v6713_v61, %v6625_v39  ;;  %7040 = vmatpush.bf16.msra.mxu3 %v9699_v9  ;;  %7129 = vmatpush.bf16.msra.mxu0 %v9707_v52  ;;  %v8546_v29 = vor.u32 %v9538_v11, %v8545_v59  ;;  %v9717_v11 = vld [vmem:[%s12931_s4 + $0x220] sm:$0xff]  ;;  %v8511_v13 = vld [vmem:[#allocation2 + $0xc4] sm:$0xf0] }
 0x3ca   : > { %v12224_v0 = vpop.f32.mrf.mxu0  ;;  %6953 = vmatpush.bf16.msra.mxu2 %v9689_v40  ;;  %7216 = vmatpush.bf16.msra.mxu1 %v9717_v11  ;;  %v9565_v11 = vld [vmem:[#allocation2 + $0x1e0] sm:$0xf0] }
 0x3cb   : > { %6875 = vmatmul.bf16.gmra.mxu1 %v8510_v60  ;;  %v12222_v41 = vpop.f32.mrf.mxu1 }
 0x3cd   : > { %7041 = vmatpush.bf16.msra.mxu3 %v9698_v57  ;;  %7130 = vmatpush.bf16.msra.mxu0 %v9706_v28  ;;  %v8582_v28 = vor.u32 %v9547_v1, %v8581_v63  ;;  %v8519_v1 = vld [vmem:[#allocation2 + $0xcc] sm:$0xf0] }
 0x3ce   : > { %v6626_v27 = vpop.f32.mrf.mxu2  ;;  %v6718_v32 = vpop.f32.mrf.mxu3 }
 0x3cf   : > { %v6627_v49 = vadd.f32 %v6626_v27, %v12037_v38  ;;  %v9697_v38 = vld [vmem:[%s12931_s4 + $0x180] sm:$0xff]  ;;  %v12293_v27 = vadd.f32 %v12175_v35, %v12197_v47  ;;  %v12307_v35 = vadd.f32 %v12195_v22, %v12226_v46  ;;  %v8617_v46 = vld [vmem:[#allocation2 + $0x178] sm:$0xf] }
 0x3d0   : > { %v8475_v47 = vld [vmem:[#allocation2 + $0x7c] sm:$0xf0] }
 0x3d1   : > { %v12258_v50 = vadd.f32 %v6715_v45, %v6627_v49  ;;  %7042 = vmatpush.bf16.msra.mxu3 %v9697_v38  ;;  %7131 = vmatpush.bf16.msra.mxu0 %v9705_v34  ;;  %v8481_v22 = vld [vmem:[#allocation2 + $0x60] sm:$0xf] }
 0x3d2   : > { %v12256_v58 = vpop.f32.mrf.mxu0 }
 0x3d3   : > { %v12254_v12 = vpop.f32.mrf.mxu1  ;;  %6851 = vmatmul.bf16.gmra.mxu0 %v8974_v10 }
 0x3d6   : > { %v6629_v33 = vpop.f32.mrf.mxu2  ;;  %v6720_v39 = vpop.f32.mrf.mxu3 }
 0x3d7   : > { %v6630_v2 = vadd.f32 %v6629_v33, %v12074_v43  ;;  %v9507_v43 = vld [vmem:[#allocation2 + $0x14] sm:$0xf] }
 0x3d8   : > { %6673 = vmatmul.bf16.gmra.mxu2 %v8966_v14  ;;  %6762 = vmatmul.bf16.gmra.mxu3 %v8970_v44  ;;  %v8442_v57 = vor.u32 %v9507_v43, %v8439_v30  ;;  %v8483_v14 = vld [vmem:[#allocation2 + $0x84] sm:$0xf0]  ;;  %v9516_v44 = vld [vmem:[#allocation2 + $0x5c] sm:$0xf] }
 0x3d9   : > { %v12278_v4 = vadd.f32 %v6718_v32, %v6630_v2  ;;  %v8486_v38 = vor.u32 %v9517_v53, %v8483_v14  ;;  %v9556_v32 = vld [vmem:[#allocation2 + $0x198] sm:$0xf0]  ;;  %v8478_v2 = vor.u32 %v9516_v44, %v8475_v47 }
 0x3da   : > { %v12276_v31 = vpop.f32.mrf.mxu0  ;;  %v8618_v56 = vor.u32 %v9556_v32, %v8617_v46  ;;  %v9535_v46 = vld [vmem:[#allocation2 + $0xf4] sm:$0xf] }
 0x3db   : > { %6880 = vmatmul.bf16.gmra.mxu1 %v8546_v29  ;;  %v12274_v60 = vpop.f32.mrf.mxu1  ;;  %v9521_v29 = vld [vmem:[#allocation2 + $0x80] sm:$0xf0] }
 0x3dc   : > { %v8482_v30 = vor.u32 %v9521_v29, %v8481_v22  ;;  %v8555_v22 = vld [vmem:[#allocation2 + $0x114] sm:$0xf0] }
 0x3de   : > { %v6631_v61 = vpop.f32.mrf.mxu2  ;;  %v6723_v45 = vpop.f32.mrf.mxu3 }
 0x3df   : > { %v6632_v9 = vadd.f32 %v6631_v61, %v12097_v26  ;;  %v12318_v61 = vadd.f32 %v12224_v0, %v12258_v50  ;;  %v9526_v0 = vld [vmem:[#allocation2 + $0xac] sm:$0xf] }
 0x3e1   : > { %v12289_v21 = vadd.f32 %v6720_v39, %v6632_v9 }
 0x3e2   : > { %v12287_v5 = vpop.f32.mrf.mxu0 }
 0x3e3   : > { %v12285_v52 = vpop.f32.mrf.mxu1  ;;  %7132 = vmatmul.bf16.vlgmr.msra.gmra.mxu0 %v8450_v37 }
 0x3e6   : > { %v6634_v26 = vpop.f32.mrf.mxu2 }
 0x3e7   : > { %v6635_v10 = vadd.f32 %v6634_v26, %v12111_v7  ;;  %v6725_v7 = vpop.f32.mrf.mxu3 }
 0x3e8   : > { %6954 = vmatmul.bf16.vlgmr.msra.gmra.mxu2 %v8442_v57  ;;  %7043 = vmatmul.bf16.vlgmr.msra.gmra.mxu3 %v8446_v25  ;;  %v12329_v57 = vadd.f32 %v12256_v58, %v12278_v4  ;;  %v8522_v25 = vor.u32 %v9526_v0, %v8519_v1  ;;  %v8517_v58 = vld [vmem:[#allocation2 + $0xa8] sm:$0xf]  ;;  %v8653_v4 = vld [vmem:[#allocation2 + $0x1c0] sm:$0xf]  ;;  %v9539_v1 = vld [vmem:[#allocation2 + $0x110] sm:$0xf0] }
 0x3e9   : > { %v12300_v24 = vadd.f32 %v6723_v45, %v6635_v10  ;;  %v9530_v45 = vld [vmem:[#allocation2 + $0xc8] sm:$0xf0] }
 0x3ea   : > { %v12298_v18 = vpop.f32.mrf.mxu0  ;;  %v8518_v53 = vor.u32 %v9530_v45, %v8517_v58 }
 0x3eb   : > { %6885 = vmatmul.bf16.gmra.mxu1 %v8582_v28  ;;  %v12296_v49 = vpop.f32.mrf.mxu1 }
 0x3ee   : > { %v6636_v40 = vpop.f32.mrf.mxu2 }
 0x3ef   : > { %v6637_v34 = vadd.f32 %v6636_v40, %v12128_v36  ;;  %v6728_v39 = vpop.f32.mrf.mxu3  ;;  %v8654_v40 = vor.u32 %v9565_v11, %v8653_v4 }
 0x3f1   : > { %v12314_v54 = vadd.f32 %v6725_v7, %v6637_v34  ;;  %v12340_v7 = vadd.f32 %v12276_v31, %v12289_v21  ;;  %v12354_v31 = vadd.f32 %v12287_v5, %v12300_v24  ;;  %v8547_v21 = vld [vmem:[#allocation2 + $0x10c] sm:$0xf0]  ;;  %v8689_v24 = vld [vmem:[#allocation2 + $0x208] sm:$0xf] }
 0x3f2   : > { %v12312_v33 = vpop.f32.mrf.mxu0  ;;  %v8553_v5 = vld [vmem:[#allocation2 + $0xf0] sm:$0xf] }
 0x3f3   : > { %v12310_v59 = vpop.f32.mrf.mxu1  ;;  %7137 = vmatmul.bf16.gmra.mxu0 %v8486_v38 }
 0x3f6   : > { %v6639_v36 = vpop.f32.mrf.mxu2 }
 0x3f7   : > { %v6640_v37 = vadd.f32 %v6639_v36, %v12145_v15  ;;  %v6730_v63 = vpop.f32.mrf.mxu3  ;;  %v9525_v15 = vld [vmem:[#allocation2 + $0xa4] sm:$0xf] }
 0x3f8   : > { %6959 = vmatmul.bf16.gmra.mxu2 %v8478_v2  ;;  %7048 = vmatmul.bf16.gmra.mxu3 %v8482_v30  ;;  %v8514_v14 = vor.u32 %v9525_v15, %v8511_v13  ;;  %v9716_v2 = vld [vmem:[%s12931_s4 + $0x218] sm:$0xff]  ;;  %v9574_v13 = vld [vmem:[#allocation2 + $0x228] sm:$0xf0]  ;;  %v12365_v15 = vadd.f32 %v12298_v18, %v12314_v54 }
 0x3f9   : > { %v12325_v8 = vadd.f32 %v6728_v39, %v6640_v37  ;;  %7217 = vmatpush.bf16.msra.mxu1 %v9716_v2  ;;  %v9534_v37 = vld [vmem:[#allocation2 + $0xec] sm:$0xf]  ;;  %v9544_v18 = vld [vmem:[#allocation2 + $0x13c] sm:$0xf] }
 0x3fa   : > { %v12323_v43 = vpop.f32.mrf.mxu0  ;;  %v8550_v0 = vor.u32 %v9534_v37, %v8547_v21  ;;  %v9548_v21 = vld [vmem:[#allocation2 + $0x158] sm:$0xf0] }
 0x3fb   : > { %6890 = vmatmul.bf16.gmra.mxu1 %v8618_v56  ;;  %v12321_v9 = vpop.f32.mrf.mxu1  ;;  %v8558_v56 = vor.u32 %v9535_v46, %v8555_v22  ;;  %v9583_v46 = vld [vmem:[#allocation2 + $0x270] sm:$0xf0] }
 0x3fe   : > { %v6641_v50 = vpop.f32.mrf.mxu2 }
 0x3ff   : > { %v6642_v28 = vadd.f32 %v6641_v50, %v12162_v55  ;;  %v6733_v38 = vpop.f32.mrf.mxu3 }
 0x401   : > { %v12336_v47 = vadd.f32 %v6730_v63, %v6642_v28  ;;  %v8690_v28 = vor.u32 %v9574_v13, %v8689_v24 }
 0x402   : > { %v12334_v10 = vpop.f32.mrf.mxu0 }
 0x403   : > { %v12332_v26 = vpop.f32.mrf.mxu1  ;;  %7142 = vmatmul.bf16.gmra.mxu0 %v8522_v25  ;;  %v8554_v25 = vor.u32 %v9539_v1, %v8553_v5 }
 0x406   : > { %v6644_v55 = vpop.f32.mrf.mxu2 }
 0x407   : > { %v6645_v34 = vadd.f32 %v6644_v55, %v12173_v16  ;;  %v6735_v16 = vpop.f32.mrf.mxu3  ;;  %v8583_v55 = vld [vmem:[#allocation2 + $0x154] sm:$0xf0] }
 0x408   : > { %6964 = vmatmul.bf16.gmra.mxu2 %v8514_v14  ;;  %7053 = vmatmul.bf16.gmra.mxu3 %v8518_v53  ;;  %v8591_v53 = vld [vmem:[#allocation2 + $0x15c] sm:$0xf0] }
 0x409   : > { %v12347_v32 = vadd.f32 %v6733_v38, %v6645_v34  ;;  %v8594_v34 = vor.u32 %v9544_v18, %v8591_v53 }
 0x40a   : > { %v12345_v29 = vpop.f32.mrf.mxu0 }
 0x40b   : > { %6895 = vmatmul.bf16.gmra.mxu1 %v8654_v40  ;;  %v12343_v44 = vpop.f32.mrf.mxu1  ;;  %v12376_v40 = vadd.f32 %v12312_v33, %v12325_v8 }
 0x40e   : > { %v6646_v30 = vpop.f32.mrf.mxu2 }
 0x40f   : > { %v6647_v36 = vadd.f32 %v6646_v30, %v12193_v6  ;;  %v6738_v45 = vpop.f32.mrf.mxu3 }
 0x411   : > { %v12359_v50 = vadd.f32 %v6735_v16, %v6647_v36  ;;  %v8725_v36 = vld [vmem:[#allocation2 + $0x250] sm:$0xf] }
 0x412   : > { %v12361_v63 = vpop.f32.mrf.mxu0  ;;  %v8726_v8 = vor.u32 %v9583_v46, %v8725_v36  ;;  %v8625_v46 = vld [vmem:[#allocation2 + $0x180] sm:$0xf] }
 0x413   : > { %v12357_v39 = vpop.f32.mrf.mxu1  ;;  %7147 = vmatmul.bf16.gmra.mxu0 %v8558_v56  ;;  %v8589_v56 = vld [vmem:[#allocation2 + $0x138] sm:$0xf] }
 0x414   : > { %v8590_v33 = vor.u32 %v9548_v21, %v8589_v56 }
 0x416   : > { %v6649_v6 = vpop.f32.mrf.mxu2 }
 0x417   : > { %v6650_v11 = vadd.f32 %v6649_v6, %v12222_v41  ;;  %v6740_v38 = vpop.f32.mrf.mxu3  ;;  %v9543_v41 = vld [vmem:[#allocation2 + $0x134] sm:$0xf]  ;;  %v8619_v6 = vld [vmem:[#allocation2 + $0x19c] sm:$0xf0] }
 0x418   : > { %6969 = vmatmul.bf16.gmra.mxu2 %v8550_v0  ;;  %7058 = vmatmul.bf16.gmra.mxu3 %v8554_v25  ;;  %v8586_v30 = vor.u32 %v9543_v41, %v8583_v55  ;;  %v9715_v25 = vld [vmem:[%s12931_s4 + $0x210] sm:$0xff] }
 0x419   : > { %v12370_v58 = vadd.f32 %v6738_v45, %v6650_v11  ;;  %7218 = vmatpush.bf16.msra.mxu1 %v9715_v25  ;;  %v9553_v45 = vld [vmem:[#allocation2 + $0x184] sm:$0xf]  ;;  %v8655_v25 = vld [vmem:[#allocation2 + $0x1e4] sm:$0xf0] }
 0x41a   : > { %v12372_v4 = vpop.f32.mrf.mxu0 }
 0x41b   : > { %6900 = vmatmul.bf16.gmra.mxu1 %v8690_v28  ;;  %v12368_v14 = vpop.f32.mrf.mxu1  ;;  %v8627_v28 = vld [vmem:[#allocation2 + $0x1a4] sm:$0xf0] }
 0x41c   : > { %v8630_v55 = vor.u32 %v9553_v45, %v8627_v28  ;;  %v9562_v28 = vld [vmem:[#allocation2 + $0x1cc] sm:$0xf] }
 0x41e   : > { %v6651_v54 = vpop.f32.mrf.mxu2 }
 0x41f   : > { %v6652_v2 = vadd.f32 %v6651_v54, %v12254_v12  ;;  %v6743_v12 = vpop.f32.mrf.mxu3 }
 0x421   : > { %v12381_v16 = vadd.f32 %v6740_v38, %v6652_v2  ;;  %v9557_v38 = vld [vmem:[#allocation2 + $0x1a0] sm:$0xf0]  ;;  %v9592_v2 = vld [vmem:[#allocation2 + $0x2b8] sm:$0xf0] }
 0x422   : > { %v12383_v37 = vpop.f32.mrf.mxu0  ;;  %v8626_v56 = vor.u32 %v9557_v38, %v8625_v46  ;;  %v8797_v46 = vld [vmem:[#allocation2 + $0x2e0] sm:$0xf] }
 0x423   : > { %v12379_v22 = vpop.f32.mrf.mxu1  ;;  %7152 = vmatmul.bf16.gmra.mxu0 %v8594_v34 }
 0x426   : > { %v6654_v1 = vpop.f32.mrf.mxu2 }
 0x427   : > { %v6655_v13 = vadd.f32 %v6654_v1, %v12274_v60  ;;  %v6745_v53 = vpop.f32.mrf.mxu3 }
 0x428   : > { %6974 = vmatmul.bf16.gmra.mxu2 %v8586_v30  ;;  %7063 = vmatmul.bf16.gmra.mxu3 %v8590_v33  ;;  %v8761_v30 = vld [vmem:[#allocation2 + $0x298] sm:$0xf] }
 0x429   : > { %v12389_v24 = vadd.f32 %v6743_v12, %v6655_v13  ;;  %v8762_v36 = vor.u32 %v9592_v2, %v8761_v30 }
 0x42a   : > { %v12394_v18 = vpop.f32.mrf.mxu0 }
 0x42b   : > { %6905 = vmatmul.bf16.gmra.mxu1 %v8726_v8  ;;  %v6866_v0 = vpop.f32.mrf.mxu1 }
 0x42c   : > { %v12387_v5 = vadd.f32 %v6866_v0, %v12123_v17  ;;  %v9552_v17 = vld [vmem:[#allocation2 + $0x17c] sm:$0xf]  ;;  %v8663_v0 = vld [vmem:[#allocation2 + $0x1ec] sm:$0xf0] }
 0x42d   : > { %v8622_v41 = vor.u32 %v9552_v17, %v8619_v6  ;;  %v9601_v17 = vld [vmem:[#allocation2 + $0x300] sm:$0xf0] }
 0x42e   : > { %v6656_v11 = vpop.f32.mrf.mxu2 }
 0x42f   : > { %v6657_v60 = vadd.f32 %v6656_v11, %v12285_v52  ;;  %v6748_v52 = vpop.f32.mrf.mxu3  ;;  %v8666_v11 = vor.u32 %v9562_v28, %v8663_v0  ;;  %v8699_v0 = vld [vmem:[#allocation2 + $0x234] sm:$0xf0]  ;;  %v8691_v28 = vld [vmem:[#allocation2 + $0x22c] sm:$0xf0] }
 0x431   : > { %v12400_v21 = vadd.f32 %v6745_v53, %v6657_v60  ;;  %v9561_v60 = vld [vmem:[#allocation2 + $0x1c4] sm:$0xf] }
 0x432   : > { %v12406_v12 = vpop.f32.mrf.mxu0  ;;  %v8658_v38 = vor.u32 %v9561_v60, %v8655_v25 }
 0x433   : > { %v6868_v54 = vpop.f32.mrf.mxu1  ;;  %7157 = vmatmul.bf16.gmra.mxu0 %v8630_v55 }
 0x434   : > { %v12398_v34 = vadd.f32 %v6868_v54, %v12142_v62  ;;  %v9566_v54 = vld [vmem:[#allocation2 + $0x1e8] sm:$0xf0] }
 0x436   : > { %v6659_v33 = vpop.f32.mrf.mxu2 }
 0x437   : > { %v6660_v8 = vadd.f32 %v6659_v33, %v12296_v49  ;;  %v6750_v45 = vpop.f32.mrf.mxu3  ;;  %v12413_v49 = vadd.f32 %v12323_v43, %v12336_v47  ;;  %v12425_v33 = vadd.f32 %v12334_v10, %v12347_v32 }
 0x438   : > { %6979 = vmatmul.bf16.gmra.mxu2 %v8622_v41  ;;  %7068 = vmatmul.bf16.gmra.mxu3 %v8626_v56  ;;  %v8661_v41 = vld [vmem:[#allocation2 + $0x1c8] sm:$0xf]  ;;  %v8798_v56 = vor.u32 %v9601_v17, %v8797_v46 }
 0x439   : > { %v12408_v13 = vadd.f32 %v6748_v52, %v6660_v8  ;;  %v8662_v30 = vor.u32 %v9566_v54, %v8661_v41  ;;  %v9610_v54 = vld [vmem:[#allocation2 + $0x348] sm:$0xf0]  ;;  %v8697_v41 = vld [vmem:[#allocation2 + $0x210] sm:$0xf]  ;;  %v8833_v46 = vld [vmem:[#allocation2 + $0x328] sm:$0xf] }
 0x43b   : > { %6910 = vmatmul.bf16.gmra.mxu1 %v8762_v36  ;;  %v6871_v1 = vpop.f32.mrf.mxu1 }
 0x43c   : > { %v12404_v62 = vadd.f32 %v6871_v1, %v12159_v42  ;;  %v9714_v1 = vld [vmem:[%s12931_s4 + $0x208] sm:$0xff] }
 0x43d   : > { %7219 = vmatpush.bf16.msra.mxu1 %v9714_v1  ;;  %v8735_v1 = vld [vmem:[#allocation2 + $0x27c] sm:$0xf0] }
 0x43e   : > { %v6661_v6 = vpop.f32.mrf.mxu2 }
 0x43f   : > { %v6662_v53 = vadd.f32 %v6661_v6, %v12310_v59  ;;  %v12420_v59 = vpop.f32.mrf.mxu0  ;;  %v6753_v43 = vpop.f32.mrf.mxu3 }
 0x441   : > { %v12418_v2 = vadd.f32 %v6750_v45, %v6662_v53  ;;  %v9575_v53 = vld [vmem:[#allocation2 + $0x230] sm:$0xf0] }
 0x443   : > { %v6873_v55 = vpop.f32.mrf.mxu1  ;;  %7162 = vmatmul.bf16.gmra.mxu0 %v8666_v11 }
 0x444   : > { %v12416_v42 = vadd.f32 %v6873_v55, %v12170_v19  ;;  %v12440_v55 = vadd.f32 %v12345_v29, %v12359_v50  ;;  %v12452_v50 = vadd.f32 %v12361_v63, %v12370_v58  ;;  %v12462_v63 = vadd.f32 %v12372_v4, %v12381_v16  ;;  %v9619_v58 = vld [vmem:[#allocation2 + $0x390] sm:$0xf0] }
 0x446   : > { %v6664_v36 = vpop.f32.mrf.mxu2 }
 0x447   : > { %v6665_v47 = vadd.f32 %v6664_v36, %v12321_v9  ;;  %v12435_v25 = vpop.f32.mrf.mxu0  ;;  %v9571_v9 = vld [vmem:[#allocation2 + $0x214] sm:$0xf]  ;;  %v6755_v45 = vpop.f32.mrf.mxu3 }
 0x448   : > { %6984 = vmatmul.bf16.gmra.mxu2 %v8658_v38  ;;  %7073 = vmatmul.bf16.gmra.mxu3 %v8662_v30  ;;  %v8702_v11 = vor.u32 %v9571_v9, %v8699_v0  ;;  %v8698_v30 = vor.u32 %v9575_v53, %v8697_v41  ;;  %v8727_v0 = vld [vmem:[#allocation2 + $0x274] sm:$0xf0]  ;;  %v8869_v41 = vld [vmem:[#allocation2 + $0x370] sm:$0xf] }
 0x449   : > { %v12430_v8 = vadd.f32 %v6753_v43, %v6665_v47 }
 0x44b   : > { %6915 = vmatmul.bf16.gmra.mxu1 %v8798_v56  ;;  %v6876_v19 = vpop.f32.mrf.mxu1 }
 0x44c   : > { %v12428_v52 = vadd.f32 %v6876_v19, %v12190_v20  ;;  %v9570_v20 = vld [vmem:[#allocation2 + $0x20c] sm:$0xf] }
 0x44d   : > { %v8694_v17 = vor.u32 %v9570_v20, %v8691_v28  ;;  %v9580_v28 = vld [vmem:[#allocation2 + $0x25c] sm:$0xf] }
 0x44e   : > { %v6666_v6 = vpop.f32.mrf.mxu2 }
 0x44f   : > { %v6667_v10 = vadd.f32 %v6666_v6, %v12332_v26  ;;  %v8834_v26 = vor.u32 %v9610_v54, %v8833_v46  ;;  %v6758_v36 = vpop.f32.mrf.mxu3  ;;  %v12447_v43 = vpop.f32.mrf.mxu0  ;;  %v8870_v46 = vor.u32 %v9619_v58, %v8869_v41 }
 0x451   : > { %v12445_v38 = vadd.f32 %v6755_v45, %v6667_v10  ;;  %v8738_v45 = vor.u32 %v9580_v28, %v8735_v1  ;;  %v8771_v1 = vld [vmem:[#allocation2 + $0x2c4] sm:$0xf0] }
 0x453   : > { %v6878_v32 = vpop.f32.mrf.mxu1  ;;  %7167 = vmatmul.bf16.gmra.mxu0 %v8702_v11 }
 0x454   : > { %v12443_v60 = vadd.f32 %v6878_v32, %v12216_v48  ;;  %v9584_v32 = vld [vmem:[#allocation2 + $0x278] sm:$0xf0] }
 0x456   : > { %v6669_v56 = vpop.f32.mrf.mxu2 }
 0x457   : > { %v6670_v29 = vadd.f32 %v6669_v56, %v12343_v44  ;;  %v6760_v6 = vpop.f32.mrf.mxu3  ;;  %v9579_v44 = vld [vmem:[#allocation2 + $0x254] sm:$0xf]  ;;  %v12467_v53 = vpop.f32.mrf.mxu0 }
 0x458   : > { %6989 = vmatmul.bf16.gmra.mxu2 %v8694_v17  ;;  %7078 = vmatmul.bf16.gmra.mxu3 %v8698_v30  ;;  %v8730_v20 = vor.u32 %v9579_v44, %v8727_v0  ;;  %v8733_v17 = vld [vmem:[#allocation2 + $0x258] sm:$0xf]  ;;  %v8763_v0 = vld [vmem:[#allocation2 + $0x2bc] sm:$0xf0]  ;;  %v9628_v44 = vld [vmem:[#allocation2 + $0x3d8] sm:$0xf0] }
 0x459   : > { %v12457_v19 = vadd.f32 %v6758_v36, %v6670_v29  ;;  %v9713_v29 = vld [vmem:[%s12931_s4 + $0x200] sm:$0xff] }
 0x45a   : > { %7220 = vmatpush.bf16.msra.mxu1 %v9713_v29  ;;  %v8799_v29 = vld [vmem:[#allocation2 + $0x304] sm:$0xf0] }
 0x45b   : > { %6920 = vmatmul.bf16.gmra.mxu1 %v8834_v26  ;;  %v6881_v48 = vpop.f32.mrf.mxu1  ;;  %v12474_v26 = vadd.f32 %v12383_v37, %v12389_v24 }
 0x45c   : > { %v12455_v47 = vadd.f32 %v6881_v48, %v12248_v51 }
 0x45e   : > { %v6671_v9 = vpop.f32.mrf.mxu2 }
 0x45f   : > { %v6672_v11 = vadd.f32 %v6671_v9, %v12357_v39  ;;  %v8734_v39 = vor.u32 %v9584_v32, %v8733_v17  ;;  %v6763_v4 = vpop.f32.mrf.mxu3  ;;  %v12484_v48 = vpop.f32.mrf.mxu0  ;;  %v8905_v17 = vld [vmem:[#allocation2 + $0x3b8] sm:$0xf] }
 0x461   : > { %v12469_v54 = vadd.f32 %v6760_v6, %v6672_v11  ;;  %v12489_v11 = vadd.f32 %v12394_v18, %v12400_v21 }
 0x463   : > { %v6883_v10 = vpop.f32.mrf.mxu1  ;;  %7172 = vmatmul.bf16.gmra.mxu0 %v8738_v45  ;;  %v9593_v45 = vld [vmem:[#allocation2 + $0x2c0] sm:$0xf0] }
 0x464   : > { %v12465_v51 = vadd.f32 %v6883_v10, %v12271_v3 }
 0x466   : > { %v6674_v30 = vpop.f32.mrf.mxu2 }
 0x467   : > { %v6675_v16 = vadd.f32 %v6674_v30, %v12368_v14  ;;  %v9589_v14 = vld [vmem:[#allocation2 + $0x2a4] sm:$0xf]  ;;  %v6765_v9 = vpop.f32.mrf.mxu3  ;;  %v12501_v30 = vadd.f32 %v12406_v12, %v12408_v13  ;;  %v12513_v12 = vadd.f32 %v12420_v59, %v12418_v2 }
 0x468   : > { %6994 = vmatmul.bf16.gmra.mxu2 %v8730_v20  ;;  %7083 = vmatmul.bf16.gmra.mxu3 %v8734_v39  ;;  %v8774_v6 = vor.u32 %v9589_v14, %v8771_v1  ;;  %v8769_v20 = vld [vmem:[#allocation2 + $0x2a0] sm:$0xf]  ;;  %v12496_v39 = vpop.f32.mrf.mxu0  ;;  %v9598_v1 = vld [vmem:[#allocation2 + $0x2ec] sm:$0xf]  ;;  %v9637_v13 = vld [vmem:[#allocation2 + $0x420] sm:$0xf0] }
 0x469   : > { %v12479_v36 = vadd.f32 %v6763_v4, %v6675_v16  ;;  %v8770_v41 = vor.u32 %v9593_v45, %v8769_v20 }
 0x46b   : > { %6925 = vmatmul.bf16.gmra.mxu1 %v8870_v46  ;;  %v6886_v3 = vpop.f32.mrf.mxu1 }
 0x46c   : > { %v12477_v56 = vadd.f32 %v6886_v3, %v12282_v23  ;;  %v9588_v23 = vld [vmem:[#allocation2 + $0x29c] sm:$0xf]  ;;  %v8807_v3 = vld [vmem:[#allocation2 + $0x30c] sm:$0xf0] }
 0x46d   : > { %v8766_v32 = vor.u32 %v9588_v23, %v8763_v0 }
 0x46e   : > { %v6676_v28 = vpop.f32.mrf.mxu2 }
 0x46f   : > { %v6677_v37 = vadd.f32 %v6676_v28, %v12379_v22  ;;  %v8906_v22 = vor.u32 %v9628_v44, %v8905_v17  ;;  %v7044_v18 = vpop.f32.mrf.mxu3  ;;  %v8810_v28 = vor.u32 %v9598_v1, %v8807_v3  ;;  %v8805_v44 = vld [vmem:[#allocation2 + $0x2e8] sm:$0xf]  ;;  %v9607_v3 = vld [vmem:[#allocation2 + $0x334] sm:$0xf] }
 0x471   : > { %v12494_v58 = vadd.f32 %v6765_v9, %v6677_v37  ;;  %v12508_v9 = vpop.f32.mrf.mxu0  ;;  %v9597_v37 = vld [vmem:[#allocation2 + $0x2e4] sm:$0xf] }
 0x472   : > { %v8802_v23 = vor.u32 %v9597_v37, %v8799_v29 }
 0x473   : > { %v6888_v24 = vpop.f32.mrf.mxu1  ;;  %7177 = vmatmul.bf16.gmra.mxu0 %v8774_v6 }
 0x474   : > { %v12492_v10 = vadd.f32 %v6888_v24, %v12293_v27  ;;  %v9602_v24 = vld [vmem:[#allocation2 + $0x308] sm:$0xf0] }
 0x475   : > { %v8806_v20 = vor.u32 %v9602_v24, %v8805_v44  ;;  %v8841_v24 = vld [vmem:[#allocation2 + $0x330] sm:$0xf] }
 0x476   : > { %v6955_v46 = vpop.f32.mrf.mxu2 }
 0x477   : > { %v6956_v21 = vadd.f32 %v6955_v46, %v12387_v5  ;;  %v7046_v14 = vpop.f32.mrf.mxu3 }
 0x478   : > { %6999 = vmatmul.bf16.gmra.mxu2 %v8766_v32  ;;  %7088 = vmatmul.bf16.gmra.mxu3 %v8770_v41  ;;  %v8941_v32 = vld [vmem:[#allocation2 + $0x400] sm:$0xf] }
 0x479   : > { %v12506_v16 = vadd.f32 %v7044_v18, %v6956_v21  ;;  %v12528_v46 = vpop.f32.mrf.mxu0  ;;  %v8843_v21 = vld [vmem:[#allocation2 + $0x354] sm:$0xf0] }
 0x47b   : > { %6930 = vmatmul.bf16.gmra.mxu1 %v8906_v22  ;;  %v6891_v27 = vpop.f32.mrf.mxu1 }
 0x47c   : > { %v12504_v4 = vadd.f32 %v6891_v27, %v12307_v35  ;;  %v8835_v27 = vld [vmem:[#allocation2 + $0x34c] sm:$0xf0] }
 0x47e   : > { %v6957_v0 = vpop.f32.mrf.mxu2 }
 0x47f   : > { %v6958_v5 = vadd.f32 %v6957_v0, %v12398_v34  ;;  %v8942_v34 = vor.u32 %v9637_v13, %v8941_v32  ;;  %v7049_v41 = vpop.f32.mrf.mxu3  ;;  %v8846_v0 = vor.u32 %v9607_v3, %v8843_v21  ;;  %v8977_v13 = vld [vmem:[#allocation2 + $0x448] sm:$0xf]  ;;  %v9616_v21 = vld [vmem:[#allocation2 + $0x37c] sm:$0xf] }
 0x481   : > { %v12518_v45 = vadd.f32 %v7046_v14, %v6958_v5  ;;  %v9611_v5 = vld [vmem:[#allocation2 + $0x350] sm:$0xf0] }
 0x483   : > { %v6893_v6 = vpop.f32.mrf.mxu1  ;;  %7182 = vmatmul.bf16.gmra.mxu0 %v8810_v28  ;;  %v9606_v28 = vld [vmem:[#allocation2 + $0x32c] sm:$0xf] }
 0x484   : > { %v12516_v35 = vadd.f32 %v6893_v6, %v12318_v61  ;;  %v12523_v61 = vadd.f32 %v12435_v25, %v12430_v8  ;;  %v12535_v8 = vadd.f32 %v12447_v43, %v12445_v38  ;;  %v9646_v25 = vld [vmem:[#allocation2 + $0x468] sm:$0xf0]  ;;  %v8838_v6 = vor.u32 %v9606_v28, %v8835_v27 }
 0x485   : > { %v8978_v44 = vor.u32 %v9646_v25, %v8977_v13  ;;  %v8453_v25 = vld [vmem:[#allocation2 + $0x20] sm:$0xf] }
 0x486   : > { %v6960_v17 = vpop.f32.mrf.mxu2 }
 0x487   : > { %v6961_v2 = vadd.f32 %v6960_v17, %v12404_v62  ;;  %v7051_v1 = vpop.f32.mrf.mxu3 }
 0x488   : > { %7004 = vmatmul.bf16.gmra.mxu2 %v8802_v23  ;;  %7093 = vmatmul.bf16.gmra.mxu3 %v8806_v20  ;;  %v8842_v23 = vor.u32 %v9611_v5, %v8841_v24  ;;  %v12547_v20 = vadd.f32 %v12467_v53, %v12457_v19  ;;  %v12559_v19 = vadd.f32 %v12484_v48, %v12469_v54  ;;  %v9513_v53 = vld [vmem:[#allocation2 + $0x40] sm:$0xf0]  ;;  %v8877_v5 = vld [vmem:[#allocation2 + $0x378] sm:$0xf] }
 0x489   : > { %v12530_v18 = vadd.f32 %v7049_v41, %v6961_v2  ;;  %v8879_v41 = vld [vmem:[#allocation2 + $0x39c] sm:$0xf0] }
 0x48b   : > { %6935 = vmatmul.bf16.gmra.mxu1 %v8942_v34  ;;  %v6896_v59 = vpop.f32.mrf.mxu1 }
 0x48c   : > { %v12526_v22 = vadd.f32 %v6896_v59, %v12329_v57  ;;  %v8871_v59 = vld [vmem:[#allocation2 + $0x394] sm:$0xf0] }
 0x48e   : > { %v6962_v29 = vpop.f32.mrf.mxu2 }
 0x48f   : > { %v6963_v62 = vadd.f32 %v6962_v29, %v12416_v42  ;;  %v12542_v42 = vpop.f32.mrf.mxu0  ;;  %v7054_v38 = vpop.f32.mrf.mxu3  ;;  %v8882_v29 = vor.u32 %v9616_v21, %v8879_v41 }
 0x491   : > { %v12540_v37 = vadd.f32 %v7051_v1, %v6963_v62  ;;  %v9620_v62 = vld [vmem:[#allocation2 + $0x398] sm:$0xf0] }
 0x493   : > { %v6898_v14 = vpop.f32.mrf.mxu1  ;;  %7187 = vmatmul.bf16.gmra.mxu0 %v8846_v0  ;;  %v9615_v0 = vld [vmem:[#allocation2 + $0x374] sm:$0xf] }
 0x494   : > { %v12538_v57 = vadd.f32 %v6898_v14, %v12340_v7  ;;  %v8874_v14 = vor.u32 %v9615_v0, %v8871_v59  ;;  %v8913_v0 = vld [vmem:[#allocation2 + $0x3c0] sm:$0xf] }
 0x496   : > { %v6965_v32 = vpop.f32.mrf.mxu2 }
 0x497   : > { %v6966_v43 = vadd.f32 %v6965_v32, %v12428_v52  ;;  %v12554_v2 = vpop.f32.mrf.mxu0  ;;  %v7056_v3 = vpop.f32.mrf.mxu3 }
 0x498   : > { %7009 = vmatmul.bf16.gmra.mxu2 %v8838_v6  ;;  %7098 = vmatmul.bf16.gmra.mxu3 %v8842_v23  ;;  %v8878_v6 = vor.u32 %v9620_v62, %v8877_v5 }
 0x499   : > { %v12552_v17 = vadd.f32 %v7054_v38, %v6966_v43  ;;  %v8915_v38 = vld [vmem:[#allocation2 + $0x3e4] sm:$0xf0]  ;;  %v8907_v43 = vld [vmem:[#allocation2 + $0x3dc] sm:$0xf0] }
 0x49b   : > { %6940 = vmatmul.bf16.gmra.mxu1 %v8978_v44  ;;  %v6901_v7 = vpop.f32.mrf.mxu1 }
 0x49c   : > { %v12550_v34 = vadd.f32 %v6901_v7, %v12354_v31  ;;  %v9625_v7 = vld [vmem:[#allocation2 + $0x3c4] sm:$0xf] }
 0x49d   : > { %v8918_v59 = vor.u32 %v9625_v7, %v8915_v38  ;;  %v12595_v38 = vadd.f32 %v12542_v42, %v12518_v45  ;;  %v8525_v7 = vld [vmem:[#allocation2 + $0xb0] sm:$0xf] }
 0x49e   : > { %v6967_v27 = vpop.f32.mrf.mxu2  ;;  %v8979_v42 = vld [vmem:[#allocation2 + $0x46c] sm:$0xf0] }
 0x49f   : > { %v6968_v52 = vadd.f32 %v6967_v27, %v12443_v60  ;;  %v8454_v60 = vor.u32 %v9513_v53, %v8453_v25  ;;  %v7059_v13 = vpop.f32.mrf.mxu3  ;;  %v7140_v23 = vpop.f32.mrf.mxu0  ;;  %v8489_v53 = vld [vmem:[#allocation2 + $0x68] sm:$0xf] }
 0x4a1   : > { %v12564_v28 = vadd.f32 %v7056_v3, %v6968_v52  ;;  %v9629_v3 = vld [vmem:[#allocation2 + $0x3e0] sm:$0xf0] }
 0x4a3   : > { %v6903_v1 = vpop.f32.mrf.mxu1  ;;  %7192 = vmatmul.bf16.gmra.mxu0 %v8882_v29  ;;  %v9522_v29 = vld [vmem:[#allocation2 + $0x88] sm:$0xf0] }
 0x4a4   : > { %v12562_v31 = vadd.f32 %v6903_v1, %v12365_v15  ;;  %v12569_v15 = vadd.f32 %v12496_v39, %v12479_v36  ;;  %v12579_v36 = vadd.f32 %v12508_v9, %v12494_v58  ;;  %v12588_v58 = vadd.f32 %v12528_v46, %v12506_v16  ;;  %v8951_v9 = vld [vmem:[#allocation2 + $0x42c] sm:$0xf0]  ;;  %v9531_v16 = vld [vmem:[#allocation2 + $0xd0] sm:$0xf0] }
 0x4a6   : > { %v6970_v24 = vpop.f32.mrf.mxu2 }
 0x4a7   : > { %v6971_v54 = vadd.f32 %v6970_v24, %v12455_v47  ;;  %v9624_v47 = vld [vmem:[#allocation2 + $0x3bc] sm:$0xf]  ;;  %v7061_v39 = vpop.f32.mrf.mxu3  ;;  %v7143_v62 = vpop.f32.mrf.mxu0 }
 0x4a8   : > { %7014 = vmatmul.bf16.gmra.mxu2 %v8874_v14  ;;  %7103 = vmatmul.bf16.gmra.mxu3 %v8878_v6  ;;  %v8910_v52 = vor.u32 %v9624_v47, %v8907_v43  ;;  %v8490_v14 = vor.u32 %v9522_v29, %v8489_v53  ;;  %v8943_v6 = vld [vmem:[#allocation2 + $0x424] sm:$0xf0]  ;;  %v12602_v47 = vadd.f32 %v12554_v2, %v12530_v18  ;;  %v8985_v2 = vld [vmem:[#allocation2 + $0x450] sm:$0xf] }
 0x4a9   : > { %v12574_v32 = vadd.f32 %v7059_v13, %v6971_v54  ;;  %v9633_v54 = vld [vmem:[#allocation2 + $0x404] sm:$0xf]  ;;  %v12608_v53 = vadd.f32 %v7140_v23, %v12540_v37 }
 0x4aa   : > { %v8946_v46 = vor.u32 %v9633_v54, %v8943_v6  ;;  %v9549_v54 = vld [vmem:[#allocation2 + $0x160] sm:$0xf0] }
 0x4ab   : > { %7221 = vmatmul.bf16.vlgmr.msra.gmra.mxu1 %v8454_v60  ;;  %v6906_v48 = vpop.f32.mrf.mxu1  ;;  %v9634_v60 = vld [vmem:[#allocation2 + $0x40c] sm:$0xf] }
 0x4ac   : > { %v12572_v44 = vadd.f32 %v6906_v48, %v12376_v40  ;;  %v8954_v24 = vor.u32 %v9634_v60, %v8951_v9  ;;  %v9638_v48 = vld [vmem:[#allocation2 + $0x428] sm:$0xf0] }
 0x4ae   : > { %v6972_v41 = vpop.f32.mrf.mxu2 }
 0x4af   : > { %v6973_v21 = vadd.f32 %v6972_v41, %v12465_v51  ;;  %v8914_v51 = vor.u32 %v9629_v3, %v8913_v0  ;;  %v7145_v25 = vpop.f32.mrf.mxu0  ;;  %v9643_v3 = vld [vmem:[#allocation2 + $0x454] sm:$0xf] }
 0x4b0   : > { %v9647_v0 = vld [vmem:[#allocation2 + $0x470] sm:$0xf0] }
 0x4b1   : > { %v12584_v1 = vadd.f32 %v7061_v39, %v6973_v21  ;;  %v8986_v9 = vor.u32 %v9647_v0, %v8985_v2 }
 0x4b3   : > { %v6908_v27 = vpop.f32.mrf.mxu1  ;;  %7197 = vmatmul.bf16.gmra.mxu0 %v8918_v59  ;;  %v8526_v59 = vor.u32 %v9531_v16, %v8525_v7 }
 0x4b4   : > { %v12582_v40 = vadd.f32 %v6908_v27, %v12413_v49 }
 0x4b7   : > { %v7148_v21 = vpop.f32.mrf.mxu0 }
 0x4b8   : > { %7019 = vmatmul.bf16.gmra.mxu2 %v8910_v52  ;;  %7108 = vmatmul.bf16.gmra.mxu3 %v8914_v51  ;;  %v9642_v52 = vld [vmem:[#allocation2 + $0x44c] sm:$0xf] }
 0x4b9   : > { %v8982_v18 = vor.u32 %v9642_v52, %v8979_v42 }
 0x4bb   : > { %7226 = vmatmul.bf16.gmra.mxu1 %v8490_v14  ;;  %v6911_v5 = vpop.f32.mrf.mxu1 }
 0x4bc   : > { %v12591_v49 = vadd.f32 %v6911_v5, %v12425_v33  ;;  %v8949_v33 = vld [vmem:[#allocation2 + $0x408] sm:$0xf]  ;;  %v9540_v5 = vld [vmem:[#allocation2 + $0x118] sm:$0xf0] }
 0x4bd   : > { %v8950_v41 = vor.u32 %v9638_v48, %v8949_v33  ;;  %v8597_v48 = vld [vmem:[#allocation2 + $0x140] sm:$0xf]  ;;  %v12626_v33 = vadd.f32 %v7148_v21, %v12574_v32 }
 0x4be   : > { %v8598_v16 = vor.u32 %v9549_v54, %v8597_v48  ;;  %v9594_v48 = vld [vmem:[#allocation2 + $0x2c8] sm:$0xf0] }
 0x4bf   : > { %v7150_v51 = vpop.f32.mrf.mxu0 }
 0x4c3   : > { %v6913_v13 = vpop.f32.mrf.mxu1  ;;  %7202 = vmatmul.bf16.gmra.mxu0 %v8954_v24  ;;  %v12614_v24 = vadd.f32 %v7143_v62, %v12552_v17  ;;  %v12632_v62 = vadd.f32 %v7150_v51, %v12584_v1 }
 0x4c4   : > { %v12598_v43 = vadd.f32 %v6913_v13, %v12440_v55  ;;  %v8987_v55 = vld [vmem:[#allocation2 + $0x474] sm:$0xf0] }
 0x4c5   : > { %v8990_v39 = vor.u32 %v9643_v3, %v8987_v55 }
 0x4c8   : > { %7024 = vmatmul.bf16.gmra.mxu2 %v8946_v46  ;;  %7113 = vmatmul.bf16.gmra.mxu3 %v8950_v41 }
 0x4cb   : > { %7231 = vmatmul.bf16.gmra.mxu1 %v8526_v59  ;;  %v6916_v27 = vpop.f32.mrf.mxu1 }
 0x4cc   : > { %v12605_v45 = vadd.f32 %v6916_v27, %v12452_v50  ;;  %v8561_v50 = vld [vmem:[#allocation2 + $0xf8] sm:$0xf]  ;;  %v8669_v27 = vld [vmem:[#allocation2 + $0x1d0] sm:$0xf] }
 0x4cd   : > { %v8562_v6 = vor.u32 %v9540_v5, %v8561_v50  ;;  %v8741_v5 = vld [vmem:[#allocation2 + $0x260] sm:$0xf] }
 0x4d3   : > { %v6918_v29 = vpop.f32.mrf.mxu1  ;;  %7207 = vmatmul.bf16.gmra.mxu0 %v8990_v39  ;;  %v9576_v39 = vld [vmem:[#allocation2 + $0x238] sm:$0xf0] }
 0x4d4   : > { %v12611_v14 = vadd.f32 %v6918_v29, %v12462_v63  ;;  %v12620_v63 = vadd.f32 %v7145_v25, %v12564_v28  ;;  %v8633_v25 = vld [vmem:[#allocation2 + $0x188] sm:$0xf] }
 0x4d8   : > { %7029 = vmatmul.bf16.gmra.mxu2 %v8982_v18  ;;  %7118 = vmatmul.bf16.gmra.mxu3 %v8986_v9 }
 0x4db   : > { %7236 = vmatmul.bf16.gmra.mxu1 %v8562_v6  ;;  %v6921_v60 = vpop.f32.mrf.mxu1  ;;  %v12671_v6 = vpop.f32.mrf.mxu2 }
 0x4dc   : > { %v12617_v37 = vadd.f32 %v6921_v60, %v12474_v26  ;;  %v9787_v60 = vld [vmem:[%s9993_s13] sm:$0xff] }
 0x4e3   : > { %v6923_v23 = vpop.f32.mrf.mxu1 }
 0x4e4   : > { %v12623_v13 = vadd.f32 %v6923_v23, %v12489_v11  ;;  %v9558_v11 = vld [vmem:[#allocation2 + $0x1a8] sm:$0xf0] }
 0x4e5   : > { %v8634_v7 = vor.u32 %v9558_v11, %v8633_v25 }
 0x4eb   : > { %7241 = vmatmul.bf16.gmra.mxu1 %v8598_v16  ;;  %v6926_v46 = vpop.f32.mrf.mxu1 }
 0x4ec   : > { %v12629_v17 = vadd.f32 %v6926_v46, %v12501_v30  ;;  %v9567_v30 = vld [vmem:[#allocation2 + $0x1f0] sm:$0xf0]  ;;  %v8777_v46 = vld [vmem:[#allocation2 + $0x2a8] sm:$0xf] }
 0x4ed   : > { %v8670_v55 = vor.u32 %v9567_v30, %v8669_v27  ;;  %v8778_v11 = vor.u32 %v9594_v48, %v8777_v46  ;;  %v12685_v30 = vpop.f32.mrf.mxu2  ;;  %v9791_v46 = vld [vmem:[%s9993_s13 + $0x20] sm:$0xff] }
 0x4f3   : > { %v6928_v26 = vpop.f32.mrf.mxu1 }
 0x4f4   : > { %v12635_v28 = vadd.f32 %v6928_v26, %v12513_v12  ;;  %v12679_v26 = vpop.f32.mrf.mxu3 }
 0x4fb   : > { %7246 = vmatmul.bf16.gmra.mxu1 %v8634_v7  ;;  %v6931_v41 = vpop.f32.mrf.mxu1  ;;  %v12682_v7 = vpop.f32.mrf.mxu0 }
 0x4fc   : > { %v12638_v59 = vadd.f32 %v6931_v41, %v12523_v61  ;;  %v8705_v61 = vld [vmem:[#allocation2 + $0x218] sm:$0xf]  ;;  %v9788_v41 = vld [vmem:[%s9993_s13 + $0x8] sm:$0xff] }
 0x4fd   : > { %v8706_v29 = vor.u32 %v9576_v39, %v8705_v61  ;;  %v9789_v39 = vld [vmem:[%s9993_s13 + $0x10] sm:$0xff] }
 0x503   : > { %v6933_v32 = vpop.f32.mrf.mxu1 }
 0x504   : > { %v12641_v21 = vadd.f32 %v6933_v32, %v12535_v8 }
 0x50b   : > { %7251 = vmatmul.bf16.gmra.mxu1 %v8670_v55  ;;  %v6936_v1 = vpop.f32.mrf.mxu1 }
 0x50c   : > { %v12644_v12 = vadd.f32 %v6936_v1, %v12547_v20  ;;  %v9585_v20 = vld [vmem:[#allocation2 + $0x280] sm:$0xf0] }
 0x50d   : > { %v8742_v18 = vor.u32 %v9585_v20, %v8741_v5  ;;  %v9603_v20 = vld [vmem:[#allocation2 + $0x310] sm:$0xf0]  ;;  %v12698_v5 = vpop.f32.mrf.mxu2 }
 0x513   : > { %v6938_v42 = vpop.f32.mrf.mxu1 }
 0x514   : > { %v12647_v3 = vadd.f32 %v6938_v42, %v12559_v19  ;;  %v12658_v19 = vld [vmem:[%s12932_s5] ss:$0 sm:$0xff]  ;;  %v12691_v42 = vpop.f32.mrf.mxu3 }
 0x515   : > { %v12710_v48 = vpop.f32.mrf.mxu2 }
 0x51b   : > { %7256 = vmatmul.bf16.gmra.mxu1 %v8706_v29  ;;  %v6941_v8 = vpop.f32.mrf.mxu1 }
 0x51c   : > { %v12650_v52 = vadd.f32 %v6941_v8, %v12569_v15  ;;  %v12665_v15 = vld [vmem:[%s12933_s6] ss:$0 sm:$0xff]  ;;  %v12694_v8 = vpop.f32.mrf.mxu0 }
 0x523   : > { %v6943_v0 = vpop.f32.mrf.mxu1 }
 0x524   : > { %v12653_v51 = vadd.f32 %v6943_v0, %v12579_v36 }
 0x52b   : > { %7261 = vmatmul.bf16.gmra.mxu1 %v8742_v18  ;;  %v7222_v2 = vpop.f32.mrf.mxu1  ;;  %v8813_v18 = vld [vmem:[#allocation2 + $0x2f0] sm:$0xf] }
 0x52c   : > { %v7223_v50 = vadd.f32 %v7222_v2, %v12588_v58  ;;  %v8814_v2 = vor.u32 %v9603_v20, %v8813_v18 }
 0x52e   : > { %v7306_v36 = vmul.f32 %v12658_v19, %v7223_v50 }
 0x530   : > { %v7342_v9 = vadd.f32 %v12665_v15, %v7306_v36  ;;  %v9790_v36 = vld [vmem:[%s9993_s13 + $0x18] sm:$0xff] }
 0x532   : > { %v7374_v23 = vadd.f32 %v9787_v60, %v7342_v9  ;;  %v12703_v60 = vpop.f32.mrf.mxu3 }
 0x533   : > { %v7224_v54 = vpop.f32.mrf.mxu1 }
 0x534   : > { %7406 = vst [vmem:[%s12674_s29] sm:$0xff] %v7374_v23  ;;  %v7225_v58 = vadd.f32 %v7224_v54, %v12595_v38  ;;  %v12707_v54 = vpop.f32.mrf.mxu0 }
 0x536   : > { %v7307_v16 = vmul.f32 %v12658_v19, %v7225_v58 }
 0x538   : > { %v7343_v25 = vadd.f32 %v12665_v15, %v7307_v16 }
 0x53a   : > { %v7375_v32 = vadd.f32 %v9788_v41, %v7343_v25 }
 0x53b   : > { %7266 = vmatmul.bf16.gmra.mxu1 %v8778_v11  ;;  %v7227_v27 = vpop.f32.mrf.mxu1 }
 0x53c   : > { %7407 = vst [vmem:[%s12674_s29 + $0x8] sm:$0xff] %v7375_v32  ;;  %v7228_v38 = vadd.f32 %v7227_v27, %v12602_v47  ;;  %v9612_v32 = vld [vmem:[#allocation2 + $0x358] sm:$0xf0]  ;;  %v12716_v27 = vpop.f32.mrf.mxu3 }
 0x53e   : > { %v7308_v55 = vmul.f32 %v12658_v19, %v7228_v38  ;;  %v8849_v38 = vld [vmem:[#allocation2 + $0x338] sm:$0xf] }
 0x540   : > { %v7344_v1 = vadd.f32 %v12665_v15, %v7308_v55  ;;  %v8850_v55 = vor.u32 %v9612_v32, %v8849_v38  ;;  %v6978_v32 = vadd.f32 %v12685_v30, %v12492_v10  ;;  %v6981_v10 = vadd.f32 %v12698_v5, %v12504_v4  ;;  %v9795_v30 = vld [vmem:[%s9993_s13 + $0x40] sm:$0xff] }
 0x542   : > { %v7376_v61 = vadd.f32 %v9789_v39, %v7344_v1  ;;  %v12719_v1 = vpop.f32.mrf.mxu0 }
 0x543   : > { %v7229_v29 = vpop.f32.mrf.mxu1 }
 0x544   : > { %7408 = vst [vmem:[%s12674_s29 + $0x10] sm:$0xff] %v7376_v61  ;;  %v7230_v0 = vadd.f32 %v7229_v29, %v12608_v53  ;;  %v12722_v61 = vpop.f32.mrf.mxu2  ;;  %v9792_v29 = vld [vmem:[%s9993_s13 + $0x28] sm:$0xff]  ;;  %v12728_v18 = vpop.f32.mrf.mxu3 }
 0x546   : > { %v7309_v47 = vmul.f32 %v12658_v19, %v7230_v0 }
 0x548   : > { %v7345_v50 = vadd.f32 %v12665_v15, %v7309_v47 }
 0x54a   : > { %v7377_v9 = vadd.f32 %v9790_v36, %v7345_v50  ;;  %v6976_v50 = vadd.f32 %v12671_v6, %v12477_v56  ;;  %v12733_v36 = vpop.f32.mrf.mxu0 }
 0x54b   : > { %7271 = vmatmul.bf16.gmra.mxu1 %v8814_v2  ;;  %v7232_v23 = vpop.f32.mrf.mxu1 }
 0x54c   : > { %7409 = vst [vmem:[%s12674_s29 + $0x18] sm:$0xff] %v7377_v9  ;;  %v7233_v53 = vadd.f32 %v7232_v23, %v12614_v24  ;;  %v9793_v9 = vld [vmem:[%s9993_s13 + $0x30] sm:$0xff]  ;;  %v12743_v6 = vpop.f32.mrf.mxu3 }
 0x54e   : > { %v7310_v58 = vmul.f32 %v12658_v19, %v7233_v53  ;;  %v12736_v53 = vpop.f32.mrf.mxu2 }
 0x550   : > { %v7346_v16 = vadd.f32 %v12665_v15, %v7310_v58 }
 0x552   : > { %v7378_v11 = vadd.f32 %v9791_v46, %v7346_v16  ;;  %v9621_v16 = vld [vmem:[#allocation2 + $0x3a0] sm:$0xf0]  ;;  %v7065_v46 = vadd.f32 %v12679_v26, %v6976_v50  ;;  %v12749_v26 = vpop.f32.mrf.mxu0 }
 0x553   : > { %v7234_v25 = vpop.f32.mrf.mxu1 }
 0x554   : > { %7410 = vst [vmem:[%s12674_s29 + $0x20] sm:$0xff] %v7378_v11  ;;  %v7235_v41 = vadd.f32 %v7234_v25, %v12620_v63  ;;  %v8885_v25 = vld [vmem:[#allocation2 + $0x380] sm:$0xf] }
 0x556   : > { %v7311_v24 = vmul.f32 %v12658_v19, %v7235_v41  ;;  %v8886_v41 = vor.u32 %v9621_v16, %v8885_v25  ;;  %v8921_v16 = vld [vmem:[#allocation2 + $0x3c8] sm:$0xf] }
 0x558   : > { %v7347_v39 = vadd.f32 %v12665_v15, %v7311_v24  ;;  %v9794_v24 = vld [vmem:[%s9993_s13 + $0x38] sm:$0xff] }
 0x55a   : > { %v7379_v0 = vadd.f32 %v9792_v29, %v7347_v39  ;;  %v6990_v29 = vpop.f32.mrf.mxu2 }
 0x55b   : > { %7276 = vmatmul.bf16.gmra.mxu1 %v8850_v55  ;;  %v7237_v20 = vpop.f32.mrf.mxu1 }
 0x55c   : > { %7411 = vst [vmem:[%s12674_s29 + $0x28] sm:$0xff] %v7379_v0  ;;  %v7238_v63 = vadd.f32 %v7237_v20, %v12626_v33  ;;  %v7067_v0 = vadd.f32 %v12691_v42, %v6978_v32  ;;  %v7070_v42 = vadd.f32 %v12703_v60, %v6981_v10 }
 0x55e   : > { %v7312_v47 = vmul.f32 %v12658_v19, %v7238_v63 }
 0x560   : > { %v7348_v2 = vadd.f32 %v12665_v15, %v7312_v47 }
 0x562   : > { %v7380_v23 = vadd.f32 %v9793_v9, %v7348_v2  ;;  %v12759_v2 = vpop.f32.mrf.mxu3  ;;  %v6992_v4 = vpop.f32.mrf.mxu2 }
 0x563   : > { %v7239_v58 = vpop.f32.mrf.mxu1 }
 0x564   : > { %7412 = vst [vmem:[%s12674_s29 + $0x30] sm:$0xff] %v7380_v23  ;;  %v7240_v33 = vadd.f32 %v7239_v58, %v12632_v62  ;;  %v7154_v62 = vadd.f32 %v12682_v7, %v7065_v46  ;;  %v7156_v7 = vadd.f32 %v12694_v8, %v7067_v0  ;;  %v9630_v23 = vld [vmem:[#allocation2 + $0x3e8] sm:$0xf0]  ;;  %v12763_v58 = vpop.f32.mrf.mxu0  ;;  %v6983_v8 = vadd.f32 %v12710_v48, %v12516_v35  ;;  %v9797_v48 = vld [vmem:[%s9993_s13 + $0x50] sm:$0xff] }
 0x565   : > { %v8922_v5 = vor.u32 %v9630_v23, %v8921_v16  ;;  %v6986_v35 = vadd.f32 %v12722_v61, %v12526_v22  ;;  %v6988_v22 = vadd.f32 %v12736_v53, %v12538_v57  ;;  %v9798_v61 = vld [vmem:[%s9993_s13 + $0x58] sm:$0xff]  ;;  %v9799_v57 = vld [vmem:[%s9993_s13 + $0x60] sm:$0xff] }
 0x566   : > { %v7313_v11 = vmul.f32 %v12658_v19, %v7240_v33 }
 0x567   : > { %v7075_v10 = vadd.f32 %v12728_v18, %v6986_v35  ;;  %v8993_v35 = vld [vmem:[#allocation2 + $0x458] sm:$0xf] }
 0x568   : > { %v7349_v56 = vadd.f32 %v12665_v15, %v7313_v11  ;;  %v9796_v11 = vld [vmem:[%s9993_s13 + $0x48] sm:$0xff] }
 0x56a   : > { %v7381_v38 = vadd.f32 %v9794_v24, %v7349_v56  ;;  %v7081_v32 = vpop.f32.mrf.mxu3  ;;  %v7072_v24 = vadd.f32 %v12716_v27, %v6983_v8  ;;  %v9639_v27 = vld [vmem:[#allocation2 + $0x430] sm:$0xf0] }
 0x56b   : > { %7281 = vmatmul.bf16.gmra.mxu1 %v8886_v41  ;;  %v7242_v55 = vpop.f32.mrf.mxu1  ;;  %v7159_v41 = vadd.f32 %v12707_v54, %v7070_v42  ;;  %v7164_v42 = vadd.f32 %v12733_v36, %v7075_v10 }
 0x56c   : > { %7413 = vst [vmem:[%s12674_s29 + $0x38] sm:$0xff] %v7381_v38  ;;  %v7243_v39 = vadd.f32 %v7242_v55, %v7154_v62  ;;  %v12774_v62 = vpop.f32.mrf.mxu0  ;;  %v7161_v54 = vadd.f32 %v12719_v1, %v7072_v24  ;;  %v9648_v24 = vld [vmem:[#allocation2 + $0x478] sm:$0xf0] }
 0x56e   : > { %v7314_v20 = vmul.f32 %v12658_v19, %v7243_v39  ;;  %v6995_v39 = vpop.f32.mrf.mxu2 }
 0x570   : > { %v7350_v63 = vadd.f32 %v12665_v15, %v7314_v20 }
 0x572   : > { %v7382_v47 = vadd.f32 %v9795_v30, %v7350_v63 }
 0x573   : > { %v7244_v50 = vpop.f32.mrf.mxu1 }
 0x574   : > { %7414 = vst [vmem:[%s12674_s29 + $0x40] sm:$0xff] %v7382_v47  ;;  %v7245_v9 = vadd.f32 %v7244_v50, %v7156_v7  ;;  %v8957_v47 = vld [vmem:[#allocation2 + $0x410] sm:$0xf]  ;;  %v7084_v7 = vpop.f32.mrf.mxu3  ;;  %v7173_v1 = vpop.f32.mrf.mxu0 }
 0x575   : > { %v8958_v50 = vor.u32 %v9639_v27, %v8957_v47 }
 0x576   : > { %v7315_v33 = vmul.f32 %v12658_v19, %v7245_v9 }
 0x578   : > { %v7351_v46 = vadd.f32 %v12665_v15, %v7315_v33  ;;  %v6997_v33 = vpop.f32.mrf.mxu2 }
 0x57a   : > { %v7383_v25 = vadd.f32 %v9796_v11, %v7351_v46 }
 0x57b   : > { %7286 = vmatmul.bf16.gmra.mxu1 %v8922_v5  ;;  %v7247_v60 = vpop.f32.mrf.mxu1  ;;  %v7077_v5 = vadd.f32 %v12743_v6, %v6988_v22 }
 0x57c   : > { %7415 = vst [vmem:[%s12674_s29 + $0x48] sm:$0xff] %v7383_v25  ;;  %v7248_v56 = vadd.f32 %v7247_v60, %v7159_v41  ;;  %v7086_v11 = vpop.f32.mrf.mxu3  ;;  %v6991_v25 = vadd.f32 %v6990_v29, %v12550_v34  ;;  %v7175_v36 = vpop.f32.mrf.mxu0  ;;  %v6993_v29 = vadd.f32 %v6992_v4, %v12562_v31  ;;  %v9801_v31 = vld [vmem:[%s9993_s13 + $0x70] sm:$0xff] }
 0x57d   : > { %v7166_v41 = vadd.f32 %v12749_v26, %v7077_v5  ;;  %v9800_v26 = vld [vmem:[%s9993_s13 + $0x68] sm:$0xff] }
 0x57e   : > { %v7316_v38 = vmul.f32 %v12658_v19, %v7248_v56  ;;  %v7080_v6 = vadd.f32 %v12759_v2, %v6991_v25  ;;  %v7082_v2 = vadd.f32 %v7081_v32, %v6993_v29 }
 0x580   : > { %v7352_v55 = vadd.f32 %v12665_v15, %v7316_v38  ;;  %v7000_v38 = vpop.f32.mrf.mxu2  ;;  %v7171_v22 = vadd.f32 %v12774_v62, %v7082_v2 }
 0x582   : > { %v7384_v0 = vadd.f32 %v9797_v48, %v7352_v55  ;;  %v8994_v48 = vor.u32 %v9648_v24, %v8993_v35  ;;  %v9803_v24 = vld [vmem:[%s9993_s13 + $0x80] sm:$0xff] }
 0x583   : > { %v7249_v20 = vpop.f32.mrf.mxu1 }
 0x584   : > { %7416 = vst [vmem:[%s12674_s29 + $0x50] sm:$0xff] %v7384_v0  ;;  %v7250_v63 = vadd.f32 %v7249_v20, %v7161_v54  ;;  %v7169_v54 = vadd.f32 %v12763_v58, %v7080_v6  ;;  %v7089_v20 = vpop.f32.mrf.mxu3  ;;  %v7178_v10 = vpop.f32.mrf.mxu0 }
 0x586   : > { %v7317_v30 = vmul.f32 %v12658_v19, %v7250_v63 }
 0x588   : > { %v7353_v9 = vadd.f32 %v12665_v15, %v7317_v30  ;;  %v7002_v47 = vpop.f32.mrf.mxu2 }
 0x589   : > { %v7003_v29 = vadd.f32 %v7002_v47, %v12598_v43 }
 0x58a   : > { %v7385_v23 = vadd.f32 %v9798_v61, %v7353_v9  ;;  %v6996_v9 = vadd.f32 %v6995_v39, %v12572_v44  ;;  %v9802_v44 = vld [vmem:[%s9993_s13 + $0x78] sm:$0xff] }
 0x58b   : > { %7291 = vmatmul.bf16.gmra.mxu1 %v8958_v50  ;;  %v7252_v18 = vpop.f32.mrf.mxu1 }
 0x58c   : > { %7417 = vst [vmem:[%s12674_s29 + $0x58] sm:$0xff] %v7385_v23  ;;  %v7253_v16 = vadd.f32 %v7252_v18, %v7164_v42  ;;  %v7091_v23 = vpop.f32.mrf.mxu3  ;;  %v7085_v42 = vadd.f32 %v7084_v7, %v6996_v9  ;;  %v7180_v18 = vpop.f32.mrf.mxu0 }
 0x58e   : > { %v7318_v46 = vmul.f32 %v12658_v19, %v7253_v16 }
 0x590   : > { %v7354_v8 = vadd.f32 %v12665_v15, %v7318_v46  ;;  %v7005_v5 = vpop.f32.mrf.mxu2  ;;  %v6998_v46 = vadd.f32 %v6997_v33, %v12582_v40 }
 0x592   : > { %v7386_v53 = vadd.f32 %v9799_v57, %v7354_v8  ;;  %v7174_v8 = vadd.f32 %v7173_v1, %v7085_v42  ;;  %v7087_v57 = vadd.f32 %v7086_v11, %v6998_v46 }
 0x593   : > { %v7254_v60 = vpop.f32.mrf.mxu1 }
 0x594   : > { %7418 = vst [vmem:[%s12674_s29 + $0x60] sm:$0xff] %v7386_v53  ;;  %v7255_v56 = vadd.f32 %v7254_v60, %v7166_v41  ;;  %v7094_v7 = vpop.f32.mrf.mxu3  ;;  %v7001_v60 = vadd.f32 %v7000_v38, %v12591_v49  ;;  %v7176_v40 = vadd.f32 %v7175_v36, %v7087_v57 }
 0x596   : > { %v7319_v55 = vmul.f32 %v12658_v19, %v7255_v56  ;;  %v7183_v56 = vpop.f32.mrf.mxu0  ;;  %v7090_v35 = vadd.f32 %v7089_v20, %v7001_v60 }
 0x598   : > { %v7355_v34 = vadd.f32 %v12665_v15, %v7319_v55  ;;  %v7007_v33 = vpop.f32.mrf.mxu2  ;;  %v7179_v38 = vadd.f32 %v7178_v10, %v7090_v35 }
 0x599   : > { %v7008_v42 = vadd.f32 %v7007_v33, %v12611_v14 }
 0x59a   : > { %v7387_v0 = vadd.f32 %v9800_v26, %v7355_v34  ;;  %v9804_v26 = vld [vmem:[%s9993_s13 + $0x88] sm:$0xff] }
 0x59b   : > { %7296 = vmatmul.bf16.gmra.mxu1 %v8994_v48  ;;  %v7257_v63 = vpop.f32.mrf.mxu1 }
 0x59c   : > { %7419 = vst [vmem:[%s12674_s29 + $0x68] sm:$0xff] %v7387_v0  ;;  %v7258_v27 = vadd.f32 %v7257_v63, %v7169_v54  ;;  %v7096_v34 = vpop.f32.mrf.mxu3 }
 0x59e   : > { %v7320_v30 = vmul.f32 %v12658_v19, %v7258_v27  ;;  %v7185_v54 = vpop.f32.mrf.mxu0  ;;  %v7092_v27 = vadd.f32 %v7091_v23, %v7003_v29 }
 0x5a0   : > { %v7356_v50 = vadd.f32 %v12665_v15, %v7320_v30  ;;  %v7010_v63 = vpop.f32.mrf.mxu2  ;;  %v7006_v30 = vadd.f32 %v7005_v5, %v12605_v45  ;;  %v7181_v43 = vadd.f32 %v7180_v18, %v7092_v27 }
 0x5a1   : > { %v7011_v57 = vadd.f32 %v7010_v63, %v12617_v37 }
 0x5a2   : > { %v7388_v4 = vadd.f32 %v9801_v31, %v7356_v50  ;;  %v9805_v50 = vld [vmem:[%s9993_s13 + $0x90] sm:$0xff] }
 0x5a3   : > { %v7259_v58 = vpop.f32.mrf.mxu1 }
 0x5a4   : > { %7420 = vst [vmem:[%s12674_s29 + $0x70] sm:$0xff] %v7388_v4  ;;  %v7260_v61 = vadd.f32 %v7259_v58, %v7171_v22  ;;  %v7099_v47 = vpop.f32.mrf.mxu3  ;;  %v7095_v4 = vadd.f32 %v7094_v7, %v7006_v30 }
 0x5a6   : > { %v7321_v32 = vmul.f32 %v12658_v19, %v7260_v61  ;;  %v7188_v22 = vpop.f32.mrf.mxu0 }
 0x5a8   : > { %v7357_v16 = vadd.f32 %v12665_v15, %v7321_v32  ;;  %v7012_v61 = vpop.f32.mrf.mxu2  ;;  %v9806_v32 = vld [vmem:[%s9993_s13 + $0x98] sm:$0xff] }
 0x5a9   : > { %v7013_v33 = vadd.f32 %v7012_v61, %v12623_v13 }
 0x5aa   : > { %v7389_v39 = vadd.f32 %v9802_v44, %v7357_v16  ;;  %v7184_v16 = vadd.f32 %v7183_v56, %v7095_v4  ;;  %v7097_v44 = vadd.f32 %v7096_v34, %v7008_v42  ;;  %v7100_v56 = vadd.f32 %v7099_v47, %v7011_v57  ;;  %v9810_v47 = vld [vmem:[%s9993_s13 + $0xb8] sm:$0xff] }
 0x5ab   : > { %v7262_v25 = vpop.f32.mrf.mxu1 }
 0x5ac   : > { %7421 = vst [vmem:[%s12674_s29 + $0x78] sm:$0xff] %v7389_v39  ;;  %v7263_v62 = vadd.f32 %v7262_v25, %v7174_v8  ;;  %v7101_v46 = vpop.f32.mrf.mxu3  ;;  %v7186_v7 = vadd.f32 %v7185_v54, %v7097_v44  ;;  %v7189_v37 = vadd.f32 %v7188_v22, %v7100_v56  ;;  %v9809_v54 = vld [vmem:[%s9993_s13 + $0xb0] sm:$0xff] }
 0x5ad   : > { %v7102_v29 = vadd.f32 %v7101_v46, %v7013_v33 }
 0x5ae   : > { %v7322_v53 = vmul.f32 %v12658_v19, %v7263_v62  ;;  %v7190_v8 = vpop.f32.mrf.mxu0 }
 0x5b0   : > { %v7358_v41 = vadd.f32 %v12665_v15, %v7322_v53  ;;  %v7015_v62 = vpop.f32.mrf.mxu2  ;;  %v9807_v53 = vld [vmem:[%s9993_s13 + $0xa0] sm:$0xff] }
 0x5b2   : > { %v7390_v6 = vadd.f32 %v9803_v24, %v7358_v41 }
 0x5b3   : > { %v7264_v55 = vpop.f32.mrf.mxu1 }
 0x5b4   : > { %7422 = vst [vmem:[%s12674_s29 + $0x80] sm:$0xff] %v7390_v6  ;;  %v7265_v1 = vadd.f32 %v7264_v55, %v7176_v40  ;;  %v7104_v6 = vpop.f32.mrf.mxu3 }
 0x5b6   : > { %v7323_v11 = vmul.f32 %v12658_v19, %v7265_v1  ;;  %v7193_v55 = vpop.f32.mrf.mxu0  ;;  %v9808_v1 = vld [vmem:[%s9993_s13 + $0xa8] sm:$0xff] }
 0x5b8   : > { %v7359_v48 = vadd.f32 %v12665_v15, %v7323_v11  ;;  %v7017_v11 = vpop.f32.mrf.mxu2 }
 0x5ba   : > { %v7391_v49 = vadd.f32 %v9804_v26, %v7359_v48 }
 0x5bb   : > { %v7267_v0 = vpop.f32.mrf.mxu1 }
 0x5bc   : > { %7423 = vst [vmem:[%s12674_s29 + $0x88] sm:$0xff] %v7391_v49  ;;  %v7268_v36 = vadd.f32 %v7267_v0, %v7179_v38  ;;  %v7106_v38 = vpop.f32.mrf.mxu3  ;;  %v7016_v0 = vadd.f32 %v7015_v62, %v12629_v17 }
 0x5be   : > { %v7324_v20 = vmul.f32 %v12658_v19, %v7268_v36  ;;  %v7191_v36 = vadd.f32 %v7190_v8, %v7102_v29  ;;  %v7195_v27 = vpop.f32.mrf.mxu0  ;;  %v7105_v30 = vadd.f32 %v7104_v6, %v7016_v0  ;;  %v9814_v0 = vld [vmem:[%s9993_s13 + $0xd8] sm:$0xff] }
 0x5c0   : > { %v7360_v2 = vadd.f32 %v12665_v15, %v7324_v20  ;;  %v7194_v17 = vadd.f32 %v7193_v55, %v7105_v30 }
 0x5c2   : > { %v7392_v9 = vadd.f32 %v9805_v50, %v7360_v2  ;;  %v7020_v2 = vpop.f32.mrf.mxu2 }
 0x5c3   : > { %v7269_v31 = vpop.f32.mrf.mxu1 }
 0x5c4   : > { %7424 = vst [vmem:[%s12674_s29 + $0x90] sm:$0xff] %v7392_v9  ;;  %v7270_v10 = vadd.f32 %v7269_v31, %v7181_v43  ;;  %v7018_v43 = vadd.f32 %v7017_v11, %v12635_v28 }
 0x5c6   : > { %v7325_v58 = vmul.f32 %v12658_v19, %v7270_v10  ;;  %v7109_v10 = vpop.f32.mrf.mxu3  ;;  %v7198_v61 = vpop.f32.mrf.mxu0 }
 0x5c8   : > { %v7361_v23 = vadd.f32 %v12665_v15, %v7325_v58  ;;  %v7107_v58 = vadd.f32 %v7106_v38, %v7018_v43 }
 0x5ca   : > { %v7393_v45 = vadd.f32 %v9806_v32, %v7361_v23  ;;  %v7022_v42 = vpop.f32.mrf.mxu2 }
 0x5cb   : > { %v7272_v5 = vpop.f32.mrf.mxu1 }
 0x5cc   : > { %7425 = vst [vmem:[%s12674_s29 + $0x98] sm:$0xff] %v7393_v45  ;;  %v7273_v18 = vadd.f32 %v7272_v5, %v7184_v16  ;;  %v7021_v45 = vadd.f32 %v7020_v2, %v12638_v59  ;;  %v9811_v16 = vld [vmem:[%s9993_s13 + $0xc0] sm:$0xff]  ;;  %v7196_v5 = vadd.f32 %v7195_v27, %v7107_v58 }
 0x5ce   : > { %v7326_v39 = vmul.f32 %v12658_v19, %v7273_v18  ;;  %v7111_v44 = vpop.f32.mrf.mxu3 }
 0x5d0   : > { %v7362_v25 = vadd.f32 %v12665_v15, %v7326_v39  ;;  %v7110_v39 = vadd.f32 %v7109_v10, %v7021_v45 }
 0x5d2   : > { %v7394_v14 = vadd.f32 %v9807_v53, %v7362_v25  ;;  %v7200_v25 = vpop.f32.mrf.mxu0  ;;  %v7025_v57 = vpop.f32.mrf.mxu2  ;;  %v7023_v53 = vadd.f32 %v7022_v42, %v12641_v21 }
 0x5d3   : > { %v7274_v41 = vpop.f32.mrf.mxu1  ;;  %v7026_v55 = vadd.f32 %v7025_v57, %v12644_v12 }
 0x5d4   : > { %7426 = vst [vmem:[%s12674_s29 + $0xa0] sm:$0xff] %v7394_v14  ;;  %v7275_v60 = vadd.f32 %v7274_v41, %v7186_v7  ;;  %v9812_v14 = vld [vmem:[%s9993_s13 + $0xc8] sm:$0xff]  ;;  %v7199_v7 = vadd.f32 %v7198_v61, %v7110_v39  ;;  %v7112_v56 = vadd.f32 %v7111_v44, %v7023_v53  ;;  %v9817_v39 = vld [vmem:[%s9993_s13 + $0xf0] sm:$0xff] }
 0x5d6   : > { %v7327_v24 = vmul.f32 %v12658_v19, %v7275_v60  ;;  %v7114_v6 = vpop.f32.mrf.mxu3 }
 0x5d8   : > { %v7363_v40 = vadd.f32 %v12665_v15, %v7327_v24 }
 0x5da   : > { %v7395_v35 = vadd.f32 %v9808_v1, %v7363_v40  ;;  %v7203_v33 = vpop.f32.mrf.mxu0  ;;  %v9813_v1 = vld [vmem:[%s9993_s13 + $0xd0] sm:$0xff] }
 0x5db   : > { %v7277_v48 = vpop.f32.mrf.mxu1 }
 0x5dc   : > { %7427 = vst [vmem:[%s12674_s29 + $0xa8] sm:$0xff] %v7395_v35  ;;  %v7278_v34 = vadd.f32 %v7277_v48, %v7189_v37  ;;  %v7201_v35 = vadd.f32 %v7200_v25, %v7112_v56  ;;  %v7027_v37 = vpop.f32.mrf.mxu2 }
 0x5dd   : > { %v7028_v38 = vadd.f32 %v7027_v37, %v12647_v3 }
 0x5de   : > { %v7328_v26 = vmul.f32 %v12658_v19, %v7278_v34  ;;  %v7115_v34 = vadd.f32 %v7114_v6, %v7026_v55 }
 0x5e0   : > { %v7364_v49 = vadd.f32 %v12665_v15, %v7328_v26  ;;  %v7204_v12 = vadd.f32 %v7203_v33, %v7115_v34 }
 0x5e2   : > { %v7396_v13 = vadd.f32 %v9809_v54, %v7364_v49  ;;  %v7116_v49 = vpop.f32.mrf.mxu3 }
 0x5e3   : > { %v7279_v63 = vpop.f32.mrf.mxu1 }
 0x5e4   : > { %7428 = vst [vmem:[%s12674_s29 + $0xb0] sm:$0xff] %v7396_v13  ;;  %v7280_v20 = vadd.f32 %v7279_v63, %v7191_v36  ;;  %v7205_v63 = vpop.f32.mrf.mxu0  ;;  %v7030_v27 = vpop.f32.mrf.mxu2 }
 0x5e6   : > { %v7329_v50 = vmul.f32 %v12658_v19, %v7280_v20  ;;  %v7117_v20 = vadd.f32 %v7116_v49, %v7028_v38 }
 0x5e8   : > { %v7365_v9 = vadd.f32 %v12665_v15, %v7329_v50  ;;  %v7031_v50 = vadd.f32 %v7030_v27, %v12650_v52  ;;  %v7206_v3 = vadd.f32 %v7205_v63, %v7117_v20  ;;  %v9816_v52 = vld [vmem:[%s9993_s13 + $0xe8] sm:$0xff] }
 0x5ea   : > { %v7397_v31 = vadd.f32 %v9810_v47, %v7365_v9  ;;  %v9815_v9 = vld [vmem:[%s9993_s13 + $0xe0] sm:$0xff]  ;;  %v7119_v47 = vpop.f32.mrf.mxu3 }
 0x5eb   : > { %v7282_v4 = vpop.f32.mrf.mxu1  ;;  %v7120_v10 = vadd.f32 %v7119_v47, %v7031_v50 }
 0x5ec   : > { %7429 = vst [vmem:[%s12674_s29 + $0xb8] sm:$0xff] %v7397_v31  ;;  %v7283_v22 = vadd.f32 %v7282_v4, %v7194_v17  ;;  %v7032_v58 = vpop.f32.mrf.mxu2 }
 0x5ee   : > { %v7330_v23 = vmul.f32 %v12658_v19, %v7283_v22  ;;  %v7208_v22 = vpop.f32.mrf.mxu0 }
 0x5f0   : > { %v7366_v32 = vadd.f32 %v12665_v15, %v7330_v23  ;;  %v7033_v23 = vadd.f32 %v7032_v58, %v12653_v51 }
 0x5f2   : > { %v7398_v28 = vadd.f32 %v9811_v16, %v7366_v32  ;;  %v7209_v32 = vadd.f32 %v7208_v22, %v7120_v10 }
 0x5f3   : > { %v7284_v18 = vpop.f32.mrf.mxu1 }
 0x5f4   : > { %7430 = vst [vmem:[%s12674_s29 + $0xc0] sm:$0xff] %v7398_v28  ;;  %v7285_v46 = vadd.f32 %v7284_v18, %v7196_v5  ;;  %v7121_v28 = vpop.f32.mrf.mxu3 }
 0x5f5   : > { %v7122_v5 = vadd.f32 %v7121_v28, %v7033_v23 }
 0x5f6   : > { %v7331_v8 = vmul.f32 %v12658_v19, %v7285_v46  ;;  %v7210_v44 = vpop.f32.mrf.mxu0 }
 0x5f8   : > { %v7367_v62 = vadd.f32 %v12665_v15, %v7331_v8  ;;  %v7211_v8 = vadd.f32 %v7210_v44, %v7122_v5 }
 0x5fa   : > { %v7399_v59 = vadd.f32 %v9812_v14, %v7367_v62  ;;  %v9818_v14 = vld [vmem:[%s9993_s13 + $0xf8] sm:$0xff] }
 0x5fb   : > { %v7287_v41 = vpop.f32.mrf.mxu1 }
 0x5fc   : > { %7431 = vst [vmem:[%s12674_s29 + $0xc8] sm:$0xff] %v7399_v59  ;;  %v7288_v60 = vadd.f32 %v7287_v41, %v7199_v7 }
 0x5fe   : > { %v7332_v24 = vmul.f32 %v12658_v19, %v7288_v60 }
 0x600   : > { %v7368_v40 = vadd.f32 %v12665_v15, %v7332_v24 }
 0x602   : > { %v7400_v21 = vadd.f32 %v9813_v1, %v7368_v40 }
 0x603   : > { %v7289_v11 = vpop.f32.mrf.mxu1 }
 0x604   : > { %7432 = vst [vmem:[%s12674_s29 + $0xd0] sm:$0xff] %v7400_v21  ;;  %v7290_v48 = vadd.f32 %v7289_v11, %v7201_v35 }
 0x606   : > { %v7333_v29 = vmul.f32 %v12658_v19, %v7290_v48 }
 0x608   : > { %v7369_v26 = vadd.f32 %v12665_v15, %v7333_v29 }
 0x60a   : > { %v7401_v54 = vadd.f32 %v9814_v0, %v7369_v26 }
 0x60b   : > { %v7292_v13 = vpop.f32.mrf.mxu1 }
 0x60c   : > { %7433 = vst [vmem:[%s12674_s29 + $0xd8] sm:$0xff] %v7401_v54  ;;  %v7293_v36 = vadd.f32 %v7292_v13, %v7204_v12 }
 0x60e   : > { %v7334_v2 = vmul.f32 %v12658_v19, %v7293_v36 }
 0x610   : > { %v7370_v30 = vadd.f32 %v12665_v15, %v7334_v2 }
 0x612   : > { %v7402_v43 = vadd.f32 %v9815_v9, %v7370_v30 }
 0x613   : > { %v7294_v31 = vpop.f32.mrf.mxu1 }
 0x614   : > { %7434 = vst [vmem:[%s12674_s29 + $0xe0] sm:$0xff] %v7402_v43  ;;  %v7295_v17 = vadd.f32 %v7294_v31, %v7206_v3 }
 0x616   : > { %v7335_v4 = vmul.f32 %v12658_v19, %v7295_v17 }
 0x618   : > { %v7371_v61 = vadd.f32 %v12665_v15, %v7335_v4 }
 0x61a   : > { %v7403_v42 = vadd.f32 %v9816_v52, %v7371_v61 }
 0x61b   : > { %v7297_v45 = vpop.f32.mrf.mxu1 }
 0x61c   : > { %7435 = vst [vmem:[%s12674_s29 + $0xe8] sm:$0xff] %v7403_v42  ;;  %v7298_v16 = vadd.f32 %v7297_v45, %v7209_v32 }
 0x61e   : > { %v7336_v18 = vmul.f32 %v12658_v19, %v7298_v16 }
 0x620   : > { %v7372_v46 = vadd.f32 %v12665_v15, %v7336_v18 }
 0x622   : > { %v7404_v51 = vadd.f32 %v9817_v39, %v7372_v46 }
 0x623   : > { %v7299_v25 = vpop.f32.mrf.mxu1 }
 0x624   : > { %7436 = vst [vmem:[%s12674_s29 + $0xf0] sm:$0xff] %v7404_v51  ;;  %v7300_v62 = vadd.f32 %v7299_v25, %v7211_v8 }
 0x626   : > { %v7337_v57 = vmul.f32 %v12658_v19, %v7300_v62 }
 0x628   : > { %v7373_v53 = vadd.f32 %v12665_v15, %v7337_v57 }
 0x62a   : > { %v7405_v59 = vadd.f32 %v9818_v14, %v7373_v53 }
 0x62c   : > { %7437 = vst [vmem:[%s12674_s29 + $0xf8] sm:$0xff] %v7405_v59 }
 0x62d   : > { %9846 = shalt.err (!%p9843_p3)
}
 0x62e   : > { %s9883_s13 = smov 128   ;;  %s9884_s20 = smov 8  }
 0x62f   : > { %9738 = dma.vmem_to_hbm [thread:$0]  (%p9963_p5), %s7452_s16, 4096, %s7454_s17, %s7439_s28, %s9883_s13, %s9883_s13, %s9884_s20  }
 0x630 PF: > { %p9744_p4 = scmp.ge.s32.totalorder %s9881_s27, 2  ;;  %s7468_s29 = sand.u32 1, %s9869_s24  }
 0x631   : > { %s7469_s14 = scalar_lea.sflag [#allocation4], %s7468_s29 }
 0x632   : > { %p9741_p7 = pnand %p9744_p4, %p9967_p6 }
 0x634   : > { %p9742_p8 = pneg %p9741_p7 }
 0x636   : > { %9864 = dma.done.wait (%p9742_p8), %s7469_s14, 4096  }
 0x637   : > { %9866 = vsyncadd (%p9742_p8), %s7469_s14, 4294963200  ;;  %p17_p9 = scmp.ge.s32.totalorder %s9950_s30, 6   ;;  %s12996_s24 = smov %s9873_s25 }
 0x638   : > { %s12997_s25 = smov %s9877_s26  ;;  %s12998_s26 = smov %s9961_s10 }
 0x639   : > { %s12999_s27 = smov %s9950_s30  ;;  %19 = sbr.rel (!%p17_p9) target bundleno = 3 (0x3), region = 83 }
 0x63e   :  { %7475 = vsyncpa [#allocation4], 1 }
 0x63f   :  { %7477 = vsyncpa [#allocation4 + $0x1], 1 }

</bundles_post_ra>
